<compile_context>
chip_gen: v7x
topology: tpu7x:2x2x1
jax: 0.10.0
libtpu: 0.0.40
codegen_flags: <defaults>
</compile_context>

<pallas_src>
import string

import jax
import jax.numpy as jnp
import numpy as np
from jax.experimental import pallas as pl
from jax.experimental.pallas import tpu as pltpu


def _round_up(x, m):
    return ((x + m - 1) // m) * m


def make_lstm_embed_kernel(L, H, E_pad):
    """LSTM recurrence (statically unrolled over L steps) + final linear."""

    def kernel(x_ref, wih_ref, whh_ref, b_ref, wout_ref, bout_ref, out_ref):
        # x_ref:    (TB, L)     char indices as f32 (one batch tile of words)
        # wih_ref:  (1, 4H)     input->gates (input_size == 1)
        # whh_ref:  (H, 4H)     hidden->gates
        # b_ref:    (1, 4H)     combined bias (b_ih + b_hh)
        # wout_ref: (H, E_pad)  final linear weight (transposed, zero-padded to 128 lanes)
        # bout_ref: (1, E_pad)  final linear bias (zero-padded)
        # out_ref:  (TB, E_pad) lane-dense output tile
        x_all = x_ref[...]                       # (TB, L)
        wih = wih_ref[...]                       # (1, 4H)
        whh = whh_ref[...]                       # (H, 4H)
        b = b_ref[...]                           # (1, 4H)
        TB = x_all.shape[0]

        # Hoisted off the serial h/c dependency chain: per-step input projection
        # + bias broadcast, computed once up front (L small => tiny VMEM temp,
        # and it overlaps freely with the recurrence matmuls).
        x_projs = [x_all[:, t:t + 1] * wih + b for t in range(L)]   # L x (TB, 4H)

        h = jnp.zeros((TB, H), jnp.float32)
        c = jnp.zeros((TB, H), jnp.float32)

        # Static unroll: the only thing left per step on the critical path is the
        # recurrence matmul (MXU) and the gate nonlinearities (EUP/VPU).
        for t in range(L):
            if t == 0:
                gates = x_projs[0]               # h == 0 -> skip the first matmul
            else:
                gates = x_projs[t] + jnp.dot(
                    h, whh, preferred_element_type=jnp.float32)      # (TB, 4H)
            # PyTorch gate order: i | f | g | o  (slices on 128-lane boundaries)
            i_g = jax.nn.sigmoid(gates[:, 0 * H:1 * H])
            g_g = jnp.tanh(gates[:, 2 * H:3 * H])
            o_g = jax.nn.sigmoid(gates[:, 3 * H:4 * H])
            if t == 0:
                c = i_g * g_g                    # c == 0 -> skip the forget term
            else:
                f_g = jax.nn.sigmoid(gates[:, 1 * H:2 * H])
                c = f_g * c + i_g * g_g
            h = o_g * jnp.tanh(c)

        out = jnp.dot(h, wout_ref[...], preferred_element_type=jnp.float32) + bout_ref[...]
        out_ref[...] = out.astype(out_ref.dtype)

    return kernel


def text_embedding_forward(x, w_ih, w_hh, b, w_out, b_out, *, block_b=128):
    """x: (B, L) f32 char indices; returns (B, E) embeddings."""
    B, L = x.shape
    H, four_h = w_hh.shape
    E = w_out.shape[1]
    assert four_h == 4 * H
    assert H % 128 == 0, "keep gate slice boundaries on 128-lane tiles"

    # Lane-dense output: pad E up to the 128-lane width (zero-padded weights).
    E_pad = _round_up(E, 128)
    # Batch tile: multiple of 8 sublanes, capped at block_b; pad B to a multiple.
    TB = min(block_b, _round_up(B, 8))
    B_pad = _round_up(B, TB)

    x_p = x if B_pad == B else jnp.pad(x, ((0, B_pad - B), (0, 0)))
    w_out_p = w_out if E_pad == E else jnp.pad(w_out, ((0, 0), (0, E_pad - E)))
    b_out_p = b_out if E_pad == E else jnp.pad(b_out, ((0, 0), (0, E_pad - E)))

    grid = (B_pad // TB,)
    out = pl.pallas_call(
        make_lstm_embed_kernel(L, H, E_pad),
        out_shape=jax.ShapeDtypeStruct((B_pad, E_pad), jnp.float32),
        grid=grid,
        in_specs=[
            pl.BlockSpec((TB, L), lambda i: (i, 0)),        # x tile follows the grid
            pl.BlockSpec((1, four_h), lambda i: (0, 0)),    # weights: constant index
            pl.BlockSpec((H, four_h), lambda i: (0, 0)),    #   -> stay VMEM-resident
            pl.BlockSpec((1, four_h), lambda i: (0, 0)),
            pl.BlockSpec((H, E_pad), lambda i: (0, 0)),
            pl.BlockSpec((1, E_pad), lambda i: (0, 0)),
        ],
        out_specs=pl.BlockSpec((TB, E_pad), lambda i: (i, 0)),
        compiler_params=pltpu.CompilerParams(
            dimension_semantics=("parallel",)),             # megacore-shard the word axis
    )(x_p, w_ih, w_hh, b, w_out_p, b_out_p)

    return out[:B, :E]


def reference_forward(x, w_ih, w_hh, b, w_out, b_out):
    """Pure-JAX reference with identical math (per-word unbatched LSTM, batched)."""
    B, L = x.shape
    H = w_hh.shape[0]
    h = jnp.zeros((B, H), jnp.float32)
    c = jnp.zeros((B, H), jnp.float32)
    for t in range(L):
        gates = x[:, t:t + 1] * w_ih + h @ w_hh + b
        i_g = jax.nn.sigmoid(gates[:, 0 * H:1 * H])
        f_g = jax.nn.sigmoid(gates[:, 1 * H:2 * H])
        g_g = jnp.tanh(gates[:, 2 * H:3 * H])
        o_g = jax.nn.sigmoid(gates[:, 3 * H:4 * H])
        c = f_g * c + i_g * g_g
        h = o_g * jnp.tanh(c)
    return h @ w_out + b_out


if __name__ == "__main__":
    # Small, deterministic configuration (module default hidden_dim is 512; 128 here).
    H = 128          # hidden_dim (multiple of 128 for lane-aligned gate slices)
    E = 10           # embedding_dim
    L = 6            # word length (seq_len per word)
    B = 256          # number of words -> grid of 2 batch tiles of 128

    # Vocab: char <-> index (1..26), as the module's vocab does.
    alphabet = string.ascii_lowercase
    char2index = {ch: i + 1 for i, ch in enumerate(alphabet)}
    index2char = {i + 1: ch for i, ch in enumerate(alphabet)}

    key = jax.random.PRNGKey(0)
    kx, k1, k2, k3, k4, k5, k6 = jax.random.split(key, 7)

    # Deterministic random equal-length "words", then encode like the module does.
    idx = np.asarray(jax.random.randint(kx, (B, L), 1, len(alphabet) + 1))
    words = ["".join(index2char[int(v)] for v in row) for row in idx]
    x = jnp.array([[char2index[c] for c in w] for w in words], dtype=jnp.float32)

    # PyTorch-style uniform(+-1/sqrt(H)) init; weights stored transposed (in, out).
    bound = 1.0 / np.sqrt(H)
    w_ih = jax.random.uniform(k1, (1, 4 * H), jnp.float32, -bound, bound)   # (4H,1)^T
    w_hh = jax.random.uniform(k2, (H, 4 * H), jnp.float32, -bound, bound)   # (4H,H)^T
    b_ih = jax.random.uniform(k3, (1, 4 * H), jnp.float32, -bound, bound)
    b_hh = jax.random.uniform(k4, (1, 4 * H), jnp.float32, -bound, bound)
    b = b_ih + b_hh
    w_out = jax.random.uniform(k5, (H, E), jnp.float32, -bound, bound)      # (E,H)^T
    b_out = jax.random.uniform(k6, (1, E), jnp.float32, -bound, bound)

    out = text_embedding_forward(x, w_ih, w_hh, b, w_out, b_out, block_b=128)
    out = jax.block_until_ready(out)

    ref = reference_forward(x, w_ih, w_hh, b, w_out, b_out)
    np.testing.assert_allclose(np.asarray(out), np.asarray(ref), rtol=1e-3, atol=1e-3)
    assert out.shape == (B, E)

    print("KERNEL_OK")
</pallas_src>

<mosaic_0001>
module attributes {stable_mosaic.version = 11 : i64} {
  func.func @kernel(%arg0: i32, %arg1: memref<128x6xf32, #tpu.memory_space<vmem>>, %arg2: memref<1x512xf32, #tpu.memory_space<vmem>>, %arg3: memref<128x512xf32, #tpu.memory_space<vmem>>, %arg4: memref<1x512xf32, #tpu.memory_space<vmem>>, %arg5: memref<128x128xf32, #tpu.memory_space<vmem>>, %arg6: memref<1x128xf32, #tpu.memory_space<vmem>>, %arg7: memref<128x128xf32, #tpu.memory_space<vmem>>) attributes {dimension_semantics = [#tpu.dimension_semantics<parallel>], iteration_bounds = array<i64: 2>, scalar_prefetch = 0 : i64, scratch_operands = 0 : i64, tpu.core_type = #tpu.core_type<tc>, window_params = [{transform_indices = @transform_0, window_bounds = array<i64: 128, 6>}, {pipeline_mode = #tpu.pipeline_mode<synchronous>, transform_indices = @transform_1, window_bounds = array<i64: 1, 512>}, {pipeline_mode = #tpu.pipeline_mode<synchronous>, transform_indices = @transform_2, window_bounds = array<i64: 128, 512>}, {pipeline_mode = #tpu.pipeline_mode<synchronous>, transform_indices = @transform_3, window_bounds = array<i64: 1, 512>}, {pipeline_mode = #tpu.pipeline_mode<synchronous>, transform_indices = @transform_4, window_bounds = array<i64: 128, 128>}, {pipeline_mode = #tpu.pipeline_mode<synchronous>, transform_indices = @transform_5, window_bounds = array<i64: 1, 128>}, {transform_indices = @transform_6, window_bounds = array<i64: 128, 128>}]} {
    %c0 = arith.constant 0 : index
    %c0_0 = arith.constant 0 : index
    %0 = vector.load %arg1[%c0, %c0_0] : memref<128x6xf32, #tpu.memory_space<vmem>>, vector<128x6xf32>
    %c0_1 = arith.constant 0 : index
    %c0_2 = arith.constant 0 : index
    %1 = vector.load %arg2[%c0_1, %c0_2] : memref<1x512xf32, #tpu.memory_space<vmem>>, vector<1x512xf32>
    %c0_3 = arith.constant 0 : index
    %c0_4 = arith.constant 0 : index
    %2 = vector.load %arg3[%c0_3, %c0_4] : memref<128x512xf32, #tpu.memory_space<vmem>>, vector<128x512xf32>
    %c0_5 = arith.constant 0 : index
    %c0_6 = arith.constant 0 : index
    %3 = vector.load %arg4[%c0_5, %c0_6] : memref<1x512xf32, #tpu.memory_space<vmem>>, vector<1x512xf32>
    %4 = vector.extract_strided_slice %0 {offsets = [0, 0], sizes = [128, 1], strides = [1, 1]} : vector<128x6xf32> to vector<128x1xf32>
    %5 = vector.broadcast %4 : vector<128x1xf32> to vector<128x512xf32>
    %6 = vector.broadcast %1 : vector<1x512xf32> to vector<128x512xf32>
    %7 = arith.mulf %5, %6 : vector<128x512xf32>
    %8 = vector.broadcast %3 : vector<1x512xf32> to vector<128x512xf32>
    %9 = arith.addf %7, %8 : vector<128x512xf32>
    %10 = vector.extract_strided_slice %0 {offsets = [0, 1], sizes = [128, 1], strides = [1, 1]} : vector<128x6xf32> to vector<128x1xf32>
    %11 = vector.broadcast %10 : vector<128x1xf32> to vector<128x512xf32>
    %12 = vector.broadcast %1 : vector<1x512xf32> to vector<128x512xf32>
    %13 = arith.mulf %11, %12 : vector<128x512xf32>
    %14 = vector.broadcast %3 : vector<1x512xf32> to vector<128x512xf32>
    %15 = arith.addf %13, %14 : vector<128x512xf32>
    %16 = vector.extract_strided_slice %0 {offsets = [0, 2], sizes = [128, 1], strides = [1, 1]} : vector<128x6xf32> to vector<128x1xf32>
    %17 = vector.broadcast %16 : vector<128x1xf32> to vector<128x512xf32>
    %18 = vector.broadcast %1 : vector<1x512xf32> to vector<128x512xf32>
    %19 = arith.mulf %17, %18 : vector<128x512xf32>
    %20 = vector.broadcast %3 : vector<1x512xf32> to vector<128x512xf32>
    %21 = arith.addf %19, %20 : vector<128x512xf32>
    %22 = vector.extract_strided_slice %0 {offsets = [0, 3], sizes = [128, 1], strides = [1, 1]} : vector<128x6xf32> to vector<128x1xf32>
    %23 = vector.broadcast %22 : vector<128x1xf32> to vector<128x512xf32>
    %24 = vector.broadcast %1 : vector<1x512xf32> to vector<128x512xf32>
    %25 = arith.mulf %23, %24 : vector<128x512xf32>
    %26 = vector.broadcast %3 : vector<1x512xf32> to vector<128x512xf32>
    %27 = arith.addf %25, %26 : vector<128x512xf32>
    %28 = vector.extract_strided_slice %0 {offsets = [0, 4], sizes = [128, 1], strides = [1, 1]} : vector<128x6xf32> to vector<128x1xf32>
    %29 = vector.broadcast %28 : vector<128x1xf32> to vector<128x512xf32>
    %30 = vector.broadcast %1 : vector<1x512xf32> to vector<128x512xf32>
    %31 = arith.mulf %29, %30 : vector<128x512xf32>
    %32 = vector.broadcast %3 : vector<1x512xf32> to vector<128x512xf32>
    %33 = arith.addf %31, %32 : vector<128x512xf32>
    %34 = vector.extract_strided_slice %0 {offsets = [0, 5], sizes = [128, 1], strides = [1, 1]} : vector<128x6xf32> to vector<128x1xf32>
    %35 = vector.broadcast %34 : vector<128x1xf32> to vector<128x512xf32>
    %36 = vector.broadcast %1 : vector<1x512xf32> to vector<128x512xf32>
    %37 = arith.mulf %35, %36 : vector<128x512xf32>
    %38 = vector.broadcast %3 : vector<1x512xf32> to vector<128x512xf32>
    %39 = arith.addf %37, %38 : vector<128x512xf32>
    %40 = vector.extract_strided_slice %9 {offsets = [0, 0], sizes = [128, 128], strides = [1, 1]} : vector<128x512xf32> to vector<128x128xf32>
    %41 = arith.negf %40 : vector<128x128xf32>
    %42 = math.exp %41 : vector<128x128xf32>
    %cst = arith.constant 1.000000e+00 : f32
    %43 = vector.broadcast %cst : f32 to vector<128x128xf32>
    %44 = arith.addf %43, %42 : vector<128x128xf32>
    %45 = arith.divf %43, %44 : vector<128x128xf32>
    %46 = vector.extract_strided_slice %9 {offsets = [0, 256], sizes = [128, 128], strides = [1, 1]} : vector<128x512xf32> to vector<128x128xf32>
    %47 = math.tanh %46 : vector<128x128xf32>
    %48 = vector.extract_strided_slice %9 {offsets = [0, 384], sizes = [128, 128], strides = [1, 1]} : vector<128x512xf32> to vector<128x128xf32>
    %49 = arith.negf %48 : vector<128x128xf32>
    %50 = math.exp %49 : vector<128x128xf32>
    %cst_7 = arith.constant 1.000000e+00 : f32
    %51 = vector.broadcast %cst_7 : f32 to vector<128x128xf32>
    %52 = arith.addf %51, %50 : vector<128x128xf32>
    %53 = arith.divf %51, %52 : vector<128x128xf32>
    %54 = arith.mulf %45, %47 : vector<128x128xf32>
    %55 = math.tanh %54 : vector<128x128xf32>
    %56 = arith.mulf %53, %55 : vector<128x128xf32>
    %cst_8 = arith.constant dense<0.000000e+00> : vector<128x512xf32>
    %57 = tpu.matmul %56, %2, %cst_8 {dimension_numbers = #tpu.dot_dimension_numbers<[1], [0], [0], [1], [0, 0, 1, 1], [], []>} : vector<128x128xf32>, vector<128x512xf32>, vector<128x512xf32> -> vector<128x512xf32>
    %58 = arith.addf %15, %57 : vector<128x512xf32>
    %59 = vector.extract_strided_slice %58 {offsets = [0, 0], sizes = [128, 128], strides = [1, 1]} : vector<128x512xf32> to vector<128x128xf32>
    %60 = arith.negf %59 : vector<128x128xf32>
    %61 = math.exp %60 : vector<128x128xf32>
    %cst_9 = arith.constant 1.000000e+00 : f32
    %62 = vector.broadcast %cst_9 : f32 to vector<128x128xf32>
    %63 = arith.addf %62, %61 : vector<128x128xf32>
    %64 = arith.divf %62, %63 : vector<128x128xf32>
    %65 = vector.extract_strided_slice %58 {offsets = [0, 256], sizes = [128, 128], strides = [1, 1]} : vector<128x512xf32> to vector<128x128xf32>
    %66 = math.tanh %65 : vector<128x128xf32>
    %67 = vector.extract_strided_slice %58 {offsets = [0, 384], sizes = [128, 128], strides = [1, 1]} : vector<128x512xf32> to vector<128x128xf32>
    %68 = arith.negf %67 : vector<128x128xf32>
    %69 = math.exp %68 : vector<128x128xf32>
    %cst_10 = arith.constant 1.000000e+00 : f32
    %70 = vector.broadcast %cst_10 : f32 to vector<128x128xf32>
    %71 = arith.addf %70, %69 : vector<128x128xf32>
    %72 = arith.divf %70, %71 : vector<128x128xf32>
    %73 = vector.extract_strided_slice %58 {offsets = [0, 128], sizes = [128, 128], strides = [1, 1]} : vector<128x512xf32> to vector<128x128xf32>
    %74 = arith.negf %73 : vector<128x128xf32>
    %75 = math.exp %74 : vector<128x128xf32>
    %cst_11 = arith.constant 1.000000e+00 : f32
    %76 = vector.broadcast %cst_11 : f32 to vector<128x128xf32>
    %77 = arith.addf %76, %75 : vector<128x128xf32>
    %78 = arith.divf %76, %77 : vector<128x128xf32>
    %79 = arith.mulf %78, %54 : vector<128x128xf32>
    %80 = arith.mulf %64, %66 : vector<128x128xf32>
    %81 = arith.addf %79, %80 : vector<128x128xf32>
    %82 = math.tanh %81 : vector<128x128xf32>
    %83 = arith.mulf %72, %82 : vector<128x128xf32>
    %cst_12 = arith.constant dense<0.000000e+00> : vector<128x512xf32>
    %84 = tpu.matmul %83, %2, %cst_12 {dimension_numbers = #tpu.dot_dimension_numbers<[1], [0], [0], [1], [0, 0, 1, 1], [], []>} : vector<128x128xf32>, vector<128x512xf32>, vector<128x512xf32> -> vector<128x512xf32>
    %85 = arith.addf %21, %84 : vector<128x512xf32>
    %86 = vector.extract_strided_slice %85 {offsets = [0, 0], sizes = [128, 128], strides = [1, 1]} : vector<128x512xf32> to vector<128x128xf32>
    %87 = arith.negf %86 : vector<128x128xf32>
    %88 = math.exp %87 : vector<128x128xf32>
    %cst_13 = arith.constant 1.000000e+00 : f32
    %89 = vector.broadcast %cst_13 : f32 to vector<128x128xf32>
    %90 = arith.addf %89, %88 : vector<128x128xf32>
    %91 = arith.divf %89, %90 : vector<128x128xf32>
    %92 = vector.extract_strided_slice %85 {offsets = [0, 256], sizes = [128, 128], strides = [1, 1]} : vector<128x512xf32> to vector<128x128xf32>
    %93 = math.tanh %92 : vector<128x128xf32>
    %94 = vector.extract_strided_slice %85 {offsets = [0, 384], sizes = [128, 128], strides = [1, 1]} : vector<128x512xf32> to vector<128x128xf32>
    %95 = arith.negf %94 : vector<128x128xf32>
    %96 = math.exp %95 : vector<128x128xf32>
    %cst_14 = arith.constant 1.000000e+00 : f32
    %97 = vector.broadcast %cst_14 : f32 to vector<128x128xf32>
    %98 = arith.addf %97, %96 : vector<128x128xf32>
    %99 = arith.divf %97, %98 : vector<128x128xf32>
    %100 = vector.extract_strided_slice %85 {offsets = [0, 128], sizes = [128, 128], strides = [1, 1]} : vector<128x512xf32> to vector<128x128xf32>
    %101 = arith.negf %100 : vector<128x128xf32>
    %102 = math.exp %101 : vector<128x128xf32>
    %cst_15 = arith.constant 1.000000e+00 : f32
    %103 = vector.broadcast %cst_15 : f32 to vector<128x128xf32>
    %104 = arith.addf %103, %102 : vector<128x128xf32>
    %105 = arith.divf %103, %104 : vector<128x128xf32>
    %106 = arith.mulf %105, %81 : vector<128x128xf32>
    %107 = arith.mulf %91, %93 : vector<128x128xf32>
    %108 = arith.addf %106, %107 : vector<128x128xf32>
    %109 = math.tanh %108 : vector<128x128xf32>
    %110 = arith.mulf %99, %109 : vector<128x128xf32>
    %cst_16 = arith.constant dense<0.000000e+00> : vector<128x512xf32>
    %111 = tpu.matmul %110, %2, %cst_16 {dimension_numbers = #tpu.dot_dimension_numbers<[1], [0], [0], [1], [0, 0, 1, 1], [], []>} : vector<128x128xf32>, vector<128x512xf32>, vector<128x512xf32> -> vector<128x512xf32>
    %112 = arith.addf %27, %111 : vector<128x512xf32>
    %113 = vector.extract_strided_slice %112 {offsets = [0, 0], sizes = [128, 128], strides = [1, 1]} : vector<128x512xf32> to vector<128x128xf32>
    %114 = arith.negf %113 : vector<128x128xf32>
    %115 = math.exp %114 : vector<128x128xf32>
    %cst_17 = arith.constant 1.000000e+00 : f32
    %116 = vector.broadcast %cst_17 : f32 to vector<128x128xf32>
    %117 = arith.addf %116, %115 : vector<128x128xf32>
    %118 = arith.divf %116, %117 : vector<128x128xf32>
    %119 = vector.extract_strided_slice %112 {offsets = [0, 256], sizes = [128, 128], strides = [1, 1]} : vector<128x512xf32> to vector<128x128xf32>
    %120 = math.tanh %119 : vector<128x128xf32>
    %121 = vector.extract_strided_slice %112 {offsets = [0, 384], sizes = [128, 128], strides = [1, 1]} : vector<128x512xf32> to vector<128x128xf32>
    %122 = arith.negf %121 : vector<128x128xf32>
    %123 = math.exp %122 : vector<128x128xf32>
    %cst_18 = arith.constant 1.000000e+00 : f32
    %124 = vector.broadcast %cst_18 : f32 to vector<128x128xf32>
    %125 = arith.addf %124, %123 : vector<128x128xf32>
    %126 = arith.divf %124, %125 : vector<128x128xf32>
    %127 = vector.extract_strided_slice %112 {offsets = [0, 128], sizes = [128, 128], strides = [1, 1]} : vector<128x512xf32> to vector<128x128xf32>
    %128 = arith.negf %127 : vector<128x128xf32>
    %129 = math.exp %128 : vector<128x128xf32>
    %cst_19 = arith.constant 1.000000e+00 : f32
    %130 = vector.broadcast %cst_19 : f32 to vector<128x128xf32>
    %131 = arith.addf %130, %129 : vector<128x128xf32>
    %132 = arith.divf %130, %131 : vector<128x128xf32>
    %133 = arith.mulf %132, %108 : vector<128x128xf32>
    %134 = arith.mulf %118, %120 : vector<128x128xf32>
    %135 = arith.addf %133, %134 : vector<128x128xf32>
    %136 = math.tanh %135 : vector<128x128xf32>
    %137 = arith.mulf %126, %136 : vector<128x128xf32>
    %cst_20 = arith.constant dense<0.000000e+00> : vector<128x512xf32>
    %138 = tpu.matmul %137, %2, %cst_20 {dimension_numbers = #tpu.dot_dimension_numbers<[1], [0], [0], [1], [0, 0, 1, 1], [], []>} : vector<128x128xf32>, vector<128x512xf32>, vector<128x512xf32> -> vector<128x512xf32>
    %139 = arith.addf %33, %138 : vector<128x512xf32>
    %140 = vector.extract_strided_slice %139 {offsets = [0, 0], sizes = [128, 128], strides = [1, 1]} : vector<128x512xf32> to vector<128x128xf32>
    %141 = arith.negf %140 : vector<128x128xf32>
    %142 = math.exp %141 : vector<128x128xf32>
    %cst_21 = arith.constant 1.000000e+00 : f32
    %143 = vector.broadcast %cst_21 : f32 to vector<128x128xf32>
    %144 = arith.addf %143, %142 : vector<128x128xf32>
    %145 = arith.divf %143, %144 : vector<128x128xf32>
    %146 = vector.extract_strided_slice %139 {offsets = [0, 256], sizes = [128, 128], strides = [1, 1]} : vector<128x512xf32> to vector<128x128xf32>
    %147 = math.tanh %146 : vector<128x128xf32>
    %148 = vector.extract_strided_slice %139 {offsets = [0, 384], sizes = [128, 128], strides = [1, 1]} : vector<128x512xf32> to vector<128x128xf32>
    %149 = arith.negf %148 : vector<128x128xf32>
    %150 = math.exp %149 : vector<128x128xf32>
    %cst_22 = arith.constant 1.000000e+00 : f32
    %151 = vector.broadcast %cst_22 : f32 to vector<128x128xf32>
    %152 = arith.addf %151, %150 : vector<128x128xf32>
    %153 = arith.divf %151, %152 : vector<128x128xf32>
    %154 = vector.extract_strided_slice %139 {offsets = [0, 128], sizes = [128, 128], strides = [1, 1]} : vector<128x512xf32> to vector<128x128xf32>
    %155 = arith.negf %154 : vector<128x128xf32>
    %156 = math.exp %155 : vector<128x128xf32>
    %cst_23 = arith.constant 1.000000e+00 : f32
    %157 = vector.broadcast %cst_23 : f32 to vector<128x128xf32>
    %158 = arith.addf %157, %156 : vector<128x128xf32>
    %159 = arith.divf %157, %158 : vector<128x128xf32>
    %160 = arith.mulf %159, %135 : vector<128x128xf32>
    %161 = arith.mulf %145, %147 : vector<128x128xf32>
    %162 = arith.addf %160, %161 : vector<128x128xf32>
    %163 = math.tanh %162 : vector<128x128xf32>
    %164 = arith.mulf %153, %163 : vector<128x128xf32>
    %cst_24 = arith.constant dense<0.000000e+00> : vector<128x512xf32>
    %165 = tpu.matmul %164, %2, %cst_24 {dimension_numbers = #tpu.dot_dimension_numbers<[1], [0], [0], [1], [0, 0, 1, 1], [], []>} : vector<128x128xf32>, vector<128x512xf32>, vector<128x512xf32> -> vector<128x512xf32>
    %166 = arith.addf %39, %165 : vector<128x512xf32>
    %167 = vector.extract_strided_slice %166 {offsets = [0, 0], sizes = [128, 128], strides = [1, 1]} : vector<128x512xf32> to vector<128x128xf32>
    %168 = arith.negf %167 : vector<128x128xf32>
    %169 = math.exp %168 : vector<128x128xf32>
    %cst_25 = arith.constant 1.000000e+00 : f32
    %170 = vector.broadcast %cst_25 : f32 to vector<128x128xf32>
    %171 = arith.addf %170, %169 : vector<128x128xf32>
    %172 = arith.divf %170, %171 : vector<128x128xf32>
    %173 = vector.extract_strided_slice %166 {offsets = [0, 256], sizes = [128, 128], strides = [1, 1]} : vector<128x512xf32> to vector<128x128xf32>
    %174 = math.tanh %173 : vector<128x128xf32>
    %175 = vector.extract_strided_slice %166 {offsets = [0, 384], sizes = [128, 128], strides = [1, 1]} : vector<128x512xf32> to vector<128x128xf32>
    %176 = arith.negf %175 : vector<128x128xf32>
    %177 = math.exp %176 : vector<128x128xf32>
    %cst_26 = arith.constant 1.000000e+00 : f32
    %178 = vector.broadcast %cst_26 : f32 to vector<128x128xf32>
    %179 = arith.addf %178, %177 : vector<128x128xf32>
    %180 = arith.divf %178, %179 : vector<128x128xf32>
    %181 = vector.extract_strided_slice %166 {offsets = [0, 128], sizes = [128, 128], strides = [1, 1]} : vector<128x512xf32> to vector<128x128xf32>
    %182 = arith.negf %181 : vector<128x128xf32>
    %183 = math.exp %182 : vector<128x128xf32>
    %cst_27 = arith.constant 1.000000e+00 : f32
    %184 = vector.broadcast %cst_27 : f32 to vector<128x128xf32>
    %185 = arith.addf %184, %183 : vector<128x128xf32>
    %186 = arith.divf %184, %185 : vector<128x128xf32>
    %187 = arith.mulf %186, %162 : vector<128x128xf32>
    %188 = arith.mulf %172, %174 : vector<128x128xf32>
    %189 = arith.addf %187, %188 : vector<128x128xf32>
    %190 = math.tanh %189 : vector<128x128xf32>
    %191 = arith.mulf %180, %190 : vector<128x128xf32>
    %c0_28 = arith.constant 0 : index
    %c0_29 = arith.constant 0 : index
    %192 = vector.load %arg5[%c0_28, %c0_29] : memref<128x128xf32, #tpu.memory_space<vmem>>, vector<128x128xf32>
    %cst_30 = arith.constant dense<0.000000e+00> : vector<128x128xf32>
    %193 = tpu.matmul %191, %192, %cst_30 {dimension_numbers = #tpu.dot_dimension_numbers<[1], [0], [0], [1], [0, 0, 1, 1], [], []>} : vector<128x128xf32>, vector<128x128xf32>, vector<128x128xf32> -> vector<128x128xf32>
    %c0_31 = arith.constant 0 : index
    %c0_32 = arith.constant 0 : index
    %194 = vector.load %arg6[%c0_31, %c0_32] : memref<1x128xf32, #tpu.memory_space<vmem>>, vector<1x128xf32>
    %195 = vector.broadcast %194 : vector<1x128xf32> to vector<128x128xf32>
    %196 = arith.addf %193, %195 : vector<128x128xf32>
    %c0_33 = arith.constant 0 : index
    %c0_34 = arith.constant 0 : index
    %197 = vector.load %arg7[%c0_33, %c0_34] : memref<128x128xf32, #tpu.memory_space<vmem>>, vector<128x128xf32>
    tpu.vector_store %arg7[%c0_33, %c0_34], %196 {strides = array<i32>} : memref<128x128xf32, #tpu.memory_space<vmem>>, vector<128x128xf32>,
    return
  }
  func.func @transform_0(%arg0: i32) -> (i32, i32) {
    %c0_i32 = arith.constant 0 : i32
    %c0_i32_0 = arith.constant 0 : i32
    return %arg0, %c0_i32 : i32, i32
  }
  func.func @transform_1(%arg0: i32) -> (i32, i32) {
    %c0_i32 = arith.constant 0 : i32
    %c0_i32_0 = arith.constant 0 : i32
    %c0_i32_1 = arith.constant 0 : i32
    return %c0_i32, %c0_i32_0 : i32, i32
  }
  func.func @transform_2(%arg0: i32) -> (i32, i32) {
    %c0_i32 = arith.constant 0 : i32
    %c0_i32_0 = arith.constant 0 : i32
    %c0_i32_1 = arith.constant 0 : i32
    return %c0_i32, %c0_i32_0 : i32, i32
  }
  func.func @transform_3(%arg0: i32) -> (i32, i32) {
    %c0_i32 = arith.constant 0 : i32
    %c0_i32_0 = arith.constant 0 : i32
    %c0_i32_1 = arith.constant 0 : i32
    return %c0_i32, %c0_i32_0 : i32, i32
  }
  func.func @transform_4(%arg0: i32) -> (i32, i32) {
    %c0_i32 = arith.constant 0 : i32
    %c0_i32_0 = arith.constant 0 : i32
    %c0_i32_1 = arith.constant 0 : i32
    return %c0_i32, %c0_i32_0 : i32, i32
  }
  func.func @transform_5(%arg0: i32) -> (i32, i32) {
    %c0_i32 = arith.constant 0 : i32
    %c0_i32_0 = arith.constant 0 : i32
    %c0_i32_1 = arith.constant 0 : i32
    return %c0_i32, %c0_i32_0 : i32, i32
  }
  func.func @transform_6(%arg0: i32) -> (i32, i32) {
    %c0_i32 = arith.constant 0 : i32
    %c0_i32_0 = arith.constant 0 : i32
    return %arg0, %c0_i32 : i32, i32
  }
}

</mosaic_0001>

<bundles_post_ra>
// kernel: tpu_custom_call.1
= control target key start
LH: loop header
LB: loop body
LE: loop exit
PB: predicated region body
PF: predicated region fallthrough
CT: control target
= control target key end

     0   :  { %11 = vsyncpa [#allocation3], 0  ;;  %s11490_s0 = inlined_call_operand.vmem [shape: f32[256,6], index: 0, kind: input, shape index: {}]   ;;  %s11491_s1 = inlined_call_operand.vmem [shape: f32[1,512], index: 1, kind: input, shape index: {}]   ;;  %s11492_s2 = inlined_call_operand.hbm [shape: f32[128,512], index: 2, kind: input, shape index: {}]   ;;  %s11493_s3 = inlined_call_operand.vmem [shape: f32[1,512], index: 3, kind: input, shape index: {}]   ;;  %s11494_s4 = inlined_call_operand.vmem [shape: f32[128,128], index: 4, kind: input, shape index: {}]   ;;  %s11495_s5 = inlined_call_operand.vmem [shape: f32[1,128], index: 5, kind: input, shape index: {}]   ;;  %s11496_s6 = inlined_call_operand.hbm [shape: f32[256,128], index: 6, kind: output, shape index: {}]  }
   0x1   :  { %12 = vsyncpa [#allocation4], 0 }
   0x2   :  { %14 = vsyncpa [#allocation4 + $0x1], 0  ;;  %s8405_s21 = smov 0   ;;  %s8407_s22 = smov 0  }
   0x3   :  { %s8409_s23 = smov 0   ;;  %s8411_s24 = smov 0  }
   0x4 LB: > { %s8426_s25 = sadd.s32 4294967295, %s8355_s24   ;;  %s5906_s26 = sadd.s32 4294967294, %s8355_s24   ;;  %s8355_s24 = sphi %s8411_s24, %s11941_s24   ;;  %s8351_s23 = sphi %s8409_s23, %s11940_s23   ;;  %s8347_s22 = sphi %s8407_s22, %s11939_s22   ;;  %s8343_s21 = sphi %s8405_s21, %s11938_s21  }
   0x5   : > { %s8430_s27 = sadd.s32 1, %s8355_s24   ;;  %s158_s28 = sadd.s32 1, %s8351_s23 }
   0x6   : > { %s155_s29 = ssub.s32 %s8355_s24, %s8430_s27  ;;  %p168_p0 = scmp.ne.s32.totalorder %s8351_s23, %s8347_s22 }
   0x7   : > { %p156_p1 = scmp.eq.s32.totalorder %s155_s29, 0  ;;  %p169_p2 = scmp.eq.s32.totalorder %s8426_s25, 1 }
   0x8   : > { %p174_p3 = scmp.ne.s32.totalorder %s8347_s22, %s8343_s21  ;;  %p175_p4 = scmp.eq.s32.totalorder %s5906_s26, 1 }
   0x9   : > { %s8441_s30 = scalar_select %p156_p1, %s8351_s23, %s158_s28  }
   0xa   : > { %p8443_p5 = por %p169_p2, %p168_p0  ;;  %p8447_p6 = por %p175_p4, %p174_p3 }
   0xb   : > { %p5907_p7 = scmp.ge.s32.totalorder %s8355_s24, 1  ;;  %p182_p8 = scmp.lt.s32.totalorder %s8355_s24, 3 }
   0xc   : > { %s11619_s7 = scalar_select %p8443_p5, 1, 0 }
   0xd   : > { %s11620_s8 = scalar_select %p8447_p6, 1, 0 }
   0xe   : > { %p11497_p9 = scmp.eq.s32.totalorder %s8426_s25, 0  ;;  %p8454_p10 = pnand %p5907_p7, %p182_p8 }
   0xf   : > { %s8357_s10 = smov [#allocation2]   ;;  %s8261_s15 = scalar_lea.hbm %s11492_s2, 8192 }
  0x10   : > { %s11621_s9 = scalar_select %p8454_p10, 1, 0 }
  0x11   : > { %s197_s11 = sshll.u32 %s8357_s10, 4  ;;  %p6656_p11 = pneg %p8454_p10  ;;  %s198_s11 = int_to_ptr.vmem [resolvable:$true] %s197_s11 }
  0x12   : > { %p8262_p13 = scmp.ne.s32.totalorder %s11492_s2, %s8261_s15  ;;  %p8268_p3 = scmp.lt.u32.totalorder %s8261_s15, %s11492_s2 }
  0x13   : > { %p8462_p12 = pnand %p11497_p9, %p6656_p11 }
  0x15   : > { %p8263_p0 = pneg %p8462_p12 }
  0x17   : > { %p8264_p1 = pnand %p8263_p0, %p8262_p13 }
  0x19   : > { %p8265_p2 = pneg %p8264_p1 }
  0x1b   : > { %p8270_p4 = pnand %p8268_p3, %p8265_p2 }
  0x1d   : > { %8273 = shalt.err (!%p8270_p4)
}
  0x1e   : > { %s8274_s20 = scalar_lea.vmem %s198_s11, 8192  ;;  %p8282_p9 = scmp.lt.s32.totalorder %s198_s11, %s198_s11 }
  0x1f   : > { %p8275_p7 = scmp.ne.s32.totalorder %s198_s11, %s8274_s20  ;;  %p8283_p6 = scmp.lt.s32.totalorder %s8274_s20, %s8274_s20 }
  0x21   : > { %p8277_p8 = pnand %p8275_p7, %p8263_p0  ;;  %p8284_p5 = por %p8283_p6, %p8282_p9 }
  0x23   : > { %p8278_p11 = pneg %p8277_p8 }
  0x25   : > { %p8285_p10 = pnand %p8284_p5, %p8278_p11 }
  0x27   : > { %8288 = shalt.err (!%p8285_p10)
}
  0x28   : > { %s8358_s26 = smov 512   ;;  %s8359_s28 = smov 32  }
  0x29   : > { %6659 = dma.hbm_to_vmem [thread:$0]  (!%p8462_p12), %s11492_s2, 8192, %s198_s11, [#allocation3], %s8358_s26, %s8358_s26, %s8359_s28  }
  0x2a   : > { %p11623_p13 = scmp.ne.s32.totalorder %s11621_s9, 0 }
  0x2c   : > { %231 = sbr.rel (%p11623_p13) target bundleno = 2108 (0x83c), region = 44 }
  0x33   : > { %p11624_p1 = scmp.eq.s32.totalorder %s8426_s25, 0 }
  0x35   : > { %8334 = dma.done.wait (%p11624_p1), [#allocation3], 8192   ;;  %p11625_p0 = pmov %p11624_p1 }
  0x36   : > { %s5913_s13 = sshll.u32 %s8426_s25, 4  ;;  %v8360_v0 = vmov 0   ;;  %v286_v17 = vld [vmem:[#allocation2 + $0x8] sm:$0xff]  ;;  %v288_v19 = vld [vmem:[#allocation2 + $0x18] sm:$0xff]  ;;  %v285_v22 = vld [vmem:[#allocation2] sm:$0xff]  ;;  %s6193_s9 = sshll.u32 %s8426_s25, 11 }
  0x37   : > { %8336 = vsyncadd (%p11625_p0), [#allocation3], 4294959104  ;;  %6712 = vset.pattern.permute.xlu1 %v8360_v0  ;;  %6711 = vset.pattern.permute.xlu0 %v8360_v0  ;;  %p262_p5 = scmp.lt.s32.totalorder %s5913_s13, 31  ;;  %v290_v18 = vld [vmem:[#allocation2 + $0x28] sm:$0xff]  ;;  %v292_v21 = vld [vmem:[#allocation2 + $0x38] sm:$0xff]  ;;  %s11441_s19 = scalar_lea.hbm %s11496_s6, %s6193_s9 }
  0x38   : > { %v8558_v20 = vpack.c.bf16 %v290_v18, %v286_v17  ;;  %v289_v23 = vld [vmem:[#allocation2 + $0x20] sm:$0xff]  ;;  %v8560_v24 = vpack.c.bf16 %v292_v21, %v288_v19  ;;  %v287_v26 = vld [vmem:[#allocation2 + $0x10] sm:$0xff]  ;;  %v294_v29 = vld [vmem:[#allocation2 + $0x48] sm:$0xff]  ;;  %p11936_p9 = scmp.ne.s32.totalorder %s11619_s7, 0  ;;  %s8367_s26 = smov [#allocation5]  }
  0x39   : > { %s11943_s13 = smov (!%p262_p5, %s5913_s13), 31  ;;  %v8562_v25 = vpack.c.bf16 %v289_v23, %v285_v22  ;;  %v291_v27 = vld [vmem:[#allocation2 + $0x30] sm:$0xff]  ;;  %v298_v30 = vld [vmem:[#allocation2 + $0x68] sm:$0xff]  ;;  %v296_v31 = vld [vmem:[#allocation2 + $0x58] sm:$0xff]  ;;  %s8293_s28 = sshll.u32 %s8367_s26, 4  ;;  %s8294_s28 = int_to_ptr.vmem [resolvable:$false] %s8293_s28 }
  0x3a   : > { %s5914_s12 = sshll.u32 %s11943_s13, 3  ;;  %11626 = vst [vmem:[#allocation8_spill] sm:$0xff] %v8558_v20  ;;  %11627 = vst [vmem:[#allocation9_spill] sm:$0xff] %v8560_v24  ;;  %6283 = vmatprep.subr.bf16.mxu0 %v8558_v20  ;;  %v8565_v28 = vpack.c.bf16 %v291_v27, %v287_v26  ;;  %6315 = vmatprep.subr.bf16.mxu1 %v8560_v24  ;;  %v8570_v32 = vpack.c.bf16 %v298_v30, %v294_v29  ;;  %v300_v33 = vld [vmem:[#allocation2 + $0x78] sm:$0xff]  ;;  %v293_v34 = vld [vmem:[#allocation2 + $0x40] sm:$0xff]  ;;  %s258_s13 = sand.u32 1, %s8347_s22  }
  0x3b   : > { %s8492_s11 = scalar_lea.vmem %s11490_s0, %s5914_s12  ;;  %11628 = vst [vmem:[#allocation10_spill] sm:$0xff] %v8562_v25  ;;  %6285 = vmatpush1.bf16.msra.mxu0 %v8562_v25  ;;  %v297_v35 = vld [vmem:[#allocation2 + $0x60] sm:$0xff]  ;;  %v8572_v36 = vpack.c.bf16 %v300_v33, %v296_v31  ;;  %v295_v38 = vld [vmem:[#allocation2 + $0x50] sm:$0xff]  ;;  %v302_v41 = vld [vmem:[#allocation2 + $0x88] sm:$0xff]  ;;  %s5912_s12 = sshll.u32 %s258_s13, 7 }
  0x3c   : > { %v8495_v1 = vld [vmem:[%s8492_s11 + $0x10] sm:$0xff]  ;;  %v8498_v2 = vld [vmem:[%s8492_s11] sm:$0xff]  ;;  %v8503_v3 = vld [vmem:[%s8492_s11 + $0x18] sm:$0xff]  ;;  %11629 = vst [vmem:[#allocation11_spill] sm:$0xff] %v8565_v28  ;;  %6317 = vmatpush1.bf16.msra.mxu1 %v8565_v28  ;;  %v8574_v37 = vpack.c.bf16 %v297_v35, %v293_v34  ;;  %6287 = vmatprep.subr.bf16.mxu0 %v8570_v32  ;;  %s11449_s20 = scalar_lea.sflag [#allocation4], %s258_s13  ;;  %s8295_s29 = scalar_lea.vmem %s8294_s28, 4096 }
  0x3d   : > { %362 = vperm.xlu1 %6712, %v8495_v1   ;;  %352 = vperm.xlu0 %6711, %v8498_v2   ;;  %v8506_v4 = vld [vmem:[%s8492_s11 + $0x8] sm:$0xff]  ;;  %v8514_v6 = vld [vmem:[%s8492_s11 + $0x20] sm:$0xff]  ;;  %v8519_v7 = vld [vmem:[%s8492_s11 + $0x38] sm:$0xff]  ;;  %11630 = vst [vmem:[#allocation12_spill] sm:$0xff] %v8570_v32 }
  0x3e   : > { %v8511_v5 = vld [vmem:[%s8492_s11 + $0x28] sm:$0xff]  ;;  %v8522_v8 = vld [vmem:[%s8492_s11 + $0x30] sm:$0xff]  ;;  %v8530_v10 = vld [vmem:[%s8492_s11 + $0x40] sm:$0xff]  ;;  %11631 = vst [vmem:[#allocation13_spill] sm:$0xff] %v8572_v36  ;;  %6319 = vmatprep.subr.bf16.mxu1 %v8572_v36 }
  0x3f   : > { %v8527_v9 = vld [vmem:[%s8492_s11 + $0x48] sm:$0xff]  ;;  %v8535_v11 = vld [vmem:[%s8492_s11 + $0x58] sm:$0xff]  ;;  %v8538_v12 = vld [vmem:[%s8492_s11 + $0x50] sm:$0xff]  ;;  %11632 = vst [vmem:[#allocation14_spill] sm:$0xff] %v8574_v37  ;;  %6289 = vmatpush1.bf16.msra.mxu0 %v8574_v37 }
  0x40   : > { %v8543_v13 = vld [vmem:[%s8492_s11 + $0x68] sm:$0xff]  ;;  %v8546_v14 = vld [vmem:[%s8492_s11 + $0x60] sm:$0xff]  ;;  %v8551_v15 = vld [vmem:[%s8492_s11 + $0x78] sm:$0xff] }
  0x41   : > { %367 = vperm.xlu1 %6712, %v8503_v3   ;;  %357 = vperm.xlu0 %6711, %v8506_v4   ;;  %v8554_v16 = vld [vmem:[%s8492_s11 + $0x70] sm:$0xff]  ;;  %v306_v42 = vld [vmem:[#allocation2 + $0xa8] sm:$0xff]  ;;  %v304_v43 = vld [vmem:[#allocation2 + $0x98] sm:$0xff] }
  0x42   : > { %v299_v39 = vld [vmem:[#allocation2 + $0x70] sm:$0xff]  ;;  %v8582_v44 = vpack.c.bf16 %v306_v42, %v302_v41  ;;  %v308_v45 = vld [vmem:[#allocation2 + $0xb8] sm:$0xff]  ;;  %v301_v46 = vld [vmem:[#allocation2 + $0x80] sm:$0xff] }
  0x43   : > { %v8577_v40 = vpack.c.bf16 %v299_v39, %v295_v38  ;;  %v305_v47 = vld [vmem:[#allocation2 + $0xa0] sm:$0xff]  ;;  %v8584_v48 = vpack.c.bf16 %v308_v45, %v304_v43  ;;  %v303_v50 = vld [vmem:[#allocation2 + $0x90] sm:$0xff]  ;;  %v310_v53 = vld [vmem:[#allocation2 + $0xc8] sm:$0xff] }
  0x44   : > { %11634 = vst [vmem:[#allocation16_spill] sm:$0xff] %v8582_v44  ;;  %v8586_v49 = vpack.c.bf16 %v305_v47, %v301_v46  ;;  %v307_v51 = vld [vmem:[#allocation2 + $0xb0] sm:$0xff]  ;;  %6291 = vmatprep.subr.bf16.mxu0 %v8582_v44  ;;  %v314_v54 = vld [vmem:[#allocation2 + $0xe8] sm:$0xff]  ;;  %v312_v55 = vld [vmem:[#allocation2 + $0xd8] sm:$0xff] }
  0x45   : > { %377 = vperm.xlu1 %6712, %v8511_v5   ;;  %372 = vperm.xlu0 %6711, %v8514_v6   ;;  %11633 = vst [vmem:[#allocation15_spill] sm:$0xff] %v8577_v40  ;;  %11635 = vst [vmem:[#allocation17_spill] sm:$0xff] %v8584_v48  ;;  %v8589_v52 = vpack.c.bf16 %v307_v51, %v303_v50  ;;  %v8594_v56 = vpack.c.bf16 %v314_v54, %v310_v53  ;;  %v316_v57 = vld [vmem:[#allocation2 + $0xf8] sm:$0xff]  ;;  %v309_v58 = vld [vmem:[#allocation2 + $0xc0] sm:$0xff] }
  0x46   : > { %6321 = vmatpush1.bf16.msra.mxu1 %v8577_v40  ;;  %11636 = vst [vmem:[#allocation18_spill] sm:$0xff] %v8586_v49  ;;  %6293 = vmatpush1.bf16.msra.mxu0 %v8586_v49  ;;  %v313_v59 = vld [vmem:[#allocation2 + $0xe0] sm:$0xff]  ;;  %v8596_v60 = vpack.c.bf16 %v316_v57, %v312_v55  ;;  %v311_v62 = vld [vmem:[#allocation2 + $0xd0] sm:$0xff]  ;;  %v318_v17 = vld [vmem:[#allocation2 + $0x108] sm:$0xff] }
  0x47   : > { %11637 = vst [vmem:[#allocation19_spill] sm:$0xff] %v8589_v52  ;;  %6323 = vmatprep.subr.bf16.mxu1 %v8584_v48  ;;  %11638 = vst [vmem:[#allocation20_spill] sm:$0xff] %v8594_v56  ;;  %v8598_v61 = vpack.c.bf16 %v313_v59, %v309_v58  ;;  %v315_v63 = vld [vmem:[#allocation2 + $0xf0] sm:$0xff]  ;;  %6295 = vmatprep.subr.bf16.mxu0 %v8594_v56  ;;  %v322_v18 = vld [vmem:[#allocation2 + $0x128] sm:$0xff] }
  0x48   : > { %11639 = vst [vmem:[#allocation21_spill] sm:$0xff] %v8596_v60  ;;  %v8601_v0 = vpack.c.bf16 %v315_v63, %v311_v62  ;;  %v320_v19 = vld [vmem:[#allocation2 + $0x118] sm:$0xff]  ;;  %v8606_v21 = vpack.c.bf16 %v322_v18, %v318_v17  ;;  %v317_v23 = vld [vmem:[#allocation2 + $0x100] sm:$0xff]  ;;  %v319_v30 = vld [vmem:[#allocation2 + $0x110] sm:$0xff] }
  0x49   : > { %387 = vperm.xlu1 %6712, %v8519_v7   ;;  %382 = vperm.xlu0 %6711, %v8522_v8   ;;  %11640 = vst [vmem:[#allocation22_spill] sm:$0xff] %v8598_v61  ;;  %v324_v22 = vld [vmem:[#allocation2 + $0x138] sm:$0xff]  ;;  %v321_v26 = vld [vmem:[#allocation2 + $0x120] sm:$0xff]  ;;  %v323_v31 = vld [vmem:[#allocation2 + $0x130] sm:$0xff] }
  0x4a   : > { %6325 = vmatpush1.bf16.msra.mxu1 %v8589_v52  ;;  %11641 = vst [vmem:[#allocation23_spill] sm:$0xff] %v8601_v0  ;;  %6297 = vmatpush1.bf16.msra.mxu0 %v8598_v61  ;;  %11642 = vst [vmem:[#allocation24_spill] sm:$0xff] %v8606_v21  ;;  %v8608_v27 = vpack.c.bf16 %v324_v22, %v320_v19  ;;  %v8610_v29 = vpack.c.bf16 %v321_v26, %v317_v23  ;;  %v326_v34 = vld [vmem:[#allocation2 + $0x148] sm:$0xff]  ;;  %v328_v38 = vld [vmem:[#allocation2 + $0x158] sm:$0xff] }
  0x4b   : > { %6327 = vmatprep.subr.bf16.mxu1 %v8596_v60  ;;  %6299 = vmatprep.subr.bf16.mxu0 %v8606_v21  ;;  %v8613_v33 = vpack.c.bf16 %v323_v31, %v319_v30  ;;  %v330_v35 = vld [vmem:[#allocation2 + $0x168] sm:$0xff]  ;;  %v332_v41 = vld [vmem:[#allocation2 + $0x178] sm:$0xff]  ;;  %v325_v42 = vld [vmem:[#allocation2 + $0x140] sm:$0xff] }
  0x4c   : > { %11643 = vst [vmem:[#allocation25_spill] sm:$0xff] %v8608_v27  ;;  %11644 = vst [vmem:[#allocation26_spill] sm:$0xff] %v8610_v29  ;;  %v8618_v39 = vpack.c.bf16 %v330_v35, %v326_v34  ;;  %v329_v43 = vld [vmem:[#allocation2 + $0x160] sm:$0xff]  ;;  %v8620_v45 = vpack.c.bf16 %v332_v41, %v328_v38  ;;  %v327_v47 = vld [vmem:[#allocation2 + $0x150] sm:$0xff] }
  0x4d   : > { %397 = vperm.xlu1 %6712, %v8527_v9   ;;  %392 = vperm.xlu0 %6711, %v8530_v10   ;;  %11645 = vst [vmem:[#allocation27_spill] sm:$0xff] %v8613_v33  ;;  %v8622_v46 = vpack.c.bf16 %v329_v43, %v325_v42  ;;  %v331_v50 = vld [vmem:[#allocation2 + $0x170] sm:$0xff]  ;;  %v334_v53 = vld [vmem:[#allocation2 + $0x188] sm:$0xff]  ;;  %v336_v55 = vld [vmem:[#allocation2 + $0x198] sm:$0xff] }
  0x4e   : > { %6329 = vmatpush1.bf16.msra.mxu1 %v8601_v0  ;;  %6301 = vmatpush1.bf16.msra.mxu0 %v8610_v29  ;;  %11646 = vst [vmem:[#allocation28_spill] sm:$0xff] %v8618_v39  ;;  %11647 = vst [vmem:[#allocation29_spill] sm:$0xff] %v8620_v45  ;;  %v8625_v51 = vpack.c.bf16 %v331_v50, %v327_v47  ;;  %v338_v54 = vld [vmem:[#allocation2 + $0x1a8] sm:$0xff]  ;;  %v340_v58 = vld [vmem:[#allocation2 + $0x1b8] sm:$0xff] }
  0x4f   : > { %6331 = vmatprep.subr.bf16.mxu1 %v8608_v27  ;;  %11648 = vst [vmem:[#allocation30_spill] sm:$0xff] %v8622_v46  ;;  %6303 = vmatprep.subr.bf16.mxu0 %v8618_v39  ;;  %v8630_v57 = vpack.c.bf16 %v338_v54, %v334_v53  ;;  %v333_v59 = vld [vmem:[#allocation2 + $0x180] sm:$0xff]  ;;  %v8632_v63 = vpack.c.bf16 %v340_v58, %v336_v55  ;;  %v335_v18 = vld [vmem:[#allocation2 + $0x190] sm:$0xff]  ;;  %v342_v23 = vld [vmem:[#allocation2 + $0x1c8] sm:$0xff]  ;;  %v11500_v53 = vmov 0.0   ;;  %v431_v54 = vlaneseq }
  0x50   : > { %11649 = vst [vmem:[#allocation31_spill] sm:$0xff] %v8625_v51  ;;  %v337_v62 = vld [vmem:[#allocation2 + $0x1a0] sm:$0xff]  ;;  %v339_v19 = vld [vmem:[#allocation2 + $0x1b0] sm:$0xff]  ;;  %v346_v26 = vld [vmem:[#allocation2 + $0x1e8] sm:$0xff]  ;;  %1848 = vmatprep.mubr.f32.mxu0 %v11500_v53  ;;  %2009 = vmatprep.mubr.f32.mxu1 %v11500_v53 }
  0x51   : > { %407 = vperm.xlu1 %6712, %v8535_v11   ;;  %402 = vperm.xlu0 %6711, %v8538_v12   ;;  %11650 = vst [vmem:[#allocation32_spill] sm:$0xff] %v8630_v57  ;;  %11651 = vst [vmem:[#allocation33_spill] sm:$0xff] %v8632_v63  ;;  %v8634_v17 = vpack.c.bf16 %v337_v62, %v333_v59  ;;  %v8637_v22 = vpack.c.bf16 %v339_v19, %v335_v18  ;;  %v344_v30 = vld [vmem:[#allocation2 + $0x1d8] sm:$0xff]  ;;  %v341_v35 = vld [vmem:[#allocation2 + $0x1c0] sm:$0xff]  ;;  %v8658_v55 = vshrl.u32 %v431_v54, 7 }
  0x52   : > { %6333 = vmatpush1.bf16.msra.mxu1 %v8613_v33  ;;  %6305 = vmatpush1.bf16.msra.mxu0 %v8622_v46  ;;  %v8642_v31 = vpack.c.bf16 %v346_v26, %v342_v23  ;;  %v348_v34 = vld [vmem:[#allocation2 + $0x1f8] sm:$0xff]  ;;  %v345_v38 = vld [vmem:[#allocation2 + $0x1e0] sm:$0xff]  ;;  %v343_v43 = vld [vmem:[#allocation2 + $0x1d0] sm:$0xff] }
  0x53   : > { %6335 = vmatprep.subr.bf16.mxu1 %v8620_v45  ;;  %11652 = vst [vmem:[#allocation34_spill] sm:$0xff] %v8634_v17  ;;  %6307 = vmatprep.subr.bf16.mxu0 %v8630_v57  ;;  %11653 = vst [vmem:[#allocation35_spill] sm:$0xff] %v8637_v22  ;;  %v8644_v41 = vpack.c.bf16 %v348_v34, %v344_v30  ;;  %v8646_v42 = vpack.c.bf16 %v345_v38, %v341_v35  ;;  %v347_v47 = vld [vmem:[#allocation2 + $0x1f0] sm:$0xff]  ;;  %v433_v58 = vsub.s32 0, %v8658_v55  ;;  %v284_v59 = vld [vmem:[%s11491_s1] sm:$0xf] }
  0x54   : > { %11654 = vst [vmem:[#allocation36_spill] sm:$0xff] %v8642_v31  ;;  %v8649_v50 = vpack.c.bf16 %v347_v47, %v343_v43  ;;  %11658 = vst [vmem:[#allocation40_spill] sm:$0xff] %v8658_v55  ;;  %v445_v62 = vsub.s32 3, %v8658_v55  ;;  %v349_v23 = vld [vmem:[%s11493_s3] sm:$0xf] }
  0x55   : > { %417 = vperm.xlu1 %6712, %v8543_v13   ;;  %412 = vperm.xlu0 %6711, %v8546_v14   ;;  %11655 = vst [vmem:[#allocation37_spill] sm:$0xff] %v8644_v41  ;;  %11656 = vst [vmem:[#allocation38_spill] sm:$0xff] %v8646_v42  ;;  %v8665_v19 = vrot.slane %v284_v59, %v433_v58  ;;  %v8672_v34 = vrot.slane %v349_v23, %v433_v58 }
  0x56   : > { %6337 = vmatpush1.bf16.msra.mxu1 %v8625_v51  ;;  %6309 = vmatpush1.bf16.msra.mxu0 %v8634_v17  ;;  %11657 = vst [vmem:[#allocation39_spill] sm:$0xff] %v8649_v50  ;;  %v8670_v30 = vrot.slane %v284_v59, %v445_v62  ;;  %v8677_v54 = vrot.slane %v349_v23, %v445_v62 }
  0x57   : > { %6339 = vmatprep.subr.bf16.mxu1 %v8632_v63  ;;  %6311 = vmatprep.subr.bf16.mxu0 %v8642_v31 }
  0x59   : > { %427 = vperm.xlu1 %6712, %v8551_v15   ;;  %422 = vperm.xlu0 %6711, %v8554_v16  }
  0x5a   : > { %6341 = vmatpush1.bf16.msra.mxu1 %v8637_v22  ;;  %6313 = vmatpush1.bf16.msra.mxu0 %v8646_v42  ;;  %v441_v42 = vsub.s32 2, %v8658_v55 }
  0x5b   : > { %6343 = vmatprep.subr.bf16.mxu1 %v8644_v41  ;;  %6347 = vmatprep.subr.bf16.mxu0 %v8558_v20 }
  0x5c   : > { %v8689_v57 = vrot.slane %v284_v59, %v441_v42 }
  0x5e   : > { %6345 = vmatpush1.bf16.msra.mxu1 %v8649_v50 }
  0x5f   : > { %6379 = vmatprep.subr.bf16.mxu1 %v8560_v24 }
  0xbc   : > { %v363_v18 = vpop.permute.xlu1 %362  ;;  %v353_v26 = vpop.permute.xlu0 %352 }
  0xbd   : > { %v457_v35 = vmul.f32 %v8665_v19, %v363_v18  ;;  %v459_v38 = vmul.f32 %v8670_v30, %v363_v18  ;;  %v451_v47 = vmul.f32 %v8665_v19, %v353_v26  ;;  %v453_v53 = vmul.f32 %v8670_v30, %v353_v26 }
  0xbf   : > { %v526_v24 = vadd.f32 %v8672_v34, %v457_v35  ;;  %v528_v58 = vadd.f32 %v8677_v54, %v459_v38  ;;  %v520_v31 = vadd.f32 %v8672_v34, %v451_v47  ;;  %v522_v22 = vadd.f32 %v8677_v54, %v453_v53 }
  0xc0   : > { %v368_v43 = vpop.permute.xlu1 %367  ;;  %v358_v50 = vpop.permute.xlu0 %357  ;;  %v8694_v47 = vrot.slane %v349_v23, %v441_v42  ;;  %v458_v53 = vmul.f32 %v8689_v57, %v363_v18 }
  0xc1   : > { %v460_v20 = vmul.f32 %v8665_v19, %v368_v43  ;;  %v462_v41 = vmul.f32 %v8670_v30, %v368_v43  ;;  %v454_v62 = vmul.f32 %v8665_v19, %v358_v50  ;;  %v5917_v17 = vmul.f32 -1.442695, %v526_v24 }
  0xc2   : > { %v5933_v35 = vmul.f32 -1.442695, %v528_v58  ;;  %v5915_v46 = vmul.f32 -1.442695, %v520_v31  ;;  %v456_v55 = vmul.f32 %v8670_v30, %v358_v50  ;;  %v5931_v45 = vmul.f32 -1.442695, %v522_v22 }
  0xc3   : > { %v529_v63 = vadd.f32 %v8672_v34, %v460_v20  ;;  %v531_v51 = vadd.f32 %v8677_v54, %v462_v41  ;;  %v523_v39 = vadd.f32 %v8672_v34, %v454_v62  ;;  %6723 = vpow2.f32 %v5917_v17 }
  0xc4   : > { %v378_v38 = vpop.permute.xlu1 %377  ;;  %6725 = vpow2.f32 %v5933_v35  ;;  %v452_v20 = vmul.f32 %v8689_v57, %v353_v26  ;;  %v8699_v41 = vpop.permute.xlu0 %372  ;;  %v525_v31 = vadd.f32 %v8677_v54, %v456_v55  ;;  %v461_v42 = vmul.f32 %v8689_v57, %v368_v43 }
  0xc5   : > { %v5918_v24 = vmul.f32 -1.442695, %v529_v63  ;;  %v5934_v59 = vmul.f32 -1.442695, %v531_v51  ;;  %v466_v58 = vmul.f32 %v8665_v19, %v378_v38  ;;  %6727 = vpow2.f32 %v5915_v46 }
  0xc6   : > { %v468_v22 = vmul.f32 %v8670_v30, %v378_v38  ;;  %6729 = vpow2.f32 %v5931_v45  ;;  %v5916_v23 = vmul.f32 -1.442695, %v523_v39  ;;  %v527_v17 = vadd.f32 %v8694_v47, %v458_v53 }
  0xc7   : > { %6731 = vpow2.f32 %v5918_v24  ;;  %v455_v63 = vmul.f32 %v8689_v57, %v358_v50  ;;  %v463_v51 = vmul.f32 %v8665_v19, %v8699_v41  ;;  %v521_v18 = vadd.f32 %v8694_v47, %v452_v20 }
  0xc8   : > { %6733 = vpow2.f32 %v5934_v59  ;;  %v535_v46 = vadd.f32 %v8672_v34, %v466_v58  ;;  %v5932_v55 = vmul.f32 -1.442695, %v525_v31  ;;  %v537_v26 = vadd.f32 %v8677_v54, %v468_v22  ;;  %v388_v24 = vpop.permute.xlu1 %387 }
  0xc9   : > { %v530_v45 = vadd.f32 %v8694_v47, %v461_v42  ;;  %6735 = vpow2.f32 %v5916_v23  ;;  %v467_v39 = vmul.f32 %v8689_v57, %v378_v38  ;;  %v524_v43 = vadd.f32 %v8694_v47, %v455_v63 }
  0xca   : > { %6737 = vtanh.f32 %v527_v17  ;;  %v532_v50 = vadd.f32 %v8672_v34, %v463_v51  ;;  %v5920_v62 = vmul.f32 -1.442695, %v535_v46  ;;  %v5936_v53 = vmul.f32 -1.442695, %v537_v26  ;;  %v383_v51 = vpop.permute.xlu0 %382 }
  0xcb   : > { %6739 = vtanh.f32 %v521_v18  ;;  %v536_v59 = vadd.f32 %v8694_v47, %v467_v39  ;;  %v465_v58 = vmul.f32 %v8670_v30, %v8699_v41  ;;  %v472_v23 = vmul.f32 %v8665_v19, %v388_v24 }
  0xcc   : > { %6741 = vpow2.f32 %v5932_v55  ;;  %v5919_v38 = vmul.f32 -1.442695, %v532_v50  ;;  %v8362_v39 = vmov 1  }
  0xcd   : > { %v6724_v35 = vpop.eup %6723  ;;  %6743 = vtanh.f32 %v530_v45  ;;  %v534_v55 = vadd.f32 %v8677_v54, %v465_v58  ;;  %v474_v45 = vmul.f32 %v8670_v30, %v388_v24  ;;  %6713 = vset.pattern.permute.xlu0 %v8362_v39  ;;  %6714 = vset.pattern.permute.xlu1 %v8362_v39 }
  0xce   : > { %v6726_v20 = vpop.eup %6725  ;;  %6745 = vtanh.f32 %v524_v43  ;;  %v1578_v42 = vadd.f32 1.0, %v6724_v35  ;;  %v469_v35 = vmul.f32 %v8665_v19, %v383_v51  ;;  %569 = vperm.xlu0 %6713, %v8498_v2   ;;  %573 = vperm.xlu1 %6714, %v8506_v4  }
  0xcf   : > { %v6728_v31 = vpop.eup %6727  ;;  %6747 = vpow2.f32 %v5920_v62  ;;  %v1690_v63 = vadd.f32 1.0, %v6726_v20  ;;  %v541_v62 = vadd.f32 %v8672_v34, %v472_v23 }
  0xd0   : > { %v6730_v22 = vpop.eup %6729  ;;  %6749 = vpow2.f32 %v5936_v53  ;;  %v1576_v46 = vadd.f32 1.0, %v6728_v31  ;;  %v5935_v31 = vmul.f32 -1.442695, %v534_v55  ;;  %v538_v4 = vadd.f32 %v8672_v34, %v469_v35 }
  0xd1   : > { %v6732_v17 = vpop.eup %6731  ;;  %6751 = vtanh.f32 %v536_v59  ;;  %v1688_v26 = vadd.f32 1.0, %v6730_v22  ;;  %v464_v59 = vmul.f32 %v8689_v57, %v8699_v41  ;;  %v5922_v2 = vmul.f32 -1.442695, %v541_v62 }
  0xd2   : > { %v6734_v18 = vpop.eup %6733  ;;  %6753 = vpow2.f32 %v5919_v38  ;;  %v1579_v50 = vadd.f32 1.0, %v6732_v17  ;;  %v398_v17 = vpop.permute.xlu1 %397  ;;  %581 = vperm.xlu0 %6713, %v8503_v3   ;;  %577 = vperm.xlu1 %6714, %v8495_v1   ;;  %v471_v55 = vmul.f32 %v8670_v30, %v383_v51  ;;  %v5921_v1 = vmul.f32 -1.442695, %v538_v4 }
  0xd3   : > { %v6736_v43 = vpop.eup %6735  ;;  %6755 = vrcp.f32 %v1578_v42  ;;  %v1691_v20 = vadd.f32 1.0, %v6734_v18  ;;  %v543_v42 = vadd.f32 %v8677_v54, %v474_v45  ;;  %v473_v45 = vmul.f32 %v8689_v57, %v388_v24  ;;  %v393_v3 = vpop.permute.xlu0 %392 }
  0xd4   : > { %v8725_v53 = vpop.eup %6737  ;;  %6757 = vrcp.f32 %v1690_v63  ;;  %v1577_v22 = vadd.f32 1.0, %v6736_v43  ;;  %v533_v63 = vadd.f32 %v8694_v47, %v464_v59  ;;  %v478_v43 = vmul.f32 %v8665_v19, %v398_v17 }
  0xd5   : > { %v8729_v58 = vpop.eup %6739  ;;  %6759 = vrcp.f32 %v1576_v46  ;;  %v5938_v39 = vmul.f32 -1.442695, %v543_v42  ;;  %v480_v59 = vmul.f32 %v8670_v30, %v398_v17 }
  0xd6   : > { %v6742_v38 = vpop.eup %6741  ;;  %6761 = vrcp.f32 %v1688_v26  ;;  %589 = vperm.xlu0 %6713, %v8511_v5   ;;  %585 = vperm.xlu1 %6714, %v8514_v6   ;;  %v542_v5 = vadd.f32 %v8694_v47, %v473_v45  ;;  %v547_v6 = vadd.f32 %v8672_v34, %v478_v43  ;;  %v477_v45 = vmul.f32 %v8670_v30, %v393_v3 }
  0xd7   : > { %v8732_v23 = vpop.eup %6743  ;;  %6763 = vrcp.f32 %v1579_v50  ;;  %v1689_v46 = vadd.f32 1.0, %v6742_v38  ;;  %v540_v38 = vadd.f32 %v8677_v54, %v471_v55 }
  0xd8   : > { %v8737_v41 = vpop.eup %6745  ;;  %6765 = vrcp.f32 %v1691_v20  ;;  %v470_v20 = vmul.f32 %v8689_v57, %v383_v51  ;;  %v479_v51 = vmul.f32 %v8689_v57, %v398_v17 }
  0xd9   : > { %v6748_v18 = vpop.eup %6747  ;;  %6767 = vpow2.f32 %v5935_v31 }
  0xda   : > { %v6750_v26 = vpop.eup %6749  ;;  %6769 = vrcp.f32 %v1577_v22  ;;  %v1581_v35 = vadd.f32 1.0, %v6748_v18  ;;  %v475_v22 = vmul.f32 %v8665_v19, %v393_v3  ;;  %597 = vperm.xlu0 %6713, %v8519_v7   ;;  %593 = vperm.xlu1 %6714, %v8522_v8   ;;  %v539_v18 = vadd.f32 %v8694_v47, %v470_v20 }
  0xdb   : > { %v8743_v50 = vpop.eup %6751  ;;  %6771 = vpow2.f32 %v5922_v2  ;;  %v1693_v31 = vadd.f32 1.0, %v6750_v26  ;;  %v5937_v26 = vmul.f32 -1.442695, %v540_v38  ;;  %v5924_v7 = vmul.f32 -1.442695, %v547_v6 }
  0xdc   : > { %v6754_v62 = vpop.eup %6753  ;;  %6773 = vtanh.f32 %v533_v63  ;;  %v548_v43 = vadd.f32 %v8694_v47, %v479_v51  ;;  %v546_v38 = vadd.f32 %v8677_v54, %v477_v45 }
  0xdd   : > { %v8749_v24 = vpop.eup %6755  ;;  %6775 = vrcp.f32 %v1689_v46  ;;  %v1580_v4 = vadd.f32 1.0, %v6754_v62  ;;  %v549_v46 = vadd.f32 %v8677_v54, %v480_v59  ;;  %v8772_v62 = vpop.permute.xlu0 %402 }
  0xde   : > { %v8753_v42 = vpop.eup %6757  ;;  %6777 = vpow2.f32 %v5938_v39  ;;  %v544_v39 = vadd.f32 %v8672_v34, %v475_v22  ;;  %605 = vperm.xlu0 %6713, %v8527_v9   ;;  %601 = vperm.xlu1 %6714, %v8530_v10   ;;  %v408_v59 = vpop.permute.xlu1 %407 }
  0xdf   : > { %v6760_v2 = vpop.eup %6759  ;;  %6779 = vpow2.f32 %v5921_v1  ;;  %v476_v1 = vmul.f32 %v8689_v57, %v393_v3  ;;  %v5940_v20 = vmul.f32 -1.442695, %v549_v46  ;;  %v481_v3 = vmul.f32 %v8665_v19, %v8772_v62 }
  0xe0   : > { %v8760_v63 = vpop.eup %6761  ;;  %6781 = vrcp.f32 %v1581_v35  ;;  %v5923_v22 = vmul.f32 -1.442695, %v544_v39  ;;  %v484_v10 = vmul.f32 %v8665_v19, %v408_v59 }
  0xe1   : > { %v8764_v55 = vpop.eup %6763  ;;  %6783 = vrcp.f32 %v1693_v31  ;;  %v545_v9 = vadd.f32 %v8694_v47, %v476_v1  ;;  %v550_v39 = vadd.f32 %v8672_v34, %v481_v3 }
  0xe2   : > { %v8768_v17 = vpop.eup %6765  ;;  %6785 = vtanh.f32 %v542_v5  ;;  %613 = vperm.xlu0 %6713, %v8535_v11   ;;  %609 = vperm.xlu1 %6714, %v8538_v12   ;;  %v553_v11 = vadd.f32 %v8672_v34, %v484_v10  ;;  %v8796_v12 = vpop.permute.xlu0 %412 }
  0xe3   : > { %v6768_v8 = vpop.eup %6767  ;;  %6787 = vrcp.f32 %v1580_v4 }
  0xe4   : > { %v6770_v35 = vpop.eup %6769  ;;  %6789 = vtanh.f32 %v539_v18  ;;  %v1692_v6 = vadd.f32 1.0, %v6768_v8  ;;  %v5926_v3 = vmul.f32 -1.442695, %v553_v11 }
  0xe5   : > { %v6772_v31 = vpop.eup %6771  ;;  %6791 = vpow2.f32 %v5937_v26  ;;  %v5939_v26 = vmul.f32 -1.442695, %v546_v38  ;;  %v8805_v38 = vmul.f32 %v6770_v35, %v8737_v41  ;;  %v8818_v41 = vmul.f32 %v8749_v24, %v8725_v53 }
  0xe6   : > { %v8777_v5 = vpop.eup %6773  ;;  %6793 = vpow2.f32 %v5924_v7  ;;  %v1583_v18 = vadd.f32 1.0, %v6772_v31  ;;  %v8791_v7 = vmul.f32 %v6760_v2, %v8729_v58  ;;  %621 = vperm.xlu0 %6713, %v8543_v13   ;;  %617 = vperm.xlu1 %6714, %v8546_v14   ;;  %v485_v58 = vmul.f32 %v8689_v57, %v408_v59  ;;  %v8828_v53 = vpop.permute.xlu0 %422 }
  0xe7   : > { %v8781_v4 = vpop.eup %6775  ;;  %6795 = vtanh.f32 %v548_v43  ;;  %v486_v2 = vmul.f32 %v8670_v30, %v408_v59  ;;  %11659 = vst [vmem:[#allocation41_spill] sm:$0xff] %v8805_v38  ;;  %v487_v13 = vmul.f32 %v8665_v19, %v8796_v12  ;;  %11660 = vst [vmem:[#allocation42_spill] sm:$0xff] %v8818_v41 }
  0xe8   : > { %v6778_v51 = vpop.eup %6777  ;;  %6797 = vpow2.f32 %v5940_v20  ;;  %v554_v10 = vadd.f32 %v8694_v47, %v485_v58  ;;  %v483_v58 = vmul.f32 %v8670_v30, %v8772_v62 }
  0xe9   : > { %v6780_v46 = vpop.eup %6779  ;;  %6799 = vpow2.f32 %v5923_v22  ;;  %v1695_v43 = vadd.f32 1.0, %v6778_v51  ;;  %v555_v51 = vadd.f32 %v8677_v54, %v486_v2 }
  0xea   : > { %v8787_v45 = vpop.eup %6781  ;;  %6801 = vrcp.f32 %v1692_v6  ;;  %v1582_v20 = vadd.f32 1.0, %v6780_v46  ;;  %v5925_v6 = vmul.f32 -1.442695, %v550_v39  ;;  %629 = vperm.xlu0 %6713, %v8551_v15   ;;  %625 = vperm.xlu1 %6714, %v8554_v16   ;;  %v556_v16 = vadd.f32 %v8672_v34, %v487_v13 }
  0xeb   : > { %v8793_v8 = vpop.eup %6783  ;;  %6803 = vtanh.f32 %v545_v9  ;;  %v8812_v9 = vpop.permute.xlu1 %417 }
  0xec   : > { %v8800_v1 = vpop.eup %6785  ;;  %6805 = vrcp.f32 %v1583_v18  ;;  %v490_v15 = vmul.f32 %v8665_v19, %v8812_v9  ;;  %v5927_v13 = vmul.f32 -1.442695, %v556_v16  ;;  %v552_v16 = vadd.f32 %v8677_v54, %v483_v58 }
  0xed   : > { %v6788_v31 = vpop.eup %6787  ;;  %6807 = vpow2.f32 %v5939_v26 }
  0xee   : > { %v8807_v22 = vpop.eup %6789  ;;  %6809 = vtanh.f32 %v8791_v7 }
  0xef   : > { %v6792_v14 = vpop.eup %6791  ;;  %6811 = vrcp.f32 %v1695_v43  ;;  %v8835_v43 = vmul.f32 %v8764_v55, %v8732_v23  ;;  %v482_v55 = vmul.f32 %v8689_v57, %v8772_v62 }
  0xf0   : > { %v6794_v59 = vpop.eup %6793  ;;  %6813 = vrcp.f32 %v1582_v20  ;;  %v1694_v46 = vadd.f32 1.0, %v6792_v14  ;;  %v5942_v20 = vmul.f32 -1.442695, %v555_v51  ;;  %v493_v14 = vmul.f32 %v8665_v19, %v8828_v53 }
  0xf1   : > { %v8820_v35 = vpop.eup %6795  ;;  %6815 = vtanh.f32 %v8805_v38  ;;  %v1585_v39 = vadd.f32 1.0, %v6794_v59  ;;  %11661 = vst [vmem:[#allocation43_spill] sm:$0xff] %v8835_v43  ;;  %v8848_v59 = vpop.permute.xlu1 %427  ;;  %v8852_v51 = vmul.f32 %v6788_v31, %v8777_v5  ;;  %v551_v5 = vadd.f32 %v8694_v47, %v482_v55 }
  0xf2   : > { %v6798_v18 = vpop.eup %6797  ;;  %6817 = vpow2.f32 %v5925_v6  ;;  %v559_v6 = vadd.f32 %v8672_v34, %v490_v15  ;;  %v496_v62 = vmul.f32 %v8665_v19, %v8848_v59  ;;  %v562_v38 = vadd.f32 %v8672_v34, %v493_v14 }
  0xf3   : > { %v6800_v26 = vpop.eup %6799  ;;  %6819 = vpow2.f32 %v5926_v3  ;;  %v1697_v15 = vadd.f32 1.0, %v6798_v18  ;;  %v11662_v18 = vmov 0.0  }
  0xf4   : > { %v8830_v24 = vpop.eup %6801  ;;  %6821 = vtanh.f32 %v8818_v41  ;;  %v1584_v23 = vadd.f32 1.0, %v6800_v26  ;;  %v5928_v41 = vmul.f32 -1.442695, %v559_v6  ;;  %v5941_v6 = vmul.f32 -1.442695, %v552_v16 }
  0xf5   : > { %v8837_v11 = vpop.eup %6803  ;;  %6823 = vtanh.f32 %v554_v10  ;;  %v565_v14 = vadd.f32 %v8672_v34, %v496_v62 }
  0xf6   : > { %v8841_v2 = vpop.eup %6805  ;;  %6825 = vrcp.f32 %v1694_v46 }
  0xf7   : > { %v6808_v3 = vpop.eup %6807  ;;  %6827 = vrcp.f32 %v1585_v39 }
  0xf8   : > { %v6810_v10 = vpop.eup %6809  ;;  %6829 = vtanh.f32 %v8835_v43  ;;  %v1696_v55 = vadd.f32 1.0, %v6808_v3 }
  0xf9   : > { %v8854_v46 = vpop.eup %6811  ;;  %6831 = vpow2.f32 %v5942_v20  ;;  %v1768_v39 = vmul.f32 %v6810_v10, %v8760_v63  ;;  %v8868_v20 = vmul.f32 %v8787_v45, %v8743_v50  ;;  %v489_v10 = vmul.f32 %v8670_v30, %v8796_v12 }
  0xfa   : > { %v6814_v26 = vpop.eup %6813  ;;  %6833 = vpow2.f32 %v5927_v13 }
  0xfb   : > { %v6816_v43 = vpop.eup %6815  ;;  %6835 = vrcp.f32 %v1584_v23  ;;  %1849 = vmatmul.mubr.f32.vlgmr.msra.gmra.mrb[0].mxu0 %v1768_v39  ;;  %2010 = vmatmul.mubr.f32.vlgmr.msra.gmra.mrb[0].mxu1 %v1768_v39  ;;  %11663 = vst [vmem:[#allocation44_spill] sm:$0xff] %v8868_v20  ;;  %v5929_v23 = vmul.f32 -1.442695, %v562_v38  ;;  %v8885_v38 = vmul.f32 %v6814_v26, %v8807_v22  ;;  %v492_v39 = vmul.f32 %v8670_v30, %v8812_v9 }
  0xfc   : > { %v6818_v31 = vpop.eup %6817  ;;  %1854 = vmatprep.mubr.f32.mxu0 %v11662_v18  ;;  %2015 = vmatprep.mubr.f32.mxu1 %v11662_v18  ;;  %v1769_v63 = vmul.f32 %v6816_v43, %v8781_v4  ;;  %6837 = vtanh.f32 %v8852_v51  ;;  %v491_v43 = vmul.f32 %v8689_v57, %v8812_v9  ;;  %v488_v22 = vmul.f32 %v8689_v57, %v8796_v12 }
  0xfd   : > { %v6820_v58 = vpop.eup %6819  ;;  %6839 = vrcp.f32 %v1697_v15  ;;  %6349 = vmatpush1.bf16.msra.mxu0 %v8562_v25  ;;  %6381 = vmatpush1.bf16.msra.mxu1 %v8565_v28  ;;  %v1586_v50 = vadd.f32 1.0, %v6818_v31  ;;  %11664 = vst [vmem:[#allocation45_spill] sm:$0xff] %v8885_v38  ;;  %v5930_v26 = vmul.f32 -1.442695, %v565_v14  ;;  %v8907_v12 = vmul.f32 %v8841_v2, %v8800_v1 }
  0xfe   : > { %v6822_v13 = vpop.eup %6821  ;;  %6841 = vpow2.f32 %v5928_v41  ;;  %6351 = vmatprep.subr.bf16.mxu0 %v8570_v32  ;;  %6383 = vmatprep.subr.bf16.mxu1 %v8572_v36  ;;  %v558_v31 = vadd.f32 %v8677_v54, %v489_v10  ;;  %v497_v14 = vmul.f32 %v8689_v57, %v8848_v59 }
  0xff   : > { %v8875_v4 = vpop.eup %6823  ;;  %6843 = vtanh.f32 %v551_v5  ;;  %1855 = vmatmul.mubr.f32.gmra.mrb[2].mxu0 %v1769_v63  ;;  %2016 = vmatmul.mubr.f32.gmra.mrb[2].mxu1 %v1769_v63  ;;  %v1770_v15 = vmul.f32 %v6822_v13, %v8753_v42  ;;  %v1587_v42 = vadd.f32 1.0, %v6820_v58  ;;  %11665 = vst [vmem:[#allocation46_spill] sm:$0xff] %v8907_v12  ;;  %v560_v5 = vadd.f32 %v8694_v47, %v491_v43 }
 0x100   : > { %v8877_v45 = vpop.eup %6825  ;;  %1860 = vmatprep.mubr.f32.mxu0 %v11662_v18  ;;  %2021 = vmatprep.mubr.f32.mxu1 %v11662_v18  ;;  %6845 = vtanh.f32 %v8868_v20  ;;  %v557_v13 = vadd.f32 %v8694_v47, %v488_v22  ;;  %v5943_v43 = vmul.f32 -1.442695, %v558_v31  ;;  %v8363_v20 = vmov 2  }
 0x101   : > { %v8887_v41 = vpop.eup %6827  ;;  %6847 = vpow2.f32 %v5941_v6  ;;  %6353 = vmatpush1.bf16.msra.mxu0 %v8574_v37  ;;  %6385 = vmatpush1.bf16.msra.mxu1 %v8577_v40  ;;  %v561_v6 = vadd.f32 %v8677_v54, %v492_v39  ;;  %v494_v39 = vmul.f32 %v8689_v57, %v8828_v53 }
 0x102   : > { %v6830_v16 = vpop.eup %6829  ;;  %6849 = vpow2.f32 %v5929_v23  ;;  %6355 = vmatprep.subr.bf16.mxu0 %v8582_v44  ;;  %6387 = vmatprep.subr.bf16.mxu1 %v8584_v48 }
 0x103   : > { %v8900_v3 = vpop.eup %6831  ;;  %6851 = vrcp.f32 %v1586_v50  ;;  %1861 = vmatmul.mubr.f32.gmra.mrb[4].mxu0 %v1770_v15  ;;  %2022 = vmatmul.mubr.f32.gmra.mrb[4].mxu1 %v1770_v15  ;;  %v1771_v63 = vmul.f32 %v6830_v16, %v8768_v17  ;;  %v5944_v16 = vmul.f32 -1.442695, %v561_v6  ;;  %v563_v31 = vadd.f32 %v8694_v47, %v494_v39  ;;  %v11674_v39 = vld [vmem:[#allocation33_spill] sm:$0xff] }
 0x104   : > { %v6834_v62 = vpop.eup %6833  ;;  %1866 = vmatprep.mubr.f32.mxu0 %v11662_v18  ;;  %2027 = vmatprep.mubr.f32.mxu1 %v11662_v18  ;;  %6853 = vtanh.f32 %v8885_v38 }
 0x105   : > { %v6836_v9 = vpop.eup %6835  ;;  %6855 = vrcp.f32 %v1696_v55  ;;  %6357 = vmatpush1.bf16.msra.mxu0 %v8586_v49  ;;  %6389 = vmatpush1.bf16.msra.mxu1 %v8589_v52  ;;  %v1588_v2 = vadd.f32 1.0, %v6834_v62  ;;  %v495_v55 = vmul.f32 %v8670_v30, %v8828_v53  ;;  %v8944_v53 = vmul.f32 %v8887_v41, %v8820_v35  ;;  %v11669_v35 = vld [vmem:[#allocation29_spill] sm:$0xff] }
 0x106   : > { %v6838_v58 = vpop.eup %6837  ;;  %6857 = vpow2.f32 %v5930_v26  ;;  %6359 = vmatprep.subr.bf16.mxu0 %v8594_v56  ;;  %6391 = vmatprep.subr.bf16.mxu1 %v8596_v60  ;;  %v8926_v23 = vmul.f32 %v6836_v9, %v8837_v11  ;;  %v498_v26 = vmul.f32 %v8670_v30, %v8848_v59  ;;  %v566_v62 = vadd.f32 %v8694_v47, %v497_v14 }
 0x107   : > { %v8918_v1 = vpop.eup %6839  ;;  %6859 = vrcp.f32 %v1587_v42  ;;  %1867 = vmatmul.mubr.f32.gmra.mrb[6].mxu0 %v1771_v63  ;;  %2028 = vmatmul.mubr.f32.gmra.mrb[6].mxu1 %v1771_v63  ;;  %v1772_v10 = vmul.f32 %v6838_v58, %v8830_v24  ;;  %11667 = vst [vmem:[#allocation48_spill] sm:$0xff] %v8944_v53  ;;  %v564_v9 = vadd.f32 %v8677_v54, %v495_v55  ;;  %v11668_v63 = vld [vmem:[#allocation28_spill] sm:$0xff]  ;;  %v11672_v55 = vld [vmem:[#allocation31_spill] sm:$0xff] }
 0x108   : > { %v6842_v17 = vpop.eup %6841  ;;  %1872 = vmatprep.mubr.f32.mxu0 %v11662_v18  ;;  %2033 = vmatprep.mubr.f32.mxu1 %v11662_v18  ;;  %6861 = vtanh.f32 %v8907_v12  ;;  %11666 = vst [vmem:[#allocation47_spill] sm:$0xff] %v8926_v23 }
 0x109   : > { %v6844_v50 = vpop.eup %6843  ;;  %6863 = vtanh.f32 %v560_v5  ;;  %6361 = vmatpush1.bf16.msra.mxu0 %v8598_v61  ;;  %6393 = vmatpush1.bf16.msra.mxu1 %v8601_v0  ;;  %v1589_v22 = vadd.f32 1.0, %v6842_v17  ;;  %v5945_v17 = vmul.f32 -1.442695, %v564_v9  ;;  %v11677_v9 = vld [vmem:[#allocation35_spill] sm:$0xff] }
 0x10a   : > { %v6846_v15 = vpop.eup %6845  ;;  %6865 = vtanh.f32 %v557_v13  ;;  %6363 = vmatprep.subr.bf16.mxu0 %v8606_v21  ;;  %6395 = vmatprep.subr.bf16.mxu1 %v8608_v27 }
 0x10b   : > { %v6848_v11 = vpop.eup %6847  ;;  %6867 = vrcp.f32 %v1588_v2  ;;  %1873 = vmatmul.mubr.f32.gmra.mrb[8].mxu0 %v1772_v10  ;;  %2034 = vmatmul.mubr.f32.gmra.mrb[8].mxu1 %v1772_v10  ;;  %v1773_v5 = vmul.f32 %v6846_v15, %v8793_v8  ;;  %v567_v2 = vadd.f32 %v8677_v54, %v498_v26 }
 0x10c   : > { %v6850_v24 = vpop.eup %6849  ;;  %1878 = vmatprep.mubr.f32.mxu0 %v11662_v18  ;;  %2039 = vmatprep.mubr.f32.mxu1 %v11662_v18  ;;  %6869 = vtanh.f32 %v8926_v23  ;;  %v1698_v15 = vadd.f32 1.0, %v6848_v11 }
 0x10d   : > { %v6852_v42 = vpop.eup %6851  ;;  %6871 = vpow2.f32 %v5943_v43  ;;  %6365 = vmatpush1.bf16.msra.mxu0 %v8610_v29  ;;  %6397 = vmatpush1.bf16.msra.mxu1 %v8613_v33  ;;  %v1590_v58 = vadd.f32 1.0, %v6850_v24  ;;  %v11671_v43 = vld [vmem:[#allocation30_spill] sm:$0xff]  ;;  %v5946_v26 = vmul.f32 -1.442695, %v567_v2 }
 0x10e   : > { %v6854_v59 = vpop.eup %6853  ;;  %6873 = vpow2.f32 %v5944_v16  ;;  %6367 = vmatprep.subr.bf16.mxu0 %v11668_v63  ;;  %6399 = vmatprep.subr.bf16.mxu1 %v11669_v35  ;;  %v8957_v8 = vmul.f32 %v6852_v42, %v6844_v50  ;;  %v11673_v16 = vld [vmem:[#allocation32_spill] sm:$0xff]  ;;  %v11681_v2 = vld [vmem:[#allocation38_spill] sm:$0xff] }
 0x10f   : > { %v6856_v41 = vpop.eup %6855  ;;  %6875 = vrcp.f32 %v1589_v22  ;;  %1879 = vmatmul.mubr.f32.gmra.mrb[10].mxu0 %v1773_v5  ;;  %2040 = vmatmul.mubr.f32.gmra.mrb[10].mxu1 %v1773_v5  ;;  %v1774_v14 = vmul.f32 %v6854_v59, %v8877_v45  ;;  %v1699_v59 = vadd.f32 1.0, %v8900_v3 }
 0x110   : > { %v6858_v6 = vpop.eup %6857  ;;  %1884 = vmatprep.mubr.f32.mxu0 %v11662_v18  ;;  %2045 = vmatprep.mubr.f32.mxu1 %v11662_v18  ;;  %6877 = vtanh.f32 %v8944_v53  ;;  %11670 = vst [vmem:[#allocation49_spill] sm:$0xff] %v8957_v8 }
 0x111   : > { %v6860_v13 = vpop.eup %6859  ;;  %6879 = vtanh.f32 %v566_v62  ;;  %6369 = vmatpush1.bf16.msra.mxu0 %v11671_v43  ;;  %6401 = vmatpush1.bf16.msra.mxu1 %v11672_v55  ;;  %v1591_v22 = vadd.f32 1.0, %v6858_v6  ;;  %v11676_v62 = vld [vmem:[#allocation34_spill] sm:$0xff] }
 0x112   : > { %v6862_v10 = vpop.eup %6861  ;;  %6881 = vtanh.f32 %v563_v31  ;;  %6371 = vmatprep.subr.bf16.mxu0 %v11673_v16  ;;  %6403 = vmatprep.subr.bf16.mxu1 %v11674_v39  ;;  %v8969_v45 = vmul.f32 %v6860_v13, %v8875_v4  ;;  %v11678_v31 = vld [vmem:[#allocation36_spill] sm:$0xff] }
 0x113   : > { %v6864_v50 = vpop.eup %6863  ;;  %6883 = vrcp.f32 %v1590_v58  ;;  %1885 = vmatmul.mubr.f32.gmra.mrb[12].mxu0 %v1774_v14  ;;  %2046 = vmatmul.mubr.f32.gmra.mrb[12].mxu1 %v1774_v14  ;;  %v1775_v42 = vmul.f32 %v6862_v10, %v8854_v46  ;;  %v11679_v58 = vld [vmem:[#allocation37_spill] sm:$0xff] }
 0x114   : > { %v6866_v24 = vpop.eup %6865  ;;  %1890 = vmatprep.mubr.f32.mxu0 %v11662_v18  ;;  %2051 = vmatprep.mubr.f32.mxu1 %v11662_v18  ;;  %6885 = vtanh.f32 %v8957_v8  ;;  %11675 = vst [vmem:[#allocation50_spill] sm:$0xff] %v8969_v45 }
 0x115   : > { %v6868_v11 = vpop.eup %6867  ;;  %6887 = vpow2.f32 %v5945_v17  ;;  %6373 = vmatpush1.bf16.msra.mxu0 %v11676_v62  ;;  %6405 = vmatpush1.bf16.msra.mxu1 %v11677_v9  ;;  %v11682_v17 = vld [vmem:[#allocation39_spill] sm:$0xff] }
 0x116   : > { %v6870_v5 = vpop.eup %6869  ;;  %6889 = vrcp.f32 %v1698_v15  ;;  %6375 = vmatprep.subr.bf16.mxu0 %v11678_v31  ;;  %6407 = vmatprep.subr.bf16.mxu1 %v11679_v58  ;;  %v8980_v46 = vmul.f32 %v6868_v11, %v6866_v24  ;;  %v11683_v15 = vld [vmem:[#allocation8_spill] sm:$0xff] }
 0x117   : > { %v6872_v6 = vpop.eup %6871  ;;  %6891 = vrcp.f32 %v1591_v22  ;;  %1891 = vmatmul.mubr.f32.gmra.mrb[14].mxu0 %v1775_v42  ;;  %2052 = vmatmul.mubr.f32.gmra.mrb[14].mxu1 %v1775_v42  ;;  %v1776_v3 = vmul.f32 %v6870_v5, %v6856_v41  ;;  %v11684_v22 = vld [vmem:[#allocation9_spill] sm:$0xff] }
 0x118   : > { %v6874_v4 = vpop.eup %6873  ;;  %1896 = vmatprep.mubr.f32.mxu0 %v11662_v18  ;;  %2057 = vmatprep.mubr.f32.mxu1 %v11662_v18  ;;  %6893 = vtanh.f32 %v8969_v45  ;;  %11680 = vst [vmem:[#allocation51_spill] sm:$0xff] %v8980_v46  ;;  %v1700_v10 = vadd.f32 1.0, %v6872_v6 }
 0x119   : > { %v6876_v13 = vpop.eup %6875  ;;  %6895 = vpow2.f32 %v5946_v26  ;;  %6377 = vmatpush1.bf16.msra.mxu0 %v11681_v2  ;;  %6409 = vmatpush1.bf16.msra.mxu1 %v11682_v17  ;;  %v1701_v5 = vadd.f32 1.0, %v6874_v4 }
 0x11a   : > { %v6878_v14 = vpop.eup %6877  ;;  %6897 = vrcp.f32 %v1699_v59  ;;  %6411 = vmatprep.subr.bf16.mxu0 %v11683_v15  ;;  %6443 = vmatprep.subr.bf16.mxu1 %v11684_v22  ;;  %v8989_v41 = vmul.f32 %v6876_v13, %v6864_v50 }
 0x11b   : > { %v6880_v42 = vpop.eup %6879  ;;  %1897 = vmatmul.mubr.f32.gmra.mrb[16].mxu0 %v1776_v3  ;;  %2058 = vmatmul.mubr.f32.gmra.mrb[16].mxu1 %v1776_v3  ;;  %6899 = vtanh.f32 %v8980_v46  ;;  %v1777_v11 = vmul.f32 %v6878_v14, %v8918_v1 }
 0x11c   : > { %v6882_v45 = vpop.eup %6881  ;;  %1902 = vmatprep.mubr.f32.mxu0 %v11662_v18  ;;  %2063 = vmatprep.mubr.f32.mxu1 %v11662_v18  ;;  %11685 = vst [vmem:[#allocation52_spill] sm:$0xff] %v8989_v41  ;;  %6901 = vrcp.f32 %v1700_v10 }
 0x11d   : > { %v6884_v24 = vpop.eup %6883  ;;  %6903 = vtanh.f32 %v8989_v41  ;;  %6715 = vset.pattern.permute.xlu1 %v8363_v20  ;;  %6716 = vset.pattern.permute.xlu0 %v8363_v20 }
 0x11e   : > { %v6886_v26 = vpop.eup %6885  ;;  %v8995_v3 = vmul.f32 %v6884_v24, %v6882_v45  ;;  %6905 = vrcp.f32 %v1701_v5 }
 0x11f   : > { %v6888_v59 = vpop.eup %6887  ;;  %1903 = vmatmul.mubr.f32.gmra.mrb[18].mxu0 %v1777_v11  ;;  %2064 = vmatmul.mubr.f32.gmra.mrb[18].mxu1 %v1777_v11 }
 0x120   : > { %v6890_v6 = vpop.eup %6889  ;;  %1908 = vmatprep.mubr.f32.mxu0 %v11662_v18  ;;  %2069 = vmatprep.mubr.f32.mxu1 %v11662_v18  ;;  %11686 = vst [vmem:[#allocation53_spill] sm:$0xff] %v8995_v3  ;;  %v1702_v1 = vadd.f32 1.0, %v6888_v59  ;;  %6907 = vtanh.f32 %v8995_v3 }
 0x121   : > { %v6892_v50 = vpop.eup %6891  ;;  %v1778_v13 = vmul.f32 %v6890_v6, %v6886_v26 }
 0x122   : > { %v6894_v46 = vpop.eup %6893  ;;  %v9000_v10 = vmul.f32 %v6892_v50, %v6880_v42  ;;  %6909 = vrcp.f32 %v1702_v1 }
 0x123   : > { %v6896_v14 = vpop.eup %6895  ;;  %1909 = vmatmul.mubr.f32.gmra.mrb[20].mxu0 %v1778_v13  ;;  %2070 = vmatmul.mubr.f32.gmra.mrb[20].mxu1 %v1778_v13 }
 0x124   : > { %v6898_v4 = vpop.eup %6897  ;;  %1914 = vmatprep.mubr.f32.mxu0 %v11662_v18  ;;  %2075 = vmatprep.mubr.f32.mxu1 %v11662_v18  ;;  %11687 = vst [vmem:[#allocation54_spill] sm:$0xff] %v9000_v10  ;;  %v1703_v24 = vadd.f32 1.0, %v6896_v14  ;;  %6911 = vtanh.f32 %v9000_v10 }
 0x125   : > { %v1779_v11 = vmul.f32 %v6898_v4, %v6894_v46  ;;  %v6900_v45 = vpop.eup %6899 }
 0x126   : > { %v6902_v26 = vpop.eup %6901  ;;  %6913 = vrcp.f32 %v1703_v24  ;;  %v8195_v24 = vld [vmem:[%s11491_s1] sm:$0xf] }
 0x127   : > { %1915 = vmatmul.mubr.f32.gmra.mrb[22].mxu0 %v1779_v11  ;;  %2076 = vmatmul.mubr.f32.gmra.mrb[22].mxu1 %v1779_v11  ;;  %v1780_v5 = vmul.f32 %v6902_v26, %v6900_v45  ;;  %v6904_v59 = vpop.eup %6903  ;;  %v11688_v11 = vld [vmem:[#allocation40_spill] sm:$0xff] }
 0x128   : > { %1920 = vmatprep.mubr.f32.mxu0 %v11662_v18  ;;  %2081 = vmatprep.mubr.f32.mxu1 %v11662_v18  ;;  %v6906_v42 = vpop.eup %6905  ;;  %v437_v45 = vsub.s32 1, %v11688_v11 }
 0x129   : > { %v1781_v46 = vmul.f32 %v6906_v42, %v6904_v59  ;;  %v8196_v42 = vld [vmem:[%s11493_s3] sm:$0xf] }
 0x12a   : > { %v6908_v6 = vpop.eup %6907  ;;  %v9017_v26 = vrot.slane %v8195_v24, %v437_v45 }
 0x12b   : > { %1921 = vmatmul.mubr.f32.gmra.mrb[24].mxu0 %v1780_v5  ;;  %2082 = vmatmul.mubr.f32.gmra.mrb[24].mxu1 %v1780_v5 }
 0x12c   : > { %1926 = vmatprep.mubr.f32.mxu0 %v11662_v18  ;;  %2087 = vmatprep.mubr.f32.mxu1 %v11662_v18  ;;  %v6910_v50 = vpop.eup %6909 }
 0x12d   : > { %v1782_v13 = vmul.f32 %v6910_v50, %v6908_v6 }
 0x12e   : > { %v6912_v1 = vpop.eup %6911 }
 0x12f   : > { %1927 = vmatmul.mubr.f32.gmra.mrb[26].mxu0 %v1781_v46  ;;  %2088 = vmatmul.mubr.f32.gmra.mrb[26].mxu1 %v1781_v46  ;;  %v9023_v46 = vrot.slane %v8196_v42, %v437_v45 }
 0x130   : > { %1932 = vmatprep.mubr.f32.mxu0 %v11662_v18  ;;  %2093 = vmatprep.mubr.f32.mxu1 %v11662_v18  ;;  %v6914_v14 = vpop.eup %6913 }
 0x131   : > { %v1783_v4 = vmul.f32 %v6914_v14, %v6912_v1 }
 0x133   : > { %1933 = vmatmul.mubr.f32.gmra.mrb[28].mxu0 %v1782_v13  ;;  %2094 = vmatmul.mubr.f32.gmra.mrb[28].mxu1 %v1782_v13 }
 0x134   : > { %1938 = vmatprep.mubr.f32.mxu0 %v11662_v18  ;;  %2099 = vmatprep.mubr.f32.mxu1 %v11662_v18 }
 0x137   : > { %1939 = vmatmul.mubr.f32.gmra.mrb[30].mxu0 %v1783_v4  ;;  %2100 = vmatmul.mubr.f32.gmra.mrb[30].mxu1 %v1783_v4 }
 0x138   : > { %2618 = vmatprep.mubr.f32.mxu0 %v11662_v18  ;;  %2779 = vmatprep.mubr.f32.mxu1 %v11662_v18 }
 0x14d   : > { %v570_v5 = vpop.permute.xlu0 %569  ;;  %v9026_v50 = vpop.permute.xlu1 %573 }
 0x14e   : > { %v632_v59 = vmul.f32 %v570_v5, %v8665_v19  ;;  %v633_v6 = vmul.f32 %v570_v5, %v9017_v26  ;;  %v636_v1 = vmul.f32 %v9026_v50, %v8665_v19  ;;  %v637_v4 = vmul.f32 %v9026_v50, %v9017_v26 }
 0x14f   : > { %v635_v10 = vmul.f32 %v570_v5, %v8670_v30 }
 0x150   : > { %v696_v13 = vadd.f32 %v632_v59, %v8672_v34  ;;  %v697_v14 = vadd.f32 %v633_v6, %v9023_v46  ;;  %v700_v41 = vadd.f32 %v636_v1, %v8672_v34  ;;  %v701_v53 = vadd.f32 %v637_v4, %v9023_v46 }
 0x151   : > { %v9036_v8 = vpop.permute.xlu1 %577  ;;  %v634_v6 = vmul.f32 %v570_v5, %v8689_v57  ;;  %v699_v17 = vadd.f32 %v635_v10, %v8677_v54  ;;  %v9047_v4 = vpop.permute.xlu0 %581  ;;  %v638_v5 = vmul.f32 %v9026_v50, %v8689_v57 }
 0x152   : > { %v640_v22 = vmul.f32 %v9036_v8, %v8665_v19  ;;  %v644_v31 = vmul.f32 %v9047_v4, %v8665_v19 }
 0x154   : > { %v708_v39 = vadd.f32 %v644_v31, %v8672_v34  ;;  %v642_v31 = vmul.f32 %v9036_v8, %v8689_v57 }
 0x155   : > { %v9065_v43 = vpop.permute.xlu1 %585 }
 0x159   : > { %v9097_v29 = vpop.permute.xlu1 %593 }
 0x15a   : > { %11692 = vst [vmem:[#allocation57_spill] sm:$0xff] %v9097_v29 }
 0x1ce   : > { %v1850_v11 = vpop.f32.mrb[0].mxu0  ;;  %v2011_v24 = vpop.f32.mrb[0].mxu1 }
 0x1cf   : > { %v2106_v45 = vadd.f32 %v1850_v11, %v696_v13  ;;  %v1852_v42 = vpop.f32.mrb[1].mxu0  ;;  %v2013_v3 = vpop.f32.mrb[1].mxu1  ;;  %v641_v11 = vmul.f32 %v9036_v8, %v9017_v26 }
 0x1d0   : > { %v2107_v59 = vadd.f32 %v1852_v42, %v697_v14  ;;  %v698_v42 = vadd.f32 %v634_v6, %v8694_v47 }
 0x1d1   : > { %v5947_v23 = vmul.f32 -1.442695, %v2106_v45  ;;  %v705_v9 = vadd.f32 %v641_v11, %v9023_v46 }
 0x1d2   : > { %v5979_v15 = vmul.f32 -1.442695, %v2107_v59  ;;  %v1856_v2 = vpop.f32.mrb[2].mxu0  ;;  %v2017_v13 = vpop.f32.mrb[2].mxu1  ;;  %v704_v59 = vadd.f32 %v640_v22, %v8672_v34  ;;  %v2108_v22 = vadd.f32 %v2011_v24, %v698_v42 }
 0x1d3   : > { %6915 = vpow2.f32 %v5947_v23  ;;  %v2110_v1 = vadd.f32 %v1856_v2, %v700_v41  ;;  %v1858_v58 = vpop.f32.mrb[3].mxu0  ;;  %v9045_v14 = vpop.f32.mrb[3].mxu1  ;;  %v2109_v23 = vadd.f32 %v2013_v3, %v699_v17  ;;  %v702_v3 = vadd.f32 %v638_v5, %v8694_v47 }
 0x1d4   : > { %6917 = vpow2.f32 %v5979_v15  ;;  %v2111_v45 = vadd.f32 %v1858_v58, %v701_v53  ;;  %v645_v15 = vmul.f32 %v9047_v4, %v9017_v26  ;;  %v648_v5 = vmul.f32 %v9065_v43, %v8665_v19 }
 0x1d5   : > { %v5948_v10 = vmul.f32 -1.442695, %v2110_v1  ;;  %v5963_v17 = vmul.f32 -1.442695, %v2109_v23 }
 0x1d6   : > { %v5980_v2 = vmul.f32 -1.442695, %v2111_v45  ;;  %v1862_v41 = vpop.f32.mrb[4].mxu0  ;;  %v2023_v12 = vpop.f32.mrb[4].mxu1  ;;  %v709_v55 = vadd.f32 %v645_v15, %v9023_v46 }
 0x1d7   : > { %6919 = vpow2.f32 %v5948_v10  ;;  %v2114_v62 = vadd.f32 %v1862_v41, %v704_v59  ;;  %v1864_v53 = vpop.f32.mrb[5].mxu0  ;;  %v9058_v58 = vpop.f32.mrb[5].mxu1 }
 0x1d8   : > { %6921 = vpow2.f32 %v5980_v2  ;;  %v2115_v6 = vadd.f32 %v1864_v53, %v705_v9 }
 0x1d9   : > { %v5949_v1 = vmul.f32 -1.442695, %v2114_v62 }
 0x1da   : > { %v5981_v45 = vmul.f32 -1.442695, %v2115_v6  ;;  %v1868_v16 = vpop.f32.mrb[6].mxu0  ;;  %v2029_v11 = vpop.f32.mrb[6].mxu1  ;;  %v646_v6 = vmul.f32 %v9047_v4, %v8689_v57 }
 0x1db   : > { %6923 = vpow2.f32 %v5949_v1  ;;  %v2118_v10 = vadd.f32 %v1868_v16, %v708_v39  ;;  %v1870_v59 = vpop.f32.mrb[7].mxu0  ;;  %v9063_v41 = vpop.f32.mrb[7].mxu1  ;;  %v2112_v16 = vadd.f32 %v2017_v13, %v702_v3  ;;  %v706_v13 = vadd.f32 %v642_v31, %v8694_v47 }
 0x1dc   : > { %6925 = vpow2.f32 %v5981_v45  ;;  %v2119_v9 = vadd.f32 %v1870_v59, %v709_v55 }
 0x1dd   : > { %v6916_v62 = vpop.eup %6915  ;;  %6927 = vtanh.f32 %v2108_v22  ;;  %v5950_v24 = vmul.f32 -1.442695, %v2118_v10  ;;  %v649_v22 = vmul.f32 %v9065_v43, %v9017_v26  ;;  %v9079_v10 = vpop.permute.xlu0 %589 }
 0x1de   : > { %v6918_v42 = vpop.eup %6917  ;;  %v2218_v23 = vadd.f32 1.0, %v6916_v62  ;;  %6929 = vpow2.f32 %v5963_v17  ;;  %v1874_v39 = vpop.f32.mrb[8].mxu0  ;;  %v5982_v15 = vmul.f32 -1.442695, %v2119_v9  ;;  %v712_v17 = vadd.f32 %v648_v5, %v8672_v34 }
 0x1df   : > { %v2426_v2 = vadd.f32 1.0, %v6918_v42  ;;  %6931 = vpow2.f32 %v5950_v24  ;;  %v9071_v53 = vpop.f32.mrb[8].mxu1  ;;  %v1876_v55 = vpop.f32.mrb[9].mxu0  ;;  %v2116_v42 = vadd.f32 %v2023_v12, %v706_v13  ;;  %v713_v31 = vadd.f32 %v649_v22, %v9023_v46 }
 0x1e0   : > { %6933 = vrcp.f32 %v2218_v23  ;;  %v9077_v1 = vpop.f32.mrb[9].mxu1  ;;  %v2122_v23 = vadd.f32 %v1874_v39, %v712_v17  ;;  %v652_v5 = vmul.f32 %v9079_v10, %v8665_v19 }
 0x1e1   : > { %11689 = vst [vmem:[#allocation40_spill] sm:$0xff] %v9077_v1  ;;  %v6920_v45 = vpop.eup %6919  ;;  %6935 = vrcp.f32 %v2426_v2  ;;  %v710_v2 = vadd.f32 %v646_v6, %v8694_v47  ;;  %v2123_v39 = vadd.f32 %v1876_v55, %v713_v31  ;;  %v656_v55 = vmul.f32 %v9097_v29, %v8665_v19 }
 0x1e2   : > { %v6922_v3 = vpop.eup %6921  ;;  %v2219_v59 = vadd.f32 1.0, %v6920_v45  ;;  %6937 = vtanh.f32 %v2112_v16  ;;  %v1880_v9 = vpop.f32.mrb[10].mxu0  ;;  %v653_v16 = vmul.f32 %v9079_v10, %v9017_v26 }
 0x1e3   : > { %v9083_v62 = vpop.f32.mrb[10].mxu1  ;;  %v2427_v24 = vadd.f32 1.0, %v6922_v3  ;;  %6939 = vpow2.f32 %v5982_v15  ;;  %v1882_v38 = vpop.f32.mrb[11].mxu0  ;;  %v2120_v15 = vadd.f32 %v2029_v11, %v710_v2 }
 0x1e4   : > { %v9085_v35 = vpop.f32.mrb[11].mxu1  ;;  %6941 = vrcp.f32 %v2219_v59  ;;  %v717_v11 = vadd.f32 %v653_v16, %v9023_v46 }
 0x1e5   : > { %11690 = vst [vmem:[#allocation55_spill] sm:$0xff] %v9085_v35  ;;  %v6924_v45 = vpop.eup %6923  ;;  %6943 = vrcp.f32 %v2427_v24  ;;  %v5951_v35 = vmul.f32 -1.442695, %v2122_v23  ;;  %v716_v24 = vadd.f32 %v652_v5, %v8672_v34  ;;  %v5983_v23 = vmul.f32 -1.442695, %v2123_v39  ;;  %v9116_v39 = vpop.permute.xlu0 %597 }
 0x1e6   : > { %v6926_v3 = vpop.eup %6925  ;;  %v2220_v12 = vadd.f32 1.0, %v6924_v45  ;;  %v1886_v13 = vpop.f32.mrb[12].mxu0  ;;  %6945 = vtanh.f32 %v2116_v42  ;;  %v657_v5 = vmul.f32 %v9097_v29, %v9017_v26 }
 0x1e7   : > { %v9093_v17 = vpop.f32.mrb[12].mxu1  ;;  %v6928_v59 = vpop.eup %6927  ;;  %v2428_v6 = vadd.f32 1.0, %v6926_v3  ;;  %v2126_v31 = vadd.f32 %v1880_v9, %v716_v24  ;;  %v650_v9 = vmul.f32 %v9065_v43, %v8689_v57 }
 0x1e8   : > { %v1888_v22 = vpop.f32.mrb[13].mxu0  ;;  %v9095_v63 = vpop.f32.mrb[13].mxu1  ;;  %6947 = vrcp.f32 %v2220_v12 }
 0x1e9   : > { %11691 = vst [vmem:[#allocation56_spill] sm:$0xff] %v9095_v63  ;;  %v6930_v33 = vpop.eup %6929  ;;  %6949 = vrcp.f32 %v2428_v6  ;;  %v714_v20 = vadd.f32 %v650_v9, %v8694_v47 }
 0x1ea   : > { %v6932_v1 = vpop.eup %6931  ;;  %6951 = vtanh.f32 %v2120_v15  ;;  %v9103_v45 = vpop.f32.mrb[14].mxu0  ;;  %v2330_v27 = vadd.f32 1.0, %v6930_v33  ;;  %v639_v33 = vmul.f32 %v9026_v50, %v8670_v30 }
 0x1eb   : > { %v6934_v2 = vpop.eup %6933  ;;  %v2221_v42 = vadd.f32 1.0, %v6932_v1  ;;  %v9105_v3 = vpop.f32.mrb[14].mxu1  ;;  %6953 = vpow2.f32 %v5951_v35  ;;  %v2127_v35 = vadd.f32 %v1882_v38, %v717_v11  ;;  %v721_v11 = vadd.f32 %v657_v5, %v9023_v46 }
 0x1ec   : > { %v6936_v63 = vpop.eup %6935  ;;  %v2490_v12 = vmul.f32 %v6934_v2, %v6928_v59  ;;  %v9109_v16 = vpop.f32.mrb[15].mxu0  ;;  %v720_v59 = vadd.f32 %v656_v55, %v8672_v34 }
 0x1ed   : > { %v9111_v6 = vpop.f32.mrb[15].mxu1  ;;  %v6938_v21 = vpop.eup %6937  ;;  %v2474_v1 = vmul.f32 %v6936_v63, %v8791_v7  ;;  %6955 = vrcp.f32 %v2221_v42  ;;  %v5952_v7 = vmul.f32 -1.442695, %v2126_v31  ;;  %v8198_v31 = vld [vmem:[%s8492_s11 + $0x8] sm:$0xff]  ;;  %v2131_v5 = vadd.f32 %v1888_v22, %v721_v11 }
 0x1ee   : > { %11693 = vst [vmem:[#allocation58_spill] sm:$0xff] %v9111_v6  ;;  %v6940_v15 = vpop.eup %6939  ;;  %6957 = vpow2.f32 %v5983_v23  ;;  %v9123_v63 = vpop.f32.mrb[16].mxu0  ;;  %v2130_v50 = vadd.f32 %v1886_v13, %v720_v59  ;;  %v8197_v23 = vld [vmem:[%s8492_s11] sm:$0xff]  ;;  %765 = vperm.xlu0 %6716, %v8198_v31   ;;  %v5984_v13 = vmul.f32 -1.442695, %v2127_v35  ;;  %v661_v22 = vmul.f32 %v9116_v39, %v9017_v26 }
 0x1ef   : > { %v6942_v24 = vpop.eup %6941  ;;  %v9121_v2 = vadd.f32 %v2490_v12, %v2474_v1  ;;  %v2429_v6 = vadd.f32 1.0, %v6940_v15  ;;  %v9125_v42 = vpop.f32.mrb[16].mxu1  ;;  %6959 = vrcp.f32 %v2330_v27  ;;  %761 = vperm.xlu1 %6715, %v8197_v23   ;;  %v11697_v1 = vld [vmem:[#allocation41_spill] sm:$0xff] }
 0x1f0   : > { %11695 = vst [vmem:[#allocation60_spill] sm:$0xff] %v9125_v42  ;;  %v6944_v0 = vpop.eup %6943  ;;  %v2491_v38 = vmul.f32 %v6942_v24, %v6938_v21  ;;  %v9128_v55 = vpop.f32.mrb[17].mxu0  ;;  %v660_v21 = vmul.f32 %v9116_v39, %v8665_v19  ;;  %v2124_v24 = vadd.f32 %v9071_v53, %v714_v20  ;;  %v8199_v53 = vld [vmem:[%s8492_s11 + $0x10] sm:$0xff] }
 0x1f1   : > { %11694 = vst [vmem:[#allocation59_spill] sm:$0xff] %v9121_v2  ;;  %v9130_v12 = vpop.f32.mrb[17].mxu1  ;;  %6961 = vtanh.f32 %v9121_v2  ;;  %v2475_v15 = vmul.f32 %v6944_v0, %v11697_v1  ;;  %v6946_v27 = vpop.eup %6945  ;;  %v654_v2 = vmul.f32 %v9079_v10, %v8689_v57 }
 0x1f2   : > { %11696 = vst [vmem:[#allocation61_spill] sm:$0xff] %v9130_v12  ;;  %6963 = vrcp.f32 %v2429_v6  ;;  %v6948_v59 = vpop.eup %6947  ;;  %v9140_v23 = vpop.f32.mrb[18].mxu0  ;;  %v5953_v6 = vmul.f32 -1.442695, %v2130_v50 }
 0x1f3   : > { %6965 = vpow2.f32 %v5952_v7  ;;  %v9142_v31 = vpop.f32.mrb[18].mxu1  ;;  %v9144_v0 = vadd.f32 %v2491_v38, %v2475_v15  ;;  %v6950_v9 = vpop.eup %6949  ;;  %v2492_v1 = vmul.f32 %v6948_v59, %v6946_v27  ;;  %769 = vperm.xlu1 %6715, %v8199_v53   ;;  %v8200_v7 = vld [vmem:[%s8492_s11 + $0x20] sm:$0xff]  ;;  %v703_v38 = vadd.f32 %v639_v33, %v8677_v54  ;;  %v11701_v15 = vld [vmem:[#allocation42_spill] sm:$0xff] }
 0x1f4   : > { %11698 = vst [vmem:[#allocation41_spill] sm:$0xff] %v9142_v31  ;;  %v9150_v35 = vpop.f32.mrb[19].mxu0  ;;  %v9152_v11 = vpop.f32.mrb[19].mxu1  ;;  %777 = vperm.xlu0 %6716, %v8200_v7   ;;  %v2476_v27 = vmul.f32 %v6950_v9, %v11701_v15  ;;  %v724_v59 = vadd.f32 %v660_v21, %v8672_v34  ;;  %6967 = vpow2.f32 %v5984_v13  ;;  %v718_v21 = vadd.f32 %v654_v2, %v8694_v47 }
 0x1f5   : > { %11699 = vst [vmem:[#allocation62_spill] sm:$0xff] %v9144_v0  ;;  %11700 = vst [vmem:[#allocation63_spill] sm:$0xff] %v9152_v11  ;;  %v6952_v20 = vpop.eup %6951  ;;  %v9159_v50 = vpop.permute.xlu1 %601  ;;  %v5985_v0 = vmul.f32 -1.442695, %v2131_v5  ;;  %6969 = vtanh.f32 %v2124_v24  ;;  %v725_v15 = vadd.f32 %v661_v22, %v9023_v46  ;;  %v8202_v24 = vld [vmem:[%s8492_s11 + $0x30] sm:$0xff]  ;;  %v658_v22 = vmul.f32 %v9097_v29, %v8689_v57 }
 0x1f6   : > { %v6954_v12 = vpop.eup %6953  ;;  %v2134_v53 = vadd.f32 %v9103_v45, %v724_v59  ;;  %v9162_v7 = vpop.f32.mrb[20].mxu0  ;;  %v9166_v33 = vadd.f32 %v2492_v1, %v2476_v27  ;;  %6971 = vpow2.f32 %v5953_v6  ;;  %v2113_v59 = vadd.f32 %v9045_v14, %v703_v38 }
 0x1f7   : > { %v6956_v31 = vpop.eup %6955  ;;  %v2222_v11 = vadd.f32 1.0, %v6954_v12  ;;  %v9164_v42 = vpop.f32.mrb[20].mxu1  ;;  %v8201_v12 = vld [vmem:[%s8492_s11 + $0x18] sm:$0xff]  ;;  %v2128_v6 = vadd.f32 %v9083_v62, %v718_v21 }
 0x1f8   : > { %11702 = vst [vmem:[#allocation42_spill] sm:$0xff] %v9164_v42  ;;  %11703 = vst [vmem:[#allocation64_spill] sm:$0xff] %v9166_v33  ;;  %v2493_v9 = vmul.f32 %v6956_v31, %v6952_v20  ;;  %v9170_v13 = vpop.f32.mrb[21].mxu0  ;;  %v9172_v5 = vpop.f32.mrb[21].mxu1  ;;  %773 = vperm.xlu1 %6715, %v8201_v12   ;;  %785 = vperm.xlu0 %6716, %v8202_v24   ;;  %v664_v31 = vmul.f32 %v9159_v50, %v8665_v19  ;;  %v5954_v14 = vmul.f32 -1.442695, %v2134_v53 }
 0x1f9   : > { %11704 = vst [vmem:[#allocation65_spill] sm:$0xff] %v9172_v5  ;;  %v6958_v45 = vpop.eup %6957  ;;  %6973 = vrcp.f32 %v2222_v11  ;;  %v2135_v20 = vadd.f32 %v9109_v16, %v725_v15  ;;  %v643_v12 = vmul.f32 %v9036_v8, %v8670_v30  ;;  %v665_v24 = vmul.f32 %v9159_v50, %v9017_v26  ;;  %v8203_v5 = vld [vmem:[%s8492_s11 + $0x28] sm:$0xff]  ;;  %v8204_v16 = vld [vmem:[%s8492_s11 + $0x40] sm:$0xff]  ;;  %v9201_v29 = vpop.permute.xlu0 %605 }
 0x1fa   : > { %v6960_v1 = vpop.eup %6959  ;;  %v2430_v2 = vadd.f32 1.0, %v6958_v45  ;;  %6975 = vpow2.f32 %v5985_v0  ;;  %v9185_v11 = vpop.f32.mrb[22].mxu0  ;;  %v5964_v8 = vmul.f32 -1.442695, %v2113_v59  ;;  %v11706_v0 = vld [vmem:[#allocation43_spill] sm:$0xff]  ;;  %v647_v33 = vmul.f32 %v9047_v4, %v8670_v30 }
 0x1fb   : > { %v6962_v27 = vpop.eup %6961  ;;  %v9189_v62 = vpop.f32.mrb[22].mxu1  ;;  %v707_v59 = vadd.f32 %v643_v12, %v8677_v54  ;;  %v729_v12 = vadd.f32 %v665_v24, %v9023_v46 }
 0x1fc   : > { %v6964_v38 = vpop.eup %6963  ;;  %6977 = vrcp.f32 %v2430_v2  ;;  %11705 = vst [vmem:[#allocation66_spill] sm:$0xff] %v9189_v62  ;;  %v9191_v21 = vpop.f32.mrb[23].mxu0  ;;  %v2538_v45 = vmul.f32 %v6962_v27, %v6960_v1  ;;  %781 = vperm.xlu1 %6715, %v8203_v5   ;;  %793 = vperm.xlu0 %6716, %v8204_v16   ;;  %v728_v2 = vadd.f32 %v664_v31, %v8672_v34  ;;  %v5986_v5 = vmul.f32 -1.442695, %v2135_v20  ;;  %v8206_v16 = vld [vmem:[%s8492_s11 + $0x50] sm:$0xff] }
 0x1fd   : > { %v6966_v15 = vpop.eup %6965  ;;  %v2477_v53 = vmul.f32 %v6964_v38, %v11706_v0  ;;  %v9199_v42 = vpop.f32.mrb[23].mxu1  ;;  %6979 = vtanh.f32 %v2128_v6  ;;  %v722_v1 = vadd.f32 %v658_v22, %v8694_v47  ;;  %v2139_v0 = vadd.f32 %v9128_v55, %v729_v12  ;;  %v8207_v12 = vld [vmem:[%s8492_s11 + $0x48] sm:$0xff] }
 0x1fe   : > { %v2223_v62 = vadd.f32 1.0, %v6966_v15  ;;  %2619 = vmatmul.mubr.f32.vlgmr.msra.gmra.mrb[32].mxu0 %v2538_v45  ;;  %2780 = vmatmul.mubr.f32.vlgmr.msra.gmra.mrb[32].mxu1 %v2538_v45  ;;  %6981 = vpow2.f32 %v5954_v14  ;;  %v2138_v4 = vadd.f32 %v9123_v63, %v728_v2  ;;  %v9206_v27 = vpop.f32.mrb[24].mxu0  ;;  %v9208_v31 = vpop.f32.mrb[24].mxu1  ;;  %v668_v14 = vmul.f32 %v9201_v29, %v8665_v19  ;;  %v8205_v45 = vld [vmem:[%s8492_s11 + $0x38] sm:$0xff] }
 0x1ff   : > { %2624 = vmatprep.mubr.f32.mxu0 %v11662_v18  ;;  %2785 = vmatprep.mubr.f32.mxu1 %v11662_v18  ;;  %v9212_v6 = vadd.f32 %v2493_v9, %v2477_v53  ;;  %v6968_v22 = vpop.eup %6967  ;;  %v2132_v20 = vadd.f32 %v9093_v17, %v722_v1  ;;  %v9218_v63 = vpop.f32.mrb[25].mxu0  ;;  %v2117_v9 = vadd.f32 %v9058_v58, %v707_v59 }
 0x200   : > { %6983 = vrcp.f32 %v2223_v62  ;;  %v9220_v38 = vpop.f32.mrb[25].mxu1  ;;  %789 = vperm.xlu1 %6715, %v8205_v45   ;;  %801 = vperm.xlu0 %6716, %v8206_v16   ;;  %v6970_v15 = vpop.eup %6969  ;;  %v2431_v62 = vadd.f32 1.0, %v6968_v22  ;;  %v662_v17 = vmul.f32 %v9116_v39, %v8689_v57  ;;  %v669_v53 = vmul.f32 %v9201_v29, %v9017_v26  ;;  %v8208_v45 = vld [vmem:[%s8492_s11 + $0x60] sm:$0xff] }
 0x201   : > { %6985 = vpow2.f32 %v5964_v8  ;;  %6413 = vmatpush1.bf16.msra.mxu0 %v8562_v25  ;;  %6445 = vmatpush1.bf16.msra.mxu1 %v8565_v28  ;;  %v6972_v24 = vpop.eup %6971  ;;  %v5955_v2 = vmul.f32 -1.442695, %v2138_v4 }
 0x202   : > { %6987 = vpow2.f32 %v5986_v5  ;;  %6415 = vmatprep.subr.bf16.mxu0 %v8570_v32  ;;  %6447 = vmatprep.subr.bf16.mxu1 %v8572_v36  ;;  %v2224_v8 = vadd.f32 1.0, %v6972_v24  ;;  %v9234_v1 = vpop.f32.mrb[26].mxu0  ;;  %v732_v5 = vadd.f32 %v668_v14, %v8672_v34  ;;  %v9237_v22 = vpop.f32.mrb[26].mxu1  ;;  %v5965_v36 = vmul.f32 -1.442695, %v2117_v9 }
 0x203   : > { %v6974_v58 = vpop.eup %6973  ;;  %6989 = vrcp.f32 %v2431_v62  ;;  %v9239_v55 = vpop.f32.mrb[27].mxu0  ;;  %v711_v62 = vadd.f32 %v647_v33, %v8677_v54  ;;  %v726_v4 = vadd.f32 %v662_v17, %v8694_v47  ;;  %v733_v9 = vadd.f32 %v669_v53, %v9023_v46 }
 0x204   : > { %v2494_v59 = vmul.f32 %v6974_v58, %v6970_v15  ;;  %6991 = vtanh.f32 %v2132_v20  ;;  %797 = vperm.xlu1 %6715, %v8207_v12   ;;  %809 = vperm.xlu0 %6716, %v8208_v45   ;;  %v6976_v16 = vpop.eup %6975  ;;  %v9245_v24 = vpop.f32.mrb[27].mxu1  ;;  %v5987_v58 = vmul.f32 -1.442695, %v2139_v0  ;;  %v2142_v12 = vadd.f32 %v9140_v23, %v732_v5 }
 0x205   : > { %6993 = vrcp.f32 %v2224_v8  ;;  %6417 = vmatpush1.bf16.msra.mxu0 %v8574_v37  ;;  %6449 = vmatpush1.bf16.msra.mxu1 %v8577_v40  ;;  %v9249_v14 = vpop.permute.xlu1 %609  ;;  %v2432_v15 = vadd.f32 1.0, %v6976_v16  ;;  %v2136_v17 = vadd.f32 %v9105_v3, %v726_v4  ;;  %v666_v53 = vmul.f32 %v9159_v50, %v8689_v57  ;;  %v8210_v3 = vld [vmem:[%s8492_s11 + $0x70] sm:$0xff]  ;;  %v11709_v37 = vld [vmem:[#allocation24_spill] sm:$0xff] }
 0x206   : > { %v6978_v20 = vpop.eup %6977  ;;  %6419 = vmatprep.subr.bf16.mxu0 %v8582_v44  ;;  %6451 = vmatprep.subr.bf16.mxu1 %v8584_v48  ;;  %6995 = vpow2.f32 %v5955_v2  ;;  %v672_v8 = vmul.f32 %v9249_v14, %v8665_v19  ;;  %v9259_v45 = vpop.f32.mrb[28].mxu0  ;;  %v2121_v4 = vadd.f32 %v9063_v41, %v711_v62  ;;  %v651_v41 = vmul.f32 %v9065_v43, %v8670_v30  ;;  %v8211_v43 = vld [vmem:[%s8492_s11 + $0x68] sm:$0xff] }
 0x207   : > { %v2478_v33 = vmul.f32 %v6978_v20, %v8852_v51  ;;  %v9261_v0 = vpop.f32.mrb[28].mxu1  ;;  %v6980_v23 = vpop.eup %6979  ;;  %6997 = vrcp.f32 %v2432_v15  ;;  %v8209_v51 = vld [vmem:[%s8492_s11 + $0x58] sm:$0xff]  ;;  %v2143_v20 = vadd.f32 %v9150_v35, %v733_v9  ;;  %v673_v15 = vmul.f32 %v9249_v14, %v9017_v26 }
 0x208   : > { %v9265_v5 = vpop.f32.mrb[29].mxu0  ;;  %v9267_v16 = vpop.f32.mrb[29].mxu1  ;;  %805 = vperm.xlu1 %6715, %v8209_v51   ;;  %817 = vperm.xlu0 %6716, %v8210_v3   ;;  %6999 = vpow2.f32 %v5965_v36  ;;  %v5956_v51 = vmul.f32 -1.442695, %v2142_v12  ;;  %v736_v62 = vadd.f32 %v672_v8, %v8672_v34  ;;  %v730_v12 = vadd.f32 %v666_v53, %v8694_v47 }
 0x209   : > { %v6982_v2 = vpop.eup %6981  ;;  %6421 = vmatpush1.bf16.msra.mxu0 %v8586_v49  ;;  %6453 = vmatpush1.bf16.msra.mxu1 %v8589_v52  ;;  %v9277_v44 = vpop.permute.xlu0 %613  ;;  %7001 = vpow2.f32 %v5987_v58  ;;  %v9279_v3 = vadd.f32 %v2494_v59, %v2478_v33  ;;  %v655_v59 = vmul.f32 %v9079_v10, %v8670_v30  ;;  %v5988_v8 = vmul.f32 -1.442695, %v2143_v20  ;;  %v11707_v10 = vld [vmem:[#allocation23_spill] sm:$0xff]  ;;  %v11708_v52 = vld [vmem:[#allocation44_spill] sm:$0xff]  ;;  %v11710_v20 = vld [vmem:[#allocation25_spill] sm:$0xff] }
 0x20a   : > { %v6984_v48 = vpop.eup %6983  ;;  %v2225_v40 = vadd.f32 1.0, %v6982_v2  ;;  %6423 = vmatprep.subr.bf16.mxu0 %v8594_v56  ;;  %6455 = vmatprep.subr.bf16.mxu1 %v8596_v60  ;;  %7003 = vtanh.f32 %v2136_v17  ;;  %v9286_v9 = vpop.f32.mrb[30].mxu0  ;;  %v676_v56 = vmul.f32 %v9277_v44, %v8665_v19  ;;  %v5966_v53 = vmul.f32 -1.442695, %v2121_v4 }
 0x20b   : > { %v6986_v36 = vpop.eup %6985  ;;  %v2495_v35 = vmul.f32 %v6984_v48, %v6980_v23  ;;  %v9288_v2 = vpop.f32.mrb[30].mxu1  ;;  %v2146_v23 = vadd.f32 %v9162_v7, %v736_v62  ;;  %v715_v62 = vadd.f32 %v651_v41, %v8677_v54 }
 0x20c   : > { %v6988_v58 = vpop.eup %6987  ;;  %7005 = vrcp.f32 %v2225_v40  ;;  %v9293_v33 = vpop.f32.mrb[31].mxu0  ;;  %813 = vperm.xlu1 %6715, %v8211_v43   ;;  %v737_v43 = vadd.f32 %v673_v15, %v9023_v46  ;;  %v740_v41 = vadd.f32 %v676_v56, %v8672_v34  ;;  %v2331_v28 = vadd.f32 1.0, %v6986_v36 }
 0x20d   : > { %v9295_v60 = vpop.f32.mrb[31].mxu1  ;;  %v6990_v48 = vpop.eup %6989  ;;  %v2433_v17 = vadd.f32 1.0, %v6988_v58  ;;  %6425 = vmatpush1.bf16.msra.mxu0 %v8598_v61  ;;  %6457 = vmatpush1.bf16.msra.mxu1 %v11707_v10  ;;  %7007 = vpow2.f32 %v5956_v51  ;;  %v11711_v58 = vld [vmem:[#allocation60_spill] sm:$0xff]  ;;  %v670_v10 = vmul.f32 %v9201_v29, %v8689_v57  ;;  %v8212_v51 = vld [vmem:[%s8492_s11 + $0x78] sm:$0xff]  ;;  %v719_v56 = vadd.f32 %v655_v59, %v8677_v54  ;;  %v11718_v59 = vld [vmem:[#allocation30_spill] sm:$0xff] }
 0x20e   : > { %v6992_v40 = vpop.eup %6991  ;;  %v2479_v49 = vmul.f32 %v6990_v48, %v11708_v52  ;;  %6427 = vmatprep.subr.bf16.mxu0 %v11709_v37  ;;  %6459 = vmatprep.subr.bf16.mxu1 %v11710_v20  ;;  %v2140_v61 = vadd.f32 %v11711_v58, %v730_v12  ;;  %v2147_v4 = vadd.f32 %v9170_v13, %v737_v43  ;;  %v11712_v48 = vld [vmem:[#allocation40_spill] sm:$0xff]  ;;  %v5957_v20 = vmul.f32 -1.442695, %v2146_v23  ;;  %v11714_v12 = vld [vmem:[#allocation27_spill] sm:$0xff]  ;;  %v11717_v23 = vld [vmem:[#allocation45_spill] sm:$0xff] }
 0x20f   : > { %v6994_v7 = vpop.eup %6993  ;;  %7009 = vrcp.f32 %v2433_v17  ;;  %v2125_v37 = vadd.f32 %v11712_v48, %v715_v62  ;;  %v11713_v17 = vld [vmem:[#allocation26_spill] sm:$0xff]  ;;  %v11715_v13 = vld [vmem:[#allocation28_spill] sm:$0xff]  ;;  %v734_v62 = vadd.f32 %v670_v10, %v8694_v47  ;;  %v11720_v10 = vld [vmem:[#allocation57_spill] sm:$0xff] }
 0x210   : > { %v2496_v32 = vmul.f32 %v6994_v7, %v6992_v40  ;;  %v9312_v52 = vadd.f32 %v2495_v35, %v2479_v49  ;;  %821 = vperm.xlu1 %6715, %v8212_v51   ;;  %v6996_v15 = vpop.eup %6995  ;;  %7011 = vpow2.f32 %v5988_v8  ;;  %v677_v49 = vmul.f32 %v9277_v44, %v9017_v26  ;;  %v11716_v35 = vld [vmem:[#allocation29_spill] sm:$0xff]  ;;  %v9323_v8 = vpop.permute.xlu1 %617 }
 0x211   : > { %6429 = vmatpush1.bf16.msra.mxu0 %v11713_v17  ;;  %6461 = vmatpush1.bf16.msra.mxu1 %v11714_v12  ;;  %v6998_v58 = vpop.eup %6997  ;;  %7013 = vpow2.f32 %v5966_v53  ;;  %v2226_v40 = vadd.f32 1.0, %v6996_v15  ;;  %v5989_v53 = vmul.f32 -1.442695, %v2147_v4  ;;  %v2150_v51 = vadd.f32 %v9185_v11, %v740_v41 }
 0x212   : > { %6431 = vmatprep.subr.bf16.mxu0 %v11715_v13  ;;  %6463 = vmatprep.subr.bf16.mxu1 %v11716_v35  ;;  %v7000_v43 = vpop.eup %6999  ;;  %v2480_v7 = vmul.f32 %v6998_v58, %v11717_v23  ;;  %7015 = vtanh.f32 %v2140_v61  ;;  %v680_v15 = vmul.f32 %v9323_v8, %v8665_v19  ;;  %v5967_v35 = vmul.f32 -1.442695, %v2125_v37  ;;  %v11719_v58 = vld [vmem:[#allocation31_spill] sm:$0xff]  ;;  %v11722_v23 = vld [vmem:[#allocation32_spill] sm:$0xff]  ;;  %v11723_v37 = vld [vmem:[#allocation33_spill] sm:$0xff] }
 0x213   : > { %v7002_v36 = vpop.eup %7001  ;;  %7017 = vrcp.f32 %v2226_v40  ;;  %v659_v4 = vmul.f32 %v11720_v10, %v8670_v30  ;;  %v11721_v40 = vld [vmem:[#allocation41_spill] sm:$0xff]  ;;  %v741_v41 = vadd.f32 %v677_v49, %v9023_v46  ;;  %v2332_v49 = vadd.f32 1.0, %v7000_v43 }
 0x214   : > { %v7004_v48 = vpop.eup %7003  ;;  %v2434_v13 = vadd.f32 1.0, %v7002_v36  ;;  %7019 = vpow2.f32 %v5957_v20  ;;  %v9331_v12 = vadd.f32 %v2496_v32, %v2480_v7  ;;  %v2144_v11 = vadd.f32 %v11721_v40, %v734_v62  ;;  %v11724_v20 = vld [vmem:[#allocation55_spill] sm:$0xff]  ;;  %v11729_v43 = vld [vmem:[#allocation37_spill] sm:$0xff] }
 0x215   : > { %6433 = vmatpush1.bf16.msra.mxu0 %v11718_v59  ;;  %6465 = vmatpush1.bf16.msra.mxu1 %v11719_v58  ;;  %7021 = vrcp.f32 %v2331_v28  ;;  %v2129_v32 = vadd.f32 %v11724_v20, %v719_v56  ;;  %v674_v36 = vmul.f32 %v9249_v14, %v8689_v57  ;;  %v5958_v28 = vmul.f32 -1.442695, %v2150_v51  ;;  %v11725_v56 = vld [vmem:[#allocation34_spill] sm:$0xff]  ;;  %v11728_v51 = vld [vmem:[#allocation36_spill] sm:$0xff] }
 0x216   : > { %v7006_v61 = vpop.eup %7005  ;;  %6435 = vmatprep.subr.bf16.mxu0 %v11722_v23  ;;  %6467 = vmatprep.subr.bf16.mxu1 %v11723_v37  ;;  %7023 = vrcp.f32 %v2434_v13  ;;  %v2151_v10 = vadd.f32 %v9191_v21, %v741_v41  ;;  %v744_v62 = vadd.f32 %v680_v15, %v8672_v34  ;;  %v681_v37 = vmul.f32 %v9323_v8, %v9017_v26  ;;  %v11726_v13 = vld [vmem:[#allocation35_spill] sm:$0xff] }
 0x217   : > { %v2497_v7 = vmul.f32 %v7006_v61, %v7004_v48  ;;  %v7008_v58 = vpop.eup %7007  ;;  %7025 = vpow2.f32 %v5989_v53  ;;  %v723_v48 = vadd.f32 %v659_v4, %v8677_v54  ;;  %v11727_v61 = vld [vmem:[#allocation46_spill] sm:$0xff]  ;;  %v678_v21 = vmul.f32 %v9277_v44, %v8689_v57 }
 0x218   : > { %7027 = vpow2.f32 %v5967_v35  ;;  %v2227_v23 = vadd.f32 1.0, %v7008_v58  ;;  %v5968_v15 = vmul.f32 -1.442695, %v2129_v32  ;;  %v738_v58 = vadd.f32 %v674_v36, %v8694_v47  ;;  %v11731_v32 = vld [vmem:[#allocation38_spill] sm:$0xff] }
 0x219   : > { %v7010_v40 = vpop.eup %7009  ;;  %6437 = vmatpush1.bf16.msra.mxu0 %v11725_v56  ;;  %6469 = vmatpush1.bf16.msra.mxu1 %v11726_v13  ;;  %7029 = vtanh.f32 %v2144_v11  ;;  %v2154_v41 = vadd.f32 %v9206_v27, %v744_v62  ;;  %v9358_v13 = vpop.permute.xlu0 %621  ;;  %v5990_v11 = vmul.f32 -1.442695, %v2151_v10  ;;  %v11732_v27 = vld [vmem:[#allocation39_spill] sm:$0xff]  ;;  %v11733_v62 = vld [vmem:[#allocation56_spill] sm:$0xff] }
 0x21a   : > { %v2481_v53 = vmul.f32 %v7010_v40, %v11727_v61  ;;  %6439 = vmatprep.subr.bf16.mxu0 %v11728_v51  ;;  %6471 = vmatprep.subr.bf16.mxu1 %v11729_v43  ;;  %v7012_v35 = vpop.eup %7011  ;;  %7031 = vrcp.f32 %v2227_v23  ;;  %v11730_v51 = vld [vmem:[#allocation42_spill] sm:$0xff]  ;;  %v745_v43 = vadd.f32 %v681_v37, %v9023_v46  ;;  %v684_v23 = vmul.f32 %v9358_v13, %v8665_v19 }
 0x21b   : > { %v7014_v20 = vpop.eup %7013  ;;  %v2435_v4 = vadd.f32 1.0, %v7012_v35  ;;  %7033 = vpow2.f32 %v5958_v28  ;;  %v2148_v56 = vadd.f32 %v11730_v51, %v738_v58  ;;  %v2133_v35 = vadd.f32 %v11733_v62, %v723_v48  ;;  %v11734_v28 = vld [vmem:[#allocation8_spill] sm:$0xff] }
 0x21c   : > { %v9360_v40 = vadd.f32 %v2497_v7, %v2481_v53  ;;  %v7016_v61 = vpop.eup %7015  ;;  %7035 = vrcp.f32 %v2332_v49  ;;  %v11735_v7 = vld [vmem:[#allocation9_spill] sm:$0xff]  ;;  %v5959_v53 = vmul.f32 -1.442695, %v2154_v41  ;;  %v2155_v37 = vadd.f32 %v9218_v63, %v745_v43 }
 0x21d   : > { %6441 = vmatpush1.bf16.msra.mxu0 %v11731_v32  ;;  %6473 = vmatpush1.bf16.msra.mxu1 %v11732_v27  ;;  %v7018_v36 = vpop.eup %7017  ;;  %7037 = vrcp.f32 %v2435_v4  ;;  %v2333_v58 = vadd.f32 1.0, %v7014_v20  ;;  %v685_v27 = vmul.f32 %v9358_v13, %v9017_v26  ;;  %v742_v4 = vadd.f32 %v678_v21, %v8694_v47  ;;  %v11737_v21 = vld [vmem:[#allocation66_spill] sm:$0xff] }
 0x21e   : > { %6475 = vmatprep.subr.bf16.mxu0 %v11734_v28  ;;  %6507 = vmatprep.subr.bf16.mxu1 %v11735_v7  ;;  %v7020_v10 = vpop.eup %7019  ;;  %7039 = vpow2.f32 %v5968_v15  ;;  %v2498_v49 = vmul.f32 %v7018_v36, %v7016_v61  ;;  %v748_v62 = vadd.f32 %v684_v23, %v8672_v34  ;;  %v9378_v15 = vpop.permute.xlu1 %625  ;;  %v5969_v41 = vmul.f32 -1.442695, %v2133_v35  ;;  %v11736_v61 = vld [vmem:[#allocation47_spill] sm:$0xff] }
 0x21f   : > { %v9372_v51 = vpop.eup %7021  ;;  %v2228_v32 = vadd.f32 1.0, %v7020_v10  ;;  %7041 = vpow2.f32 %v5990_v11  ;;  %v682_v43 = vmul.f32 %v9323_v8, %v8689_v57  ;;  %v5991_v36 = vmul.f32 -1.442695, %v2155_v37 }
 0x220   : > { %v7024_v48 = vpop.eup %7023  ;;  %7043 = vtanh.f32 %v2148_v56  ;;  %v2158_v56 = vadd.f32 %v9234_v1, %v748_v62  ;;  %v2152_v23 = vadd.f32 %v11737_v21, %v742_v4  ;;  %v749_v28 = vadd.f32 %v685_v27, %v9023_v46 }
 0x221   : > { %v7026_v7 = vpop.eup %7025  ;;  %v2482_v63 = vmul.f32 %v7024_v48, %v11736_v61  ;;  %7045 = vrcp.f32 %v2228_v32  ;;  %v688_v32 = vmul.f32 %v9378_v15, %v8665_v19  ;;  %v746_v62 = vadd.f32 %v682_v43, %v8694_v47 }
 0x222   : > { %v7028_v20 = vpop.eup %7027  ;;  %v2436_v11 = vadd.f32 1.0, %v7026_v7  ;;  %7047 = vpow2.f32 %v5959_v53  ;;  %v663_v7 = vmul.f32 %v9116_v39, %v8670_v30  ;;  %v2159_v1 = vadd.f32 %v9239_v55, %v749_v28  ;;  %v11738_v39 = vld [vmem:[#allocation48_spill] sm:$0xff] }
 0x223   : > { %v7030_v10 = vpop.eup %7029  ;;  %7049 = vrcp.f32 %v2333_v58  ;;  %v9386_v59 = vadd.f32 %v2498_v49, %v2482_v63  ;;  %v5960_v27 = vmul.f32 -1.442695, %v2158_v56  ;;  %v2334_v4 = vadd.f32 1.0, %v7028_v20  ;;  %v9398_v63 = vpop.permute.xlu0 %629  ;;  %v11739_v20 = vld [vmem:[#allocation62_spill] sm:$0xff] }
 0x224   : > { %v7032_v35 = vpop.eup %7031  ;;  %7051 = vrcp.f32 %v2436_v11  ;;  %v689_v61 = vmul.f32 %v9378_v15, %v9017_v26  ;;  %v752_v55 = vadd.f32 %v688_v32, %v8672_v34  ;;  %v2156_v56 = vadd.f32 %v9208_v31, %v746_v62 }
 0x225   : > { %v7034_v48 = vpop.eup %7033  ;;  %7053 = vpow2.f32 %v5969_v41  ;;  %v2499_v53 = vmul.f32 %v7032_v35, %v7030_v10  ;;  %v5992_v10 = vmul.f32 -1.442695, %v2159_v1  ;;  %v686_v32 = vmul.f32 %v9358_v13, %v8689_v57  ;;  %v11740_v1 = vld [vmem:[#allocation58_spill] sm:$0xff] }
 0x226   : > { %v9393_v37 = vpop.eup %7035  ;;  %v2229_v58 = vadd.f32 1.0, %v7034_v48  ;;  %7055 = vpow2.f32 %v5991_v36  ;;  %v727_v36 = vadd.f32 %v663_v7, %v8677_v54  ;;  %v692_v31 = vmul.f32 %v9398_v63, %v8665_v19 }
 0x227   : > { %v7038_v49 = vpop.eup %7037  ;;  %7057 = vtanh.f32 %v2152_v23  ;;  %v2162_v23 = vadd.f32 %v9259_v45, %v752_v55 }
 0x228   : > { %v7040_v41 = vpop.eup %7039  ;;  %v2483_v11 = vmul.f32 %v7038_v49, %v11738_v39  ;;  %7059 = vrcp.f32 %v2229_v58  ;;  %v753_v58 = vadd.f32 %v689_v61, %v9023_v46  ;;  %v2137_v62 = vadd.f32 %v11740_v1, %v727_v36 }
 0x229   : > { %v7042_v28 = vpop.eup %7041  ;;  %7061 = vtanh.f32 %v11739_v20  ;;  %v2335_v49 = vadd.f32 1.0, %v7040_v41  ;;  %v750_v41 = vadd.f32 %v686_v32, %v8694_v47  ;;  %v693_v36 = vmul.f32 %v9398_v63, %v9017_v26 }
 0x22a   : > { %v7044_v43 = vpop.eup %7043  ;;  %v2437_v21 = vadd.f32 1.0, %v7042_v28  ;;  %7063 = vpow2.f32 %v5960_v27  ;;  %v9406_v35 = vadd.f32 %v2499_v53, %v2483_v11  ;;  %v5961_v11 = vmul.f32 -1.442695, %v2162_v23  ;;  %v11741_v28 = vld [vmem:[#allocation49_spill] sm:$0xff] }
 0x22b   : > { %v7046_v48 = vpop.eup %7045  ;;  %7065 = vrcp.f32 %v2334_v4  ;;  %v667_v4 = vmul.f32 %v9159_v50, %v8670_v30  ;;  %v2163_v61 = vadd.f32 %v9265_v5, %v753_v58  ;;  %v756_v50 = vadd.f32 %v692_v31, %v8672_v34 }
 0x22c   : > { %v7048_v7 = vpop.eup %7047  ;;  %v2500_v39 = vmul.f32 %v7046_v48, %v7044_v43  ;;  %7067 = vrcp.f32 %v2437_v21  ;;  %v671_v21 = vmul.f32 %v9201_v29, %v8670_v30  ;;  %v2160_v5 = vadd.f32 %v9237_v22, %v750_v41  ;;  %v11742_v48 = vld [vmem:[#allocation64_spill] sm:$0xff] }
 0x22d   : > { %v9414_v27 = vpop.eup %7049  ;;  %v2230_v45 = vadd.f32 1.0, %v7048_v7  ;;  %7069 = vtanh.f32 %v2156_v56  ;;  %v5970_v56 = vmul.f32 -1.442695, %v2137_v62  ;;  %v731_v7 = vadd.f32 %v667_v4, %v8677_v54 }
 0x22e   : > { %v7052_v53 = vpop.eup %7051  ;;  %7071 = vpow2.f32 %v5992_v10  ;;  %v5993_v1 = vmul.f32 -1.442695, %v2163_v61  ;;  %v690_v29 = vmul.f32 %v9378_v15, %v8689_v57  ;;  %v757_v31 = vadd.f32 %v693_v36, %v9023_v46 }
 0x22f   : > { %v7054_v55 = vpop.eup %7053  ;;  %v2484_v20 = vmul.f32 %v7052_v53, %v11741_v28  ;;  %7073 = vrcp.f32 %v2230_v45  ;;  %v675_v41 = vmul.f32 %v9249_v14, %v8670_v30  ;;  %v11745_v14 = vld [vmem:[#allocation63_spill] sm:$0xff] }
 0x230   : > { %v7056_v43 = vpop.eup %7055  ;;  %7075 = vrcp.f32 %v2335_v49  ;;  %v2166_v49 = vadd.f32 %v9286_v9, %v756_v50  ;;  %v2336_v53 = vadd.f32 1.0, %v7054_v55  ;;  %v2167_v55 = vadd.f32 %v9293_v33, %v757_v31 }
 0x231   : > { %v7058_v10 = vpop.eup %7057  ;;  %v2438_v23 = vadd.f32 1.0, %v7056_v43  ;;  %7077 = vtanh.f32 %v11742_v48  ;;  %v9428_v58 = vadd.f32 %v2500_v39, %v2484_v20  ;;  %v11743_v20 = vld [vmem:[#allocation61_spill] sm:$0xff] }
 0x232   : > { %v7060_v32 = vpop.eup %7059  ;;  %7079 = vpow2.f32 %v5961_v11  ;;  %v2141_v39 = vadd.f32 %v11743_v20, %v731_v7  ;;  %v735_v11 = vadd.f32 %v671_v21, %v8677_v54  ;;  %v5962_v36 = vmul.f32 -1.442695, %v2166_v49 }
 0x233   : > { %v7062_v62 = vpop.eup %7061  ;;  %v2501_v45 = vmul.f32 %v7060_v32, %v7058_v10  ;;  %7081 = vrcp.f32 %v2438_v23  ;;  %v739_v49 = vadd.f32 %v675_v41, %v8677_v54  ;;  %v11748_v41 = vld [vmem:[#allocation51_spill] sm:$0xff] }
 0x234   : > { %v7064_v22 = vpop.eup %7063  ;;  %7083 = vpow2.f32 %v5970_v56  ;;  %v2539_v28 = vmul.f32 %v7062_v62, %v9372_v51  ;;  %v11744_v56 = vld [vmem:[#allocation50_spill] sm:$0xff]  ;;  %v754_v51 = vadd.f32 %v690_v29, %v8694_v47  ;;  %v5971_v10 = vmul.f32 -1.442695, %v2141_v39 }
 0x235   : > { %v9437_v4 = vpop.eup %7065  ;;  %v2231_v9 = vadd.f32 1.0, %v7064_v22  ;;  %7085 = vtanh.f32 %v2160_v5  ;;  %v2145_v23 = vadd.f32 %v11745_v14, %v735_v11  ;;  %v5994_v29 = vmul.f32 -1.442695, %v2167_v55 }
 0x236   : > { %v7068_v61 = vpop.eup %7067  ;;  %2625 = vmatmul.mubr.f32.gmra.mrb[34].mxu0 %v2539_v28  ;;  %2786 = vmatmul.mubr.f32.gmra.mrb[34].mxu1 %v2539_v28  ;;  %7087 = vpow2.f32 %v5993_v1  ;;  %v2164_v7 = vadd.f32 %v9261_v0, %v754_v51  ;;  %v679_v22 = vmul.f32 %v9277_v44, %v8670_v30 }
 0x237   : > { %v7070_v43 = vpop.eup %7069  ;;  %v2485_v50 = vmul.f32 %v7068_v61, %v11744_v56  ;;  %7089 = vrcp.f32 %v2231_v9  ;;  %2630 = vmatprep.mubr.f32.mxu0 %v11662_v18  ;;  %2791 = vmatprep.mubr.f32.mxu1 %v11662_v18  ;;  %v5972_v20 = vmul.f32 -1.442695, %v2145_v23 }
 0x238   : > { %v7072_v21 = vpop.eup %7071  ;;  %7091 = vrcp.f32 %v2336_v53  ;;  %v694_v53 = vmul.f32 %v9398_v63, %v8689_v57  ;;  %v743_v55 = vadd.f32 %v679_v22, %v8677_v54 }
 0x239   : > { %v7074_v5 = vpop.eup %7073  ;;  %v2439_v32 = vadd.f32 1.0, %v7072_v21  ;;  %7093 = vtanh.f32 %v9212_v6  ;;  %v9450_v33 = vadd.f32 %v2501_v45, %v2485_v50  ;;  %v11747_v45 = vld [vmem:[#allocation65_spill] sm:$0xff] }
 0x23a   : > { %v9452_v1 = vpop.eup %7075  ;;  %v2502_v62 = vmul.f32 %v7074_v5, %v7070_v43  ;;  %7095 = vpow2.f32 %v5962_v36  ;;  %v2149_v39 = vadd.f32 %v11747_v45, %v739_v49  ;;  %v683_v43 = vmul.f32 %v9323_v8, %v8670_v30 }
 0x23b   : > { %11746 = vst [vmem:[#allocation43_spill] sm:$0xff] %v9450_v33  ;;  %v7078_v31 = vpop.eup %7077  ;;  %7097 = vrcp.f32 %v2439_v32  ;;  %v758_v50 = vadd.f32 %v694_v53, %v8694_v47  ;;  %v2153_v8 = vadd.f32 %v9199_v42, %v743_v55 }
 0x23c   : > { %v7080_v0 = vpop.eup %7079  ;;  %7099 = vpow2.f32 %v5971_v10  ;;  %v2540_v28 = vmul.f32 %v7078_v31, %v9393_v37  ;;  %v5973_v56 = vmul.f32 -1.442695, %v2149_v39 }
 0x23d   : > { %v7082_v11 = vpop.eup %7081  ;;  %v2232_v9 = vadd.f32 1.0, %v7080_v0  ;;  %7101 = vtanh.f32 %v2164_v7  ;;  %v2168_v5 = vadd.f32 %v9288_v2, %v758_v50  ;;  %v747_v7 = vadd.f32 %v683_v43, %v8677_v54 }
 0x23e   : > { %v7084_v61 = vpop.eup %7083  ;;  %v2486_v36 = vmul.f32 %v7082_v11, %v11748_v41  ;;  %2631 = vmatmul.mubr.f32.gmra.mrb[36].mxu0 %v2540_v28  ;;  %2792 = vmatmul.mubr.f32.gmra.mrb[36].mxu1 %v2540_v28  ;;  %7103 = vpow2.f32 %v5994_v29  ;;  %v687_v29 = vmul.f32 %v9358_v13, %v8670_v30  ;;  %v5974_v2 = vmul.f32 -1.442695, %v2153_v8 }
 0x23f   : > { %v7086_v44 = vpop.eup %7085  ;;  %7105 = vrcp.f32 %v2232_v9  ;;  %2636 = vmatprep.mubr.f32.mxu0 %v11662_v18  ;;  %2797 = vmatprep.mubr.f32.mxu1 %v11662_v18  ;;  %v2157_v0 = vadd.f32 %v9220_v38, %v747_v7  ;;  %v691_v28 = vmul.f32 %v9378_v15, %v8670_v30 }
 0x240   : > { %v7088_v37 = vpop.eup %7087  ;;  %7107 = vpow2.f32 %v5972_v20  ;;  %v9468_v51 = vadd.f32 %v2502_v62, %v2486_v36  ;;  %v2337_v62 = vadd.f32 1.0, %v7084_v61  ;;  %v11750_v20 = vld [vmem:[#allocation52_spill] sm:$0xff] }
 0x241   : > { %v7090_v21 = vpop.eup %7089  ;;  %v2440_v10 = vadd.f32 1.0, %v7088_v37  ;;  %7109 = vtanh.f32 %v9279_v3  ;;  %v5975_v41 = vmul.f32 -1.442695, %v2157_v0  ;;  %v755_v43 = vadd.f32 %v691_v28, %v8677_v54 }
 0x242   : > { %11749 = vst [vmem:[#allocation44_spill] sm:$0xff] %v9468_v51  ;;  %v9471_v14 = vpop.eup %7091  ;;  %v2503_v23 = vmul.f32 %v7090_v21, %v7086_v44  ;;  %7111 = vtanh.f32 %v9312_v52 }
 0x243   : > { %v7094_v32 = vpop.eup %7093  ;;  %7113 = vrcp.f32 %v2440_v10  ;;  %v2165_v10 = vadd.f32 %v9267_v16, %v755_v43 }
 0x244   : > { %v7096_v49 = vpop.eup %7095  ;;  %7115 = vpow2.f32 %v5973_v56  ;;  %v2541_v31 = vmul.f32 %v7094_v32, %v9414_v27  ;;  %v751_v27 = vadd.f32 %v687_v29, %v8677_v54  ;;  %v695_v56 = vmul.f32 %v9398_v63, %v8670_v30 }
 0x245   : > { %v7098_v22 = vpop.eup %7097  ;;  %v2233_v53 = vadd.f32 1.0, %v7096_v49  ;;  %7117 = vtanh.f32 %v9331_v12  ;;  %v5977_v29 = vmul.f32 -1.442695, %v2165_v10 }
 0x246   : > { %v7100_v42 = vpop.eup %7099  ;;  %v2487_v45 = vmul.f32 %v7098_v22, %v11750_v20  ;;  %2637 = vmatmul.mubr.f32.gmra.mrb[38].mxu0 %v2541_v31  ;;  %2798 = vmatmul.mubr.f32.gmra.mrb[38].mxu1 %v2541_v31  ;;  %7119 = vtanh.f32 %v2168_v5  ;;  %v2161_v15 = vadd.f32 %v9245_v24, %v751_v27  ;;  %v759_v16 = vadd.f32 %v695_v56, %v8677_v54 }
 0x247   : > { %v7102_v39 = vpop.eup %7101  ;;  %7121 = vrcp.f32 %v2233_v53  ;;  %2642 = vmatprep.mubr.f32.mxu0 %v11662_v18  ;;  %2803 = vmatprep.mubr.f32.mxu1 %v11662_v18  ;;  %v2338_v55 = vadd.f32 1.0, %v7100_v42 }
 0x248   : > { %v7104_v13 = vpop.eup %7103  ;;  %7123 = vrcp.f32 %v2337_v62  ;;  %v9488_v11 = vadd.f32 %v2503_v23, %v2487_v45  ;;  %v5976_v24 = vmul.f32 -1.442695, %v2161_v15  ;;  %v11752_v23 = vld [vmem:[#allocation53_spill] sm:$0xff]  ;;  %v11754_v45 = vld [vmem:[#allocation54_spill] sm:$0xff] }
 0x249   : > { %v7106_v38 = vpop.eup %7105  ;;  %v2441_v9 = vadd.f32 1.0, %v7104_v13  ;;  %7125 = vtanh.f32 %v9360_v40 }
 0x24a   : > { %11751 = vst [vmem:[#allocation60_spill] sm:$0xff] %v9488_v11  ;;  %v7108_v61 = vpop.eup %7107  ;;  %7127 = vpow2.f32 %v5974_v2  ;;  %v2504_v36 = vmul.f32 %v7106_v38, %v7102_v39 }
 0x24b   : > { %v7110_v44 = vpop.eup %7109  ;;  %7129 = vrcp.f32 %v2441_v9  ;;  %v2339_v49 = vadd.f32 1.0, %v7108_v61 }
 0x24c   : > { %v7112_v37 = vpop.eup %7111  ;;  %v2542_v50 = vmul.f32 %v7110_v44, %v9437_v4  ;;  %7131 = vtanh.f32 %v9386_v59 }
 0x24d   : > { %v7114_v21 = vpop.eup %7113  ;;  %7133 = vpow2.f32 %v5975_v41  ;;  %v2543_v32 = vmul.f32 %v7112_v37, %v9452_v1  ;;  %v2169_v1 = vadd.f32 %v9295_v60, %v759_v16 }
 0x24e   : > { %v7116_v8 = vpop.eup %7115  ;;  %v2488_v5 = vmul.f32 %v7114_v21, %v11752_v23  ;;  %2643 = vmatmul.mubr.f32.gmra.mrb[40].mxu0 %v2542_v50  ;;  %2804 = vmatmul.mubr.f32.gmra.mrb[40].mxu1 %v2542_v50  ;;  %7135 = vrcp.f32 %v2338_v55 }
 0x24f   : > { %v7118_v7 = vpop.eup %7117  ;;  %2648 = vmatprep.mubr.f32.mxu0 %v11662_v18  ;;  %2809 = vmatprep.mubr.f32.mxu1 %v11662_v18  ;;  %7137 = vtanh.f32 %v9406_v35  ;;  %v2340_v2 = vadd.f32 1.0, %v7116_v8  ;;  %v5978_v28 = vmul.f32 -1.442695, %v2169_v1 }
 0x250   : > { %v7120_v63 = vpop.eup %7119  ;;  %v9503_v4 = vadd.f32 %v2504_v36, %v2488_v5  ;;  %7139 = vpow2.f32 %v5976_v24  ;;  %v2544_v53 = vmul.f32 %v7118_v7, %v9471_v14 }
 0x251   : > { %v7122_v62 = vpop.eup %7121  ;;  %7141 = vrcp.f32 %v2339_v49 }
 0x252   : > { %11753 = vst [vmem:[#allocation40_spill] sm:$0xff] %v9503_v4  ;;  %v7124_v31 = vpop.eup %7123  ;;  %v2505_v22 = vmul.f32 %v7122_v62, %v7120_v63  ;;  %2649 = vmatmul.mubr.f32.gmra.mrb[42].mxu0 %v2543_v32  ;;  %2810 = vmatmul.mubr.f32.gmra.mrb[42].mxu1 %v2543_v32  ;;  %7143 = vtanh.f32 %v9428_v58 }
 0x253   : > { %v7126_v42 = vpop.eup %7125  ;;  %2654 = vmatprep.mubr.f32.mxu0 %v11662_v18  ;;  %2815 = vmatprep.mubr.f32.mxu1 %v11662_v18  ;;  %7145 = vpow2.f32 %v5977_v29 }
 0x254   : > { %v7128_v0 = vpop.eup %7127  ;;  %v2545_v60 = vmul.f32 %v7126_v42, %v7124_v31  ;;  %7147 = vrcp.f32 %v2340_v2 }
 0x255   : > { %v7130_v20 = vpop.eup %7129  ;;  %v2341_v14 = vadd.f32 1.0, %v7128_v0  ;;  %7149 = vtanh.f32 %v9450_v33 }
 0x256   : > { %v2489_v39 = vmul.f32 %v7130_v20, %v11754_v45  ;;  %2655 = vmatmul.mubr.f32.gmra.mrb[44].mxu0 %v2544_v53  ;;  %2816 = vmatmul.mubr.f32.gmra.mrb[44].mxu1 %v2544_v53  ;;  %v7132_v13 = vpop.eup %7131  ;;  %7151 = vpow2.f32 %v5978_v28 }
 0x257   : > { %2660 = vmatprep.mubr.f32.mxu0 %v11662_v18  ;;  %2821 = vmatprep.mubr.f32.mxu1 %v11662_v18  ;;  %v7134_v27 = vpop.eup %7133  ;;  %7153 = vrcp.f32 %v2341_v14 }
 0x258   : > { %v9514_v38 = vadd.f32 %v2505_v22, %v2489_v39  ;;  %v7136_v9 = vpop.eup %7135  ;;  %v2342_v15 = vadd.f32 1.0, %v7134_v27  ;;  %7155 = vtanh.f32 %v9468_v51  ;;  %v8221_v51 = vld [vmem:[%s8492_s11 + $0x48] sm:$0xff] }
 0x259   : > { %v2546_v61 = vmul.f32 %v7136_v9, %v7132_v13  ;;  %v7138_v41 = vpop.eup %7137 }
 0x25a   : > { %11755 = vst [vmem:[#allocation45_spill] sm:$0xff] %v9514_v38  ;;  %2661 = vmatmul.mubr.f32.gmra.mrb[46].mxu0 %v2545_v60  ;;  %2822 = vmatmul.mubr.f32.gmra.mrb[46].mxu1 %v2545_v60  ;;  %v7140_v36 = vpop.eup %7139  ;;  %7157 = vrcp.f32 %v2342_v15 }
 0x25b   : > { %2666 = vmatprep.mubr.f32.mxu0 %v11662_v18  ;;  %2827 = vmatprep.mubr.f32.mxu1 %v11662_v18  ;;  %v7142_v44 = vpop.eup %7141  ;;  %v2343_v37 = vadd.f32 1.0, %v7140_v36  ;;  %7159 = vtanh.f32 %v9488_v11 }
 0x25c   : > { %v2547_v55 = vmul.f32 %v7142_v44, %v7138_v41  ;;  %v7144_v43 = vpop.eup %7143 }
 0x25d   : > { %v7146_v56 = vpop.eup %7145  ;;  %7161 = vrcp.f32 %v2343_v37 }
 0x25e   : > { %2667 = vmatmul.mubr.f32.gmra.mrb[48].mxu0 %v2546_v61  ;;  %2828 = vmatmul.mubr.f32.gmra.mrb[48].mxu1 %v2546_v61  ;;  %v7148_v50 = vpop.eup %7147  ;;  %v2344_v8 = vadd.f32 1.0, %v7146_v56  ;;  %7163 = vtanh.f32 %v9503_v4  ;;  %v8220_v4 = vld [vmem:[%s8492_s11 + $0x30] sm:$0xff] }
 0x25f   : > { %2672 = vmatprep.mubr.f32.mxu0 %v11662_v18  ;;  %2833 = vmatprep.mubr.f32.mxu1 %v11662_v18  ;;  %v2548_v21 = vmul.f32 %v7148_v50, %v7144_v43  ;;  %v7150_v10 = vpop.eup %7149 }
 0x260   : > { %v7152_v24 = vpop.eup %7151  ;;  %7165 = vrcp.f32 %v2344_v8 }
 0x261   : > { %v7154_v23 = vpop.eup %7153  ;;  %v2345_v7 = vadd.f32 1.0, %v7152_v24  ;;  %7167 = vtanh.f32 %v9514_v38 }
 0x262   : > { %2673 = vmatmul.mubr.f32.gmra.mrb[50].mxu0 %v2547_v55  ;;  %2834 = vmatmul.mubr.f32.gmra.mrb[50].mxu1 %v2547_v55  ;;  %v2549_v5 = vmul.f32 %v7154_v23, %v7150_v10  ;;  %v7156_v32 = vpop.eup %7155 }
 0x263   : > { %2678 = vmatprep.mubr.f32.mxu0 %v11662_v18  ;;  %2839 = vmatprep.mubr.f32.mxu1 %v11662_v18  ;;  %7169 = vrcp.f32 %v2345_v7 }
 0x264   : > { %v7158_v49 = vpop.eup %7157 }
 0x265   : > { %v2550_v63 = vmul.f32 %v7158_v49, %v7156_v32  ;;  %v7160_v16 = vpop.eup %7159 }
 0x266   : > { %2679 = vmatmul.mubr.f32.gmra.mrb[52].mxu0 %v2548_v21  ;;  %2840 = vmatmul.mubr.f32.gmra.mrb[52].mxu1 %v2548_v21 }
 0x267   : > { %2684 = vmatprep.mubr.f32.mxu0 %v11662_v18  ;;  %2845 = vmatprep.mubr.f32.mxu1 %v11662_v18  ;;  %v7162_v62 = vpop.eup %7161 }
 0x268   : > { %v2551_v29 = vmul.f32 %v7162_v62, %v7160_v16  ;;  %v7164_v31 = vpop.eup %7163  ;;  %v11756_v16 = vld [vmem:[#allocation59_spill] sm:$0xff] }
 0x26a   : > { %2685 = vmatmul.mubr.f32.gmra.mrb[54].mxu0 %v2549_v5  ;;  %2846 = vmatmul.mubr.f32.gmra.mrb[54].mxu1 %v2549_v5  ;;  %v7166_v22 = vpop.eup %7165 }
 0x26b   : > { %2690 = vmatprep.mubr.f32.mxu0 %v11662_v18  ;;  %2851 = vmatprep.mubr.f32.mxu1 %v11662_v18  ;;  %v2552_v1 = vmul.f32 %v7166_v22, %v7164_v31  ;;  %v7168_v53 = vpop.eup %7167 }
 0x26d   : > { %v7170_v42 = vpop.eup %7169 }
 0x26e   : > { %2691 = vmatmul.mubr.f32.gmra.mrb[56].mxu0 %v2550_v63  ;;  %2852 = vmatmul.mubr.f32.gmra.mrb[56].mxu1 %v2550_v63  ;;  %v2553_v2 = vmul.f32 %v7170_v42, %v7168_v53  ;;  %v762_v0 = vpop.permute.xlu1 %761  ;;  %v9553_v53 = vpop.permute.xlu0 %765  ;;  %v11758_v42 = vld [vmem:[#allocation11_spill] sm:$0xff] }
 0x26f   : > { %2696 = vmatprep.mubr.f32.mxu0 %v11662_v18  ;;  %2857 = vmatprep.mubr.f32.mxu1 %v11662_v18  ;;  %v824_v20 = vmul.f32 %v762_v0, %v8665_v19  ;;  %v825_v45 = vmul.f32 %v762_v0, %v9017_v26  ;;  %v827_v14 = vmul.f32 %v762_v0, %v8670_v30 }
 0x270   : > { %v826_v55 = vmul.f32 %v762_v0, %v8689_v57  ;;  %v11759_v0 = vld [vmem:[#allocation12_spill] sm:$0xff] }
 0x271   : > { %v888_v39 = vadd.f32 %v824_v20, %v8672_v34  ;;  %v889_v28 = vadd.f32 %v825_v45, %v9023_v46  ;;  %v891_v44 = vadd.f32 %v827_v14, %v8677_v54  ;;  %v11760_v20 = vld [vmem:[#allocation13_spill] sm:$0xff]  ;;  %v829_v45 = vmul.f32 %v9553_v53, %v9017_v26 }
 0x272   : > { %2697 = vmatmul.mubr.f32.gmra.mrb[58].mxu0 %v2551_v29  ;;  %2858 = vmatmul.mubr.f32.gmra.mrb[58].mxu1 %v2551_v29  ;;  %v890_v37 = vadd.f32 %v826_v55, %v8694_v47  ;;  %v11764_v14 = vld [vmem:[#allocation17_spill] sm:$0xff] }
 0x273   : > { %2702 = vmatprep.mubr.f32.mxu0 %v11662_v18  ;;  %2863 = vmatprep.mubr.f32.mxu1 %v11662_v18 }
 0x276   : > { %2703 = vmatmul.mubr.f32.gmra.mrb[60].mxu0 %v2552_v1  ;;  %2864 = vmatmul.mubr.f32.gmra.mrb[60].mxu1 %v2552_v1 }
 0x277   : > { %2708 = vmatprep.mubr.f32.mxu0 %v11662_v18  ;;  %2869 = vmatprep.mubr.f32.mxu1 %v11662_v18 }
 0x27a   : > { %2709 = vmatmul.mubr.f32.gmra.mrb[62].mxu0 %v2553_v2  ;;  %2870 = vmatmul.mubr.f32.gmra.mrb[62].mxu1 %v2553_v2  ;;  %v828_v2 = vmul.f32 %v9553_v53, %v8665_v19 }
 0x27b   : > { %3388 = vmatprep.mubr.f32.mxu0 %v11662_v18  ;;  %3549 = vmatprep.mubr.f32.mxu1 %v11662_v18 }
 0x2d1   : > { %v2620_v60 = vpop.f32.mrb[32].mxu0  ;;  %v2781_v13 = vpop.f32.mrb[32].mxu1 }
 0x2d2   : > { %v2876_v27 = vadd.f32 %v2620_v60, %v888_v39  ;;  %v2622_v9 = vpop.f32.mrb[33].mxu0  ;;  %v2783_v61 = vpop.f32.mrb[33].mxu1  ;;  %v2878_v50 = vadd.f32 %v2781_v13, %v890_v37  ;;  %v11761_v39 = vld [vmem:[#allocation14_spill] sm:$0xff]  ;;  %v892_v60 = vadd.f32 %v828_v2, %v8672_v34  ;;  %v11763_v13 = vld [vmem:[#allocation16_spill] sm:$0xff]  ;;  %v11768_v37 = vld [vmem:[#allocation21_spill] sm:$0xff] }
 0x2d3   : > { %v2877_v41 = vadd.f32 %v2622_v9, %v889_v28  ;;  %v2879_v43 = vadd.f32 %v2783_v61, %v891_v44  ;;  %v11762_v28 = vld [vmem:[#allocation15_spill] sm:$0xff] }
 0x2d4   : > { %v5995_v15 = vmul.f32 -1.442695, %v2876_v27  ;;  %v893_v27 = vadd.f32 %v829_v45, %v9023_v46 }
 0x2d5   : > { %v6027_v36 = vmul.f32 -1.442695, %v2877_v41  ;;  %v6011_v56 = vmul.f32 -1.442695, %v2879_v43  ;;  %v11765_v41 = vld [vmem:[#allocation18_spill] sm:$0xff]  ;;  %v11767_v43 = vld [vmem:[#allocation20_spill] sm:$0xff] }
 0x2d6   : > { %7171 = vpow2.f32 %v5995_v15  ;;  %v11766_v15 = vld [vmem:[#allocation19_spill] sm:$0xff] }
 0x2d7   : > { %7173 = vpow2.f32 %v6027_v36 }
 0x2d8   : > { %7175 = vpow2.f32 %v6011_v56  ;;  %v9575_v56 = vpop.permute.xlu1 %769 }
 0x2d9   : > { %7177 = vtanh.f32 %v2878_v50 }
 0x2e0   : > { %v7172_v21 = vpop.eup %7171 }
 0x2e1   : > { %v7174_v10 = vpop.eup %7173  ;;  %v2988_v8 = vadd.f32 1.0, %v7172_v21 }
 0x2e2   : > { %v3196_v24 = vadd.f32 1.0, %v7174_v10  ;;  %v7176_v23 = vpop.eup %7175  ;;  %v832_v10 = vmul.f32 %v9575_v56, %v8665_v19 }
 0x2e3   : > { %7179 = vrcp.f32 %v2988_v8  ;;  %v7178_v5 = vpop.eup %7177  ;;  %v3100_v63 = vadd.f32 1.0, %v7176_v23  ;;  %v11769_v23 = vld [vmem:[#allocation22_spill] sm:$0xff] }
 0x2e4   : > { %7181 = vrcp.f32 %v3196_v24  ;;  %v833_v24 = vmul.f32 %v9575_v56, %v9017_v26 }
 0x2e5   : > { %7183 = vrcp.f32 %v3100_v63  ;;  %v896_v63 = vadd.f32 %v832_v10, %v8672_v34 }
 0x2ed   : > { %v7180_v32 = vpop.eup %7179 }
 0x2ee   : > { %v7182_v7 = vpop.eup %7181  ;;  %v3260_v49 = vmul.f32 %v7180_v32, %v7178_v5  ;;  %v11770_v5 = vld [vmem:[#allocation23_spill] sm:$0xff]  ;;  %v830_v32 = vmul.f32 %v9553_v53, %v8689_v57 }
 0x2ef   : > { %v3244_v62 = vmul.f32 %v7182_v7, %v11756_v16  ;;  %v7184_v31 = vpop.eup %7183  ;;  %v11771_v7 = vld [vmem:[#allocation24_spill] sm:$0xff] }
 0x2f1   : > { %v9548_v29 = vadd.f32 %v3260_v49, %v3244_v62  ;;  %v11772_v49 = vld [vmem:[#allocation25_spill] sm:$0xff] }
 0x2f3   : > { %11757 = vst [vmem:[#allocation57_spill] sm:$0xff] %v9548_v29  ;;  %7185 = vtanh.f32 %v9548_v29 }
 0x2fd   : > { %v7186_v22 = vpop.eup %7185 }
 0x2fe   : > { %v3308_v1 = vmul.f32 %v7186_v22, %v7184_v31  ;;  %v897_v31 = vadd.f32 %v833_v24, %v9023_v46  ;;  %v11773_v22 = vld [vmem:[#allocation27_spill] sm:$0xff]  ;;  %v11776_v24 = vld [vmem:[#allocation30_spill] sm:$0xff] }
 0x300   : > { %3389 = vmatmul.mubr.f32.vlgmr.msra.gmra.mrb[64].mxu0 %v3308_v1  ;;  %3550 = vmatmul.mubr.f32.vlgmr.msra.gmra.mrb[64].mxu1 %v3308_v1  ;;  %v894_v1 = vadd.f32 %v830_v32, %v8694_v47  ;;  %v11777_v32 = vld [vmem:[#allocation31_spill] sm:$0xff] }
 0x301   : > { %3394 = vmatprep.mubr.f32.mxu0 %v11662_v18  ;;  %3555 = vmatprep.mubr.f32.mxu1 %v11662_v18  ;;  %v8222_v18 = vld [vmem:[%s8492_s11 + $0x40] sm:$0xff] }
 0x302   : > { %6477 = vmatpush1.bf16.msra.mxu0 %v8562_v25  ;;  %6509 = vmatpush1.bf16.msra.mxu1 %v11758_v42 }
 0x303   : > { %6479 = vmatprep.subr.bf16.mxu0 %v11759_v0  ;;  %6511 = vmatprep.subr.bf16.mxu1 %v11760_v20 }
 0x306   : > { %6481 = vmatpush1.bf16.msra.mxu0 %v11761_v39  ;;  %6513 = vmatpush1.bf16.msra.mxu1 %v11762_v28 }
 0x307   : > { %6483 = vmatprep.subr.bf16.mxu0 %v11763_v13  ;;  %6515 = vmatprep.subr.bf16.mxu1 %v11764_v14 }
 0x309   : > { %v2626_v9 = vpop.f32.mrb[34].mxu0  ;;  %v2787_v61 = vpop.f32.mrb[34].mxu1 }
 0x30a   : > { %6485 = vmatpush1.bf16.msra.mxu0 %v11765_v41  ;;  %6517 = vmatpush1.bf16.msra.mxu1 %v11766_v15  ;;  %v2880_v36 = vadd.f32 %v2626_v9, %v892_v60  ;;  %v2628_v44 = vpop.f32.mrb[35].mxu0  ;;  %v9571_v55 = vpop.f32.mrb[35].mxu1  ;;  %v11775_v9 = vld [vmem:[#allocation29_spill] sm:$0xff] }
 0x30b   : > { %6487 = vmatprep.subr.bf16.mxu0 %v11767_v43  ;;  %6519 = vmatprep.subr.bf16.mxu1 %v11768_v37  ;;  %v2881_v50 = vadd.f32 %v2628_v44, %v893_v27  ;;  %v11774_v27 = vld [vmem:[#allocation28_spill] sm:$0xff] }
 0x30c   : > { %v5996_v21 = vmul.f32 -1.442695, %v2880_v36  ;;  %v9596_v36 = vpop.permute.xlu1 %773 }
 0x30d   : > { %v6028_v8 = vmul.f32 -1.442695, %v2881_v50 }
 0x30e   : > { %6489 = vmatpush1.bf16.msra.mxu0 %v11769_v23  ;;  %6521 = vmatpush1.bf16.msra.mxu1 %v11770_v5  ;;  %7187 = vpow2.f32 %v5996_v21  ;;  %v836_v21 = vmul.f32 %v9596_v36, %v8665_v19 }
 0x30f   : > { %6491 = vmatprep.subr.bf16.mxu0 %v11771_v7  ;;  %6523 = vmatprep.subr.bf16.mxu1 %v11772_v49  ;;  %7189 = vpow2.f32 %v6028_v8  ;;  %v837_v8 = vmul.f32 %v9596_v36, %v9017_v26  ;;  %v11783_v49 = vld [vmem:[#allocation37_spill] sm:$0xff] }
 0x311   : > { %v2632_v16 = vpop.f32.mrb[36].mxu0  ;;  %v2793_v62 = vpop.f32.mrb[36].mxu1 }
 0x312   : > { %6493 = vmatpush1.bf16.msra.mxu0 %v11713_v17  ;;  %6525 = vmatpush1.bf16.msra.mxu1 %v11773_v22  ;;  %v2884_v2 = vadd.f32 %v2632_v16, %v896_v63  ;;  %v2634_v45 = vpop.f32.mrb[37].mxu0  ;;  %v9592_v60 = vpop.f32.mrb[37].mxu1  ;;  %v2882_v63 = vadd.f32 %v2787_v61, %v894_v1  ;;  %v11778_v16 = vld [vmem:[#allocation32_spill] sm:$0xff]  ;;  %v11781_v61 = vld [vmem:[#allocation35_spill] sm:$0xff] }
 0x313   : > { %6495 = vmatprep.subr.bf16.mxu0 %v11774_v27  ;;  %6527 = vmatprep.subr.bf16.mxu1 %v11775_v9  ;;  %v2885_v44 = vadd.f32 %v2634_v45, %v897_v31  ;;  %v11779_v9 = vld [vmem:[#allocation33_spill] sm:$0xff]  ;;  %v900_v45 = vadd.f32 %v836_v21, %v8672_v34  ;;  %v9616_v21 = vpop.permute.xlu0 %777 }
 0x314   : > { %v5997_v50 = vmul.f32 -1.442695, %v2884_v2  ;;  %v834_v2 = vmul.f32 %v9575_v56, %v8689_v57 }
 0x315   : > { %v6029_v10 = vmul.f32 -1.442695, %v2885_v44 }
 0x316   : > { %6497 = vmatpush1.bf16.msra.mxu0 %v11776_v24  ;;  %6529 = vmatpush1.bf16.msra.mxu1 %v11777_v32  ;;  %7191 = vpow2.f32 %v5997_v50  ;;  %v901_v24 = vadd.f32 %v837_v8, %v9023_v46  ;;  %v11780_v32 = vld [vmem:[#allocation34_spill] sm:$0xff]  ;;  %v898_v8 = vadd.f32 %v834_v2, %v8694_v47  ;;  %v838_v2 = vmul.f32 %v9596_v36, %v8689_v57 }
 0x317   : > { %6499 = vmatprep.subr.bf16.mxu0 %v11778_v16  ;;  %6531 = vmatprep.subr.bf16.mxu1 %v11779_v9  ;;  %7193 = vpow2.f32 %v6029_v10  ;;  %v11782_v16 = vld [vmem:[#allocation36_spill] sm:$0xff] }
 0x318   : > { %v7188_v31 = vpop.eup %7187  ;;  %7195 = vtanh.f32 %v2882_v63  ;;  %v840_v63 = vmul.f32 %v9616_v21, %v8665_v19  ;;  %v902_v5 = vadd.f32 %v838_v2, %v8694_v47 }
 0x319   : > { %v7190_v44 = vpop.eup %7189  ;;  %v2989_v27 = vadd.f32 1.0, %v7188_v31  ;;  %v2638_v22 = vpop.f32.mrb[38].mxu0 }
 0x31a   : > { %v2799_v17 = vpop.f32.mrb[38].mxu1  ;;  %6501 = vmatpush1.bf16.msra.mxu0 %v11780_v32  ;;  %6533 = vmatpush1.bf16.msra.mxu1 %v11781_v61  ;;  %v3197_v1 = vadd.f32 1.0, %v7190_v44  ;;  %v2888_v50 = vadd.f32 %v2638_v22, %v900_v45  ;;  %v2640_v10 = vpop.f32.mrb[39].mxu0  ;;  %v841_v22 = vmul.f32 %v9616_v21, %v9017_v26  ;;  %v11784_v45 = vld [vmem:[#allocation38_spill] sm:$0xff]  ;;  %v11786_v61 = vld [vmem:[#allocation8_spill] sm:$0xff] }
 0x31b   : > { %v9612_v9 = vpop.f32.mrb[39].mxu1  ;;  %6503 = vmatprep.subr.bf16.mxu0 %v11782_v16  ;;  %6535 = vmatprep.subr.bf16.mxu1 %v11783_v49  ;;  %7197 = vrcp.f32 %v2989_v27  ;;  %v2889_v31 = vadd.f32 %v2640_v10, %v901_v24  ;;  %v11785_v16 = vld [vmem:[#allocation39_spill] sm:$0xff]  ;;  %v2886_v49 = vadd.f32 %v2793_v62, %v898_v8  ;;  %v11787_v27 = vld [vmem:[#allocation9_spill] sm:$0xff]  ;;  %v9627_v24 = vpop.permute.xlu1 %781 }
 0x31c   : > { %7199 = vrcp.f32 %v3197_v1  ;;  %v5998_v32 = vmul.f32 -1.442695, %v2888_v50  ;;  %v904_v50 = vadd.f32 %v840_v63, %v8672_v34  ;;  %v844_v10 = vmul.f32 %v9627_v24, %v8665_v19  ;;  %v9641_v63 = vpop.permute.xlu0 %785 }
 0x31d   : > { %v6030_v44 = vmul.f32 -1.442695, %v2889_v31  ;;  %v845_v8 = vmul.f32 %v9627_v24, %v9017_v26  ;;  %v848_v43 = vmul.f32 %v9641_v63, %v8665_v19 }
 0x31e   : > { %6505 = vmatpush1.bf16.msra.mxu0 %v11784_v45  ;;  %6537 = vmatpush1.bf16.msra.mxu1 %v11785_v16  ;;  %7201 = vpow2.f32 %v5998_v32 }
 0x31f   : > { %6539 = vmatprep.subr.bf16.mxu0 %v11786_v61  ;;  %6571 = vmatprep.subr.bf16.mxu1 %v11787_v27  ;;  %7203 = vpow2.f32 %v6030_v44  ;;  %v905_v61 = vadd.f32 %v841_v22, %v9023_v46  ;;  %v908_v22 = vadd.f32 %v844_v10, %v8672_v34  ;;  %v909_v41 = vadd.f32 %v845_v8, %v9023_v46  ;;  %v9658_v28 = vpop.permute.xlu1 %789 }
 0x320   : > { %v7192_v1 = vpop.eup %7191  ;;  %7205 = vtanh.f32 %v2886_v49  ;;  %v912_v8 = vadd.f32 %v848_v43, %v8672_v34 }
 0x321   : > { %v7194_v31 = vpop.eup %7193  ;;  %v2990_v16 = vadd.f32 1.0, %v7192_v1  ;;  %v2644_v62 = vpop.f32.mrb[40].mxu0 }
 0x322   : > { %v9634_v32 = vpop.f32.mrb[40].mxu1  ;;  %v3198_v27 = vadd.f32 1.0, %v7194_v31  ;;  %v2892_v45 = vadd.f32 %v2644_v62, %v904_v50  ;;  %v2646_v7 = vpop.f32.mrb[41].mxu0  ;;  %v2890_v31 = vadd.f32 %v2799_v17, %v902_v5  ;;  %v842_v5 = vmul.f32 %v9616_v21, %v8689_v57 }
 0x323   : > { %v9639_v44 = vpop.f32.mrb[41].mxu1  ;;  %7207 = vrcp.f32 %v2990_v16  ;;  %v2893_v1 = vadd.f32 %v2646_v7, %v905_v61  ;;  %v7196_v23 = vpop.eup %7195  ;;  %v849_v16 = vmul.f32 %v9641_v63, %v9017_v26 }
 0x324   : > { %7209 = vrcp.f32 %v3198_v27  ;;  %v5999_v37 = vmul.f32 -1.442695, %v2892_v45  ;;  %v11788_v27 = vld [vmem:[#allocation62_spill] sm:$0xff] }
 0x325   : > { %v7198_v49 = vpop.eup %7197  ;;  %v6031_v50 = vmul.f32 -1.442695, %v2893_v1  ;;  %v2650_v62 = vpop.f32.mrb[42].mxu0 }
 0x326   : > { %v9647_v15 = vpop.f32.mrb[42].mxu1  ;;  %v7200_v7 = vpop.eup %7199  ;;  %v3261_v2 = vmul.f32 %v7198_v49, %v7196_v23  ;;  %7211 = vpow2.f32 %v5999_v37  ;;  %v2896_v45 = vadd.f32 %v2650_v62, %v908_v22  ;;  %v846_v37 = vmul.f32 %v9627_v24, %v8689_v57 }
 0x327   : > { %v2652_v61 = vpop.f32.mrb[43].mxu0  ;;  %v9652_v10 = vpop.f32.mrb[43].mxu1  ;;  %v3245_v14 = vmul.f32 %v7200_v7, %v11788_v27  ;;  %7213 = vpow2.f32 %v6031_v50  ;;  %v913_v22 = vadd.f32 %v849_v16, %v9023_v46  ;;  %v8364_v27 = vmov 3  }
 0x328   : > { %v2897_v13 = vadd.f32 %v2652_v61, %v909_v41  ;;  %v7202_v17 = vpop.eup %7201  ;;  %v6000_v1 = vmul.f32 -1.442695, %v2896_v45  ;;  %7215 = vtanh.f32 %v2890_v31  ;;  %v852_v61 = vmul.f32 %v9658_v28, %v8665_v19  ;;  %6717 = vset.pattern.permute.xlu0 %v8364_v27  ;;  %6718 = vset.pattern.permute.xlu1 %v8364_v27 }
 0x329   : > { %v2991_v39 = vadd.f32 1.0, %v7202_v17  ;;  %v2656_v23 = vpop.f32.mrb[44].mxu0  ;;  %v7204_v49 = vpop.eup %7203  ;;  %v9665_v7 = vadd.f32 %v3261_v2, %v3245_v14  ;;  %v906_v17 = vadd.f32 %v842_v5, %v8694_v47  ;;  %v8213_v14 = vld [vmem:[%s8492_s11] sm:$0xff]  ;;  %v831_v5 = vmul.f32 %v9553_v53, %v8670_v30  ;;  %v8215_v53 = vld [vmem:[%s8492_s11 + $0x18] sm:$0xff] }
 0x32a   : > { %7217 = vpow2.f32 %v6000_v1  ;;  %v2900_v41 = vadd.f32 %v2656_v23, %v912_v8  ;;  %v9663_v62 = vpop.f32.mrb[44].mxu1  ;;  %v2658_v50 = vpop.f32.mrb[45].mxu0  ;;  %v3199_v43 = vadd.f32 1.0, %v7204_v49  ;;  %v6032_v45 = vmul.f32 -1.442695, %v2897_v13  ;;  %953 = vperm.xlu0 %6717, %v8213_v14  }
 0x32b   : > { %7219 = vrcp.f32 %v2991_v39  ;;  %v9667_v31 = vpop.f32.mrb[45].mxu1  ;;  %v7206_v16 = vpop.eup %7205  ;;  %v2901_v1 = vadd.f32 %v2658_v50, %v913_v22  ;;  %v853_v8 = vmul.f32 %v9658_v28, %v9017_v26  ;;  %v8214_v39 = vld [vmem:[%s8492_s11 + $0x8] sm:$0xff]  ;;  %v2894_v50 = vadd.f32 %v9634_v32, %v906_v17 }
 0x32c   : > { %957 = vperm.xlu1 %6718, %v8214_v39   ;;  %7221 = vrcp.f32 %v3199_v43  ;;  %v6001_v2 = vmul.f32 -1.442695, %v2900_v41  ;;  %v916_v41 = vadd.f32 %v852_v61, %v8672_v34  ;;  %v9685_v39 = vpop.permute.xlu0 %793  ;;  %v910_v42 = vadd.f32 %v846_v37, %v8694_v47 }
 0x32d   : > { %v7208_v13 = vpop.eup %7207  ;;  %v2662_v23 = vpop.f32.mrb[46].mxu0  ;;  %7223 = vpow2.f32 %v6032_v45  ;;  %v6033_v25 = vmul.f32 -1.442695, %v2901_v1  ;;  %v917_v29 = vadd.f32 %v853_v8, %v9023_v46  ;;  %v895_v37 = vadd.f32 %v831_v5, %v8677_v54  ;;  %v8218_v5 = vld [vmem:[%s8492_s11 + $0x20] sm:$0xff] }
 0x32e   : > { %v9676_v49 = vpop.f32.mrb[46].mxu1  ;;  %v7210_v20 = vpop.eup %7209  ;;  %v3262_v22 = vmul.f32 %v7208_v13, %v7206_v16  ;;  %965 = vperm.xlu0 %6717, %v8215_v53   ;;  %v8216_v16 = vld [vmem:[%s8492_s11 + $0x10] sm:$0xff]  ;;  %7225 = vpow2.f32 %v6001_v2  ;;  %v2904_v17 = vadd.f32 %v2662_v23, %v916_v41  ;;  %v2898_v61 = vadd.f32 %v9647_v15, %v910_v42  ;;  %v8217_v53 = vld [vmem:[%s8492_s11 + $0x28] sm:$0xff] }
 0x32f   : > { %v2664_v27 = vpop.f32.mrb[47].mxu0  ;;  %v9681_v0 = vpop.f32.mrb[47].mxu1  ;;  %v3246_v14 = vmul.f32 %v7210_v20, %v11742_v48  ;;  %7227 = vtanh.f32 %v2894_v50  ;;  %v856_v1 = vmul.f32 %v9685_v39, %v8665_v19 }
 0x330   : > { %v7212_v43 = vpop.eup %7211  ;;  %961 = vperm.xlu1 %6718, %v8216_v16   ;;  %v6002_v50 = vmul.f32 -1.442695, %v2904_v17  ;;  %v857_v16 = vmul.f32 %v9685_v39, %v9017_v26  ;;  %v9716_v17 = vpop.permute.xlu1 %797 }
 0x331   : > { %v2992_v32 = vadd.f32 1.0, %v7212_v43  ;;  %v2668_v13 = vpop.f32.mrb[48].mxu0  ;;  %v9691_v48 = vpop.f32.mrb[48].mxu1  ;;  %v9693_v20 = vadd.f32 %v3262_v22, %v3246_v14  ;;  %v850_v22 = vmul.f32 %v9641_v63, %v8689_v57  ;;  %v2905_v14 = vadd.f32 %v2664_v27, %v917_v29 }
 0x332   : > { %v7214_v45 = vpop.eup %7213  ;;  %v2670_v8 = vpop.f32.mrb[49].mxu0  ;;  %973 = vperm.xlu0 %6717, %v8217_v53  }
 0x333   : > { %11789 = vst [vmem:[#allocation41_spill] sm:$0xff] %v9693_v20  ;;  %v9699_v43 = vpop.f32.mrb[49].mxu1  ;;  %v7216_v2 = vpop.eup %7215  ;;  %7229 = vrcp.f32 %v2992_v32  ;;  %v3200_v23 = vadd.f32 1.0, %v7214_v45  ;;  %v835_v32 = vmul.f32 %v9575_v56, %v8670_v30  ;;  %v914_v53 = vadd.f32 %v850_v22, %v8694_v47 }
 0x334   : > { %v7218_v41 = vpop.eup %7217  ;;  %7231 = vpow2.f32 %v6033_v25  ;;  %969 = vperm.xlu1 %6718, %v8218_v5   ;;  %v920_v25 = vadd.f32 %v856_v1, %v8672_v34  ;;  %v6034_v5 = vmul.f32 -1.442695, %v2905_v14  ;;  %v860_v1 = vmul.f32 %v9716_v17, %v8665_v19 }
 0x335   : > { %v7220_v42 = vpop.eup %7219  ;;  %7233 = vrcp.f32 %v3200_v23  ;;  %v2993_v15 = vadd.f32 1.0, %v7218_v41  ;;  %v9707_v38 = vpop.f32.mrb[50].mxu0  ;;  %v2883_v41 = vadd.f32 %v9571_v55, %v895_v37  ;;  %v2902_v37 = vadd.f32 %v9663_v62, %v914_v53 }
 0x336   : > { %v3263_v29 = vmul.f32 %v7220_v42, %v7216_v2  ;;  %7235 = vtanh.f32 %v2898_v61  ;;  %v9712_v27 = vpop.f32.mrb[50].mxu1  ;;  %v9714_v45 = vpop.f32.mrb[51].mxu0  ;;  %v839_v61 = vmul.f32 %v9596_v36, %v8670_v30  ;;  %v2908_v2 = vadd.f32 %v2668_v13, %v920_v25  ;;  %v8219_v42 = vld [vmem:[%s8492_s11 + $0x38] sm:$0xff] }
 0x337   : > { %v7222_v23 = vpop.eup %7221  ;;  %7237 = vrcp.f32 %v2993_v15  ;;  %v9720_v56 = vpop.f32.mrb[51].mxu1  ;;  %981 = vperm.xlu0 %6717, %v8219_v42   ;;  %v921_v22 = vadd.f32 %v857_v16, %v9023_v46  ;;  %v899_v36 = vadd.f32 %v835_v32, %v8677_v54 }
 0x338   : > { %11790 = vst [vmem:[#allocation55_spill] sm:$0xff] %v9720_v56  ;;  %977 = vperm.xlu1 %6718, %v8220_v4   ;;  %v7224_v11 = vpop.eup %7223  ;;  %v3247_v55 = vmul.f32 %v7222_v23, %v9212_v6  ;;  %7239 = vpow2.f32 %v6002_v50  ;;  %v854_v4 = vmul.f32 %v9658_v28, %v8689_v57  ;;  %v6012_v50 = vmul.f32 -1.442695, %v2883_v41 }
 0x339   : > { %v9731_v14 = vpop.f32.mrb[52].mxu0  ;;  %v9733_v15 = vpop.f32.mrb[52].mxu1  ;;  %v3201_v13 = vadd.f32 1.0, %v7224_v11  ;;  %7241 = vpow2.f32 %v6034_v5  ;;  %v2909_v16 = vadd.f32 %v2670_v8, %v921_v22  ;;  %v861_v23 = vmul.f32 %v9716_v17, %v9017_v26 }
 0x33a   : > { %v9738_v25 = vpop.f32.mrb[53].mxu0  ;;  %v9740_v6 = vpop.f32.mrb[53].mxu1  ;;  %v2887_v42 = vadd.f32 %v9592_v60, %v899_v36  ;;  %v6003_v32 = vmul.f32 -1.442695, %v2908_v2  ;;  %v924_v41 = vadd.f32 %v860_v1, %v8672_v34  ;;  %v9753_v22 = vadd.f32 %v3263_v29, %v3247_v55 }
 0x33b   : > { %11791 = vst [vmem:[#allocation46_spill] sm:$0xff] %v9740_v6  ;;  %v7226_v62 = vpop.eup %7225  ;;  %7243 = vrcp.f32 %v3201_v13  ;;  %989 = vperm.xlu0 %6717, %v8221_v51   ;;  %v903_v6 = vadd.f32 %v839_v61, %v8677_v54  ;;  %v843_v2 = vmul.f32 %v9616_v21, %v8670_v30  ;;  %v6035_v55 = vmul.f32 -1.442695, %v2909_v16 }
 0x33c   : > { %v7228_v53 = vpop.eup %7227  ;;  %v2994_v11 = vadd.f32 1.0, %v7226_v62  ;;  %985 = vperm.xlu1 %6718, %v8222_v18   ;;  %7245 = vtanh.f32 %v2902_v37  ;;  %11792 = vst [vmem:[#allocation42_spill] sm:$0xff] %v9753_v22  ;;  %v918_v18 = vadd.f32 %v854_v4, %v8694_v47  ;;  %v9762_v37 = vpop.permute.xlu0 %801  ;;  %v6013_v62 = vmul.f32 -1.442695, %v2887_v42 }
 0x33d   : > { %v7230_v33 = vpop.eup %7229  ;;  %v9749_v8 = vpop.f32.mrb[54].mxu0  ;;  %v925_v21 = vadd.f32 %v861_v23, %v9023_v46  ;;  %v864_v4 = vmul.f32 %v9762_v37, %v8665_v19 }
 0x33e   : > { %v9751_v5 = vpop.f32.mrb[54].mxu1  ;;  %v7232_v60 = vpop.eup %7231  ;;  %v3264_v36 = vmul.f32 %v7230_v33, %v7228_v53  ;;  %7247 = vrcp.f32 %v2994_v11  ;;  %v2912_v33 = vadd.f32 %v9707_v38, %v924_v41  ;;  %v8223_v53 = vld [vmem:[%s8492_s11 + $0x58] sm:$0xff]  ;;  %v8224_v11 = vld [vmem:[%s8492_s11 + $0x50] sm:$0xff]  ;;  %v858_v38 = vmul.f32 %v9685_v39, %v8689_v57 }
 0x33f   : > { %v9758_v51 = vpop.f32.mrb[55].mxu0  ;;  %v9760_v61 = vpop.f32.mrb[55].mxu1  ;;  %7249 = vpow2.f32 %v6012_v50  ;;  %v3202_v29 = vadd.f32 1.0, %v7232_v60  ;;  %997 = vperm.xlu0 %6717, %v8223_v53   ;;  %v2906_v50 = vadd.f32 %v9676_v49, %v918_v18  ;;  %v907_v49 = vadd.f32 %v843_v2, %v8677_v54 }
 0x340   : > { %11793 = vst [vmem:[#allocation56_spill] sm:$0xff] %v9760_v61  ;;  %v7234_v1 = vpop.eup %7233  ;;  %7251 = vpow2.f32 %v6003_v32  ;;  %993 = vperm.xlu1 %6718, %v8224_v11   ;;  %v2913_v32 = vadd.f32 %v9714_v45, %v925_v21  ;;  %v6004_v18 = vmul.f32 -1.442695, %v2912_v33  ;;  %v865_v45 = vmul.f32 %v9762_v37, %v9017_v26  ;;  %v8226_v21 = vld [vmem:[%s8492_s11 + $0x60] sm:$0xff] }
 0x341   : > { %v7236_v13 = vpop.eup %7235  ;;  %v3248_v22 = vmul.f32 %v7234_v1, %v9279_v3  ;;  %7253 = vrcp.f32 %v3202_v29  ;;  %v9774_v16 = vpop.f32.mrb[56].mxu0  ;;  %v2891_v1 = vadd.f32 %v9612_v9, %v903_v6  ;;  %v922_v9 = vadd.f32 %v858_v38, %v8694_v47 }
 0x342   : > { %v7238_v61 = vpop.eup %7237  ;;  %v9776_v23 = vpop.f32.mrb[56].mxu1  ;;  %7255 = vpow2.f32 %v6035_v55  ;;  %v2895_v56 = vadd.f32 %v9639_v44, %v907_v49  ;;  %v862_v44 = vmul.f32 %v9716_v17, %v8689_v57 }
 0x343   : > { %v3265_v42 = vmul.f32 %v7238_v61, %v7236_v13  ;;  %v9779_v41 = vpop.f32.mrb[57].mxu0  ;;  %v9781_v60 = vpop.f32.mrb[57].mxu1  ;;  %7257 = vpow2.f32 %v6013_v62  ;;  %v928_v61 = vadd.f32 %v864_v4, %v8672_v34  ;;  %v8225_v13 = vld [vmem:[%s8492_s11 + $0x68] sm:$0xff]  ;;  %v9799_v33 = vadd.f32 %v3264_v36, %v3248_v22 }
 0x344   : > { %11794 = vst [vmem:[#allocation47_spill] sm:$0xff] %v9781_v60  ;;  %v7240_v3 = vpop.eup %7239  ;;  %v9785_v29 = vpop.permute.xlu1 %805  ;;  %1005 = vperm.xlu0 %6717, %v8225_v13   ;;  %1001 = vperm.xlu1 %6718, %v8226_v21   ;;  %7259 = vtanh.f32 %v2906_v50  ;;  %v6014_v60 = vmul.f32 -1.442695, %v2891_v1  ;;  %v847_v36 = vmul.f32 %v9627_v24, %v8670_v30 }
 0x345   : > { %v2995_v53 = vadd.f32 1.0, %v7240_v3  ;;  %v7242_v11 = vpop.eup %7241  ;;  %v868_v6 = vmul.f32 %v9785_v29, %v8665_v19  ;;  %v9795_v2 = vpop.f32.mrb[58].mxu0  ;;  %v6036_v3 = vmul.f32 -1.442695, %v2913_v32  ;;  %v2916_v13 = vadd.f32 %v9731_v14, %v928_v61  ;;  %v8228_v61 = vld [vmem:[%s8492_s11 + $0x70] sm:$0xff] }
 0x346   : > { %v9797_v55 = vpop.f32.mrb[58].mxu1  ;;  %v7244_v62 = vpop.eup %7243  ;;  %v3203_v4 = vadd.f32 1.0, %v7242_v11  ;;  %v2910_v32 = vadd.f32 %v9691_v48, %v922_v9  ;;  %v929_v14 = vadd.f32 %v865_v45, %v9023_v46 }
 0x347   : > { %7261 = vrcp.f32 %v2995_v53  ;;  %v9802_v50 = vpop.f32.mrb[59].mxu0  ;;  %v9804_v38 = vpop.f32.mrb[59].mxu1  ;;  %v3249_v20 = vmul.f32 %v7244_v62, %v9312_v52  ;;  %v8227_v53 = vld [vmem:[%s8492_s11 + $0x78] sm:$0xff]  ;;  %v6005_v48 = vmul.f32 -1.442695, %v2916_v13  ;;  %v932_v9 = vadd.f32 %v868_v6, %v8672_v34 }
 0x348   : > { %11795 = vst [vmem:[#allocation66_spill] sm:$0xff] %v9804_v38  ;;  %v7246_v21 = vpop.eup %7245  ;;  %7263 = vpow2.f32 %v6004_v18  ;;  %1013 = vperm.xlu0 %6717, %v8227_v53   ;;  %1009 = vperm.xlu1 %6718, %v8228_v61   ;;  %v2917_v45 = vadd.f32 %v9738_v25, %v929_v14  ;;  %v869_v61 = vmul.f32 %v9785_v29, %v9017_v26 }
 0x349   : > { %v7248_v22 = vpop.eup %7247  ;;  %7265 = vrcp.f32 %v3203_v4  ;;  %v9816_v52 = vpop.f32.mrb[60].mxu0  ;;  %v9820_v18 = vadd.f32 %v3265_v42, %v3249_v20  ;;  %v911_v42 = vadd.f32 %v847_v36, %v8677_v54  ;;  %v926_v13 = vadd.f32 %v862_v44, %v8694_v47 }
 0x34a   : > { %v7250_v11 = vpop.eup %7249  ;;  %v3266_v1 = vmul.f32 %v7248_v22, %v7246_v21  ;;  %v9818_v49 = vpop.f32.mrb[60].mxu1  ;;  %7267 = vpow2.f32 %v6036_v3  ;;  %v6015_v22 = vmul.f32 -1.442695, %v2895_v56  ;;  %v2920_v14 = vadd.f32 %v9749_v8, %v932_v9 }
 0x34b   : > { %11796 = vst [vmem:[#allocation48_spill] sm:$0xff] %v9820_v18  ;;  %v7252_v24 = vpop.eup %7251  ;;  %v9824_v62 = vpop.f32.mrb[61].mxu0  ;;  %7269 = vpow2.f32 %v6014_v60  ;;  %v3101_v6 = vadd.f32 1.0, %v7250_v11  ;;  %v6037_v38 = vmul.f32 -1.442695, %v2917_v45  ;;  %v2914_v44 = vadd.f32 %v9712_v27, %v926_v13 }
 0x34c   : > { %v9826_v4 = vpop.f32.mrb[61].mxu1  ;;  %v7254_v21 = vpop.eup %7253  ;;  %v2996_v53 = vadd.f32 1.0, %v7252_v24  ;;  %7271 = vtanh.f32 %v2910_v32  ;;  %v866_v8 = vmul.f32 %v9762_v37, %v8689_v57  ;;  %v933_v9 = vadd.f32 %v869_v61, %v9023_v46 }
 0x34d   : > { %11797 = vst [vmem:[#allocation58_spill] sm:$0xff] %v9826_v4  ;;  %v9830_v20 = vpop.permute.xlu0 %809  ;;  %v3250_v3 = vmul.f32 %v7254_v21, %v9331_v12  ;;  %v7256_v25 = vpop.eup %7255 }
 0x34e   : > { %7273 = vrcp.f32 %v2996_v53  ;;  %v9836_v60 = vpop.f32.mrb[62].mxu0  ;;  %v9838_v56 = vpop.f32.mrb[62].mxu1  ;;  %v3204_v4 = vadd.f32 1.0, %v7256_v25  ;;  %v872_v36 = vmul.f32 %v9830_v20, %v8665_v19  ;;  %v873_v45 = vmul.f32 %v9830_v20, %v9017_v26 }
 0x34f   : > { %11798 = vst [vmem:[#allocation49_spill] sm:$0xff] %v9838_v56  ;;  %v7258_v24 = vpop.eup %7257  ;;  %7275 = vpow2.f32 %v6005_v48  ;;  %v9842_v12 = vpop.f32.mrb[63].mxu0  ;;  %v2899_v48 = vadd.f32 %v9652_v10, %v911_v42  ;;  %v9853_v53 = vadd.f32 %v3266_v1, %v3250_v3  ;;  %v2921_v27 = vadd.f32 %v9758_v51, %v933_v9 }
 0x350   : > { %v9844_v32 = vpop.f32.mrb[63].mxu1  ;;  %v7260_v11 = vpop.eup %7259  ;;  %7277 = vpow2.f32 %v6015_v22  ;;  %v6006_v22 = vmul.f32 -1.442695, %v2920_v14  ;;  %v3102_v18 = vadd.f32 1.0, %v7258_v24  ;;  %v936_v61 = vadd.f32 %v872_v36, %v8672_v34 }
 0x351   : > { %11799 = vst [vmem:[#allocation64_spill] sm:$0xff] %v9844_v32  ;;  %v7262_v21 = vpop.eup %7261  ;;  %7279 = vrcp.f32 %v3204_v4  ;;  %v851_v10 = vmul.f32 %v9641_v63, %v8670_v30  ;;  %v930_v1 = vadd.f32 %v866_v8, %v8694_v47  ;;  %v6016_v3 = vmul.f32 -1.442695, %v2899_v48  ;;  %v9863_v24 = vpop.permute.xlu1 %813 }
 0x352   : > { %v7264_v25 = vpop.eup %7263  ;;  %7281 = vrcp.f32 %v3101_v6  ;;  %v3267_v32 = vmul.f32 %v7262_v21, %v7260_v11  ;;  %v2924_v6 = vadd.f32 %v9774_v16, %v936_v61  ;;  %v937_v51 = vadd.f32 %v873_v45, %v9023_v46 }
 0x353   : > { %v7266_v13 = vpop.eup %7265  ;;  %v2997_v56 = vadd.f32 1.0, %v7264_v25  ;;  %7283 = vpow2.f32 %v6037_v38  ;;  %v6038_v36 = vmul.f32 -1.442695, %v2921_v27  ;;  %v870_v8 = vmul.f32 %v9785_v29, %v8689_v57 }
 0x354   : > { %v3251_v4 = vmul.f32 %v7266_v13, %v9360_v40  ;;  %7285 = vtanh.f32 %v2914_v44  ;;  %v7268_v42 = vpop.eup %7267  ;;  %v2918_v40 = vadd.f32 %v9733_v15, %v930_v1  ;;  %v2925_v44 = vadd.f32 %v9779_v41, %v937_v51 }
 0x355   : > { %7287 = vrcp.f32 %v2997_v56  ;;  %v7270_v14 = vpop.eup %7269  ;;  %v3205_v38 = vadd.f32 1.0, %v7268_v42  ;;  %v876_v56 = vmul.f32 %v9863_v24, %v8665_v19  ;;  %v6007_v48 = vmul.f32 -1.442695, %v2924_v6  ;;  %v9883_v42 = vpop.permute.xlu0 %817 }
 0x356   : > { %7289 = vpow2.f32 %v6006_v22  ;;  %v9865_v11 = vadd.f32 %v3267_v32, %v3251_v4  ;;  %v7272_v63 = vpop.eup %7271  ;;  %v3103_v45 = vadd.f32 1.0, %v7270_v14  ;;  %v6039_v41 = vmul.f32 -1.442695, %v2925_v44 }
 0x357   : > { %7291 = vrcp.f32 %v3102_v18  ;;  %v915_v18 = vadd.f32 %v851_v10, %v8677_v54  ;;  %v940_v22 = vadd.f32 %v876_v56, %v8672_v34  ;;  %v877_v27 = vmul.f32 %v9863_v24, %v9017_v26 }
 0x358   : > { %v7274_v16 = vpop.eup %7273  ;;  %7293 = vrcp.f32 %v3205_v38  ;;  %v934_v4 = vadd.f32 %v870_v8, %v8694_v47  ;;  %v874_v10 = vmul.f32 %v9830_v20, %v8689_v57 }
 0x359   : > { %v7276_v9 = vpop.eup %7275  ;;  %7295 = vpow2.f32 %v6016_v3  ;;  %v3268_v21 = vmul.f32 %v7274_v16, %v7272_v63  ;;  %v2903_v6 = vadd.f32 %v9667_v31, %v915_v18  ;;  %v2928_v51 = vadd.f32 %v9795_v2, %v940_v22  ;;  %v9901_v18 = vpop.permute.xlu1 %821 }
 0x35a   : > { %v7278_v32 = vpop.eup %7277  ;;  %v2998_v25 = vadd.f32 1.0, %v7276_v9  ;;  %7297 = vpow2.f32 %v6038_v36  ;;  %v941_v44 = vadd.f32 %v877_v27, %v9023_v46  ;;  %v880_v31 = vmul.f32 %v9883_v42, %v8665_v19 }
 0x35b   : > { %v7280_v15 = vpop.eup %7279  ;;  %7299 = vtanh.f32 %v2918_v40  ;;  %v3104_v3 = vadd.f32 1.0, %v7278_v32  ;;  %v855_v40 = vmul.f32 %v9658_v28, %v8670_v30  ;;  %v938_v28 = vadd.f32 %v874_v10, %v8694_v47 }
 0x35c   : > { %v9877_v13 = vpop.eup %7281  ;;  %v3252_v61 = vmul.f32 %v7280_v15, %v9386_v59  ;;  %7301 = vrcp.f32 %v2998_v25  ;;  %v2922_v59 = vadd.f32 %v9751_v5, %v934_v4  ;;  %v6008_v5 = vmul.f32 -1.442695, %v2928_v51 }
 0x35d   : > { %v7284_v1 = vpop.eup %7283  ;;  %7303 = vpow2.f32 %v6007_v48  ;;  %v2929_v9 = vadd.f32 %v9802_v50, %v941_v44  ;;  %v6017_v48 = vmul.f32 -1.442695, %v2903_v6  ;;  %v881_v32 = vmul.f32 %v9883_v42, %v9017_v26 }
 0x35e   : > { %v7286_v14 = vpop.eup %7285  ;;  %7305 = vrcp.f32 %v3103_v45  ;;  %v3206_v38 = vadd.f32 1.0, %v7284_v1  ;;  %v9888_v36 = vadd.f32 %v3268_v21, %v3252_v61  ;;  %v919_v25 = vadd.f32 %v855_v40, %v8677_v54 }
 0x35f   : > { %v7288_v63 = vpop.eup %7287  ;;  %7307 = vpow2.f32 %v6039_v41  ;;  %v859_v15 = vmul.f32 %v9685_v39, %v8670_v30  ;;  %v2926_v22 = vadd.f32 %v9776_v23, %v938_v28  ;;  %v878_v27 = vmul.f32 %v9863_v24, %v8689_v57 }
 0x360   : > { %v7290_v56 = vpop.eup %7289  ;;  %v3269_v16 = vmul.f32 %v7288_v63, %v7286_v14  ;;  %7309 = vrcp.f32 %v3206_v38  ;;  %v944_v61 = vadd.f32 %v880_v31, %v8672_v34  ;;  %v6040_v1 = vmul.f32 -1.442695, %v2929_v9 }
 0x361   : > { %v9895_v2 = vpop.eup %7291  ;;  %7311 = vrcp.f32 %v3104_v3  ;;  %v2999_v8 = vadd.f32 1.0, %v7290_v56  ;;  %v945_v6 = vadd.f32 %v881_v32, %v9023_v46  ;;  %v884_v23 = vmul.f32 %v9901_v18, %v8665_v19 }
 0x362   : > { %v7294_v21 = vpop.eup %7293  ;;  %7313 = vtanh.f32 %v2922_v59  ;;  %v2907_v38 = vadd.f32 %v9681_v0, %v919_v25  ;;  %v923_v40 = vadd.f32 %v859_v15, %v8677_v54  ;;  %v863_v44 = vmul.f32 %v9716_v17, %v8670_v30  ;;  %v11800_v15 = vld [vmem:[#allocation41_spill] sm:$0xff] }
 0x363   : > { %v7296_v45 = vpop.eup %7295  ;;  %v3253_v41 = vmul.f32 %v7294_v21, %v9406_v35  ;;  %7315 = vrcp.f32 %v2999_v8  ;;  %v2932_v35 = vadd.f32 %v9816_v52, %v944_v61  ;;  %v2933_v31 = vadd.f32 %v9824_v62, %v945_v6 }
 0x364   : > { %v7298_v50 = vpop.eup %7297  ;;  %7317 = vtanh.f32 %v9665_v7  ;;  %v3105_v14 = vadd.f32 1.0, %v7296_v45  ;;  %v885_v0 = vmul.f32 %v9901_v18, %v9017_v26  ;;  %v948_v21 = vadd.f32 %v884_v23, %v8672_v34 }
 0x365   : > { %v7300_v4 = vpop.eup %7299  ;;  %v3207_v10 = vadd.f32 1.0, %v7298_v50  ;;  %7319 = vpow2.f32 %v6008_v5  ;;  %v9912_v3 = vadd.f32 %v3269_v16, %v3253_v41  ;;  %v942_v16 = vadd.f32 %v878_v27, %v8694_v47 }
 0x366   : > { %v7302_v39 = vpop.eup %7301  ;;  %7321 = vpow2.f32 %v6017_v48  ;;  %v6009_v9 = vmul.f32 -1.442695, %v2932_v35  ;;  %v6018_v17 = vmul.f32 -1.442695, %v2907_v38  ;;  %v2911_v28 = vadd.f32 %v9699_v43, %v923_v40  ;;  %v11801_v35 = vld [vmem:[#allocation55_spill] sm:$0xff] }
 0x367   : > { %v7304_v51 = vpop.eup %7303  ;;  %v3270_v59 = vmul.f32 %v7302_v39, %v7300_v4  ;;  %7323 = vrcp.f32 %v3207_v10  ;;  %v2930_v62 = vadd.f32 %v9797_v55, %v942_v16  ;;  %v6041_v41 = vmul.f32 -1.442695, %v2933_v31  ;;  %v11802_v40 = vld [vmem:[#allocation43_spill] sm:$0xff] }
 0x368   : > { %v9919_v63 = vpop.eup %7305  ;;  %v3000_v56 = vadd.f32 1.0, %v7304_v51  ;;  %7325 = vtanh.f32 %v2926_v22  ;;  %v2936_v50 = vadd.f32 %v9836_v60, %v948_v21  ;;  %v927_v61 = vadd.f32 %v863_v44, %v8677_v54 }
 0x369   : > { %v7308_v52 = vpop.eup %7307  ;;  %7327 = vpow2.f32 %v6040_v1  ;;  %v6019_v10 = vmul.f32 -1.442695, %v2911_v28  ;;  %v949_v1 = vadd.f32 %v885_v0, %v9023_v46  ;;  %v867_v51 = vmul.f32 %v9762_v37, %v8670_v30 }
 0x36a   : > { %v7310_v8 = vpop.eup %7309  ;;  %7329 = vrcp.f32 %v3000_v56  ;;  %v3208_v5 = vadd.f32 1.0, %v7308_v52  ;;  %v2915_v60 = vadd.f32 %v11801_v35, %v927_v61  ;;  %v11803_v44 = vmov 0.0  }
 0x36b   : > { %v9929_v48 = vpop.eup %7311  ;;  %7331 = vrcp.f32 %v3105_v14  ;;  %v3254_v32 = vmul.f32 %v7310_v8, %v9428_v58  ;;  %v882_v58 = vmul.f32 %v9883_v42, %v8689_v57  ;;  %v6010_v14 = vmul.f32 -1.442695, %v2936_v50  ;;  %v11804_v8 = vld [vmem:[#allocation42_spill] sm:$0xff]  ;;  %v11807_v50 = vld [vmem:[#allocation44_spill] sm:$0xff] }
 0x36c   : > { %v7314_v45 = vpop.eup %7313  ;;  %7333 = vrcp.f32 %v3208_v5  ;;  %v2937_v38 = vadd.f32 %v9842_v12, %v949_v1  ;;  %v6020_v31 = vmul.f32 -1.442695, %v2915_v60  ;;  %v886_v61 = vmul.f32 %v9901_v18, %v8689_v57 }
 0x36d   : > { %v7316_v25 = vpop.eup %7315  ;;  %7335 = vtanh.f32 %v11800_v15  ;;  %v9936_v22 = vadd.f32 %v3270_v59, %v3254_v32  ;;  %v946_v16 = vadd.f32 %v882_v58, %v8694_v47  ;;  %v871_v32 = vmul.f32 %v9785_v29, %v8670_v30 }
 0x36e   : > { %v7318_v27 = vpop.eup %7317  ;;  %v3271_v4 = vmul.f32 %v7316_v25, %v7314_v45  ;;  %7337 = vpow2.f32 %v6009_v9  ;;  %v931_v9 = vadd.f32 %v867_v51, %v8677_v54  ;;  %v11806_v25 = vld [vmem:[#allocation46_spill] sm:$0xff] }
 0x36f   : > { %v7320_v43 = vpop.eup %7319  ;;  %7339 = vpow2.f32 %v6018_v17  ;;  %v3309_v55 = vmul.f32 %v7318_v27, %v9877_v13  ;;  %v6042_v17 = vmul.f32 -1.442695, %v2937_v38  ;;  %v2934_v45 = vadd.f32 %v9818_v49, %v946_v16  ;;  %v11810_v38 = vld [vmem:[#allocation49_spill] sm:$0xff] }
 0x370   : > { %v7322_v39 = vpop.eup %7321  ;;  %v3001_v6 = vadd.f32 1.0, %v7320_v43  ;;  %7341 = vtanh.f32 %v2930_v62  ;;  %v875_v49 = vmul.f32 %v9830_v20, %v8670_v30  ;;  %v935_v35 = vadd.f32 %v871_v32, %v8677_v54  ;;  %v11809_v20 = vld [vmem:[#allocation56_spill] sm:$0xff] }
 0x371   : > { %v7324_v23 = vpop.eup %7323  ;;  %3395 = vmatmul.mubr.f32.gmra.mrb[66].mxu0 %v3309_v55  ;;  %3556 = vmatmul.mubr.f32.gmra.mrb[66].mxu1 %v3309_v55  ;;  %7343 = vpow2.f32 %v6041_v41  ;;  %v3106_v52 = vadd.f32 1.0, %v7322_v39  ;;  %v2919_v41 = vadd.f32 %v11806_v25, %v931_v9 }
 0x372   : > { %v7326_v59 = vpop.eup %7325  ;;  %v3255_v13 = vmul.f32 %v7324_v23, %v11802_v40  ;;  %7345 = vrcp.f32 %v3001_v6  ;;  %3400 = vmatprep.mubr.f32.mxu0 %v11803_v44  ;;  %3561 = vmatprep.mubr.f32.mxu1 %v11803_v44  ;;  %v2923_v51 = vadd.f32 %v11809_v20, %v935_v35  ;;  %v11811_v40 = vld [vmem:[#allocation48_spill] sm:$0xff]  ;;  %v887_v35 = vmul.f32 %v9901_v18, %v8670_v30 }
 0x373   : > { %v7328_v56 = vpop.eup %7327  ;;  %7347 = vpow2.f32 %v6019_v10  ;;  %v6021_v39 = vmul.f32 -1.442695, %v2919_v41  ;;  %v883_v41 = vmul.f32 %v9883_v42, %v8670_v30 }
 0x374   : > { %v7330_v37 = vpop.eup %7329  ;;  %v3209_v0 = vadd.f32 1.0, %v7328_v56  ;;  %7349 = vtanh.f32 %v11804_v8  ;;  %v9952_v5 = vadd.f32 %v3271_v4, %v3255_v13  ;;  %v939_v56 = vadd.f32 %v875_v49, %v8677_v54 }
 0x375   : > { %v9954_v12 = vpop.eup %7331  ;;  %v3272_v21 = vmul.f32 %v7330_v37, %v7326_v59  ;;  %7351 = vpow2.f32 %v6010_v14  ;;  %v879_v37 = vmul.f32 %v9863_v24, %v8670_v30 }
 0x376   : > { %11805 = vst [vmem:[#allocation61_spill] sm:$0xff] %v9952_v5  ;;  %v7334_v28 = vpop.eup %7333  ;;  %7353 = vrcp.f32 %v3209_v0 }
 0x377   : > { %v7336_v62 = vpop.eup %7335  ;;  %7355 = vrcp.f32 %v3106_v52  ;;  %v3256_v27 = vmul.f32 %v7334_v28, %v11807_v50  ;;  %v11812_v28 = vld [vmem:[#allocation47_spill] sm:$0xff] }
 0x378   : > { %v7338_v4 = vpop.eup %7337  ;;  %7357 = vpow2.f32 %v6020_v31  ;;  %v3310_v58 = vmul.f32 %v7336_v62, %v9895_v2  ;;  %v950_v2 = vadd.f32 %v886_v61, %v8694_v47  ;;  %v2927_v32 = vadd.f32 %v11812_v28, %v939_v56 }
 0x379   : > { %v7340_v43 = vpop.eup %7339  ;;  %v3002_v10 = vadd.f32 1.0, %v7338_v4  ;;  %7359 = vpow2.f32 %v6042_v17  ;;  %v9965_v29 = vadd.f32 %v3272_v21, %v3256_v27  ;;  %v6022_v17 = vmul.f32 -1.442695, %v2923_v51 }
 0x37a   : > { %v7342_v55 = vpop.eup %7341  ;;  %3401 = vmatmul.mubr.f32.gmra.mrb[68].mxu0 %v3310_v58  ;;  %3562 = vmatmul.mubr.f32.gmra.mrb[68].mxu1 %v3310_v58  ;;  %7361 = vtanh.f32 %v2934_v45  ;;  %v2938_v59 = vadd.f32 %v11810_v38, %v950_v2  ;;  %v3107_v16 = vadd.f32 1.0, %v7340_v43  ;;  %v11813_v45 = vld [vmem:[#allocation60_spill] sm:$0xff]  ;;  %v6023_v58 = vmul.f32 -1.442695, %v2927_v32  ;;  %v11815_v43 = vld [vmem:[#allocation66_spill] sm:$0xff] }
 0x37b   : > { %11808 = vst [vmem:[#allocation50_spill] sm:$0xff] %v9965_v29  ;;  %v7344_v1 = vpop.eup %7343  ;;  %7363 = vrcp.f32 %v3002_v10  ;;  %3406 = vmatprep.mubr.f32.mxu0 %v11803_v44  ;;  %3567 = vmatprep.mubr.f32.mxu1 %v11803_v44  ;;  %v11817_v38 = vld [vmem:[#allocation40_spill] sm:$0xff] }
 0x37c   : > { %v7346_v60 = vpop.eup %7345  ;;  %v3210_v6 = vadd.f32 1.0, %v7344_v1  ;;  %7365 = vtanh.f32 %v9799_v33  ;;  %v947_v1 = vadd.f32 %v883_v41, %v8677_v54 }
 0x37d   : > { %v7348_v23 = vpop.eup %7347  ;;  %v3273_v14 = vmul.f32 %v7346_v60, %v7342_v55  ;;  %7367 = vtanh.f32 %v11811_v40 }
 0x37e   : > { %v7350_v13 = vpop.eup %7349  ;;  %7369 = vrcp.f32 %v3210_v6  ;;  %v3108_v55 = vadd.f32 1.0, %v7348_v23  ;;  %v11816_v6 = vld [vmem:[#allocation58_spill] sm:$0xff] }
 0x37f   : > { %v7352_v52 = vpop.eup %7351  ;;  %7371 = vpow2.f32 %v6021_v39  ;;  %v3311_v31 = vmul.f32 %v7350_v13, %v9919_v63  ;;  %v943_v63 = vadd.f32 %v879_v37, %v8677_v54  ;;  %v2935_v20 = vadd.f32 %v11816_v6, %v947_v1 }
 0x380   : > { %v7354_v0 = vpop.eup %7353  ;;  %v3003_v9 = vadd.f32 1.0, %v7352_v52  ;;  %7373 = vtanh.f32 %v9853_v53 }
 0x381   : > { %v7356_v21 = vpop.eup %7355  ;;  %v3257_v62 = vmul.f32 %v7354_v0, %v11813_v45  ;;  %3407 = vmatmul.mubr.f32.gmra.mrb[70].mxu0 %v3311_v31  ;;  %3568 = vmatmul.mubr.f32.gmra.mrb[70].mxu1 %v3311_v31  ;;  %7375 = vtanh.f32 %v2938_v59  ;;  %v2931_v42 = vadd.f32 %v11815_v43, %v943_v63  ;;  %v6025_v37 = vmul.f32 -1.442695, %v2935_v20 }
 0x382   : > { %v7358_v25 = vpop.eup %7357  ;;  %7377 = vrcp.f32 %v3003_v9  ;;  %3412 = vmatprep.mubr.f32.mxu0 %v11803_v44  ;;  %3573 = vmatprep.mubr.f32.mxu1 %v11803_v44 }
 0x383   : > { %v7360_v24 = vpop.eup %7359  ;;  %7379 = vrcp.f32 %v3107_v16  ;;  %v9989_v50 = vadd.f32 %v3273_v14, %v3257_v62  ;;  %v6024_v14 = vmul.f32 -1.442695, %v2931_v42  ;;  %v3109_v56 = vadd.f32 1.0, %v7358_v25  ;;  %v11820_v25 = vld [vmem:[#allocation45_spill] sm:$0xff] }
 0x384   : > { %v7362_v27 = vpop.eup %7361  ;;  %v3211_v61 = vadd.f32 1.0, %v7360_v24  ;;  %7381 = vtanh.f32 %v9865_v11 }
 0x385   : > { %11814 = vst [vmem:[#allocation63_spill] sm:$0xff] %v9989_v50  ;;  %v7364_v4 = vpop.eup %7363  ;;  %7383 = vpow2.f32 %v6022_v17 }
 0x386   : > { %v7366_v10 = vpop.eup %7365  ;;  %v3274_v49 = vmul.f32 %v7364_v4, %v7362_v27  ;;  %7385 = vrcp.f32 %v3211_v61 }
 0x387   : > { %v7368_v39 = vpop.eup %7367  ;;  %v3312_v2 = vmul.f32 %v7366_v10, %v9929_v48  ;;  %7387 = vtanh.f32 %v9888_v36  ;;  %v951_v48 = vadd.f32 %v887_v35, %v8677_v54 }
 0x388   : > { %v7370_v60 = vpop.eup %7369  ;;  %7389 = vpow2.f32 %v6023_v58  ;;  %v3313_v59 = vmul.f32 %v7368_v39, %v9954_v12  ;;  %v11819_v12 = vld [vmem:[#allocation64_spill] sm:$0xff] }
 0x389   : > { %v7372_v51 = vpop.eup %7371  ;;  %v3258_v23 = vmul.f32 %v7370_v60, %v11817_v38  ;;  %3413 = vmatmul.mubr.f32.gmra.mrb[72].mxu0 %v3312_v2  ;;  %3574 = vmatmul.mubr.f32.gmra.mrb[72].mxu1 %v3312_v2  ;;  %7391 = vrcp.f32 %v3108_v55  ;;  %v2939_v9 = vadd.f32 %v11819_v12, %v951_v48 }
 0x38a   : > { %v7374_v13 = vpop.eup %7373  ;;  %3418 = vmatprep.mubr.f32.mxu0 %v11803_v44  ;;  %3579 = vmatprep.mubr.f32.mxu1 %v11803_v44  ;;  %7393 = vtanh.f32 %v9912_v3  ;;  %v3110_v32 = vadd.f32 1.0, %v7372_v51 }
 0x38b   : > { %v7376_v18 = vpop.eup %7375  ;;  %v10004_v52 = vadd.f32 %v3274_v49, %v3258_v23  ;;  %7395 = vpow2.f32 %v6024_v14  ;;  %v3314_v17 = vmul.f32 %v7374_v13, %v7356_v21  ;;  %v6026_v24 = vmul.f32 -1.442695, %v2939_v9 }
 0x38c   : > { %v7378_v16 = vpop.eup %7377  ;;  %7397 = vrcp.f32 %v3109_v56 }
 0x38d   : > { %11818 = vst [vmem:[#allocation65_spill] sm:$0xff] %v10004_v52  ;;  %v7380_v31 = vpop.eup %7379  ;;  %v3275_v0 = vmul.f32 %v7378_v16, %v7376_v18  ;;  %3419 = vmatmul.mubr.f32.gmra.mrb[74].mxu0 %v3313_v59  ;;  %3580 = vmatmul.mubr.f32.gmra.mrb[74].mxu1 %v3313_v59  ;;  %7399 = vtanh.f32 %v9936_v22 }
 0x38e   : > { %v7382_v28 = vpop.eup %7381  ;;  %3424 = vmatprep.mubr.f32.mxu0 %v11803_v44  ;;  %3585 = vmatprep.mubr.f32.mxu1 %v11803_v44  ;;  %7401 = vpow2.f32 %v6025_v37 }
 0x38f   : > { %v7384_v45 = vpop.eup %7383  ;;  %v3315_v63 = vmul.f32 %v7382_v28, %v7380_v31  ;;  %7403 = vrcp.f32 %v3110_v32 }
 0x390   : > { %v7386_v62 = vpop.eup %7385  ;;  %v3111_v21 = vadd.f32 1.0, %v7384_v45  ;;  %7405 = vtanh.f32 %v9952_v5 }
 0x391   : > { %v3259_v41 = vmul.f32 %v7386_v62, %v11820_v25  ;;  %3425 = vmatmul.mubr.f32.gmra.mrb[76].mxu0 %v3314_v17  ;;  %3586 = vmatmul.mubr.f32.gmra.mrb[76].mxu1 %v3314_v17  ;;  %v7388_v27 = vpop.eup %7387  ;;  %7407 = vpow2.f32 %v6026_v24 }
 0x392   : > { %3430 = vmatprep.mubr.f32.mxu0 %v11803_v44  ;;  %3591 = vmatprep.mubr.f32.mxu1 %v11803_v44  ;;  %v7390_v61 = vpop.eup %7389  ;;  %7409 = vrcp.f32 %v3111_v21 }
 0x393   : > { %v10014_v4 = vadd.f32 %v3275_v0, %v3259_v41  ;;  %v7392_v58 = vpop.eup %7391  ;;  %v3112_v10 = vadd.f32 1.0, %v7390_v61  ;;  %7411 = vtanh.f32 %v9965_v29 }
 0x394   : > { %v3316_v43 = vmul.f32 %v7392_v58, %v7388_v27  ;;  %v7394_v42 = vpop.eup %7393 }
 0x395   : > { %11821 = vst [vmem:[#allocation51_spill] sm:$0xff] %v10014_v4  ;;  %3431 = vmatmul.mubr.f32.gmra.mrb[78].mxu0 %v3315_v63  ;;  %3592 = vmatmul.mubr.f32.gmra.mrb[78].mxu1 %v3315_v63  ;;  %v7396_v55 = vpop.eup %7395  ;;  %7413 = vrcp.f32 %v3112_v10 }
 0x396   : > { %3436 = vmatprep.mubr.f32.mxu0 %v11803_v44  ;;  %3597 = vmatprep.mubr.f32.mxu1 %v11803_v44  ;;  %v7398_v49 = vpop.eup %7397  ;;  %v3113_v35 = vadd.f32 1.0, %v7396_v55  ;;  %7415 = vtanh.f32 %v9989_v50 }
 0x397   : > { %v3317_v1 = vmul.f32 %v7398_v49, %v7394_v42  ;;  %v7400_v39 = vpop.eup %7399 }
 0x398   : > { %v7402_v2 = vpop.eup %7401  ;;  %7417 = vrcp.f32 %v3113_v35 }
 0x399   : > { %3437 = vmatmul.mubr.f32.gmra.mrb[80].mxu0 %v3316_v43  ;;  %3598 = vmatmul.mubr.f32.gmra.mrb[80].mxu1 %v3316_v43  ;;  %v7404_v60 = vpop.eup %7403  ;;  %v3114_v51 = vadd.f32 1.0, %v7402_v2  ;;  %7419 = vtanh.f32 %v10004_v52 }
 0x39a   : > { %3442 = vmatprep.mubr.f32.mxu0 %v11803_v44  ;;  %3603 = vmatprep.mubr.f32.mxu1 %v11803_v44  ;;  %v3318_v6 = vmul.f32 %v7404_v60, %v7400_v39  ;;  %v7406_v20 = vpop.eup %7405 }
 0x39b   : > { %v7408_v14 = vpop.eup %7407  ;;  %7421 = vrcp.f32 %v3114_v51 }
 0x39c   : > { %v7410_v38 = vpop.eup %7409  ;;  %v3115_v13 = vadd.f32 1.0, %v7408_v14  ;;  %7423 = vtanh.f32 %v10014_v4 }
 0x39d   : > { %3443 = vmatmul.mubr.f32.gmra.mrb[82].mxu0 %v3317_v1  ;;  %3604 = vmatmul.mubr.f32.gmra.mrb[82].mxu1 %v3317_v1  ;;  %v3319_v23 = vmul.f32 %v7410_v38, %v7406_v20  ;;  %v7412_v59 = vpop.eup %7411 }
 0x39e   : > { %3448 = vmatprep.mubr.f32.mxu0 %v11803_v44  ;;  %3609 = vmatprep.mubr.f32.mxu1 %v11803_v44  ;;  %7425 = vrcp.f32 %v3115_v13 }
 0x39f   : > { %v7414_v56 = vpop.eup %7413 }
 0x3a0   : > { %v3320_v18 = vmul.f32 %v7414_v56, %v7412_v59  ;;  %v7416_v48 = vpop.eup %7415  ;;  %v11822_v59 = vld [vmem:[#allocation57_spill] sm:$0xff] }
 0x3a1   : > { %3449 = vmatmul.mubr.f32.gmra.mrb[84].mxu0 %v3318_v6  ;;  %3610 = vmatmul.mubr.f32.gmra.mrb[84].mxu1 %v3318_v6 }
 0x3a2   : > { %3454 = vmatprep.mubr.f32.mxu0 %v11803_v44  ;;  %3615 = vmatprep.mubr.f32.mxu1 %v11803_v44  ;;  %v7418_v16 = vpop.eup %7417 }
 0x3a3   : > { %v3321_v37 = vmul.f32 %v7418_v16, %v7416_v48  ;;  %v7420_v31 = vpop.eup %7419 }
 0x3a5   : > { %3455 = vmatmul.mubr.f32.gmra.mrb[86].mxu0 %v3319_v23  ;;  %3616 = vmatmul.mubr.f32.gmra.mrb[86].mxu1 %v3319_v23  ;;  %v7422_v0 = vpop.eup %7421 }
 0x3a6   : > { %3460 = vmatprep.mubr.f32.mxu0 %v11803_v44  ;;  %3621 = vmatprep.mubr.f32.mxu1 %v11803_v44  ;;  %v3322_v12 = vmul.f32 %v7422_v0, %v7420_v31  ;;  %v7424_v9 = vpop.eup %7423 }
 0x3a8   : > { %v7426_v17 = vpop.eup %7425 }
 0x3a9   : > { %3461 = vmatmul.mubr.f32.gmra.mrb[88].mxu0 %v3320_v18  ;;  %3622 = vmatmul.mubr.f32.gmra.mrb[88].mxu1 %v3320_v18  ;;  %v3323_v28 = vmul.f32 %v7426_v17, %v7424_v9  ;;  %v954_v32 = vpop.permute.xlu0 %953  ;;  %v11825_v9 = vld [vmem:[#allocation11_spill] sm:$0xff]  ;;  %v11826_v17 = vld [vmem:[#allocation12_spill] sm:$0xff] }
 0x3aa   : > { %3466 = vmatprep.mubr.f32.mxu0 %v11803_v44  ;;  %3627 = vmatprep.mubr.f32.mxu1 %v11803_v44  ;;  %v1016_v45 = vmul.f32 %v954_v32, %v8665_v19  ;;  %v1017_v62 = vmul.f32 %v954_v32, %v9017_v26  ;;  %v1018_v10 = vmul.f32 %v954_v32, %v8689_v57 }
 0x3ab   : > { %v1019_v60 = vmul.f32 %v954_v32, %v8670_v30  ;;  %v11828_v32 = vld [vmem:[#allocation14_spill] sm:$0xff] }
 0x3ac   : > { %v1080_v25 = vadd.f32 %v1016_v45, %v8672_v34  ;;  %v1081_v41 = vadd.f32 %v1017_v62, %v9023_v46  ;;  %v1082_v55 = vadd.f32 %v1018_v10, %v8694_v47  ;;  %v11829_v45 = vld [vmem:[#allocation15_spill] sm:$0xff]  ;;  %v11830_v62 = vld [vmem:[#allocation16_spill] sm:$0xff] }
 0x3ad   : > { %3467 = vmatmul.mubr.f32.gmra.mrb[90].mxu0 %v3321_v37  ;;  %3628 = vmatmul.mubr.f32.gmra.mrb[90].mxu1 %v3321_v37  ;;  %v1083_v6 = vadd.f32 %v1019_v60, %v8677_v54  ;;  %v11841_v10 = vld [vmem:[#allocation27_spill] sm:$0xff]  ;;  %v11848_v60 = vld [vmem:[#allocation34_spill] sm:$0xff] }
 0x3ae   : > { %3472 = vmatprep.mubr.f32.mxu0 %v11803_v44  ;;  %3633 = vmatprep.mubr.f32.mxu1 %v11803_v44 }
 0x3b1   : > { %3473 = vmatmul.mubr.f32.gmra.mrb[92].mxu0 %v3322_v12  ;;  %3634 = vmatmul.mubr.f32.gmra.mrb[92].mxu1 %v3322_v12  ;;  %v11824_v12 = vld [vmem:[#allocation10_spill] sm:$0xff] }
 0x3b2   : > { %3478 = vmatprep.mubr.f32.mxu0 %v11803_v44  ;;  %3639 = vmatprep.mubr.f32.mxu1 %v11803_v44 }
 0x3b5   : > { %3479 = vmatmul.mubr.f32.gmra.mrb[94].mxu0 %v3323_v28  ;;  %3640 = vmatmul.mubr.f32.gmra.mrb[94].mxu1 %v3323_v28  ;;  %v11827_v28 = vld [vmem:[#allocation13_spill] sm:$0xff] }
 0x3b6   : > { %4158 = vmatprep.mubr.f32.mxu0 %v11803_v44  ;;  %4319 = vmatprep.mubr.f32.mxu1 %v11803_v44 }
 0x3d3   : > { %v3390_v24 = vpop.f32.mrb[64].mxu0  ;;  %v3551_v63 = vpop.f32.mrb[64].mxu1 }
 0x3d4   : > { %v3646_v27 = vadd.f32 %v3390_v24, %v1080_v25  ;;  %v3392_v21 = vpop.f32.mrb[65].mxu0  ;;  %v3553_v61 = vpop.f32.mrb[65].mxu1  ;;  %v3648_v49 = vadd.f32 %v3551_v63, %v1082_v55  ;;  %v11831_v25 = vld [vmem:[#allocation17_spill] sm:$0xff]  ;;  %v11833_v24 = vld [vmem:[#allocation19_spill] sm:$0xff]  ;;  %v11834_v63 = vld [vmem:[#allocation20_spill] sm:$0xff] }
 0x3d5   : > { %v3647_v58 = vadd.f32 %v3392_v21, %v1081_v41  ;;  %v3649_v20 = vadd.f32 %v3553_v61, %v1083_v6  ;;  %v11832_v41 = vld [vmem:[#allocation18_spill] sm:$0xff]  ;;  %v11837_v61 = vld [vmem:[#allocation23_spill] sm:$0xff]  ;;  %v11842_v55 = vld [vmem:[#allocation28_spill] sm:$0xff] }
 0x3d6   : > { %v6043_v43 = vmul.f32 -1.442695, %v3646_v27  ;;  %v11835_v27 = vld [vmem:[#allocation21_spill] sm:$0xff]  ;;  %v11836_v21 = vld [vmem:[#allocation22_spill] sm:$0xff]  ;;  %v11849_v6 = vld [vmem:[#allocation35_spill] sm:$0xff] }
 0x3d7   : > { %v6075_v42 = vmul.f32 -1.442695, %v3647_v58  ;;  %v6059_v56 = vmul.f32 -1.442695, %v3649_v20  ;;  %v11838_v58 = vld [vmem:[#allocation24_spill] sm:$0xff] }
 0x3d8   : > { %7427 = vpow2.f32 %v6043_v43  ;;  %v11839_v43 = vld [vmem:[#allocation25_spill] sm:$0xff]  ;;  %v11850_v20 = vld [vmem:[#allocation36_spill] sm:$0xff] }
 0x3d9   : > { %7429 = vpow2.f32 %v6075_v42  ;;  %v11840_v42 = vld [vmem:[#allocation26_spill] sm:$0xff] }
 0x3da   : > { %7431 = vtanh.f32 %v3648_v49  ;;  %v11843_v49 = vld [vmem:[#allocation29_spill] sm:$0xff] }
 0x3e2   : > { %v7428_v1 = vpop.eup %7427 }
 0x3e3   : > { %v7430_v39 = vpop.eup %7429  ;;  %v3758_v35 = vadd.f32 1.0, %v7428_v1  ;;  %v11844_v1 = vld [vmem:[#allocation30_spill] sm:$0xff] }
 0x3e4   : > { %v3966_v2 = vadd.f32 1.0, %v7430_v39  ;;  %v7432_v51 = vpop.eup %7431  ;;  %v11845_v39 = vld [vmem:[#allocation31_spill] sm:$0xff] }
 0x3e5   : > { %7433 = vrcp.f32 %v3758_v35  ;;  %v11846_v35 = vld [vmem:[#allocation32_spill] sm:$0xff] }
 0x3e6   : > { %7435 = vrcp.f32 %v3966_v2  ;;  %v11847_v2 = vld [vmem:[#allocation33_spill] sm:$0xff] }
 0x3e7   : > { %7437 = vpow2.f32 %v6059_v56 }
 0x3ef   : > { %v7434_v14 = vpop.eup %7433 }
 0x3f0   : > { %v7436_v38 = vpop.eup %7435  ;;  %v4030_v23 = vmul.f32 %v7434_v14, %v7432_v51  ;;  %v11851_v51 = vld [vmem:[#allocation37_spill] sm:$0xff]  ;;  %v11852_v14 = vld [vmem:[#allocation38_spill] sm:$0xff] }
 0x3f1   : > { %v4014_v13 = vmul.f32 %v7436_v38, %v11822_v59  ;;  %v7438_v48 = vpop.eup %7437  ;;  %v11853_v38 = vld [vmem:[#allocation39_spill] sm:$0xff] }
 0x3f2   : > { %v3870_v16 = vadd.f32 1.0, %v7438_v48 }
 0x3f3   : > { %v10048_v18 = vadd.f32 %v4030_v23, %v4014_v13  ;;  %v10083_v23 = vpop.permute.xlu1 %957 }
 0x3f4   : > { %v1020_v59 = vmul.f32 %v10083_v23, %v8665_v19  ;;  %v1021_v13 = vmul.f32 %v10083_v23, %v9017_v26 }
 0x3f5   : > { %11823 = vst [vmem:[#allocation52_spill] sm:$0xff] %v10048_v18  ;;  %7439 = vtanh.f32 %v10048_v18 }
 0x3f6   : > { %7441 = vrcp.f32 %v3870_v16  ;;  %v1084_v56 = vadd.f32 %v1020_v59, %v8672_v34  ;;  %v1085_v48 = vadd.f32 %v1021_v13, %v9023_v46 }
 0x3ff   : > { %v7440_v37 = vpop.eup %7439 }
 0x400   : > { %v7442_v31 = vpop.eup %7441 }
 0x401   : > { %v4078_v0 = vmul.f32 %v7442_v31, %v7440_v37 }
 0x403   : > { %4159 = vmatmul.mubr.f32.vlgmr.msra.gmra.mrb[96].mxu0 %v4078_v0  ;;  %4320 = vmatmul.mubr.f32.vlgmr.msra.gmra.mrb[96].mxu1 %v4078_v0 }
 0x404   : > { %4164 = vmatprep.mubr.f32.mxu0 %v11803_v44  ;;  %4325 = vmatprep.mubr.f32.mxu1 %v11803_v44 }
 0x405   : > { %6541 = vmatpush1.bf16.msra.mxu0 %v11824_v12  ;;  %6573 = vmatpush1.bf16.msra.mxu1 %v11825_v9 }
 0x406   : > { %6543 = vmatprep.subr.bf16.mxu0 %v11826_v17  ;;  %6575 = vmatprep.subr.bf16.mxu1 %v11827_v28  ;;  %v10093_v17 = vpop.permute.xlu1 %961 }
 0x409   : > { %6545 = vmatpush1.bf16.msra.mxu0 %v11828_v32  ;;  %6577 = vmatpush1.bf16.msra.mxu1 %v11829_v45  ;;  %v1024_v45 = vmul.f32 %v10093_v17, %v8665_v19 }
 0x40a   : > { %6547 = vmatprep.subr.bf16.mxu0 %v11830_v62  ;;  %6579 = vmatprep.subr.bf16.mxu1 %v11831_v25  ;;  %v1022_v62 = vmul.f32 %v10083_v23, %v8689_v57  ;;  %v1025_v25 = vmul.f32 %v10093_v17, %v9017_v26 }
 0x40d   : > { %6549 = vmatpush1.bf16.msra.mxu0 %v11832_v41  ;;  %6581 = vmatpush1.bf16.msra.mxu1 %v11833_v24  ;;  %v10101_v41 = vpop.permute.xlu0 %965  ;;  %v1088_v24 = vadd.f32 %v1024_v45, %v8672_v34 }
 0x40e   : > { %6551 = vmatprep.subr.bf16.mxu0 %v11834_v63  ;;  %6583 = vmatprep.subr.bf16.mxu1 %v11835_v27  ;;  %v1086_v63 = vadd.f32 %v1022_v62, %v8694_v47 }
 0x411   : > { %6553 = vmatpush1.bf16.msra.mxu0 %v11836_v21  ;;  %6585 = vmatpush1.bf16.msra.mxu1 %v11837_v61  ;;  %v1089_v61 = vadd.f32 %v1025_v25, %v9023_v46  ;;  %v10125_v62 = vpop.permute.xlu0 %973 }
 0x412   : > { %6555 = vmatprep.subr.bf16.mxu0 %v11838_v58  ;;  %6587 = vmatprep.subr.bf16.mxu1 %v11839_v43 }
 0x415   : > { %6557 = vmatpush1.bf16.msra.mxu0 %v11840_v42  ;;  %6589 = vmatpush1.bf16.msra.mxu1 %v11841_v10 }
 0x416   : > { %6559 = vmatprep.subr.bf16.mxu0 %v11842_v55  ;;  %6591 = vmatprep.subr.bf16.mxu1 %v11843_v49  ;;  %v1028_v55 = vmul.f32 %v10101_v41, %v8665_v19 }
 0x419   : > { %6561 = vmatpush1.bf16.msra.mxu0 %v11844_v1  ;;  %6593 = vmatpush1.bf16.msra.mxu1 %v11845_v39  ;;  %v1029_v1 = vmul.f32 %v10101_v41, %v9017_v26 }
 0x41a   : > { %6563 = vmatprep.subr.bf16.mxu0 %v11846_v35  ;;  %6595 = vmatprep.subr.bf16.mxu1 %v11847_v2 }
 0x41b   : > { %v1093_v59 = vadd.f32 %v1029_v1, %v9023_v46 }
 0x41d   : > { %6565 = vmatpush1.bf16.msra.mxu0 %v11848_v60  ;;  %6597 = vmatpush1.bf16.msra.mxu1 %v11849_v6  ;;  %v1092_v60 = vadd.f32 %v1028_v55, %v8672_v34 }
 0x41e   : > { %6567 = vmatprep.subr.bf16.mxu0 %v11850_v20  ;;  %6599 = vmatprep.subr.bf16.mxu1 %v11851_v51  ;;  %v1026_v51 = vmul.f32 %v10093_v17, %v8689_v57 }
 0x421   : > { %6569 = vmatpush1.bf16.msra.mxu0 %v11852_v14  ;;  %6601 = vmatpush1.bf16.msra.mxu1 %v11853_v38 }
 0x444   : > { %v3396_v16 = vpop.f32.mrb[66].mxu0  ;;  %v3557_v37 = vpop.f32.mrb[66].mxu1 }
 0x445   : > { %v3650_v31 = vadd.f32 %v3396_v16, %v1084_v56  ;;  %v3398_v0 = vpop.f32.mrb[67].mxu0  ;;  %v10091_v12 = vpop.f32.mrb[67].mxu1  ;;  %v3652_v39 = vadd.f32 %v3557_v37, %v1086_v63 }
 0x446   : > { %v3651_v9 = vadd.f32 %v3398_v0, %v1085_v48  ;;  %v10118_v37 = vpop.permute.xlu1 %969 }
 0x447   : > { %v6044_v28 = vmul.f32 -1.442695, %v3650_v31  ;;  %v1033_v45 = vmul.f32 %v10118_v37, %v9017_v26 }
 0x448   : > { %v6076_v32 = vmul.f32 -1.442695, %v3651_v9  ;;  %v1032_v9 = vmul.f32 %v10118_v37, %v8665_v19 }
 0x449   : > { %7443 = vpow2.f32 %v6044_v28  ;;  %v1090_v28 = vadd.f32 %v1026_v51, %v8694_v47 }
 0x44a   : > { %7445 = vpow2.f32 %v6076_v32  ;;  %v1096_v63 = vadd.f32 %v1032_v9, %v8672_v34 }
 0x44d   : > { %v3402_v27 = vpop.f32.mrb[68].mxu0  ;;  %v3563_v21 = vpop.f32.mrb[68].mxu1 }
 0x44e   : > { %v3654_v58 = vadd.f32 %v3402_v27, %v1088_v24  ;;  %v3404_v43 = vpop.f32.mrb[69].mxu0  ;;  %v10106_v42 = vpop.f32.mrb[69].mxu1  ;;  %v3656_v25 = vadd.f32 %v3563_v21, %v1090_v28  ;;  %v1030_v24 = vmul.f32 %v10101_v41, %v8689_v57  ;;  %v1036_v27 = vmul.f32 %v10125_v62, %v8665_v19 }
 0x44f   : > { %v3655_v10 = vadd.f32 %v3404_v43, %v1089_v61 }
 0x450   : > { %v6045_v49 = vmul.f32 -1.442695, %v3654_v58 }
 0x451   : > { %v6077_v35 = vmul.f32 -1.442695, %v3655_v10  ;;  %v1097_v10 = vadd.f32 %v1033_v45, %v9023_v46 }
 0x452   : > { %7447 = vpow2.f32 %v6045_v49 }
 0x453   : > { %v7444_v2 = vpop.eup %7443  ;;  %7449 = vpow2.f32 %v6077_v35  ;;  %v1037_v35 = vmul.f32 %v10125_v62, %v9017_v26 }
 0x454   : > { %v7446_v6 = vpop.eup %7445  ;;  %v3759_v20 = vadd.f32 1.0, %v7444_v2  ;;  %v3408_v14 = vpop.f32.mrb[70].mxu0  ;;  %7451 = vtanh.f32 %v3652_v39 }
 0x455   : > { %v3569_v38 = vpop.f32.mrb[70].mxu1  ;;  %v3967_v13 = vadd.f32 1.0, %v7446_v6  ;;  %v3658_v56 = vadd.f32 %v3408_v14, %v1092_v60  ;;  %v3410_v48 = vpop.f32.mrb[71].mxu0  ;;  %v1094_v6 = vadd.f32 %v1030_v24, %v8694_v47 }
 0x456   : > { %v10116_v16 = vpop.f32.mrb[71].mxu1  ;;  %7453 = vrcp.f32 %v3759_v20  ;;  %v3659_v31 = vadd.f32 %v3410_v48, %v1093_v59  ;;  %v10139_v2 = vpop.permute.xlu1 %977  ;;  %v1100_v59 = vadd.f32 %v1036_v27, %v8672_v34 }
 0x457   : > { %7455 = vrcp.f32 %v3967_v13  ;;  %v6046_v0 = vmul.f32 -1.442695, %v3658_v56  ;;  %v1040_v13 = vmul.f32 %v10139_v2, %v8665_v19 }
 0x458   : > { %v6078_v32 = vmul.f32 -1.442695, %v3659_v31 }
 0x459   : > { %7457 = vpow2.f32 %v6046_v0 }
 0x45a   : > { %7459 = vpow2.f32 %v6078_v32  ;;  %v3660_v32 = vadd.f32 %v3569_v38, %v1094_v6 }
 0x45b   : > { %7461 = vtanh.f32 %v3656_v25  ;;  %v1101_v25 = vadd.f32 %v1037_v35, %v9023_v46  ;;  %v8365_v35 = vmov 4  }
 0x45c   : > { %v7448_v61 = vpop.eup %7447  ;;  %v3414_v58 = vpop.f32.mrb[72].mxu0  ;;  %6719 = vset.pattern.permute.xlu1 %v8365_v35  ;;  %6720 = vset.pattern.permute.xlu0 %v8365_v35  ;;  %v8232_v35 = vld [vmem:[%s8492_s11 + $0x20] sm:$0xff] }
 0x45d   : > { %v10132_v43 = vpop.f32.mrb[72].mxu1  ;;  %v7450_v55 = vpop.eup %7449  ;;  %v3760_v49 = vadd.f32 1.0, %v7448_v61  ;;  %v3662_v1 = vadd.f32 %v3414_v58, %v1096_v63  ;;  %v1041_v61 = vmul.f32 %v10139_v2, %v9017_v26 }
 0x45e   : > { %v3416_v39 = vpop.f32.mrb[73].mxu0  ;;  %v10135_v21 = vpop.f32.mrb[73].mxu1  ;;  %v3968_v60 = vadd.f32 1.0, %v7450_v55 }
 0x45f   : > { %v3663_v20 = vadd.f32 %v3416_v39, %v1097_v10  ;;  %v7452_v51 = vpop.eup %7451  ;;  %7463 = vrcp.f32 %v3760_v49  ;;  %v6047_v14 = vmul.f32 -1.442695, %v3662_v1  ;;  %v1104_v49 = vadd.f32 %v1040_v13, %v8672_v34  ;;  %v10162_v13 = vpop.permute.xlu0 %981 }
 0x460   : > { %v7454_v56 = vpop.eup %7453  ;;  %7465 = vrcp.f32 %v3968_v60  ;;  %v3420_v31 = vpop.f32.mrb[74].mxu0  ;;  %v1034_v1 = vmul.f32 %v10118_v37, %v8689_v57 }
 0x461   : > { %v6079_v48 = vmul.f32 -1.442695, %v3663_v20  ;;  %v10145_v0 = vpop.f32.mrb[74].mxu1  ;;  %v7456_v9 = vpop.eup %7455  ;;  %v4031_v28 = vmul.f32 %v7454_v56, %v7452_v51  ;;  %v3666_v45 = vadd.f32 %v3420_v31, %v1100_v59  ;;  %7467 = vpow2.f32 %v6047_v14  ;;  %v8229_v14 = vld [vmem:[%s8492_s11] sm:$0xff]  ;;  %v8230_v59 = vld [vmem:[%s8492_s11 + $0x8] sm:$0xff] }
 0x462   : > { %v3422_v24 = vpop.f32.mrb[75].mxu0  ;;  %v10148_v63 = vpop.f32.mrb[75].mxu1  ;;  %v4015_v27 = vmul.f32 %v7456_v9, %v9665_v7  ;;  %1145 = vperm.xlu1 %6719, %v8229_v14   ;;  %1149 = vperm.xlu0 %6720, %v8230_v59   ;;  %v1023_v56 = vmul.f32 %v10083_v23, %v8670_v30  ;;  %v1105_v31 = vadd.f32 %v1041_v61, %v9023_v46 }
 0x463   : > { %v7458_v58 = vpop.eup %7457  ;;  %v6048_v10 = vmul.f32 -1.442695, %v3666_v45  ;;  %v3667_v55 = vadd.f32 %v3422_v24, %v1101_v25  ;;  %7469 = vpow2.f32 %v6079_v48  ;;  %v1098_v25 = vadd.f32 %v1034_v1, %v8694_v47  ;;  %v10184_v59 = vpop.permute.xlu1 %985 }
 0x464   : > { %v3761_v38 = vadd.f32 1.0, %v7458_v58  ;;  %v3426_v39 = vpop.f32.mrb[76].mxu0  ;;  %v7460_v7 = vpop.eup %7459  ;;  %7471 = vtanh.f32 %v3660_v32  ;;  %v10158_v51 = vadd.f32 %v4031_v28, %v4015_v27  ;;  %v1044_v28 = vmul.f32 %v10162_v13, %v8665_v19 }
 0x465   : > { %v3670_v60 = vadd.f32 %v3426_v39, %v1104_v49  ;;  %v10156_v6 = vpop.f32.mrb[76].mxu1  ;;  %v3428_v20 = vpop.f32.mrb[77].mxu0  ;;  %v3969_v48 = vadd.f32 1.0, %v7460_v7  ;;  %v6080_v32 = vmul.f32 -1.442695, %v3667_v55  ;;  %v1038_v23 = vmul.f32 %v10125_v62, %v8689_v57  ;;  %v8231_v39 = vld [vmem:[%s8492_s11 + $0x10] sm:$0xff] }
 0x466   : > { %7473 = vrcp.f32 %v3761_v38  ;;  %v10167_v9 = vpop.f32.mrb[77].mxu1  ;;  %v7462_v45 = vpop.eup %7461  ;;  %v3671_v24 = vadd.f32 %v3428_v20, %v1105_v31  ;;  %1153 = vperm.xlu1 %6719, %v8231_v39   ;;  %1161 = vperm.xlu0 %6720, %v8232_v35   ;;  %v1087_v7 = vadd.f32 %v1023_v56, %v8677_v54  ;;  %v3664_v20 = vadd.f32 %v10132_v43, %v1098_v25 }
 0x467   : > { %7475 = vpow2.f32 %v6048_v10  ;;  %v6049_v49 = vmul.f32 -1.442695, %v3670_v60  ;;  %v1045_v10 = vmul.f32 %v10162_v13, %v9017_v26  ;;  %v1102_v39 = vadd.f32 %v1038_v23, %v8694_v47 }
 0x468   : > { %7477 = vrcp.f32 %v3969_v48  ;;  %v3432_v27 = vpop.f32.mrb[78].mxu0  ;;  %v10174_v58 = vpop.f32.mrb[78].mxu1  ;;  %v1108_v48 = vadd.f32 %v1044_v28, %v8672_v34  ;;  %v1042_v35 = vmul.f32 %v10139_v2, %v8689_v57  ;;  %v6081_v18 = vmul.f32 -1.442695, %v3671_v24  ;;  %v8233_v28 = vld [vmem:[%s8492_s11 + $0x18] sm:$0xff] }
 0x469   : > { %v7464_v61 = vpop.eup %7463  ;;  %v3434_v55 = vpop.f32.mrb[79].mxu0  ;;  %7479 = vpow2.f32 %v6080_v32  ;;  %v3653_v4 = vadd.f32 %v10091_v12, %v1087_v7  ;;  %v1048_v24 = vmul.f32 %v10184_v59, %v8665_v19 }
 0x46a   : > { %v10178_v38 = vpop.f32.mrb[79].mxu1  ;;  %v7466_v1 = vpop.eup %7465  ;;  %v4032_v14 = vmul.f32 %v7464_v61, %v7462_v45  ;;  %7481 = vpow2.f32 %v6049_v49  ;;  %v3674_v25 = vadd.f32 %v3432_v27, %v1108_v48  ;;  %v1109_v61 = vadd.f32 %v1045_v10, %v9023_v46  ;;  %1157 = vperm.xlu1 %6719, %v8233_v28  }
 0x46b   : > { %v4016_v60 = vmul.f32 %v7466_v1, %v11800_v15  ;;  %v7468_v31 = vpop.eup %7467  ;;  %v8234_v1 = vld [vmem:[%s8492_s11 + $0x30] sm:$0xff]  ;;  %7483 = vtanh.f32 %v3664_v20  ;;  %v3668_v10 = vadd.f32 %v10145_v0, %v1102_v39 }
 0x46c   : > { %v3438_v56 = vpop.f32.mrb[80].mxu0  ;;  %v10191_v45 = vpop.f32.mrb[80].mxu1  ;;  %v3762_v43 = vadd.f32 1.0, %v7468_v31  ;;  %1169 = vperm.xlu0 %6720, %v8234_v1   ;;  %v3675_v48 = vadd.f32 %v3434_v55, %v1109_v61  ;;  %v6050_v7 = vmul.f32 -1.442695, %v3674_v25  ;;  %v1112_v61 = vadd.f32 %v1048_v24, %v8672_v34 }
 0x46d   : > { %v10194_v15 = vpop.f32.mrb[81].mxu0  ;;  %v10196_v32 = vpop.f32.mrb[81].mxu1  ;;  %v10203_v31 = vadd.f32 %v4032_v14, %v4016_v60  ;;  %v1049_v14 = vmul.f32 %v10184_v59, %v9017_v26  ;;  %v6060_v55 = vmul.f32 -1.442695, %v3653_v4  ;;  %v1031_v4 = vmul.f32 %v10101_v41, %v8670_v30  ;;  %v8237_v41 = vld [vmem:[%s8492_s11 + $0x38] sm:$0xff] }
 0x46e   : > { %11854 = vst [vmem:[#allocation53_spill] sm:$0xff] %v10196_v32  ;;  %v7470_v23 = vpop.eup %7469  ;;  %7485 = vrcp.f32 %v3762_v43  ;;  %v8235_v43 = vld [vmem:[%s8492_s11 + $0x28] sm:$0xff] }
 0x46f   : > { %11855 = vst [vmem:[#allocation54_spill] sm:$0xff] %v10203_v31  ;;  %v7472_v27 = vpop.eup %7471  ;;  %v3970_v49 = vadd.f32 1.0, %v7470_v23  ;;  %7487 = vpow2.f32 %v6081_v18  ;;  %1165 = vperm.xlu1 %6719, %v8235_v43   ;;  %v8236_v23 = vld [vmem:[%s8492_s11 + $0x40] sm:$0xff]  ;;  %v1027_v18 = vmul.f32 %v10093_v17, %v8670_v30  ;;  %v6082_v43 = vmul.f32 -1.442695, %v3675_v48 }
 0x470   : > { %v7474_v28 = vpop.eup %7473  ;;  %v10206_v1 = vpop.f32.mrb[82].mxu0  ;;  %1177 = vperm.xlu0 %6720, %v8236_v23   ;;  %v3678_v17 = vadd.f32 %v3438_v56, %v1112_v61  ;;  %v8238_v56 = vld [vmem:[%s8492_s11 + $0x50] sm:$0xff] }
 0x471   : > { %v7476_v52 = vpop.eup %7475  ;;  %v4033_v12 = vmul.f32 %v7474_v28, %v7472_v27  ;;  %7489 = vrcp.f32 %v3970_v49  ;;  %v10210_v20 = vpop.f32.mrb[82].mxu1  ;;  %v1106_v28 = vadd.f32 %v1042_v35, %v8694_v47 }
 0x472   : > { %v10212_v60 = vpop.f32.mrb[83].mxu0  ;;  %v7478_v0 = vpop.eup %7477  ;;  %v3763_v39 = vadd.f32 1.0, %v7476_v52  ;;  %7491 = vtanh.f32 %v3668_v10 }
 0x473   : > { %v10219_v25 = vpop.f32.mrb[83].mxu1  ;;  %v10221_v27 = vpop.permute.xlu0 %989  ;;  %v4017_v49 = vmul.f32 %v7478_v0, %v11804_v8  ;;  %v3672_v50 = vadd.f32 %v10156_v6, %v1106_v28  ;;  %v1113_v8 = vadd.f32 %v1049_v14, %v9023_v46  ;;  %1173 = vperm.xlu1 %6719, %v8237_v41   ;;  %v1091_v0 = vadd.f32 %v1027_v18, %v8677_v54 }
 0x474   : > { %11856 = vst [vmem:[#allocation59_spill] sm:$0xff] %v10219_v25  ;;  %7493 = vrcp.f32 %v3763_v39  ;;  %v10227_v52 = vpop.f32.mrb[84].mxu0  ;;  %v10229_v24 = vpop.f32.mrb[84].mxu1  ;;  %v1052_v35 = vmul.f32 %v10221_v27, %v8665_v19  ;;  %1185 = vperm.xlu0 %6720, %v8238_v56   ;;  %v1046_v6 = vmul.f32 %v10162_v13, %v8689_v57  ;;  %v1053_v61 = vmul.f32 %v10221_v27, %v9017_v26 }
 0x475   : > { %v7480_v23 = vpop.eup %7479  ;;  %7495 = vpow2.f32 %v6050_v7  ;;  %v10235_v10 = vpop.f32.mrb[85].mxu0  ;;  %v3679_v14 = vadd.f32 %v10194_v15, %v1113_v8  ;;  %v10247_v28 = vadd.f32 %v4033_v12, %v4017_v49  ;;  %v8239_v8 = vld [vmem:[%s8492_s11 + $0x48] sm:$0xff]  ;;  %v8240_v12 = vld [vmem:[%s8492_s11 + $0x60] sm:$0xff] }
 0x476   : > { %v10237_v48 = vpop.f32.mrb[85].mxu1  ;;  %7497 = vpow2.f32 %v6060_v55  ;;  %v3971_v39 = vadd.f32 1.0, %v7480_v23  ;;  %v7482_v7 = vpop.eup %7481  ;;  %v3657_v55 = vadd.f32 %v10106_v42, %v1091_v0  ;;  %v6051_v23 = vmul.f32 -1.442695, %v3678_v17 }
 0x477   : > { %11857 = vst [vmem:[#allocation8_spill] sm:$0xff] %v10237_v48  ;;  %7499 = vpow2.f32 %v6082_v43  ;;  %11858 = vst [vmem:[#allocation9_spill] sm:$0xff] %v10247_v28  ;;  %v7484_v41 = vpop.eup %7483  ;;  %v3764_v18 = vadd.f32 1.0, %v7482_v7  ;;  %v1116_v43 = vadd.f32 %v1052_v35, %v8672_v34  ;;  %1181 = vperm.xlu1 %6719, %v8239_v8   ;;  %v1095_v42 = vadd.f32 %v1031_v4, %v8677_v54  ;;  %v10263_v7 = vpop.permute.xlu1 %993 }
 0x478   : > { %7501 = vrcp.f32 %v3971_v39  ;;  %v10250_v56 = vpop.f32.mrb[86].mxu0  ;;  %v7486_v29 = vpop.eup %7485  ;;  %1193 = vperm.xlu0 %6720, %v8240_v12   ;;  %v1110_v17 = vadd.f32 %v1046_v6, %v8694_v47  ;;  %v6083_v28 = vmul.f32 -1.442695, %v3679_v14  ;;  %v1117_v8 = vadd.f32 %v1053_v61, %v9023_v46 }
 0x479   : > { %7503 = vtanh.f32 %v3672_v50  ;;  %v10253_v48 = vpop.f32.mrb[86].mxu1  ;;  %v10255_v15 = vpop.f32.mrb[87].mxu0  ;;  %v4034_v0 = vmul.f32 %v7486_v29, %v7484_v41  ;;  %v3682_v44 = vadd.f32 %v10206_v1, %v1116_v43  ;;  %v6061_v12 = vmul.f32 -1.442695, %v3657_v55  ;;  %v8242_v55 = vld [vmem:[%s8492_s11 + $0x70] sm:$0xff] }
 0x47a   : > { %v7488_v49 = vpop.eup %7487  ;;  %7505 = vrcp.f32 %v3764_v18  ;;  %v10261_v39 = vpop.f32.mrb[87].mxu1  ;;  %v1056_v29 = vmul.f32 %v10263_v7, %v8665_v19  ;;  %v3676_v14 = vadd.f32 %v10174_v58, %v1110_v17  ;;  %v1050_v1 = vmul.f32 %v10184_v59, %v8689_v57 }
 0x47b   : > { %11859 = vst [vmem:[#allocation62_spill] sm:$0xff] %v10261_v39  ;;  %v7490_v50 = vpop.eup %7489  ;;  %v3972_v35 = vadd.f32 1.0, %v7488_v49  ;;  %7507 = vpow2.f32 %v6051_v23  ;;  %v3661_v49 = vadd.f32 %v10116_v16, %v1095_v42  ;;  %v1057_v58 = vmul.f32 %v10263_v7, %v9017_v26 }
 0x47c   : > { %v4018_v4 = vmul.f32 %v7490_v50, %v9799_v33  ;;  %v10270_v6 = vpop.f32.mrb[88].mxu0  ;;  %v10272_v41 = vpop.f32.mrb[88].mxu1  ;;  %v8241_v33 = vld [vmem:[%s8492_s11 + $0x58] sm:$0xff]  ;;  %1201 = vperm.xlu0 %6720, %v8242_v55   ;;  %v1035_v50 = vmul.f32 %v10118_v37, %v8670_v30  ;;  %v1120_v42 = vadd.f32 %v1056_v29, %v8672_v34 }
 0x47d   : > { %v7492_v18 = vpop.eup %7491  ;;  %7509 = vrcp.f32 %v3972_v35  ;;  %v10277_v43 = vpop.f32.mrb[89].mxu0  ;;  %1189 = vperm.xlu1 %6719, %v8241_v33   ;;  %v3683_v35 = vadd.f32 %v10212_v60, %v1117_v8  ;;  %v1039_v8 = vmul.f32 %v10125_v62, %v8670_v30  ;;  %v1121_v25 = vadd.f32 %v1057_v58, %v9023_v46 }
 0x47e   : > { %v10279_v61 = vpop.f32.mrb[89].mxu1  ;;  %v7494_v23 = vpop.eup %7493  ;;  %7511 = vpow2.f32 %v6083_v28  ;;  %v10289_v5 = vadd.f32 %v4034_v0, %v4018_v4  ;;  %v1114_v28 = vadd.f32 %v1050_v1, %v8694_v47  ;;  %v1099_v1 = vadd.f32 %v1035_v50, %v8677_v54 }
 0x47f   : > { %11860 = vst [vmem:[#allocation41_spill] sm:$0xff] %v10279_v61  ;;  %v7496_v17 = vpop.eup %7495  ;;  %v4035_v39 = vmul.f32 %v7494_v23, %v7492_v18  ;;  %v6052_v61 = vmul.f32 -1.442695, %v3682_v44  ;;  %v10291_v55 = vpop.permute.xlu0 %997  ;;  %7513 = vpow2.f32 %v6061_v12  ;;  %v8243_v12 = vld [vmem:[%s8492_s11 + $0x68] sm:$0xff]  ;;  %v6084_v23 = vmul.f32 -1.442695, %v3683_v35 }
 0x480   : > { %11861 = vst [vmem:[#allocation55_spill] sm:$0xff] %v10289_v5  ;;  %v7498_v33 = vpop.eup %7497  ;;  %v3765_v16 = vadd.f32 1.0, %v7496_v17  ;;  %v10294_v37 = vpop.f32.mrb[90].mxu0  ;;  %7515 = vtanh.f32 %v3676_v14  ;;  %v1060_v44 = vmul.f32 %v10291_v55, %v8665_v19  ;;  %v3686_v17 = vadd.f32 %v10227_v52, %v1120_v42 }
 0x481   : > { %v7500_v60 = vpop.eup %7499  ;;  %v10301_v0 = vpop.f32.mrb[90].mxu1  ;;  %1197 = vperm.xlu1 %6719, %v8243_v12   ;;  %v6062_v14 = vmul.f32 -1.442695, %v3661_v49  ;;  %v1054_v35 = vmul.f32 %v10221_v27, %v8689_v57  ;;  %v1103_v49 = vadd.f32 %v1039_v8, %v8677_v54  ;;  %v3871_v8 = vadd.f32 1.0, %v7498_v33 }
 0x482   : > { %v10303_v4 = vpop.f32.mrb[91].mxu0  ;;  %v7502_v18 = vpop.eup %7501  ;;  %7517 = vrcp.f32 %v3765_v16  ;;  %v3973_v29 = vadd.f32 1.0, %v7500_v60  ;;  %v3680_v16 = vadd.f32 %v10191_v45, %v1114_v28  ;;  %v3665_v45 = vadd.f32 %v10135_v21, %v1099_v1 }
 0x483   : > { %v10307_v5 = vpop.f32.mrb[91].mxu1  ;;  %v7504_v62 = vpop.eup %7503  ;;  %7519 = vpow2.f32 %v6052_v61  ;;  %v4019_v31 = vmul.f32 %v7502_v18, %v11811_v40  ;;  %v3687_v61 = vadd.f32 %v10235_v10, %v1121_v25  ;;  %v8244_v40 = vld [vmem:[%s8492_s11 + $0x78] sm:$0xff]  ;;  %v6053_v28 = vmul.f32 -1.442695, %v3686_v17 }
 0x484   : > { %11862 = vst [vmem:[#allocation43_spill] sm:$0xff] %v10307_v5  ;;  %v7506_v32 = vpop.eup %7505  ;;  %7521 = vrcp.f32 %v3973_v29  ;;  %v10315_v52 = vpop.f32.mrb[92].mxu0  ;;  %v1124_v18 = vadd.f32 %v1060_v44, %v8672_v34  ;;  %v1061_v25 = vmul.f32 %v10291_v55, %v9017_v26  ;;  %v1058_v33 = vmul.f32 %v10263_v7, %v8689_v57 }
 0x485   : > { %v10317_v42 = vpop.f32.mrb[92].mxu1  ;;  %v4036_v60 = vmul.f32 %v7506_v32, %v7504_v62  ;;  %v10321_v50 = vpop.f32.mrb[93].mxu0  ;;  %1205 = vperm.xlu1 %6719, %v8244_v40   ;;  %7523 = vpow2.f32 %v6084_v23  ;;  %v1118_v62 = vadd.f32 %v1054_v35, %v8694_v47  ;;  %v10338_v23 = vadd.f32 %v4035_v39, %v4019_v31 }
 0x486   : > { %v10323_v58 = vpop.f32.mrb[93].mxu1  ;;  %v7508_v12 = vpop.eup %7507  ;;  %7525 = vpow2.f32 %v6062_v14  ;;  %v6085_v17 = vmul.f32 -1.442695, %v3687_v61  ;;  %v3690_v14 = vadd.f32 %v10250_v56, %v1124_v18  ;;  %v6063_v35 = vmul.f32 -1.442695, %v3665_v45 }
 0x487   : > { %v7510_v29 = vpop.eup %7509  ;;  %v10328_v5 = vpop.permute.xlu1 %1001  ;;  %v3766_v32 = vadd.f32 1.0, %v7508_v12  ;;  %7527 = vtanh.f32 %v3680_v16  ;;  %v3669_v18 = vadd.f32 %v10148_v63, %v1103_v49 }
 0x488   : > { %v4020_v10 = vmul.f32 %v7510_v29, %v9853_v53  ;;  %v10334_v40 = vpop.f32.mrb[94].mxu0  ;;  %v10336_v21 = vpop.f32.mrb[94].mxu1  ;;  %v1064_v31 = vmul.f32 %v10328_v5, %v8665_v19  ;;  %v3684_v29 = vadd.f32 %v10210_v20, %v1118_v62  ;;  %v1065_v45 = vmul.f32 %v10328_v5, %v9017_v26 }
 0x489   : > { %v7512_v44 = vpop.eup %7511  ;;  %7529 = vrcp.f32 %v3766_v32  ;;  %v10343_v1 = vpop.f32.mrb[95].mxu0  ;;  %v1125_v32 = vadd.f32 %v1061_v25, %v9023_v46 }
 0x48a   : > { %v10345_v53 = vpop.f32.mrb[95].mxu1  ;;  %v7514_v16 = vpop.eup %7513  ;;  %v3974_v12 = vadd.f32 1.0, %v7512_v44  ;;  %7531 = vpow2.f32 %v6053_v28  ;;  %v10351_v61 = vadd.f32 %v4036_v60, %v4020_v10  ;;  %v1128_v10 = vadd.f32 %v1064_v31, %v8672_v34 }
 0x48b   : > { %11863 = vst [vmem:[#allocation42_spill] sm:$0xff] %v10345_v53  ;;  %v7516_v39 = vpop.eup %7515  ;;  %7533 = vrcp.f32 %v3871_v8  ;;  %v1043_v53 = vmul.f32 %v10139_v2, %v8670_v30  ;;  %v6054_v8 = vmul.f32 -1.442695, %v3690_v14  ;;  %v3691_v20 = vadd.f32 %v10255_v15, %v1125_v32  ;;  %v10364_v15 = vpop.permute.xlu0 %1005 }
 0x48c   : > { %v7518_v56 = vpop.eup %7517  ;;  %7535 = vrcp.f32 %v3974_v12  ;;  %v3872_v25 = vadd.f32 1.0, %v7514_v16  ;;  %v1122_v2 = vadd.f32 %v1058_v33, %v8694_v47  ;;  %v6064_v12 = vmul.f32 -1.442695, %v3669_v18 }
 0x48d   : > { %v7520_v28 = vpop.eup %7519  ;;  %v4037_v44 = vmul.f32 %v7518_v56, %v7516_v39  ;;  %7537 = vpow2.f32 %v6085_v17  ;;  %v3694_v39 = vadd.f32 %v10270_v6, %v1128_v10  ;;  %v1129_v17 = vadd.f32 %v1065_v45, %v9023_v46 }
 0x48e   : > { %v7522_v62 = vpop.eup %7521  ;;  %7539 = vpow2.f32 %v6063_v35  ;;  %v3767_v60 = vadd.f32 1.0, %v7520_v28  ;;  %v6086_v35 = vmul.f32 -1.442695, %v3691_v20  ;;  %v3688_v33 = vadd.f32 %v10229_v24, %v1122_v2 }
 0x48f   : > { %v4021_v63 = vmul.f32 %v7522_v62, %v9865_v11  ;;  %7541 = vtanh.f32 %v3684_v29  ;;  %v7524_v49 = vpop.eup %7523  ;;  %v1107_v11 = vadd.f32 %v1043_v53, %v8677_v54  ;;  %v1068_v29 = vmul.f32 %v10364_v15, %v8665_v19 }
 0x490   : > { %7543 = vrcp.f32 %v3767_v60  ;;  %v7526_v14 = vpop.eup %7525  ;;  %v3975_v16 = vadd.f32 1.0, %v7524_v49  ;;  %v1062_v56 = vmul.f32 %v10291_v55, %v8689_v57  ;;  %v3695_v18 = vadd.f32 %v10277_v43, %v1129_v17  ;;  %v10383_v49 = vpop.permute.xlu1 %1009 }
 0x491   : > { %7545 = vpow2.f32 %v6054_v8  ;;  %v10366_v32 = vadd.f32 %v4037_v44, %v4021_v63  ;;  %v7528_v31 = vpop.eup %7527  ;;  %v3673_v28 = vadd.f32 %v10167_v9, %v1107_v11  ;;  %v6055_v8 = vmul.f32 -1.442695, %v3694_v39 }
 0x492   : > { %7547 = vrcp.f32 %v3872_v25  ;;  %v3873_v53 = vadd.f32 1.0, %v7526_v14  ;;  %v1132_v25 = vadd.f32 %v1068_v29, %v8672_v34  ;;  %v1069_v60 = vmul.f32 %v10364_v15, %v9017_v26 }
 0x493   : > { %v7530_v6 = vpop.eup %7529  ;;  %7549 = vrcp.f32 %v3975_v16  ;;  %v1126_v9 = vadd.f32 %v1062_v56, %v8694_v47  ;;  %v6087_v63 = vmul.f32 -1.442695, %v3695_v18  ;;  %v1047_v11 = vmul.f32 %v10162_v13, %v8670_v30 }
 0x494   : > { %v7532_v45 = vpop.eup %7531  ;;  %7551 = vpow2.f32 %v6064_v12  ;;  %v4038_v44 = vmul.f32 %v7530_v6, %v7528_v31  ;;  %v6065_v12 = vmul.f32 -1.442695, %v3673_v28  ;;  %v3698_v17 = vadd.f32 %v10294_v37, %v1132_v25 }
 0x495   : > { %v10376_v20 = vpop.eup %7533  ;;  %v3768_v24 = vadd.f32 1.0, %v7532_v45  ;;  %7553 = vpow2.f32 %v6086_v35  ;;  %v3692_v16 = vadd.f32 %v10253_v48, %v1126_v9  ;;  %v1066_v35 = vmul.f32 %v10328_v5, %v8689_v57 }
 0x496   : > { %v7536_v62 = vpop.eup %7535  ;;  %7555 = vtanh.f32 %v3688_v33  ;;  %v1133_v33 = vadd.f32 %v1069_v60, %v9023_v46  ;;  %v1072_v37 = vmul.f32 %v10383_v49, %v8665_v19  ;;  %v6056_v18 = vmul.f32 -1.442695, %v3698_v17 }
 0x497   : > { %v7538_v10 = vpop.eup %7537  ;;  %v4022_v43 = vmul.f32 %v7536_v62, %v9888_v36  ;;  %7557 = vrcp.f32 %v3768_v24  ;;  %v1130_v13 = vadd.f32 %v1066_v35, %v8694_v47  ;;  %v10402_v24 = vpop.permute.xlu0 %1013  ;;  %v1111_v62 = vadd.f32 %v1047_v11, %v8677_v54 }
 0x498   : > { %v7540_v2 = vpop.eup %7539  ;;  %v3976_v39 = vadd.f32 1.0, %v7538_v10  ;;  %7559 = vpow2.f32 %v6055_v8  ;;  %v3699_v45 = vadd.f32 %v10303_v4, %v1133_v33  ;;  %v1073_v8 = vmul.f32 %v10383_v49, %v9017_v26 }
 0x499   : > { %v7542_v14 = vpop.eup %7541  ;;  %7561 = vrcp.f32 %v3873_v53  ;;  %v10389_v36 = vadd.f32 %v4038_v44, %v4022_v43  ;;  %v3874_v44 = vadd.f32 1.0, %v7540_v2  ;;  %v3696_v10 = vadd.f32 %v10272_v41, %v1130_v13 }
 0x49a   : > { %v7544_v31 = vpop.eup %7543  ;;  %7563 = vrcp.f32 %v3976_v39  ;;  %v1070_v4 = vmul.f32 %v10364_v15, %v8689_v57  ;;  %v1136_v43 = vadd.f32 %v1072_v37, %v8672_v34  ;;  %v6088_v2 = vmul.f32 -1.442695, %v3699_v45 }
 0x49b   : > { %v7546_v29 = vpop.eup %7545  ;;  %v4039_v6 = vmul.f32 %v7544_v31, %v7542_v14  ;;  %7565 = vpow2.f32 %v6087_v63  ;;  %v1137_v17 = vadd.f32 %v1073_v8, %v9023_v46  ;;  %v1076_v41 = vmul.f32 %v10402_v24, %v8665_v19 }
 0x49c   : > { %v10396_v56 = vpop.eup %7547  ;;  %7567 = vpow2.f32 %v6065_v12  ;;  %v3769_v48 = vadd.f32 1.0, %v7546_v29  ;;  %v3677_v35 = vadd.f32 %v10178_v38, %v1111_v62  ;;  %v1051_v33 = vmul.f32 %v10184_v59, %v8670_v30 }
 0x49d   : > { %v7550_v28 = vpop.eup %7549  ;;  %7569 = vtanh.f32 %v3692_v16  ;;  %v1134_v37 = vadd.f32 %v1070_v4, %v8694_v47  ;;  %v1140_v8 = vadd.f32 %v1076_v41, %v8672_v34 }
 0x49e   : > { %v7552_v53 = vpop.eup %7551  ;;  %v4023_v25 = vmul.f32 %v7550_v28, %v9912_v3  ;;  %7571 = vrcp.f32 %v3769_v48  ;;  %v3702_v3 = vadd.f32 %v10315_v52, %v1136_v43  ;;  %v1055_v52 = vmul.f32 %v10221_v27, %v8670_v30 }
 0x49f   : > { %v7554_v60 = vpop.eup %7553  ;;  %7573 = vtanh.f32 %v10158_v51  ;;  %v3875_v16 = vadd.f32 1.0, %v7552_v53  ;;  %v3703_v48 = vadd.f32 %v10321_v50, %v1137_v17  ;;  %v1077_v28 = vmul.f32 %v10402_v24, %v9017_v26  ;;  %v11864_v50 = vld [vmem:[#allocation54_spill] sm:$0xff] }
 0x4a0   : > { %v7556_v9 = vpop.eup %7555  ;;  %v3977_v63 = vadd.f32 1.0, %v7554_v60  ;;  %7575 = vpow2.f32 %v6056_v18  ;;  %v10411_v12 = vadd.f32 %v4039_v6, %v4023_v25  ;;  %v6057_v45 = vmul.f32 -1.442695, %v3702_v3  ;;  %v11865_v3 = vld [vmem:[#allocation53_spill] sm:$0xff] }
 0x4a1   : > { %v7558_v39 = vpop.eup %7557  ;;  %7577 = vrcp.f32 %v3874_v44  ;;  %v6066_v44 = vmul.f32 -1.442695, %v3677_v35  ;;  %v1115_v53 = vadd.f32 %v1051_v33, %v8677_v54  ;;  %v3700_v62 = vadd.f32 %v10301_v0, %v1134_v37  ;;  %v11867_v37 = vld [vmem:[#allocation61_spill] sm:$0xff] }
 0x4a2   : > { %v7560_v14 = vpop.eup %7559  ;;  %v4040_v31 = vmul.f32 %v7558_v39, %v7556_v9  ;;  %7579 = vrcp.f32 %v3977_v63  ;;  %v1119_v60 = vadd.f32 %v1055_v52, %v8677_v54  ;;  %v3706_v4 = vadd.f32 %v10334_v40, %v1140_v8 }
 0x4a3   : > { %v10418_v11 = vpop.eup %7561  ;;  %v3770_v29 = vadd.f32 1.0, %v7560_v14  ;;  %7581 = vtanh.f32 %v3696_v10  ;;  %v6089_v10 = vmul.f32 -1.442695, %v3703_v48  ;;  %v1074_v63 = vmul.f32 %v10383_v49, %v8689_v57 }
 0x4a4   : > { %v7564_v6 = vpop.eup %7563  ;;  %7583 = vpow2.f32 %v6088_v2  ;;  %v1141_v2 = vadd.f32 %v1077_v28, %v9023_v46  ;;  %v3681_v17 = vadd.f32 %v11865_v3, %v1115_v53  ;;  %v1059_v33 = vmul.f32 %v10263_v7, %v8670_v30 }
 0x4a5   : > { %v7566_v18 = vpop.eup %7565  ;;  %v4024_v38 = vmul.f32 %v7564_v6, %v9936_v22  ;;  %7585 = vrcp.f32 %v3770_v29  ;;  %v6058_v29 = vmul.f32 -1.442695, %v3706_v4  ;;  %v11871_v4 = vld [vmem:[#allocation8_spill] sm:$0xff] }
 0x4a6   : > { %v7568_v59 = vpop.eup %7567  ;;  %7587 = vrcp.f32 %v3875_v16  ;;  %v3978_v13 = vadd.f32 1.0, %v7566_v18  ;;  %v11866_v16 = vld [vmem:[#allocation59_spill] sm:$0xff]  ;;  %v3707_v6 = vadd.f32 %v10343_v1, %v1141_v2  ;;  %v1123_v8 = vadd.f32 %v1059_v33, %v8677_v54 }
 0x4a7   : > { %v7570_v27 = vpop.eup %7569  ;;  %7589 = vtanh.f32 %v11864_v50  ;;  %v10433_v25 = vadd.f32 %v4040_v31, %v4024_v38  ;;  %v3876_v39 = vadd.f32 1.0, %v7568_v59  ;;  %v3685_v35 = vadd.f32 %v11866_v16, %v1119_v60 }
 0x4a8   : > { %v7572_v22 = vpop.eup %7571  ;;  %7591 = vrcp.f32 %v3978_v13  ;;  %v6067_v38 = vmul.f32 -1.442695, %v3681_v17  ;;  %v6090_v53 = vmul.f32 -1.442695, %v3707_v6 }
 0x4a9   : > { %v7574_v43 = vpop.eup %7573  ;;  %v4041_v9 = vmul.f32 %v7572_v22, %v7570_v27  ;;  %7593 = vpow2.f32 %v6057_v45  ;;  %v1138_v45 = vadd.f32 %v1074_v63, %v8694_v47  ;;  %v6068_v28 = vmul.f32 -1.442695, %v3685_v35 }
 0x4aa   : > { %v7576_v0 = vpop.eup %7575  ;;  %7595 = vpow2.f32 %v6066_v44  ;;  %v4079_v41 = vmul.f32 %v7574_v43, %v10376_v20  ;;  %v11868_v20 = vmov 0.0   ;;  %v11869_v44 = vld [vmem:[#allocation9_spill] sm:$0xff]  ;;  %v1063_v22 = vmul.f32 %v10291_v55, %v8670_v30 }
 0x4ab   : > { %v10442_v14 = vpop.eup %7577  ;;  %v3771_v40 = vadd.f32 1.0, %v7576_v0  ;;  %7597 = vtanh.f32 %v3700_v62  ;;  %v3704_v60 = vadd.f32 %v10317_v42, %v1138_v45  ;;  %v3689_v43 = vadd.f32 %v11871_v4, %v1123_v8  ;;  %v11872_v0 = vld [vmem:[#allocation50_spill] sm:$0xff] }
 0x4ac   : > { %v7580_v31 = vpop.eup %7579  ;;  %4165 = vmatmul.mubr.f32.gmra.mrb[98].mxu0 %v4079_v41  ;;  %4326 = vmatmul.mubr.f32.gmra.mrb[98].mxu1 %v4079_v41  ;;  %7599 = vpow2.f32 %v6089_v10  ;;  %v1078_v63 = vmul.f32 %v10402_v24, %v8689_v57  ;;  %v1067_v42 = vmul.f32 %v10328_v5, %v8670_v30  ;;  %v1127_v35 = vadd.f32 %v1063_v22, %v8677_v54  ;;  %v11875_v5 = vld [vmem:[#allocation62_spill] sm:$0xff] }
 0x4ad   : > { %v7582_v52 = vpop.eup %7581  ;;  %v4025_v48 = vmul.f32 %v7580_v31, %v11867_v37  ;;  %7601 = vrcp.f32 %v3771_v40  ;;  %4170 = vmatprep.mubr.f32.mxu0 %v11868_v20  ;;  %4331 = vmatprep.mubr.f32.mxu1 %v11868_v20  ;;  %v6069_v16 = vmul.f32 -1.442695, %v3689_v43  ;;  %v1075_v43 = vmul.f32 %v10383_v49, %v8670_v30 }
 0x4ae   : > { %v7584_v18 = vpop.eup %7583  ;;  %7603 = vrcp.f32 %v3876_v39  ;;  %v1142_v40 = vadd.f32 %v1078_v63, %v8694_v47 }
 0x4af   : > { %v7586_v7 = vpop.eup %7585  ;;  %v3979_v59 = vadd.f32 1.0, %v7584_v18  ;;  %7605 = vtanh.f32 %v11869_v44  ;;  %v10453_v13 = vadd.f32 %v4041_v9, %v4025_v48 }
 0x4b0   : > { %v10455_v1 = vpop.eup %7587  ;;  %v4042_v27 = vmul.f32 %v7586_v7, %v7582_v52  ;;  %7607 = vpow2.f32 %v6058_v29  ;;  %v11874_v29 = vld [vmem:[#allocation55_spill] sm:$0xff]  ;;  %v3693_v52 = vadd.f32 %v11875_v5, %v1127_v35  ;;  %v3708_v48 = vadd.f32 %v10336_v21, %v1142_v40 }
 0x4b1   : > { %11870 = vst [vmem:[#allocation46_spill] sm:$0xff] %v10453_v13  ;;  %v7590_v62 = vpop.eup %7589  ;;  %7609 = vrcp.f32 %v3979_v59  ;;  %v1079_v35 = vmul.f32 %v10402_v24, %v8670_v30 }
 0x4b2   : > { %v7592_v10 = vpop.eup %7591  ;;  %7611 = vpow2.f32 %v6067_v38  ;;  %v4080_v9 = vmul.f32 %v7590_v62, %v10396_v56  ;;  %v1131_v38 = vadd.f32 %v1067_v42, %v8677_v54  ;;  %v6070_v21 = vmul.f32 -1.442695, %v3693_v52  ;;  %v11876_v62 = vld [vmem:[#allocation41_spill] sm:$0xff] }
 0x4b3   : > { %v7594_v2 = vpop.eup %7593  ;;  %7613 = vpow2.f32 %v6068_v28  ;;  %v4026_v39 = vmul.f32 %v7592_v10, %v11872_v0  ;;  %v1071_v28 = vmul.f32 %v10364_v15, %v8670_v30 }
 0x4b4   : > { %v7596_v3 = vpop.eup %7595  ;;  %4171 = vmatmul.mubr.f32.gmra.mrb[100].mxu0 %v4080_v9  ;;  %4332 = vmatmul.mubr.f32.gmra.mrb[100].mxu1 %v4080_v9  ;;  %v3772_v55 = vadd.f32 1.0, %v7594_v2  ;;  %7615 = vpow2.f32 %v6090_v53  ;;  %v3697_v22 = vadd.f32 %v11876_v62, %v1131_v38 }
 0x4b5   : > { %v7598_v17 = vpop.eup %7597  ;;  %7617 = vtanh.f32 %v3704_v60  ;;  %4176 = vmatprep.mubr.f32.mxu0 %v11868_v20  ;;  %4337 = vmatprep.mubr.f32.mxu1 %v11868_v20  ;;  %v10470_v56 = vadd.f32 %v4042_v27, %v4026_v39  ;;  %v3877_v7 = vadd.f32 1.0, %v7596_v3  ;;  %v11877_v60 = vld [vmem:[#allocation63_spill] sm:$0xff] }
 0x4b6   : > { %v7600_v41 = vpop.eup %7599  ;;  %7619 = vrcp.f32 %v3772_v55  ;;  %v6071_v39 = vmul.f32 -1.442695, %v3697_v22  ;;  %v11879_v3 = vld [vmem:[#allocation43_spill] sm:$0xff] }
 0x4b7   : > { %11873 = vst [vmem:[#allocation44_spill] sm:$0xff] %v10470_v56  ;;  %v7602_v31 = vpop.eup %7601  ;;  %v3980_v33 = vadd.f32 1.0, %v7600_v41  ;;  %7621 = vtanh.f32 %v11874_v29  ;;  %v1139_v41 = vadd.f32 %v1075_v43, %v8677_v54 }
 0x4b8   : > { %v10475_v6 = vpop.eup %7603  ;;  %v4043_v37 = vmul.f32 %v7602_v31, %v7598_v17  ;;  %7623 = vtanh.f32 %v10338_v23 }
 0x4b9   : > { %v7606_v18 = vpop.eup %7605  ;;  %7625 = vrcp.f32 %v3980_v33  ;;  %v3705_v33 = vadd.f32 %v10323_v58, %v1139_v41  ;;  %v1143_v58 = vadd.f32 %v1079_v35, %v8677_v54 }
 0x4ba   : > { %v7608_v45 = vpop.eup %7607  ;;  %7627 = vpow2.f32 %v6069_v16  ;;  %v4081_v59 = vmul.f32 %v7606_v18, %v10418_v11  ;;  %v1135_v11 = vadd.f32 %v1071_v28, %v8677_v54 }
 0x4bb   : > { %v7610_v8 = vpop.eup %7609  ;;  %v3773_v27 = vadd.f32 1.0, %v7608_v45  ;;  %7629 = vtanh.f32 %v10351_v61  ;;  %v6073_v28 = vmul.f32 -1.442695, %v3705_v33 }
 0x4bc   : > { %v7612_v53 = vpop.eup %7611  ;;  %v4027_v10 = vmul.f32 %v7610_v8, %v11877_v60  ;;  %4177 = vmatmul.mubr.f32.gmra.mrb[102].mxu0 %v4081_v59  ;;  %4338 = vmatmul.mubr.f32.gmra.mrb[102].mxu1 %v4081_v59  ;;  %7631 = vtanh.f32 %v3708_v48  ;;  %v3701_v49 = vadd.f32 %v11879_v3, %v1135_v11 }
 0x4bd   : > { %v7614_v4 = vpop.eup %7613  ;;  %7633 = vrcp.f32 %v3773_v27  ;;  %4182 = vmatprep.mubr.f32.mxu0 %v11868_v20  ;;  %4343 = vmatprep.mubr.f32.mxu1 %v11868_v20  ;;  %v3878_v17 = vadd.f32 1.0, %v7612_v53 }
 0x4be   : > { %v7616_v15 = vpop.eup %7615  ;;  %7635 = vrcp.f32 %v3877_v7  ;;  %v10492_v9 = vadd.f32 %v4043_v37, %v4027_v10  ;;  %v6072_v52 = vmul.f32 -1.442695, %v3701_v49  ;;  %v11880_v37 = vld [vmem:[#allocation65_spill] sm:$0xff]  ;;  %v3879_v45 = vadd.f32 1.0, %v7614_v4  ;;  %v11883_v10 = vld [vmem:[#allocation51_spill] sm:$0xff] }
 0x4bf   : > { %v7618_v63 = vpop.eup %7617  ;;  %v3981_v2 = vadd.f32 1.0, %v7616_v15  ;;  %7637 = vtanh.f32 %v10366_v32 }
 0x4c0   : > { %11878 = vst [vmem:[#allocation56_spill] sm:$0xff] %v10492_v9  ;;  %v7620_v0 = vpop.eup %7619  ;;  %7639 = vpow2.f32 %v6070_v21 }
 0x4c1   : > { %v7622_v55 = vpop.eup %7621  ;;  %v4044_v42 = vmul.f32 %v7620_v0, %v7618_v63  ;;  %7641 = vrcp.f32 %v3981_v2 }
 0x4c2   : > { %v7624_v16 = vpop.eup %7623  ;;  %v4082_v40 = vmul.f32 %v7622_v55, %v10442_v14  ;;  %7643 = vtanh.f32 %v10389_v36 }
 0x4c3   : > { %v7626_v31 = vpop.eup %7625  ;;  %7645 = vpow2.f32 %v6071_v39  ;;  %v4083_v18 = vmul.f32 %v7624_v16, %v10455_v1  ;;  %v11882_v1 = vld [vmem:[#allocation42_spill] sm:$0xff] }
 0x4c4   : > { %v7628_v5 = vpop.eup %7627  ;;  %v4028_v48 = vmul.f32 %v7626_v31, %v11880_v37  ;;  %4183 = vmatmul.mubr.f32.gmra.mrb[104].mxu0 %v4082_v40  ;;  %4344 = vmatmul.mubr.f32.gmra.mrb[104].mxu1 %v4082_v40  ;;  %7647 = vrcp.f32 %v3878_v17  ;;  %v3709_v27 = vadd.f32 %v11882_v1, %v1143_v58 }
 0x4c5   : > { %v7630_v38 = vpop.eup %7629  ;;  %4188 = vmatprep.mubr.f32.mxu0 %v11868_v20  ;;  %4349 = vmatprep.mubr.f32.mxu1 %v11868_v20  ;;  %7649 = vtanh.f32 %v10411_v12  ;;  %v3880_v62 = vadd.f32 1.0, %v7628_v5 }
 0x4c6   : > { %v7632_v24 = vpop.eup %7631  ;;  %v10507_v14 = vadd.f32 %v4044_v42, %v4028_v48  ;;  %7651 = vpow2.f32 %v6072_v52  ;;  %v4084_v53 = vmul.f32 %v7630_v38, %v10475_v6  ;;  %v6074_v43 = vmul.f32 -1.442695, %v3709_v27 }
 0x4c7   : > { %v7634_v7 = vpop.eup %7633  ;;  %7653 = vrcp.f32 %v3879_v45 }
 0x4c8   : > { %11881 = vst [vmem:[#allocation49_spill] sm:$0xff] %v10507_v14  ;;  %v7636_v59 = vpop.eup %7635  ;;  %v4045_v8 = vmul.f32 %v7634_v7, %v7632_v24  ;;  %4189 = vmatmul.mubr.f32.gmra.mrb[106].mxu0 %v4083_v18  ;;  %4350 = vmatmul.mubr.f32.gmra.mrb[106].mxu1 %v4083_v18  ;;  %7655 = vtanh.f32 %v10433_v25 }
 0x4c9   : > { %v7638_v21 = vpop.eup %7637  ;;  %4194 = vmatprep.mubr.f32.mxu0 %v11868_v20  ;;  %4355 = vmatprep.mubr.f32.mxu1 %v11868_v20  ;;  %7657 = vpow2.f32 %v6073_v28 }
 0x4ca   : > { %v7640_v22 = vpop.eup %7639  ;;  %v4085_v15 = vmul.f32 %v7638_v21, %v7636_v59  ;;  %7659 = vrcp.f32 %v3880_v62 }
 0x4cb   : > { %v7642_v60 = vpop.eup %7641  ;;  %v3881_v6 = vadd.f32 1.0, %v7640_v22  ;;  %7661 = vtanh.f32 %v10453_v13 }
 0x4cc   : > { %v4029_v4 = vmul.f32 %v7642_v60, %v11883_v10  ;;  %4195 = vmatmul.mubr.f32.gmra.mrb[108].mxu0 %v4084_v53  ;;  %4356 = vmatmul.mubr.f32.gmra.mrb[108].mxu1 %v4084_v53  ;;  %v7644_v11 = vpop.eup %7643  ;;  %7663 = vpow2.f32 %v6074_v43 }
 0x4cd   : > { %4200 = vmatprep.mubr.f32.mxu0 %v11868_v20  ;;  %4361 = vmatprep.mubr.f32.mxu1 %v11868_v20  ;;  %v7646_v63 = vpop.eup %7645  ;;  %7665 = vrcp.f32 %v3881_v6 }
 0x4ce   : > { %v10518_v2 = vadd.f32 %v4045_v8, %v4029_v4  ;;  %v7648_v0 = vpop.eup %7647  ;;  %v3882_v49 = vadd.f32 1.0, %v7646_v63  ;;  %7667 = vtanh.f32 %v10470_v56 }
 0x4cf   : > { %v4086_v39 = vmul.f32 %v7648_v0, %v7644_v11  ;;  %v7650_v3 = vpop.eup %7649 }
 0x4d0   : > { %11884 = vst [vmem:[#allocation48_spill] sm:$0xff] %v10518_v2  ;;  %4201 = vmatmul.mubr.f32.gmra.mrb[110].mxu0 %v4085_v15  ;;  %4362 = vmatmul.mubr.f32.gmra.mrb[110].mxu1 %v4085_v15  ;;  %v7652_v55 = vpop.eup %7651  ;;  %7669 = vrcp.f32 %v3882_v49 }
 0x4d1   : > { %4206 = vmatprep.mubr.f32.mxu0 %v11868_v20  ;;  %4367 = vmatprep.mubr.f32.mxu1 %v11868_v20  ;;  %v7654_v17 = vpop.eup %7653  ;;  %v3883_v16 = vadd.f32 1.0, %v7652_v55  ;;  %7671 = vtanh.f32 %v10492_v9 }
 0x4d2   : > { %v4087_v42 = vmul.f32 %v7654_v17, %v7650_v3  ;;  %v7656_v41 = vpop.eup %7655 }
 0x4d3   : > { %v7658_v35 = vpop.eup %7657  ;;  %7673 = vrcp.f32 %v3883_v16 }
 0x4d4   : > { %4207 = vmatmul.mubr.f32.gmra.mrb[112].mxu0 %v4086_v39  ;;  %4368 = vmatmul.mubr.f32.gmra.mrb[112].mxu1 %v4086_v39  ;;  %v7660_v40 = vpop.eup %7659  ;;  %v3884_v5 = vadd.f32 1.0, %v7658_v35  ;;  %7675 = vtanh.f32 %v10507_v14 }
 0x4d5   : > { %4212 = vmatprep.mubr.f32.mxu0 %v11868_v20  ;;  %4373 = vmatprep.mubr.f32.mxu1 %v11868_v20  ;;  %v4088_v31 = vmul.f32 %v7660_v40, %v7656_v41  ;;  %v7662_v33 = vpop.eup %7661 }
 0x4d6   : > { %v7664_v52 = vpop.eup %7663  ;;  %7677 = vrcp.f32 %v3884_v5  ;;  %v4160_v53 = vpop.f32.mrb[96].mxu0 }
 0x4d7   : > { %v7666_v37 = vpop.eup %7665  ;;  %v3885_v38 = vadd.f32 1.0, %v7664_v52  ;;  %7679 = vtanh.f32 %v10518_v2  ;;  %v4321_v21 = vpop.f32.mrb[96].mxu1  ;;  %v11885_v52 = vld [vmem:[#allocation52_spill] sm:$0xff] }
 0x4d8   : > { %4213 = vmatmul.mubr.f32.gmra.mrb[114].mxu0 %v4087_v42  ;;  %4374 = vmatmul.mubr.f32.gmra.mrb[114].mxu1 %v4087_v42  ;;  %v4089_v48 = vmul.f32 %v7666_v37, %v7662_v33  ;;  %v7668_v18 = vpop.eup %7667  ;;  %v4162_v10 = vpop.f32.mrb[97].mxu0 }
 0x4d9   : > { %4218 = vmatprep.mubr.f32.mxu0 %v11868_v20  ;;  %4379 = vmatprep.mubr.f32.mxu1 %v11868_v20  ;;  %7681 = vrcp.f32 %v3885_v38  ;;  %v4323_v4 = vpop.f32.mrb[97].mxu1 }
 0x4da   : > { %v7670_v45 = vpop.eup %7669 }
 0x4db   : > { %v4090_v24 = vmul.f32 %v7670_v45, %v7668_v18  ;;  %v7672_v58 = vpop.eup %7671 }
 0x4dc   : > { %4219 = vmatmul.mubr.f32.gmra.mrb[116].mxu0 %v4088_v31  ;;  %4380 = vmatmul.mubr.f32.gmra.mrb[116].mxu1 %v4088_v31 }
 0x4dd   : > { %4224 = vmatprep.mubr.f32.mxu0 %v11868_v20  ;;  %4385 = vmatprep.mubr.f32.mxu1 %v11868_v20  ;;  %v7674_v7 = vpop.eup %7673 }
 0x4de   : > { %v4091_v28 = vmul.f32 %v7674_v7, %v7672_v58  ;;  %v7676_v8 = vpop.eup %7675 }
 0x4e0   : > { %4225 = vmatmul.mubr.f32.gmra.mrb[118].mxu0 %v4089_v48  ;;  %4386 = vmatmul.mubr.f32.gmra.mrb[118].mxu1 %v4089_v48  ;;  %v7678_v62 = vpop.eup %7677 }
 0x4e1   : > { %4230 = vmatprep.mubr.f32.mxu0 %v11868_v20  ;;  %4391 = vmatprep.mubr.f32.mxu1 %v11868_v20  ;;  %v1146_v59 = vpop.permute.xlu1 %1145  ;;  %v4092_v43 = vmul.f32 %v7678_v62, %v7676_v8  ;;  %v7680_v15 = vpop.eup %7679 }
 0x4e2   : > { %v1208_v1 = vmul.f32 %v1146_v59, %v8665_v19  ;;  %v1209_v27 = vmul.f32 %v1146_v59, %v9017_v26  ;;  %v1210_v49 = vmul.f32 %v1146_v59, %v8689_v57  ;;  %v1211_v18 = vmul.f32 %v1146_v59, %v8670_v30  ;;  %v10557_v59 = vpop.permute.xlu0 %1149 }
 0x4e3   : > { %v7682_v63 = vpop.eup %7681 }
 0x4e4   : > { %4231 = vmatmul.mubr.f32.gmra.mrb[120].mxu0 %v4090_v24  ;;  %4392 = vmatmul.mubr.f32.gmra.mrb[120].mxu1 %v4090_v24  ;;  %v1272_v22 = vadd.f32 %v1208_v1, %v8672_v34  ;;  %v1273_v60 = vadd.f32 %v1209_v27, %v9023_v46  ;;  %v4093_v3 = vmul.f32 %v7682_v63, %v7680_v15 }
 0x4e5   : > { %4236 = vmatprep.mubr.f32.mxu0 %v11868_v20  ;;  %4397 = vmatprep.mubr.f32.mxu1 %v11868_v20  ;;  %v1274_v55 = vadd.f32 %v1210_v49, %v8694_v47  ;;  %v1275_v38 = vadd.f32 %v1211_v18, %v8677_v54  ;;  %v1212_v27 = vmul.f32 %v10557_v59, %v8665_v19  ;;  %v10567_v15 = vpop.permute.xlu1 %1153 }
 0x4e6   : > { %v4416_v11 = vadd.f32 %v4160_v53, %v1272_v22  ;;  %v4417_v6 = vadd.f32 %v4162_v10, %v1273_v60  ;;  %v1213_v53 = vmul.f32 %v10557_v59, %v9017_v26  ;;  %v1216_v63 = vmul.f32 %v10567_v15, %v8665_v19 }
 0x4e7   : > { %v4418_v17 = vadd.f32 %v4321_v21, %v1274_v55  ;;  %v4419_v45 = vadd.f32 %v4323_v4, %v1275_v38  ;;  %v1276_v21 = vadd.f32 %v1212_v27, %v8672_v34 }
 0x4e8   : > { %4237 = vmatmul.mubr.f32.gmra.mrb[122].mxu0 %v4091_v28  ;;  %4398 = vmatmul.mubr.f32.gmra.mrb[122].mxu1 %v4091_v28  ;;  %v6091_v0 = vmul.f32 -1.442695, %v4416_v11  ;;  %v6123_v39 = vmul.f32 -1.442695, %v4417_v6  ;;  %v1277_v62 = vadd.f32 %v1213_v53, %v9023_v46  ;;  %v1280_v49 = vadd.f32 %v1216_v63, %v8672_v34 }
 0x4e9   : > { %4242 = vmatprep.mubr.f32.mxu0 %v11868_v20  ;;  %4403 = vmatprep.mubr.f32.mxu1 %v11868_v20  ;;  %v6107_v24 = vmul.f32 -1.442695, %v4419_v45 }
 0x4ea   : > { %7683 = vpow2.f32 %v6091_v0 }
 0x4eb   : > { %7685 = vpow2.f32 %v6123_v39  ;;  %v1217_v39 = vmul.f32 %v10567_v15, %v9017_v26 }
 0x4ec   : > { %4243 = vmatmul.mubr.f32.gmra.mrb[124].mxu0 %v4092_v43  ;;  %4404 = vmatmul.mubr.f32.gmra.mrb[124].mxu1 %v4092_v43  ;;  %7687 = vtanh.f32 %v4418_v17 }
 0x4ed   : > { %4248 = vmatprep.mubr.f32.mxu0 %v11868_v20  ;;  %4409 = vmatprep.mubr.f32.mxu1 %v11868_v20 }
 0x4f0   : > { %4249 = vmatmul.mubr.f32.gmra.mrb[126].mxu0 %v4093_v3  ;;  %4410 = vmatmul.mubr.f32.gmra.mrb[126].mxu1 %v4093_v3  ;;  %v1214_v3 = vmul.f32 %v10557_v59, %v8689_v57 }
 0x4f1   : > { %4928 = vmatprep.mubr.f32.mxu0 %v11868_v20  ;;  %5089 = vmatprep.mubr.f32.mxu1 %v11868_v20 }
 0x4f4   : > { %v7684_v42 = vpop.eup %7683 }
 0x4f5   : > { %v7686_v41 = vpop.eup %7685  ;;  %v4528_v16 = vadd.f32 1.0, %v7684_v42  ;;  %v1281_v42 = vadd.f32 %v1217_v39, %v9023_v46 }
 0x4f6   : > { %v4736_v35 = vadd.f32 1.0, %v7686_v41  ;;  %v7688_v40 = vpop.eup %7687  ;;  %v1278_v41 = vadd.f32 %v1214_v3, %v8694_v47 }
 0x4f7   : > { %7689 = vrcp.f32 %v4528_v16 }
 0x4f8   : > { %7691 = vrcp.f32 %v4736_v35 }
 0x4f9   : > { %7693 = vpow2.f32 %v6107_v24  ;;  %v1218_v24 = vmul.f32 %v10567_v15, %v8689_v57 }
 0x501   : > { %v7690_v31 = vpop.eup %7689 }
 0x502   : > { %v7692_v33 = vpop.eup %7691  ;;  %v4800_v5 = vmul.f32 %v7690_v31, %v7688_v40  ;;  %v10580_v31 = vpop.permute.xlu1 %1157 }
 0x503   : > { %v4784_v37 = vmul.f32 %v7692_v33, %v11885_v52  ;;  %v7694_v58 = vpop.eup %7693  ;;  %v1220_v52 = vmul.f32 %v10580_v31, %v8665_v19  ;;  %v1221_v18 = vmul.f32 %v10580_v31, %v9017_v26 }
 0x504   : > { %v4640_v7 = vadd.f32 1.0, %v7694_v58 }
 0x505   : > { %v10550_v48 = vadd.f32 %v4800_v5, %v4784_v37  ;;  %v1284_v58 = vadd.f32 %v1220_v52, %v8672_v34  ;;  %v1285_v27 = vadd.f32 %v1221_v18, %v9023_v46 }
 0x506   : > { %v10599_v3 = vpop.permute.xlu1 %1165 }
 0x507   : > { %11886 = vst [vmem:[#allocation47_spill] sm:$0xff] %v10550_v48  ;;  %7695 = vtanh.f32 %v10550_v48  ;;  %v1229_v52 = vmul.f32 %v10599_v3, %v9017_v26 }
 0x508   : > { %7697 = vrcp.f32 %v4640_v7 }
 0x511   : > { %v7696_v28 = vpop.eup %7695 }
 0x512   : > { %v7698_v8 = vpop.eup %7697 }
 0x513   : > { %v4848_v1 = vmul.f32 %v7698_v8, %v7696_v28 }
 0x515   : > { %4929 = vmatmul.mubr.f32.vlgmr.msra.gmra.mrb[128].mxu0 %v4848_v1  ;;  %5090 = vmatmul.mubr.f32.vlgmr.msra.gmra.mrb[128].mxu1 %v4848_v1 }
 0x516   : > { %4934 = vmatprep.mubr.f32.mxu0 %v11868_v20  ;;  %5095 = vmatprep.mubr.f32.mxu1 %v11868_v20 }
 0x57f   : > { %v4166_v22 = vpop.f32.mrb[98].mxu0  ;;  %v4327_v60 = vpop.f32.mrb[98].mxu1 }
 0x580   : > { %v4420_v10 = vadd.f32 %v4166_v22, %v1276_v21  ;;  %v4168_v4 = vpop.f32.mrb[99].mxu0  ;;  %v10565_v43 = vpop.f32.mrb[99].mxu1  ;;  %v4422_v38 = vadd.f32 %v4327_v60, %v1278_v41  ;;  %v1228_v41 = vmul.f32 %v10599_v3, %v8665_v19 }
 0x581   : > { %v4421_v11 = vadd.f32 %v4168_v4, %v1277_v62  ;;  %v10592_v60 = vpop.permute.xlu0 %1161  ;;  %v1282_v4 = vadd.f32 %v1218_v24, %v8694_v47 }
 0x582   : > { %v6092_v6 = vmul.f32 -1.442695, %v4420_v10 }
 0x583   : > { %v6124_v0 = vmul.f32 -1.442695, %v4421_v11 }
 0x584   : > { %7699 = vpow2.f32 %v6092_v6  ;;  %v1224_v6 = vmul.f32 %v10592_v60, %v8665_v19 }
 0x585   : > { %7701 = vpow2.f32 %v6124_v0  ;;  %v1225_v0 = vmul.f32 %v10592_v60, %v9017_v26  ;;  %v10613_v24 = vpop.permute.xlu0 %1169 }
 0x587   : > { %v4172_v55 = vpop.f32.mrb[100].mxu0  ;;  %v4333_v17 = vpop.f32.mrb[100].mxu1 }
 0x588   : > { %v4424_v16 = vadd.f32 %v4172_v55, %v1280_v49  ;;  %v4174_v35 = vpop.f32.mrb[101].mxu0  ;;  %v10578_v40 = vpop.f32.mrb[101].mxu1  ;;  %v4426_v39 = vadd.f32 %v4333_v17, %v1282_v4  ;;  %v1222_v49 = vmul.f32 %v10580_v31, %v8689_v57  ;;  %v1289_v17 = vadd.f32 %v1225_v0, %v9023_v46 }
 0x589   : > { %v4425_v33 = vadd.f32 %v4174_v35, %v1281_v42  ;;  %v1288_v42 = vadd.f32 %v1224_v6, %v8672_v34  ;;  %v1293_v6 = vadd.f32 %v1229_v52, %v9023_v46  ;;  %v10630_v52 = vpop.permute.xlu1 %1173 }
 0x58a   : > { %v6093_v5 = vmul.f32 -1.442695, %v4424_v16 }
 0x58b   : > { %v6125_v37 = vmul.f32 -1.442695, %v4425_v33 }
 0x58c   : > { %7703 = vpow2.f32 %v6093_v5 }
 0x58d   : > { %7705 = vpow2.f32 %v6125_v37  ;;  %v10684_v2 = vpop.permute.xlu1 %1181 }
 0x58e   : > { %v7700_v45 = vpop.eup %7699  ;;  %7707 = vtanh.f32 %v4422_v38 }
 0x58f   : > { %v7702_v7 = vpop.eup %7701  ;;  %v4529_v28 = vadd.f32 1.0, %v7700_v45  ;;  %v4178_v8 = vpop.f32.mrb[102].mxu0 }
 0x590   : > { %v4339_v1 = vpop.f32.mrb[102].mxu1  ;;  %v4737_v53 = vadd.f32 1.0, %v7702_v7  ;;  %v4428_v21 = vadd.f32 %v4178_v8, %v1284_v58  ;;  %v4180_v62 = vpop.f32.mrb[103].mxu0  ;;  %v1286_v58 = vadd.f32 %v1222_v49, %v8694_v47 }
 0x591   : > { %v10590_v22 = vpop.f32.mrb[103].mxu1  ;;  %7709 = vrcp.f32 %v4529_v28  ;;  %v4429_v10 = vadd.f32 %v4180_v62, %v1285_v27  ;;  %v1292_v27 = vadd.f32 %v1228_v41, %v8672_v34 }
 0x592   : > { %7711 = vrcp.f32 %v4737_v53  ;;  %v6094_v11 = vmul.f32 -1.442695, %v4428_v21  ;;  %v1232_v53 = vmul.f32 %v10613_v24, %v8665_v19  ;;  %v4430_v62 = vadd.f32 %v4339_v1, %v1286_v58 }
 0x593   : > { %v6126_v63 = vmul.f32 -1.442695, %v4429_v10 }
 0x594   : > { %7713 = vpow2.f32 %v6094_v11 }
 0x595   : > { %7715 = vpow2.f32 %v6126_v63 }
 0x596   : > { %v7704_v55 = vpop.eup %7703  ;;  %7717 = vtanh.f32 %v4426_v39 }
 0x597   : > { %v7706_v16 = vpop.eup %7705  ;;  %v4530_v35 = vadd.f32 1.0, %v7704_v55  ;;  %v4184_v33 = vpop.f32.mrb[104].mxu0 }
 0x598   : > { %v10606_v5 = vpop.f32.mrb[104].mxu1  ;;  %v4738_v37 = vadd.f32 1.0, %v7706_v16  ;;  %v4432_v18 = vadd.f32 %v4184_v33, %v1288_v42  ;;  %v4186_v38 = vpop.f32.mrb[105].mxu0  ;;  %v1233_v42 = vmul.f32 %v10613_v24, %v9017_v26 }
 0x599   : > { %v10611_v45 = vpop.f32.mrb[105].mxu1  ;;  %7719 = vrcp.f32 %v4530_v35  ;;  %v4433_v7 = vadd.f32 %v4186_v38, %v1289_v17  ;;  %v7708_v28 = vpop.eup %7707  ;;  %v1226_v35 = vmul.f32 %v10592_v60, %v8689_v57  ;;  %v1296_v17 = vadd.f32 %v1232_v53, %v8672_v34 }
 0x59a   : > { %7721 = vrcp.f32 %v4738_v37  ;;  %v6095_v8 = vmul.f32 -1.442695, %v4432_v18  ;;  %v1236_v53 = vmul.f32 %v10630_v52, %v8665_v19 }
 0x59b   : > { %v7710_v21 = vpop.eup %7709  ;;  %v6127_v10 = vmul.f32 -1.442695, %v4433_v7  ;;  %v4190_v4 = vpop.f32.mrb[106].mxu0 }
 0x59c   : > { %v10619_v11 = vpop.f32.mrb[106].mxu1  ;;  %v7712_v63 = vpop.eup %7711  ;;  %v4801_v0 = vmul.f32 %v7710_v21, %v7708_v28  ;;  %7723 = vpow2.f32 %v6095_v8  ;;  %v4436_v39 = vadd.f32 %v4190_v4, %v1292_v27  ;;  %v1290_v4 = vadd.f32 %v1226_v35, %v8694_v47 }
 0x59d   : > { %v4192_v49 = vpop.f32.mrb[107].mxu0  ;;  %v10622_v55 = vpop.f32.mrb[107].mxu1  ;;  %v4785_v41 = vmul.f32 %v7712_v63, %v10158_v51  ;;  %7725 = vpow2.f32 %v6127_v10  ;;  %v1297_v51 = vadd.f32 %v1233_v42, %v9023_v46 }
 0x59e   : > { %v4437_v16 = vadd.f32 %v4192_v49, %v1293_v6  ;;  %v7714_v1 = vpop.eup %7713  ;;  %v6096_v33 = vmul.f32 -1.442695, %v4436_v39  ;;  %7727 = vtanh.f32 %v4430_v62  ;;  %v1230_v6 = vmul.f32 %v10599_v3, %v8689_v57 }
 0x59f   : > { %v4531_v37 = vadd.f32 1.0, %v7714_v1  ;;  %v4196_v18 = vpop.f32.mrb[108].mxu0  ;;  %v7716_v38 = vpop.eup %7715  ;;  %v10635_v8 = vadd.f32 %v4801_v0, %v4785_v41  ;;  %v1237_v39 = vmul.f32 %v10630_v52, %v9017_v26  ;;  %v1215_v1 = vmul.f32 %v10557_v59, %v8670_v30 }
 0x5a0   : > { %7729 = vpow2.f32 %v6096_v33  ;;  %v4440_v58 = vadd.f32 %v4196_v18, %v1296_v17  ;;  %v10632_v7 = vpop.f32.mrb[108].mxu1  ;;  %v4198_v28 = vpop.f32.mrb[109].mxu0  ;;  %v4739_v27 = vadd.f32 1.0, %v7716_v38  ;;  %v6128_v21 = vmul.f32 -1.442695, %v4437_v16 }
 0x5a1   : > { %7731 = vrcp.f32 %v4531_v37  ;;  %v10637_v10 = vpop.f32.mrb[109].mxu1  ;;  %v7718_v62 = vpop.eup %7717  ;;  %v4441_v63 = vadd.f32 %v4198_v28, %v1297_v51  ;;  %v4434_v35 = vadd.f32 %v10606_v5, %v1290_v4  ;;  %v1300_v38 = vadd.f32 %v1236_v53, %v8672_v34 }
 0x5a2   : > { %7733 = vrcp.f32 %v4739_v27  ;;  %v6097_v49 = vmul.f32 -1.442695, %v4440_v58  ;;  %v10655_v58 = vpop.permute.xlu0 %1177  ;;  %v1294_v28 = vadd.f32 %v1230_v6, %v8694_v47  ;;  %v1301_v48 = vadd.f32 %v1237_v39, %v9023_v46 }
 0x5a3   : > { %v7720_v0 = vpop.eup %7719  ;;  %v4202_v42 = vpop.f32.mrb[110].mxu0  ;;  %7735 = vpow2.f32 %v6128_v21  ;;  %v6129_v27 = vmul.f32 -1.442695, %v4441_v63  ;;  %v1279_v21 = vadd.f32 %v1215_v1, %v8677_v54  ;;  %v1240_v6 = vmul.f32 %v10655_v58, %v8665_v19 }
 0x5a4   : > { %v10646_v41 = vpop.f32.mrb[110].mxu1  ;;  %v7722_v16 = vpop.eup %7721  ;;  %v4802_v33 = vmul.f32 %v7720_v0, %v7718_v62  ;;  %7737 = vpow2.f32 %v6097_v49  ;;  %v4444_v62 = vadd.f32 %v4202_v42, %v1300_v38  ;;  %v4438_v53 = vadd.f32 %v10619_v11, %v1294_v28 }
 0x5a5   : > { %v4204_v17 = vpop.f32.mrb[111].mxu0  ;;  %v10651_v37 = vpop.f32.mrb[111].mxu1  ;;  %v4786_v18 = vmul.f32 %v7722_v16, %v11864_v50  ;;  %7739 = vtanh.f32 %v4434_v35  ;;  %v1234_v42 = vmul.f32 %v10613_v24, %v8689_v57  ;;  %v1241_v38 = vmul.f32 %v10655_v58, %v9017_v26 }
 0x5a6   : > { %v7724_v51 = vpop.eup %7723  ;;  %v6098_v35 = vmul.f32 -1.442695, %v4444_v62  ;;  %v8366_v28 = vmov 5   ;;  %v8245_v62 = vld [vmem:[%s8492_s11 + $0x40] sm:$0xff] }
 0x5a7   : > { %v4532_v59 = vadd.f32 1.0, %v7724_v51  ;;  %v4208_v5 = vpop.f32.mrb[112].mxu0  ;;  %v10659_v4 = vpop.f32.mrb[112].mxu1  ;;  %v10661_v0 = vadd.f32 %v4802_v33, %v4786_v18  ;;  %v4445_v33 = vadd.f32 %v4204_v17, %v1301_v48  ;;  %6722 = vset.pattern.permute.xlu1 %v8366_v28  ;;  %6721 = vset.pattern.permute.xlu0 %v8366_v28  ;;  %v1304_v17 = vadd.f32 %v1240_v6, %v8672_v34 }
 0x5a8   : > { %v7726_v50 = vpop.eup %7725  ;;  %v4210_v63 = vpop.f32.mrb[113].mxu0  ;;  %1369 = vperm.xlu1 %6722, %v8245_v62   ;;  %v4423_v28 = vadd.f32 %v10565_v43, %v1279_v21  ;;  %v1223_v6 = vmul.f32 %v10580_v31, %v8670_v30  ;;  %v1244_v62 = vmul.f32 %v10684_v2, %v8665_v19  ;;  %v1305_v21 = vadd.f32 %v1241_v38, %v9023_v46 }
 0x5a9   : > { %11887 = vst [vmem:[#allocation60_spill] sm:$0xff] %v10661_v0  ;;  %v10667_v16 = vpop.f32.mrb[113].mxu1  ;;  %v7728_v39 = vpop.eup %7727  ;;  %7741 = vrcp.f32 %v4532_v59  ;;  %v4740_v49 = vadd.f32 1.0, %v7726_v50  ;;  %v1219_v59 = vmul.f32 %v10567_v15, %v8670_v30  ;;  %v1298_v15 = vadd.f32 %v1234_v42, %v8694_v47 }
 0x5aa   : > { %v7730_v18 = vpop.eup %7729  ;;  %7743 = vpow2.f32 %v6129_v27  ;;  %v6108_v38 = vmul.f32 -1.442695, %v4423_v28 }
 0x5ab   : > { %v7732_v1 = vpop.eup %7731  ;;  %7745 = vrcp.f32 %v4740_v49  ;;  %v4533_v11 = vadd.f32 1.0, %v7730_v18  ;;  %v10673_v51 = vpop.f32.mrb[114].mxu0  ;;  %v8246_v49 = vld [vmem:[%s8492_s11] sm:$0xff]  ;;  %v4442_v43 = vadd.f32 %v10632_v7, %v1298_v15  ;;  %v8248_v7 = vld [vmem:[%s8492_s11 + $0x48] sm:$0xff]  ;;  %v1245_v15 = vmul.f32 %v10684_v2, %v9017_v26 }
 0x5ac   : > { %v4803_v48 = vmul.f32 %v7732_v1, %v7728_v39  ;;  %7747 = vtanh.f32 %v4438_v53  ;;  %v10678_v27 = vpop.f32.mrb[114].mxu1  ;;  %v10680_v50 = vpop.f32.mrb[115].mxu0  ;;  %1337 = vperm.xlu0 %6721, %v8246_v49   ;;  %v6130_v39 = vmul.f32 -1.442695, %v4445_v33  ;;  %v4448_v1 = vadd.f32 %v4208_v5, %v1304_v17 }
 0x5ad   : > { %v7734_v18 = vpop.eup %7733  ;;  %7749 = vrcp.f32 %v4533_v11  ;;  %v10688_v53 = vpop.f32.mrb[115].mxu1  ;;  %v1283_v11 = vadd.f32 %v1219_v59, %v8677_v54  ;;  %v1238_v5 = vmul.f32 %v10630_v52, %v8689_v57 }
 0x5ae   : > { %11888 = vst [vmem:[#allocation66_spill] sm:$0xff] %v10688_v53  ;;  %v7736_v49 = vpop.eup %7735  ;;  %v4787_v14 = vmul.f32 %v7734_v18, %v11869_v44  ;;  %7751 = vpow2.f32 %v6098_v35  ;;  %v8247_v44 = vld [vmem:[%s8492_s11 + $0x8] sm:$0xff]  ;;  %v4449_v18 = vadd.f32 %v4210_v63, %v1305_v21  ;;  %v6099_v20 = vmul.f32 -1.442695, %v4448_v1 }
 0x5af   : > { %v10697_v42 = vpop.f32.mrb[116].mxu0  ;;  %v10699_v33 = vpop.f32.mrb[116].mxu1  ;;  %v4741_v31 = vadd.f32 1.0, %v7736_v49  ;;  %1341 = vperm.xlu1 %6722, %v8247_v44   ;;  %7753 = vpow2.f32 %v6130_v39  ;;  %v4427_v49 = vadd.f32 %v10578_v40, %v1283_v11  ;;  %v1287_v44 = vadd.f32 %v1223_v6, %v8677_v54 }
 0x5b0   : > { %v10704_v17 = vpop.f32.mrb[117].mxu0  ;;  %v10706_v9 = vpop.f32.mrb[117].mxu1  ;;  %1373 = vperm.xlu0 %6721, %v8248_v7   ;;  %v1308_v7 = vadd.f32 %v1244_v62, %v8672_v34  ;;  %v10719_v39 = vadd.f32 %v4803_v48, %v4787_v14  ;;  %v1227_v40 = vmul.f32 %v10592_v60, %v8670_v30  ;;  %v1302_v1 = vadd.f32 %v1238_v5, %v8694_v47  ;;  %v8250_v62 = vld [vmem:[%s8492_s11 + $0x50] sm:$0xff] }
 0x5b1   : > { %11889 = vst [vmem:[#allocation58_spill] sm:$0xff] %v10706_v9  ;;  %v7738_v35 = vpop.eup %7737  ;;  %7755 = vrcp.f32 %v4741_v31  ;;  %v1309_v5 = vadd.f32 %v1245_v15, %v9023_v46 }
 0x5b2   : > { %v7740_v59 = vpop.eup %7739  ;;  %v4534_v56 = vadd.f32 1.0, %v7738_v35  ;;  %7757 = vtanh.f32 %v4442_v43  ;;  %11890 = vst [vmem:[#allocation40_spill] sm:$0xff] %v10719_v39  ;;  %v8249_v43 = vld [vmem:[%s8492_s11 + $0x10] sm:$0xff]  ;;  %v10730_v35 = vpop.permute.xlu0 %1185  ;;  %v4452_v48 = vadd.f32 %v10673_v51, %v1308_v7 }
 0x5b3   : > { %v7742_v13 = vpop.eup %7741  ;;  %v10715_v28 = vpop.f32.mrb[118].mxu0  ;;  %1345 = vperm.xlu1 %6722, %v8249_v43  }
 0x5b4   : > { %v10717_v63 = vpop.f32.mrb[118].mxu1  ;;  %v7744_v21 = vpop.eup %7743  ;;  %v4804_v9 = vmul.f32 %v7742_v13, %v7740_v59  ;;  %7759 = vrcp.f32 %v4534_v56  ;;  %1377 = vperm.xlu0 %6721, %v8250_v62   ;;  %v6131_v13 = vmul.f32 -1.442695, %v4449_v18  ;;  %v6109_v56 = vmul.f32 -1.442695, %v4427_v49 }
 0x5b5   : > { %v10724_v11 = vpop.f32.mrb[119].mxu0  ;;  %v10726_v6 = vpop.f32.mrb[119].mxu1  ;;  %7761 = vpow2.f32 %v6108_v38  ;;  %v4742_v14 = vadd.f32 1.0, %v7744_v21  ;;  %v1248_v59 = vmul.f32 %v10730_v35, %v8665_v19  ;;  %v4446_v38 = vadd.f32 %v10646_v41, %v1302_v1 }
 0x5b6   : > { %11891 = vst [vmem:[#allocation64_spill] sm:$0xff] %v10726_v6  ;;  %v7746_v31 = vpop.eup %7745  ;;  %7763 = vpow2.f32 %v6099_v20  ;;  %v1242_v18 = vmul.f32 %v10655_v58, %v8689_v57  ;;  %v4453_v49 = vadd.f32 %v10680_v50, %v1309_v5  ;;  %v8251_v6 = vld [vmem:[%s8492_s11 + $0x18] sm:$0xff]  ;;  %v4431_v41 = vadd.f32 %v10590_v22, %v1287_v44  ;;  %v10753_v39 = vpop.permute.xlu1 %1189 }
 0x5b7   : > { %v7748_v60 = vpop.eup %7747  ;;  %v4788_v62 = vmul.f32 %v7746_v31, %v11874_v29  ;;  %7765 = vrcp.f32 %v4742_v14  ;;  %v10740_v51 = vpop.f32.mrb[120].mxu0  ;;  %1349 = vperm.xlu1 %6722, %v8251_v6   ;;  %v8252_v29 = vld [vmem:[%s8492_s11 + $0x58] sm:$0xff]  ;;  %v1291_v1 = vadd.f32 %v1227_v40, %v8677_v54  ;;  %v6100_v14 = vmul.f32 -1.442695, %v4452_v48 }
 0x5b8   : > { %v7750_v43 = vpop.eup %7749  ;;  %v10742_v7 = vpop.f32.mrb[120].mxu1  ;;  %1381 = vperm.xlu0 %6721, %v8252_v29   ;;  %7767 = vpow2.f32 %v6131_v13  ;;  %v1312_v50 = vadd.f32 %v1248_v59, %v8672_v34  ;;  %v1249_v5 = vmul.f32 %v10730_v35, %v9017_v26  ;;  %v1252_v22 = vmul.f32 %v10753_v39, %v8665_v19 }
 0x5b9   : > { %v4805_v20 = vmul.f32 %v7750_v43, %v7748_v60  ;;  %v10745_v15 = vpop.f32.mrb[121].mxu0  ;;  %v10747_v21 = vpop.f32.mrb[121].mxu1  ;;  %7769 = vpow2.f32 %v6109_v56  ;;  %v1306_v43 = vadd.f32 %v1242_v18, %v8694_v47  ;;  %v10765_v13 = vadd.f32 %v4804_v9, %v4788_v62  ;;  %v8253_v18 = vld [vmem:[%s8492_s11 + $0x20] sm:$0xff] }
 0x5ba   : > { %11892 = vst [vmem:[#allocation45_spill] sm:$0xff] %v10747_v21  ;;  %v7752_v31 = vpop.eup %7751  ;;  %7771 = vtanh.f32 %v4446_v38  ;;  %v6132_v59 = vmul.f32 -1.442695, %v4453_v49  ;;  %v4456_v29 = vadd.f32 %v10697_v42, %v1312_v50  ;;  %v8254_v21 = vld [vmem:[%s8492_s11 + $0x60] sm:$0xff]  ;;  %v6110_v0 = vmul.f32 -1.442695, %v4431_v41 }
 0x5bb   : > { %v4535_v60 = vadd.f32 1.0, %v7752_v31  ;;  %v7754_v6 = vpop.eup %7753  ;;  %v10761_v44 = vpop.f32.mrb[122].mxu0  ;;  %1353 = vperm.xlu1 %6722, %v8253_v18   ;;  %v1231_v49 = vmul.f32 %v10599_v3, %v8670_v30  ;;  %v4450_v42 = vadd.f32 %v10659_v4, %v1306_v43  ;;  %v1246_v41 = vmul.f32 %v10684_v2, %v8689_v57 }
 0x5bc   : > { %v10763_v40 = vpop.f32.mrb[122].mxu1  ;;  %v7756_v48 = vpop.eup %7755  ;;  %v4743_v56 = vadd.f32 1.0, %v7754_v6  ;;  %1385 = vperm.xlu0 %6721, %v8254_v21   ;;  %v6101_v3 = vmul.f32 -1.442695, %v4456_v29  ;;  %v1316_v4 = vadd.f32 %v1252_v22, %v8672_v34 }
 0x5bd   : > { %11893 = vst [vmem:[#allocation57_spill] sm:$0xff] %v10763_v40  ;;  %7773 = vrcp.f32 %v4535_v60  ;;  %v10768_v31 = vpop.f32.mrb[123].mxu0  ;;  %v10770_v38 = vpop.f32.mrb[123].mxu1  ;;  %v4435_v40 = vadd.f32 %v10611_v45, %v1291_v1  ;;  %v4789_v9 = vmul.f32 %v7756_v48, %v10338_v23  ;;  %v1313_v60 = vadd.f32 %v1249_v5, %v9023_v46  ;;  %v8256_v48 = vld [vmem:[%s8492_s11 + $0x68] sm:$0xff] }
 0x5be   : > { %11894 = vst [vmem:[#allocation10_spill] sm:$0xff] %v10770_v38  ;;  %v7758_v53 = vpop.eup %7757  ;;  %7775 = vpow2.f32 %v6100_v14  ;;  %v10798_v29 = vpop.permute.xlu0 %1193 }
 0x5bf   : > { %v7760_v62 = vpop.eup %7759  ;;  %7777 = vrcp.f32 %v4743_v56  ;;  %v10782_v45 = vpop.f32.mrb[124].mxu0  ;;  %v10786_v1 = vadd.f32 %v4805_v20, %v4789_v9  ;;  %v4457_v6 = vadd.f32 %v10704_v17, %v1313_v60  ;;  %v6111_v18 = vmul.f32 -1.442695, %v4435_v40 }
 0x5c0   : > { %v7762_v50 = vpop.eup %7761  ;;  %v4806_v21 = vmul.f32 %v7760_v62, %v7758_v53  ;;  %v10784_v23 = vpop.f32.mrb[124].mxu1  ;;  %7779 = vpow2.f32 %v6132_v59  ;;  %v8255_v53 = vld [vmem:[%s8492_s11 + $0x28] sm:$0xff]  ;;  %1389 = vperm.xlu0 %6721, %v8256_v48   ;;  %v1253_v59 = vmul.f32 %v10753_v39, %v9017_v26  ;;  %v1295_v17 = vadd.f32 %v1231_v49, %v8677_v54 }
 0x5c1   : > { %11895 = vst [vmem:[#allocation11_spill] sm:$0xff] %v10786_v1  ;;  %v7764_v14 = vpop.eup %7763  ;;  %v10790_v5 = vpop.f32.mrb[125].mxu0  ;;  %1357 = vperm.xlu1 %6722, %v8255_v53   ;;  %7781 = vpow2.f32 %v6110_v0  ;;  %v4641_v62 = vadd.f32 1.0, %v7762_v50  ;;  %v1310_v60 = vadd.f32 %v1246_v41, %v8694_v47  ;;  %v4460_v0 = vadd.f32 %v10715_v28, %v1316_v4  ;;  %v8257_v50 = vld [vmem:[%s8492_s11 + $0x30] sm:$0xff] }
 0x5c2   : > { %v10792_v43 = vpop.f32.mrb[125].mxu1  ;;  %v7766_v56 = vpop.eup %7765  ;;  %v4536_v20 = vadd.f32 1.0, %v7764_v14  ;;  %7783 = vtanh.f32 %v4450_v42  ;;  %v6133_v49 = vmul.f32 -1.442695, %v4457_v6  ;;  %v8258_v41 = vld [vmem:[%s8492_s11 + $0x70] sm:$0xff] }
 0x5c3   : > { %11896 = vst [vmem:[#allocation12_spill] sm:$0xff] %v10792_v43  ;;  %v4790_v22 = vmul.f32 %v7766_v56, %v10351_v61  ;;  %v7768_v9 = vpop.eup %7767  ;;  %v10804_v40 = vpop.f32.mrb[126].mxu0  ;;  %v1256_v61 = vmul.f32 %v10798_v29, %v8665_v19  ;;  %v4454_v4 = vadd.f32 %v10678_v27, %v1310_v60  ;;  %v6102_v27 = vmul.f32 -1.442695, %v4460_v0 }
 0x5c4   : > { %7785 = vrcp.f32 %v4536_v20  ;;  %v10806_v14 = vpop.f32.mrb[126].mxu1  ;;  %v7770_v53 = vpop.eup %7769  ;;  %v4744_v48 = vadd.f32 1.0, %v7768_v9  ;;  %1393 = vperm.xlu0 %6721, %v8258_v41   ;;  %v1250_v20 = vmul.f32 %v10730_v35, %v8689_v57  ;;  %v4439_v9 = vadd.f32 %v10622_v55, %v1295_v17  ;;  %v8259_v55 = vld [vmem:[%s8492_s11 + $0x38] sm:$0xff] }
 0x5c5   : > { %7787 = vpow2.f32 %v6101_v3  ;;  %v10810_v42 = vpop.f32.mrb[127].mxu0  ;;  %v10812_v56 = vpop.f32.mrb[127].mxu1  ;;  %1361 = vperm.xlu1 %6722, %v8257_v50   ;;  %v1317_v3 = vadd.f32 %v1253_v59, %v9023_v46  ;;  %v1257_v50 = vmul.f32 %v10798_v29, %v9017_v26  ;;  %v4642_v38 = vadd.f32 1.0, %v7770_v53  ;;  %v8260_v17 = vld [vmem:[%s8492_s11 + $0x78] sm:$0xff]  ;;  %s11420_s11 = scalar_lea.vmem [#allocation5], %s5912_s12 }
 0x5c6   : > { %11897 = vst [vmem:[#allocation13_spill] sm:$0xff] %v10812_v56  ;;  %v7772_v28 = vpop.eup %7771  ;;  %7789 = vpow2.f32 %v6111_v18  ;;  %v10823_v56 = vadd.f32 %v4806_v21, %v4790_v22  ;;  %v1320_v1 = vadd.f32 %v1256_v61, %v8672_v34  ;;  %v1235_v21 = vmul.f32 %v10613_v24, %v8670_v30  ;;  %v10835_v61 = vpop.permute.xlu1 %1197  ;;  %s5832_s16 = sshll.u32 %s11420_s11, 4  ;;  %s11443_s16 = int_to_ptr.vmem [resolvable:$true] %s5832_s16 }
 0x5c7   : > { %v7774_v6 = vpop.eup %7773  ;;  %7791 = vrcp.f32 %v4744_v48  ;;  %v4461_v60 = vadd.f32 %v10724_v11, %v1317_v3  ;;  %v6112_v11 = vmul.f32 -1.442695, %v4439_v9  ;;  %v1321_v48 = vadd.f32 %v1257_v50, %v9023_v46  ;;  %s8289_s25 = scalar_lea.vmem %s11443_s16, 2048  ;;  %p8296_p2 = scmp.lt.s32.totalorder %s11443_s16, %s8294_s28 }
 0x5c8   : > { %v7776_v41 = vpop.eup %7775  ;;  %7793 = vrcp.f32 %v4641_v62  ;;  %v4807_v18 = vmul.f32 %v7774_v6, %v7772_v28  ;;  %1397 = vperm.xlu0 %6721, %v8260_v17   ;;  %v1314_v62 = vadd.f32 %v1250_v20, %v8694_v47  ;;  %v4464_v53 = vadd.f32 %v10740_v51, %v1320_v1  ;;  %p8290_p6 = scmp.ne.s32.totalorder %s11443_s16, %s8289_s25  ;;  %p8297_p3 = scmp.lt.s32.totalorder %s8295_s29, %s8289_s25 }
 0x5c9   : > { %v7778_v43 = vpop.eup %7777  ;;  %v4537_v59 = vadd.f32 1.0, %v7776_v41  ;;  %7795 = vpow2.f32 %v6133_v49  ;;  %1365 = vperm.xlu1 %6722, %v8259_v55   ;;  %v6134_v3 = vmul.f32 -1.442695, %v4461_v60  ;;  %v1254_v1 = vmul.f32 %v10753_v39, %v8689_v57 }
 0x5ca   : > { %v4791_v22 = vmul.f32 %v7778_v43, %v10366_v32  ;;  %7797 = vtanh.f32 %v4454_v4  ;;  %v7780_v0 = vpop.eup %7779  ;;  %v4458_v32 = vadd.f32 %v10699_v33, %v1314_v62  ;;  %v4465_v43 = vadd.f32 %v10745_v15, %v1321_v48  ;;  %p8291_p10 = pnand %p8290_p6, %p11936_p9  ;;  %p8298_p4 = por %p8297_p3, %p8296_p2 }
 0x5cb   : > { %7799 = vrcp.f32 %v4537_v59  ;;  %v7782_v49 = vpop.eup %7781  ;;  %v4745_v28 = vadd.f32 1.0, %v7780_v0  ;;  %v1260_v4 = vmul.f32 %v10835_v61, %v8665_v19  ;;  %v6103_v50 = vmul.f32 -1.442695, %v4464_v53  ;;  %v10855_v0 = vpop.permute.xlu0 %1201 }
 0x5cc   : > { %7801 = vpow2.f32 %v6102_v27  ;;  %v10837_v6 = vadd.f32 %v4807_v18, %v4791_v22  ;;  %v7784_v24 = vpop.eup %7783  ;;  %v4643_v18 = vadd.f32 1.0, %v7782_v49  ;;  %v6135_v15 = vmul.f32 -1.442695, %v4465_v43  ;;  %p8292_p12 = pneg %p8291_p10 }
 0x5cd   : > { %7803 = vrcp.f32 %v4642_v38  ;;  %v1299_v38 = vadd.f32 %v1235_v21, %v8677_v54  ;;  %v1324_v60 = vadd.f32 %v1260_v4, %v8672_v34  ;;  %v1261_v59 = vmul.f32 %v10835_v61, %v9017_v26 }
 0x5ce   : > { %v7786_v51 = vpop.eup %7785  ;;  %7805 = vrcp.f32 %v4745_v28  ;;  %v1318_v22 = vadd.f32 %v1254_v1, %v8694_v47  ;;  %v1258_v21 = vmul.f32 %v10798_v29, %v8689_v57  ;;  %p8299_p7 = pnand %p8298_p4, %p8292_p12 }
 0x5cf   : > { %v7788_v20 = vpop.eup %7787  ;;  %7807 = vpow2.f32 %v6112_v11  ;;  %v4808_v9 = vmul.f32 %v7786_v51, %v7784_v24  ;;  %v4443_v53 = vadd.f32 %v10637_v10, %v1299_v38  ;;  %v4468_v48 = vadd.f32 %v10761_v44, %v1324_v60  ;;  %v10873_v38 = vpop.permute.xlu1 %1205 }
 0x5d0   : > { %v7790_v41 = vpop.eup %7789  ;;  %v4538_v27 = vadd.f32 1.0, %v7788_v20  ;;  %7809 = vpow2.f32 %v6134_v3  ;;  %v1325_v43 = vadd.f32 %v1261_v59, %v9023_v46  ;;  %v1264_v10 = vmul.f32 %v10855_v0, %v8665_v19 }
 0x5d1   : > { %v7792_v33 = vpop.eup %7791  ;;  %7811 = vtanh.f32 %v4458_v32  ;;  %v4644_v11 = vadd.f32 1.0, %v7790_v41  ;;  %v1239_v32 = vmul.f32 %v10630_v52, %v8670_v30  ;;  %v1322_v52 = vadd.f32 %v1258_v21, %v8694_v47 }
 0x5d2   : > { %v10849_v55 = vpop.eup %7793  ;;  %v4792_v17 = vmul.f32 %v7792_v33, %v10389_v36  ;;  %7813 = vrcp.f32 %v4538_v27  ;;  %v4462_v36 = vadd.f32 %v10717_v63, %v1318_v22  ;;  %v6104_v63 = vmul.f32 -1.442695, %v4468_v48 }
 0x5d3   : > { %v7796_v62 = vpop.eup %7795  ;;  %7815 = vpow2.f32 %v6103_v50  ;;  %v4469_v20 = vadd.f32 %v10768_v31, %v1325_v43  ;;  %v6113_v50 = vmul.f32 -1.442695, %v4443_v53  ;;  %v1265_v41 = vmul.f32 %v10855_v0, %v9017_v26 }
 0x5d4   : > { %v7798_v49 = vpop.eup %7797  ;;  %7817 = vrcp.f32 %v4643_v18  ;;  %v4746_v28 = vadd.f32 1.0, %v7796_v62  ;;  %v10860_v3 = vadd.f32 %v4808_v9, %v4792_v17  ;;  %v1303_v27 = vadd.f32 %v1239_v32, %v8677_v54 }
 0x5d5   : > { %v7800_v24 = vpop.eup %7799  ;;  %7819 = vpow2.f32 %v6135_v15  ;;  %v1243_v33 = vmul.f32 %v10655_v58, %v8670_v30  ;;  %v4466_v60 = vadd.f32 %v10742_v7, %v1322_v52  ;;  %v1262_v59 = vmul.f32 %v10835_v61, %v8689_v57 }
 0x5d6   : > { %v7802_v4 = vpop.eup %7801  ;;  %v4809_v51 = vmul.f32 %v7800_v24, %v7798_v49  ;;  %7821 = vrcp.f32 %v4746_v28  ;;  %v1328_v17 = vadd.f32 %v1264_v10, %v8672_v34  ;;  %v6136_v62 = vmul.f32 -1.442695, %v4469_v20 }
 0x5d7   : > { %v10867_v44 = vpop.eup %7803  ;;  %7823 = vrcp.f32 %v4644_v11  ;;  %v4539_v1 = vadd.f32 1.0, %v7802_v4  ;;  %v1329_v53 = vadd.f32 %v1265_v41, %v9023_v46  ;;  %v1268_v7 = vmul.f32 %v10873_v38, %v8665_v19 }
 0x5d8   : > { %v7806_v9 = vpop.eup %7805  ;;  %7825 = vtanh.f32 %v4462_v36  ;;  %v4447_v28 = vadd.f32 %v10651_v37, %v1303_v27  ;;  %v1307_v32 = vadd.f32 %v1243_v33, %v8677_v54  ;;  %v1247_v43 = vmul.f32 %v10684_v2, %v8670_v30 }
 0x5d9   : > { %v7808_v18 = vpop.eup %7807  ;;  %v4793_v15 = vmul.f32 %v7806_v9, %v10411_v12  ;;  %7827 = vrcp.f32 %v4539_v1  ;;  %v4472_v12 = vadd.f32 %v10782_v45, %v1328_v17  ;;  %v4473_v10 = vadd.f32 %v10790_v5, %v1329_v53  ;;  %v11898_v5 = vld [vmem:[#allocation57_spill] sm:$0xff] }
 0x5da   : > { %v7810_v31 = vpop.eup %7809  ;;  %7829 = vtanh.f32 %v10635_v8  ;;  %v4645_v49 = vadd.f32 1.0, %v7808_v18  ;;  %v1269_v37 = vmul.f32 %v10873_v38, %v9017_v26  ;;  %v1332_v9 = vadd.f32 %v1268_v7, %v8672_v34  ;;  %v11900_v7 = vld [vmem:[#allocation66_spill] sm:$0xff] }
 0x5db   : > { %v7812_v22 = vpop.eup %7811  ;;  %v4747_v21 = vadd.f32 1.0, %v7810_v31  ;;  %7831 = vpow2.f32 %v6104_v63  ;;  %v10884_v11 = vadd.f32 %v4809_v51, %v4793_v15  ;;  %v1326_v51 = vadd.f32 %v1262_v59, %v8694_v47  ;;  %v11899_v15 = vld [vmem:[#allocation60_spill] sm:$0xff] }
 0x5dc   : > { %v7814_v58 = vpop.eup %7813  ;;  %7833 = vpow2.f32 %v6113_v50  ;;  %v6105_v20 = vmul.f32 -1.442695, %v4472_v12  ;;  %v6114_v2 = vmul.f32 -1.442695, %v4447_v28  ;;  %v4451_v52 = vadd.f32 %v10667_v16, %v1307_v32 }
 0x5dd   : > { %v7816_v48 = vpop.eup %7815  ;;  %v4810_v36 = vmul.f32 %v7814_v58, %v7812_v22  ;;  %7835 = vrcp.f32 %v4747_v21  ;;  %v4470_v27 = vadd.f32 %v11898_v5, %v1326_v51  ;;  %v6137_v31 = vmul.f32 -1.442695, %v4473_v10 }
 0x5de   : > { %v10891_v24 = vpop.eup %7817  ;;  %v4540_v4 = vadd.f32 1.0, %v7816_v48  ;;  %7837 = vtanh.f32 %v4466_v60  ;;  %v4476_v60 = vadd.f32 %v10804_v40, %v1332_v9  ;;  %v1311_v22 = vadd.f32 %v1247_v43, %v8677_v54 }
 0x5df   : > { %v7820_v45 = vpop.eup %7819  ;;  %7839 = vpow2.f32 %v6136_v62  ;;  %v6115_v62 = vmul.f32 -1.442695, %v4451_v52  ;;  %v1333_v12 = vadd.f32 %v1269_v37, %v9023_v46  ;;  %v1251_v28 = vmul.f32 %v10730_v35, %v8670_v30 }
 0x5e0   : > { %v7822_v1 = vpop.eup %7821  ;;  %7841 = vrcp.f32 %v4540_v4  ;;  %v4748_v63 = vadd.f32 1.0, %v7820_v45  ;;  %v4455_v40 = vadd.f32 %v11900_v7, %v1311_v22  ;;  %v11901_v4 = vld [vmem:[#allocation46_spill] sm:$0xff]  ;;  %v11902_v45 = vmov 0.0  }
 0x5e1   : > { %v10901_v50 = vpop.eup %7823  ;;  %7843 = vrcp.f32 %v4645_v49  ;;  %v4794_v41 = vmul.f32 %v7822_v1, %v10433_v25  ;;  %v1266_v25 = vmul.f32 %v10855_v0, %v8689_v57  ;;  %v4477_v32 = vadd.f32 %v10810_v42, %v1333_v12 }
 0x5e2   : > { %v7826_v18 = vpop.eup %7825  ;;  %7845 = vrcp.f32 %v4748_v63  ;;  %v6116_v1 = vmul.f32 -1.442695, %v4455_v40  ;;  %v1255_v5 = vmul.f32 %v10753_v39, %v8670_v30 }
 0x5e3   : > { %v7828_v33 = vpop.eup %7827  ;;  %7847 = vtanh.f32 %v11899_v15  ;;  %v10908_v59 = vadd.f32 %v4810_v36, %v4794_v41  ;;  %v6106_v36 = vmul.f32 -1.442695, %v4476_v60  ;;  %v1330_v37 = vadd.f32 %v1266_v25, %v8694_v47 }
 0x5e4   : > { %v7830_v17 = vpop.eup %7829  ;;  %v4811_v21 = vmul.f32 %v7828_v33, %v7826_v18  ;;  %7849 = vpow2.f32 %v6105_v20  ;;  %v11903_v20 = vld [vmem:[#allocation40_spill] sm:$0xff]  ;;  %v6138_v41 = vmul.f32 -1.442695, %v4477_v32  ;;  %v1319_v40 = vadd.f32 %v1255_v5, %v8677_v54 }
 0x5e5   : > { %v7832_v16 = vpop.eup %7831  ;;  %7851 = vpow2.f32 %v6114_v2  ;;  %v4849_v58 = vmul.f32 %v7830_v17, %v10849_v55  ;;  %v1315_v2 = vadd.f32 %v1251_v28, %v8677_v54  ;;  %v11905_v17 = vld [vmem:[#allocation44_spill] sm:$0xff] }
 0x5e6   : > { %v7834_v53 = vpop.eup %7833  ;;  %v4541_v48 = vadd.f32 1.0, %v7832_v16  ;;  %7853 = vtanh.f32 %v4470_v27  ;;  %v4474_v27 = vadd.f32 %v10784_v23, %v1330_v37  ;;  %v1259_v23 = vmul.f32 %v10798_v29, %v8670_v30  ;;  %v11907_v29 = vld [vmem:[#allocation64_spill] sm:$0xff] }
 0x5e7   : > { %v7836_v49 = vpop.eup %7835  ;;  %4935 = vmatmul.mubr.f32.gmra.mrb[130].mxu0 %v4849_v58  ;;  %5096 = vmatmul.mubr.f32.gmra.mrb[130].mxu1 %v4849_v58  ;;  %7855 = vpow2.f32 %v6137_v31  ;;  %v4646_v10 = vadd.f32 1.0, %v7834_v53  ;;  %v11904_v31 = vld [vmem:[#allocation58_spill] sm:$0xff]  ;;  %v11910_v5 = vld [vmem:[#allocation56_spill] sm:$0xff] }
 0x5e8   : > { %v7838_v43 = vpop.eup %7837  ;;  %v4795_v55 = vmul.f32 %v7836_v49, %v11901_v4  ;;  %7857 = vrcp.f32 %v4541_v48  ;;  %4940 = vmatprep.mubr.f32.mxu0 %v11902_v45  ;;  %5101 = vmatprep.mubr.f32.mxu1 %v11902_v45  ;;  %v4459_v60 = vadd.f32 %v11904_v31, %v1315_v2  ;;  %v11908_v4 = vld [vmem:[#allocation11_spill] sm:$0xff]  ;;  %v1267_v31 = vmul.f32 %v10855_v0, %v8670_v30 }
 0x5e9   : > { %v7840_v51 = vpop.eup %7839  ;;  %7859 = vpow2.f32 %v6115_v62 }
 0x5ea   : > { %v7842_v35 = vpop.eup %7841  ;;  %v4749_v63 = vadd.f32 1.0, %v7840_v51  ;;  %7861 = vtanh.f32 %v11903_v20  ;;  %v10924_v9 = vadd.f32 %v4811_v21, %v4795_v55  ;;  %v1270_v21 = vmul.f32 %v10873_v38, %v8689_v57 }
 0x5eb   : > { %v10926_v42 = vpop.eup %7843  ;;  %v4812_v52 = vmul.f32 %v7842_v35, %v7838_v43  ;;  %7863 = vpow2.f32 %v6106_v36  ;;  %v6117_v7 = vmul.f32 -1.442695, %v4459_v60  ;;  %v4463_v36 = vadd.f32 %v11907_v29, %v1319_v40 }
 0x5ec   : > { %v7846_v18 = vpop.eup %7845  ;;  %7865 = vrcp.f32 %v4749_v63  ;;  %v1323_v51 = vadd.f32 %v1259_v23, %v8677_v54  ;;  %v1263_v35 = vmul.f32 %v10835_v61, %v8670_v30  ;;  %v1331_v23 = vadd.f32 %v1267_v31, %v8677_v54 }
 0x5ed   : > { %v7848_v33 = vpop.eup %7847  ;;  %7867 = vrcp.f32 %v4646_v10  ;;  %v4796_v22 = vmul.f32 %v7846_v18, %v11905_v17 }
 0x5ee   : > { %v7850_v25 = vpop.eup %7849  ;;  %7869 = vpow2.f32 %v6116_v1  ;;  %v4850_v16 = vmul.f32 %v7848_v33, %v10867_v44  ;;  %v1334_v44 = vadd.f32 %v1270_v21, %v8694_v47 }
 0x5ef   : > { %v7852_v62 = vpop.eup %7851  ;;  %v4542_v58 = vadd.f32 1.0, %v7850_v25  ;;  %7871 = vpow2.f32 %v6138_v41  ;;  %v10937_v39 = vadd.f32 %v4812_v52, %v4796_v22  ;;  %v11909_v41 = vld [vmem:[#allocation45_spill] sm:$0xff] }
 0x5f0   : > { %v7854_v12 = vpop.eup %7853  ;;  %4941 = vmatmul.mubr.f32.gmra.mrb[132].mxu0 %v4850_v16  ;;  %5102 = vmatmul.mubr.f32.gmra.mrb[132].mxu1 %v4850_v16  ;;  %7873 = vtanh.f32 %v4474_v27  ;;  %v4478_v43 = vadd.f32 %v10806_v14, %v1334_v44  ;;  %v4647_v37 = vadd.f32 1.0, %v7852_v62  ;;  %v6118_v14 = vmul.f32 -1.442695, %v4463_v36  ;;  %v11912_v16 = vld [vmem:[#allocation10_spill] sm:$0xff] }
 0x5f1   : > { %11906 = vst [vmem:[#allocation14_spill] sm:$0xff] %v10937_v39  ;;  %v7856_v53 = vpop.eup %7855  ;;  %7875 = vrcp.f32 %v4542_v58  ;;  %4946 = vmatprep.mubr.f32.mxu0 %v11902_v45  ;;  %5107 = vmatprep.mubr.f32.mxu1 %v11902_v45  ;;  %v4467_v18 = vadd.f32 %v11909_v41, %v1323_v51 }
 0x5f2   : > { %v7858_v48 = vpop.eup %7857  ;;  %v4750_v49 = vadd.f32 1.0, %v7856_v53  ;;  %7877 = vtanh.f32 %v10765_v13 }
 0x5f3   : > { %v7860_v28 = vpop.eup %7859  ;;  %v4813_v32 = vmul.f32 %v7858_v48, %v7854_v12  ;;  %7879 = vtanh.f32 %v11908_v4  ;;  %v6119_v25 = vmul.f32 -1.442695, %v4467_v18  ;;  %v11913_v48 = vld [vmem:[#allocation12_spill] sm:$0xff] }
 0x5f4   : > { %v7862_v55 = vpop.eup %7861  ;;  %7881 = vrcp.f32 %v4750_v49  ;;  %v4648_v58 = vadd.f32 1.0, %v7860_v28  ;;  %v4475_v49 = vadd.f32 %v11913_v48, %v1331_v23 }
 0x5f5   : > { %v7864_v10 = vpop.eup %7863  ;;  %7883 = vpow2.f32 %v6117_v7  ;;  %v4851_v1 = vmul.f32 %v7862_v55, %v10891_v24  ;;  %v1327_v24 = vadd.f32 %v1263_v35, %v8677_v54  ;;  %v1271_v7 = vmul.f32 %v10873_v38, %v8670_v30 }
 0x5f6   : > { %v7866_v63 = vpop.eup %7865  ;;  %v4543_v2 = vadd.f32 1.0, %v7864_v10  ;;  %7885 = vtanh.f32 %v10823_v56  ;;  %v6121_v35 = vmul.f32 -1.442695, %v4475_v49 }
 0x5f7   : > { %v7868_v52 = vpop.eup %7867  ;;  %v4797_v27 = vmul.f32 %v7866_v63, %v11910_v5  ;;  %4947 = vmatmul.mubr.f32.gmra.mrb[134].mxu0 %v4851_v1  ;;  %5108 = vmatmul.mubr.f32.gmra.mrb[134].mxu1 %v4851_v1  ;;  %7887 = vtanh.f32 %v4478_v43  ;;  %v4471_v0 = vadd.f32 %v11912_v16, %v1327_v24 }
 0x5f8   : > { %v7870_v33 = vpop.eup %7869  ;;  %7889 = vrcp.f32 %v4543_v2  ;;  %4952 = vmatprep.mubr.f32.mxu0 %v11902_v45  ;;  %5113 = vmatprep.mubr.f32.mxu1 %v11902_v45 }
 0x5f9   : > { %v7872_v61 = vpop.eup %7871  ;;  %7891 = vrcp.f32 %v4647_v37  ;;  %v10961_v60 = vadd.f32 %v4813_v32, %v4797_v27  ;;  %v6120_v36 = vmul.f32 -1.442695, %v4471_v0  ;;  %v11914_v32 = vld [vmem:[#allocation49_spill] sm:$0xff]  ;;  %v4649_v51 = vadd.f32 1.0, %v7870_v33  ;;  %v11917_v33 = vld [vmem:[#allocation48_spill] sm:$0xff] }
 0x5fa   : > { %v7874_v17 = vpop.eup %7873  ;;  %v4751_v22 = vadd.f32 1.0, %v7872_v61  ;;  %7893 = vtanh.f32 %v10837_v6 }
 0x5fb   : > { %11911 = vst [vmem:[#allocation15_spill] sm:$0xff] %v10961_v60  ;;  %v7876_v21 = vpop.eup %7875  ;;  %7895 = vpow2.f32 %v6118_v14 }
 0x5fc   : > { %v7878_v62 = vpop.eup %7877  ;;  %v4814_v12 = vmul.f32 %v7876_v21, %v7874_v17  ;;  %7897 = vrcp.f32 %v4751_v22 }
 0x5fd   : > { %v7880_v53 = vpop.eup %7879  ;;  %v4852_v40 = vmul.f32 %v7878_v62, %v10901_v50  ;;  %7899 = vtanh.f32 %v10860_v3  ;;  %v1335_v50 = vadd.f32 %v1271_v7, %v8677_v54 }
 0x5fe   : > { %v7882_v44 = vpop.eup %7881  ;;  %7901 = vpow2.f32 %v6119_v25  ;;  %v4853_v43 = vmul.f32 %v7880_v53, %v10926_v42  ;;  %v11916_v42 = vld [vmem:[#allocation13_spill] sm:$0xff] }
 0x5ff   : > { %v7884_v29 = vpop.eup %7883  ;;  %v4798_v28 = vmul.f32 %v7882_v44, %v11914_v32  ;;  %4953 = vmatmul.mubr.f32.gmra.mrb[136].mxu0 %v4852_v40  ;;  %5114 = vmatmul.mubr.f32.gmra.mrb[136].mxu1 %v4852_v40  ;;  %7903 = vrcp.f32 %v4648_v58  ;;  %v4479_v2 = vadd.f32 %v11916_v42, %v1335_v50  ;;  %v5091_v42 = vpop.f32.mrb[128].mxu1 }
 0x600   : > { %v7886_v55 = vpop.eup %7885  ;;  %4958 = vmatprep.mubr.f32.mxu0 %v11902_v45  ;;  %5119 = vmatprep.mubr.f32.mxu1 %v11902_v45  ;;  %7905 = vtanh.f32 %v10884_v11  ;;  %v4650_v18 = vadd.f32 1.0, %v7884_v29 }
 0x601   : > { %v7888_v38 = vpop.eup %7887  ;;  %v10976_v10 = vadd.f32 %v4814_v12, %v4798_v28  ;;  %7907 = vpow2.f32 %v6120_v36  ;;  %v4854_v14 = vmul.f32 %v7886_v55, %v7868_v52  ;;  %v6122_v61 = vmul.f32 -1.442695, %v4479_v2 }
 0x602   : > { %v7890_v37 = vpop.eup %7889  ;;  %7909 = vrcp.f32 %v4649_v51 }
 0x603   : > { %11915 = vst [vmem:[#allocation16_spill] sm:$0xff] %v10976_v10  ;;  %v7892_v1 = vpop.eup %7891  ;;  %v4815_v63 = vmul.f32 %v7890_v37, %v7888_v38  ;;  %4959 = vmatmul.mubr.f32.gmra.mrb[138].mxu0 %v4853_v43  ;;  %5120 = vmatmul.mubr.f32.gmra.mrb[138].mxu1 %v4853_v43  ;;  %7911 = vtanh.f32 %v10908_v59 }
 0x604   : > { %v7894_v41 = vpop.eup %7893  ;;  %4964 = vmatprep.mubr.f32.mxu0 %v11902_v45  ;;  %5125 = vmatprep.mubr.f32.mxu1 %v11902_v45  ;;  %7913 = vpow2.f32 %v6121_v35 }
 0x605   : > { %v7896_v5 = vpop.eup %7895  ;;  %v4855_v24 = vmul.f32 %v7894_v41, %v7892_v1  ;;  %7915 = vrcp.f32 %v4650_v18  ;;  %v5093_v41 = vpop.f32.mrb[129].mxu1 }
 0x606   : > { %v7898_v27 = vpop.eup %7897  ;;  %v4651_v52 = vadd.f32 1.0, %v7896_v5  ;;  %7917 = vtanh.f32 %v10924_v9 }
 0x607   : > { %v4799_v31 = vmul.f32 %v7898_v27, %v11917_v33  ;;  %4965 = vmatmul.mubr.f32.gmra.mrb[140].mxu0 %v4854_v14  ;;  %5126 = vmatmul.mubr.f32.gmra.mrb[140].mxu1 %v4854_v14  ;;  %v7900_v17 = vpop.eup %7899  ;;  %7919 = vpow2.f32 %v6122_v61 }
 0x608   : > { %4970 = vmatprep.mubr.f32.mxu0 %v11902_v45  ;;  %5131 = vmatprep.mubr.f32.mxu1 %v11902_v45  ;;  %v7902_v22 = vpop.eup %7901  ;;  %7921 = vrcp.f32 %v4651_v52 }
 0x609   : > { %v10986_v21 = vadd.f32 %v4815_v63, %v4799_v31  ;;  %v7904_v25 = vpop.eup %7903  ;;  %v4652_v62 = vadd.f32 1.0, %v7902_v22  ;;  %7923 = vtanh.f32 %v10937_v39  ;;  %v4930_v63 = vpop.f32.mrb[128].mxu0 }
 0x60a   : > { %v4856_v16 = vmul.f32 %v7904_v25, %v7900_v17  ;;  %v7906_v0 = vpop.eup %7905  ;;  %v4932_v14 = vpop.f32.mrb[129].mxu0 }
 0x60b   : > { %11918 = vst [vmem:[#allocation17_spill] sm:$0xff] %v10986_v21  ;;  %4971 = vmatmul.mubr.f32.gmra.mrb[142].mxu0 %v4855_v24  ;;  %5132 = vmatmul.mubr.f32.gmra.mrb[142].mxu1 %v4855_v24  ;;  %v7908_v58 = vpop.eup %7907  ;;  %7925 = vrcp.f32 %v4652_v62 }
 0x60c   : > { %4976 = vmatprep.mubr.f32.mxu0 %v11902_v45  ;;  %5137 = vmatprep.mubr.f32.mxu1 %v11902_v45  ;;  %v7910_v12 = vpop.eup %7909  ;;  %v4653_v7 = vadd.f32 1.0, %v7908_v58  ;;  %7927 = vtanh.f32 %v10961_v60 }
 0x60d   : > { %v4857_v23 = vmul.f32 %v7910_v12, %v7906_v0  ;;  %v7912_v53 = vpop.eup %7911 }
 0x60e   : > { %v7914_v40 = vpop.eup %7913  ;;  %7929 = vrcp.f32 %v4653_v7 }
 0x60f   : > { %4977 = vmatmul.mubr.f32.gmra.mrb[144].mxu0 %v4856_v16  ;;  %5138 = vmatmul.mubr.f32.gmra.mrb[144].mxu1 %v4856_v16  ;;  %v7916_v44 = vpop.eup %7915  ;;  %v4654_v29 = vadd.f32 1.0, %v7914_v40  ;;  %7931 = vtanh.f32 %v10976_v10 }
 0x610   : > { %4982 = vmatprep.mubr.f32.mxu0 %v11902_v45  ;;  %5143 = vmatprep.mubr.f32.mxu1 %v11902_v45  ;;  %v4858_v48 = vmul.f32 %v7916_v44, %v7912_v53  ;;  %v7918_v49 = vpop.eup %7917  ;;  %v5634_v44 = vld [vmem:[%s11494_s4] sm:$0xff] }
 0x611   : > { %v7920_v36 = vpop.eup %7919  ;;  %7933 = vrcp.f32 %v4654_v29 }
 0x612   : > { %v7922_v32 = vpop.eup %7921  ;;  %v4655_v55 = vadd.f32 1.0, %v7920_v36  ;;  %7935 = vtanh.f32 %v10986_v21  ;;  %v5636_v36 = vld [vmem:[%s11494_s4 + $0x10] sm:$0xff] }
 0x613   : > { %4983 = vmatmul.mubr.f32.gmra.mrb[146].mxu0 %v4857_v23  ;;  %5144 = vmatmul.mubr.f32.gmra.mrb[146].mxu1 %v4857_v23  ;;  %v4859_v28 = vmul.f32 %v7922_v32, %v7918_v49  ;;  %v7924_v43 = vpop.eup %7923  ;;  %v5637_v32 = vld [vmem:[%s11494_s4 + $0x18] sm:$0xff] }
 0x614   : > { %4988 = vmatprep.mubr.f32.mxu0 %v11902_v45  ;;  %5149 = vmatprep.mubr.f32.mxu1 %v11902_v45  ;;  %7937 = vrcp.f32 %v4655_v55 }
 0x615   : > { %v7926_v51 = vpop.eup %7925 }
 0x616   : > { %v4860_v38 = vmul.f32 %v7926_v51, %v7924_v43  ;;  %v7928_v50 = vpop.eup %7927 }
 0x617   : > { %4989 = vmatmul.mubr.f32.gmra.mrb[148].mxu0 %v4858_v48  ;;  %5150 = vmatmul.mubr.f32.gmra.mrb[148].mxu1 %v4858_v48  ;;  %v5635_v48 = vld [vmem:[%s11494_s4 + $0x8] sm:$0xff] }
 0x618   : > { %4994 = vmatprep.mubr.f32.mxu0 %v11902_v45  ;;  %5155 = vmatprep.mubr.f32.mxu1 %v11902_v45  ;;  %v7930_v37 = vpop.eup %7929  ;;  %v6602_v49 = vpack.c.bf16 %v5635_v48, %v5634_v44 }
 0x619   : > { %v4861_v35 = vmul.f32 %v7930_v37, %v7928_v50  ;;  %v7932_v1 = vpop.eup %7931  ;;  %v5639_v50 = vld [vmem:[%s11494_s4 + $0x28] sm:$0xff] }
 0x61a   : > { %6603 = vmatprep.subr.bf16.mxu0 %v6602_v49  ;;  %6634 = vmatprep.subr.bf16.mxu1 %v6602_v49 }
 0x61b   : > { %4995 = vmatmul.mubr.f32.gmra.mrb[150].mxu0 %v4859_v28  ;;  %5156 = vmatmul.mubr.f32.gmra.mrb[150].mxu1 %v4859_v28  ;;  %v7934_v2 = vpop.eup %7933  ;;  %v6606_v28 = vpack.c.bf16 %v5637_v32, %v5636_v36 }
 0x61c   : > { %5000 = vmatprep.mubr.f32.mxu0 %v11902_v45  ;;  %5161 = vmatprep.mubr.f32.mxu1 %v11902_v45  ;;  %v4862_v18 = vmul.f32 %v7934_v2, %v7932_v1  ;;  %v7936_v5 = vpop.eup %7935 }
 0x61d   : > { %6605 = vmatpush3.bf16.msra.mxu0 %v6602_v49  ;;  %6642 = vmatpush3.bf16.msra.mxu1 %v6602_v49 }
 0x61e   : > { %v7938_v27 = vpop.eup %7937  ;;  %6607 = vmatprep.subr.bf16.mxu0 %v6606_v28  ;;  %6635 = vmatprep.subr.bf16.mxu1 %v6606_v28 }
 0x61f   : > { %5001 = vmatmul.mubr.f32.gmra.mrb[152].mxu0 %v4860_v38  ;;  %5162 = vmatmul.mubr.f32.gmra.mrb[152].mxu1 %v4860_v38  ;;  %v4863_v33 = vmul.f32 %v7938_v27, %v7936_v5  ;;  %v5638_v38 = vld [vmem:[%s11494_s4 + $0x20] sm:$0xff] }
 0x620   : > { %5006 = vmatprep.mubr.f32.mxu0 %v11902_v45  ;;  %5167 = vmatprep.mubr.f32.mxu1 %v11902_v45  ;;  %v6610_v37 = vpack.c.bf16 %v5639_v50, %v5638_v38 }
 0x621   : > { %6609 = vmatpush3.bf16.msra.mxu0 %v6606_v28  ;;  %6643 = vmatpush3.bf16.msra.mxu1 %v6606_v28 }
 0x622   : > { %6611 = vmatprep.subr.bf16.mxu0 %v6610_v37  ;;  %6636 = vmatprep.subr.bf16.mxu1 %v6610_v37 }
 0x623   : > { %5007 = vmatmul.mubr.f32.gmra.mrb[154].mxu0 %v4861_v35  ;;  %5168 = vmatmul.mubr.f32.gmra.mrb[154].mxu1 %v4861_v35 }
 0x624   : > { %5012 = vmatprep.mubr.f32.mxu0 %v11902_v45  ;;  %5173 = vmatprep.mubr.f32.mxu1 %v11902_v45 }
 0x625   : > { %6613 = vmatpush3.bf16.msra.mxu0 %v6610_v37  ;;  %6644 = vmatpush3.bf16.msra.mxu1 %v6610_v37 }
 0x627   : > { %5013 = vmatmul.mubr.f32.gmra.mrb[156].mxu0 %v4862_v18  ;;  %5174 = vmatmul.mubr.f32.gmra.mrb[156].mxu1 %v4862_v18 }
 0x628   : > { %5018 = vmatprep.mubr.f32.mxu0 %v11902_v45  ;;  %5179 = vmatprep.mubr.f32.mxu1 %v11902_v45 }
 0x62b   : > { %5019 = vmatmul.mubr.f32.gmra.mrb[158].mxu0 %v4863_v33  ;;  %5180 = vmatmul.mubr.f32.gmra.mrb[158].mxu1 %v4863_v33  ;;  %v1338_v31 = vpop.permute.xlu0 %1337  ;;  %v11919_v33 = vld [vmem:[#allocation47_spill] sm:$0xff] }
 0x62c   : > { %v1400_v61 = vmul.f32 %v1338_v31, %v8665_v19  ;;  %v1402_v22 = vmul.f32 %v1338_v31, %v8689_v57  ;;  %v1401_v45 = vmul.f32 %v1338_v31, %v9017_v26  ;;  %v1403_v29 = vmul.f32 %v1338_v31, %v8670_v30 }
 0x62e   : > { %v1464_v24 = vadd.f32 %v1400_v61, %v8672_v34  ;;  %v1466_v25 = vadd.f32 %v1402_v22, %v8694_v47  ;;  %v1465_v53 = vadd.f32 %v1401_v45, %v9023_v46  ;;  %v1467_v43 = vadd.f32 %v1403_v29, %v8677_v54 }
 0x630   : > { %v5186_v17 = vadd.f32 %v4930_v63, %v1464_v24  ;;  %v5188_v16 = vadd.f32 %v5091_v42, %v1466_v25  ;;  %v5187_v7 = vadd.f32 %v4932_v14, %v1465_v53  ;;  %v5189_v51 = vadd.f32 %v5093_v41, %v1467_v43  ;;  %v5640_v63 = vld [vmem:[%s11494_s4 + $0x30] sm:$0xff]  ;;  %v5641_v42 = vld [vmem:[%s11494_s4 + $0x38] sm:$0xff]  ;;  %v5642_v14 = vld [vmem:[%s11494_s4 + $0x40] sm:$0xff] }
 0x631   : > { %v6614_v2 = vpack.c.bf16 %v5641_v42, %v5640_v63  ;;  %v5643_v41 = vld [vmem:[%s11494_s4 + $0x48] sm:$0xff]  ;;  %v5644_v24 = vld [vmem:[%s11494_s4 + $0x50] sm:$0xff]  ;;  %v5646_v25 = vld [vmem:[%s11494_s4 + $0x60] sm:$0xff] }
 0x632   : > { %v6139_v52 = vmul.f32 -1.442695, %v5186_v17  ;;  %v6171_v40 = vmul.f32 -1.442695, %v5187_v7  ;;  %v6155_v1 = vmul.f32 -1.442695, %v5189_v51  ;;  %v6618_v18 = vpack.c.bf16 %v5643_v41, %v5642_v14  ;;  %v11066_v7 = vpop.permute.xlu1 %1369 }
 0x633   : > { %6615 = vmatprep.subr.bf16.mxu0 %v6614_v2  ;;  %6637 = vmatprep.subr.bf16.mxu1 %v6614_v2  ;;  %v5645_v17 = vld [vmem:[%s11494_s4 + $0x58] sm:$0xff] }
 0x634   : > { %7939 = vpow2.f32 %v6139_v52  ;;  %6617 = vmatpush3.bf16.msra.mxu0 %v6614_v2  ;;  %6645 = vmatpush3.bf16.msra.mxu1 %v6614_v2  ;;  %v6622_v52 = vpack.c.bf16 %v5645_v17, %v5644_v24 }
 0x635   : > { %7941 = vtanh.f32 %v5188_v16  ;;  %6619 = vmatprep.subr.bf16.mxu0 %v6618_v18  ;;  %6638 = vmatprep.subr.bf16.mxu1 %v6618_v18  ;;  %v5647_v16 = vld [vmem:[%s11494_s4 + $0x68] sm:$0xff] }
 0x638   : > { %6621 = vmatpush3.bf16.msra.mxu0 %v6618_v18  ;;  %6646 = vmatpush3.bf16.msra.mxu1 %v6618_v18 }
 0x639   : > { %6623 = vmatprep.subr.bf16.mxu0 %v6622_v52  ;;  %6639 = vmatprep.subr.bf16.mxu1 %v6622_v52 }
 0x63c   : > { %6625 = vmatpush3.bf16.msra.mxu0 %v6622_v52  ;;  %6647 = vmatpush3.bf16.msra.mxu1 %v6622_v52 }
 0x63e   : > { %v7940_v0 = vpop.eup %7939 }
 0x63f   : > { %v5298_v62 = vadd.f32 1.0, %v7940_v0  ;;  %v7942_v58 = vpop.eup %7941  ;;  %v6626_v0 = vpack.c.bf16 %v5647_v16, %v5646_v25 }
 0x641   : > { %7943 = vrcp.f32 %v5298_v62  ;;  %6627 = vmatprep.subr.bf16.mxu0 %v6626_v0  ;;  %6640 = vmatprep.subr.bf16.mxu1 %v6626_v0 }
 0x642   : > { %7945 = vpow2.f32 %v6171_v40  ;;  %6629 = vmatpush3.bf16.msra.mxu0 %v6626_v0  ;;  %6648 = vmatpush3.bf16.msra.mxu1 %v6626_v0  ;;  %v1342_v40 = vpop.permute.xlu1 %1341 }
 0x643   : > { %v1404_v48 = vmul.f32 %v1342_v40, %v8665_v19  ;;  %v1405_v49 = vmul.f32 %v1342_v40, %v9017_v26  ;;  %v1407_v29 = vmul.f32 %v1342_v40, %v8670_v30 }
 0x645   : > { %v1468_v32 = vadd.f32 %v1404_v48, %v8672_v34  ;;  %v1469_v28 = vadd.f32 %v1405_v49, %v9023_v46  ;;  %v1471_v43 = vadd.f32 %v1407_v29, %v8677_v54 }
 0x646   : > { %v1346_v44 = vpop.permute.xlu1 %1345 }
 0x647   : > { %v1408_v63 = vmul.f32 %v1346_v44, %v8665_v19  ;;  %v1409_v14 = vmul.f32 %v1346_v44, %v9017_v26  ;;  %v1411_v41 = vmul.f32 %v1346_v44, %v8670_v30 }
 0x64a   : > { %v1350_v36 = vpop.permute.xlu1 %1349 }
 0x64b   : > { %v7944_v12 = vpop.eup %7943  ;;  %v1412_v25 = vmul.f32 %v1350_v36, %v8665_v19 }
 0x64c   : > { %v5570_v23 = vmul.f32 %v7944_v12, %v7942_v58  ;;  %v7946_v55 = vpop.eup %7945  ;;  %v5648_v58 = vld [vmem:[%s11494_s4 + $0x70] sm:$0xff]  ;;  %v5649_v12 = vld [vmem:[%s11494_s4 + $0x78] sm:$0xff] }
 0x64d   : > { %v5506_v35 = vadd.f32 1.0, %v7946_v55 }
 0x64e   : > { %v1354_v42 = vpop.permute.xlu1 %1353 }
 0x64f   : > { %7947 = vrcp.f32 %v5506_v35 }
 0x650   : > { %7949 = vpow2.f32 %v6155_v1 }
 0x652   : > { %v1358_v24 = vpop.permute.xlu1 %1357 }
 0x659   : > { %v7948_v5 = vpop.eup %7947 }
 0x65a   : > { %v7950_v27 = vpop.eup %7949  ;;  %v5554_v31 = vmul.f32 %v7948_v5, %v11919_v33  ;;  %v1406_v5 = vmul.f32 %v1342_v40, %v8689_v57  ;;  %v1472_v33 = vadd.f32 %v1408_v63, %v8672_v34 }
 0x65b   : > { %v5410_v61 = vadd.f32 1.0, %v7950_v27 }
 0x65c   : > { %v5586_v22 = vadd.f32 %v5570_v23, %v5554_v31  ;;  %v6630_v23 = vpack.c.bf16 %v5649_v12, %v5648_v58  ;;  %v1473_v31 = vadd.f32 %v1409_v14, %v9023_v46  ;;  %v1470_v17 = vadd.f32 %v1406_v5, %v8694_v47 }
 0x65d   : > { %7951 = vrcp.f32 %v5410_v61  ;;  %v1475_v61 = vadd.f32 %v1411_v41, %v8677_v54  ;;  %v1415_v58 = vmul.f32 %v1350_v36, %v8670_v30  ;;  %v1410_v12 = vmul.f32 %v1346_v44, %v8689_v57 }
 0x65e   : > { %7953 = vtanh.f32 %v5586_v22  ;;  %6631 = vmatprep.subr.bf16.mxu0 %v6630_v23  ;;  %6641 = vmatprep.subr.bf16.mxu1 %v6630_v23  ;;  %v1416_v44 = vmul.f32 %v1354_v42, %v8665_v19  ;;  %v1417_v14 = vmul.f32 %v1354_v42, %v9017_v26 }
 0x65f   : > { %6633 = vmatpush3.bf16.msra.mxu0 %v6630_v23  ;;  %6649 = vmatpush3.bf16.msra.mxu1 %v6630_v23 }
 0x667   : > { %v7952_v62 = vpop.eup %7951 }
 0x668   : > { %v7954_v45 = vpop.eup %7953 }
 0x669   : > { %v5618_v53 = vmul.f32 %v7954_v45, %v7952_v62  ;;  %v1413_v45 = vmul.f32 %v1350_v36, %v9017_v26 }
 0x66b   : > { %6258 = vmatprep.mubr.f32.mxu0 %v5618_v53 }
 0x6ba   : > { %v4936_v55 = vpop.f32.mrb[130].mxu0  ;;  %v5097_v51 = vpop.f32.mrb[130].mxu1 }
 0x6bb   : > { %v5190_v38 = vadd.f32 %v4936_v55, %v1468_v32  ;;  %v4938_v50 = vpop.f32.mrb[131].mxu0  ;;  %v5099_v37 = vpop.f32.mrb[131].mxu1  ;;  %v5192_v48 = vadd.f32 %v5097_v51, %v1470_v17  ;;  %v1476_v32 = vadd.f32 %v1412_v25, %v8672_v34  ;;  %v1422_v25 = vmul.f32 %v1358_v24, %v8689_v57 }
 0x6bc   : > { %v5191_v35 = vadd.f32 %v4938_v50, %v1469_v28  ;;  %v5193_v1 = vadd.f32 %v5099_v37, %v1471_v43  ;;  %v1477_v28 = vadd.f32 %v1413_v45, %v9023_v46  ;;  %v1479_v43 = vadd.f32 %v1415_v58, %v8677_v54  ;;  %v11092_v37 = vpop.permute.xlu1 %1361 }
 0x6bd   : > { %v6140_v2 = vmul.f32 -1.442695, %v5190_v38  ;;  %v1474_v38 = vadd.f32 %v1410_v12, %v8694_v47  ;;  %v1414_v50 = vmul.f32 %v1350_v36, %v8689_v57  ;;  %v1419_v36 = vmul.f32 %v1354_v42, %v8670_v30 }
 0x6be   : > { %v6172_v18 = vmul.f32 -1.442695, %v5191_v35  ;;  %v6156_v27 = vmul.f32 -1.442695, %v5193_v1  ;;  %v1423_v45 = vmul.f32 %v1358_v24, %v8670_v30  ;;  %v1424_v58 = vmul.f32 %v11092_v37, %v8665_v19 }
 0x6bf   : > { %7955 = vpow2.f32 %v6140_v2  ;;  %v1418_v2 = vmul.f32 %v1354_v42, %v8689_v57  ;;  %v1478_v12 = vadd.f32 %v1414_v50, %v8694_v47 }
 0x6c0   : > { %7957 = vpow2.f32 %v6172_v18  ;;  %v1488_v50 = vadd.f32 %v1424_v58, %v8672_v34 }
 0x6c1   : > { %7959 = vpow2.f32 %v6156_v27 }
 0x6c3   : > { %v4942_v52 = vpop.f32.mrb[132].mxu0  ;;  %v5103_v22 = vpop.f32.mrb[132].mxu1 }
 0x6c4   : > { %v5194_v16 = vadd.f32 %v4942_v52, %v1472_v33  ;;  %v4944_v0 = vpop.f32.mrb[133].mxu0  ;;  %v5105_v62 = vpop.f32.mrb[133].mxu1  ;;  %v5196_v42 = vadd.f32 %v5103_v22, %v1474_v38  ;;  %v11116_v38 = vadd.f32 %v1423_v45, %v8677_v54 }
 0x6c5   : > { %v5195_v23 = vadd.f32 %v4944_v0, %v1473_v31  ;;  %v5197_v53 = vadd.f32 %v5105_v62, %v1475_v61  ;;  %v1420_v61 = vmul.f32 %v1358_v24, %v8665_v19 }
 0x6c6   : > { %v6141_v40 = vmul.f32 -1.442695, %v5194_v16  ;;  %v1421_v16 = vmul.f32 %v1358_v24, %v9017_v26  ;;  %v11110_v24 = vadd.f32 %v1422_v25, %v8694_v47 }
 0x6c7   : > { %v6173_v49 = vmul.f32 -1.442695, %v5195_v23  ;;  %v6157_v29 = vmul.f32 -1.442695, %v5197_v53  ;;  %v1480_v23 = vadd.f32 %v1416_v44, %v8672_v34  ;;  %v1426_v44 = vmul.f32 %v11092_v37, %v8689_v57 }
 0x6c8   : > { %7961 = vpow2.f32 %v6141_v40  ;;  %v1482_v40 = vadd.f32 %v1418_v2, %v8694_v47  ;;  %v1485_v22 = vadd.f32 %v1421_v16, %v9023_v46 }
 0x6c9   : > { %v7956_v55 = vpop.eup %7955  ;;  %7963 = vpow2.f32 %v6173_v49  ;;  %v1483_v49 = vadd.f32 %v1419_v36, %v8677_v54  ;;  %v1425_v36 = vmul.f32 %v11092_v37, %v9017_v26 }
 0x6ca   : > { %v7958_v51 = vpop.eup %7957  ;;  %v5299_v35 = vadd.f32 1.0, %v7956_v55  ;;  %7965 = vpow2.f32 %v6157_v29  ;;  %v4948_v1 = vpop.f32.mrb[134].mxu0  ;;  %v1484_v29 = vadd.f32 %v1420_v61, %v8672_v34 }
 0x6cb   : > { %v5109_v63 = vpop.f32.mrb[134].mxu1  ;;  %7967 = vtanh.f32 %v5192_v48  ;;  %v5507_v41 = vadd.f32 1.0, %v7958_v51  ;;  %v5198_v18 = vadd.f32 %v4948_v1, %v1476_v32  ;;  %v4950_v5 = vpop.f32.mrb[135].mxu0  ;;  %v1481_v48 = vadd.f32 %v1417_v14, %v9023_v46 }
 0x6cc   : > { %v5111_v27 = vpop.f32.mrb[135].mxu1  ;;  %7969 = vrcp.f32 %v5299_v35  ;;  %v5199_v33 = vadd.f32 %v4950_v5, %v1477_v28  ;;  %v7960_v17 = vpop.eup %7959  ;;  %v5200_v1 = vadd.f32 %v5109_v63, %v1478_v12 }
 0x6cd   : > { %v5201_v31 = vadd.f32 %v5111_v27, %v1479_v43  ;;  %7971 = vrcp.f32 %v5507_v41  ;;  %v6142_v52 = vmul.f32 -1.442695, %v5198_v18  ;;  %v5411_v53 = vadd.f32 1.0, %v7960_v17  ;;  %v11113_v32 = vpop.permute.xlu1 %1365 }
 0x6ce   : > { %v6174_v0 = vmul.f32 -1.442695, %v5199_v33  ;;  %v1427_v17 = vmul.f32 %v11092_v37, %v8670_v30 }
 0x6cf   : > { %v6158_v62 = vmul.f32 -1.442695, %v5201_v31  ;;  %7973 = vpow2.f32 %v6142_v52 }
 0x6d0   : > { %7975 = vpow2.f32 %v6174_v0  ;;  %v1428_v0 = vmul.f32 %v11113_v32, %v8665_v19 }
 0x6d1   : > { %7977 = vpow2.f32 %v6158_v62  ;;  %v11130_v62 = vadd.f32 %v1426_v44, %v8694_v47  ;;  %v1432_v44 = vmul.f32 %v11066_v7, %v8665_v19 }
 0x6d2   : > { %v7962_v28 = vpop.eup %7961  ;;  %v4954_v43 = vpop.f32.mrb[136].mxu0  ;;  %7979 = vtanh.f32 %v5196_v42 }
 0x6d3   : > { %v5115_v55 = vpop.f32.mrb[136].mxu1  ;;  %v7964_v51 = vpop.eup %7963  ;;  %v5300_v35 = vadd.f32 1.0, %v7962_v28  ;;  %v5202_v2 = vadd.f32 %v4954_v43, %v1480_v23  ;;  %7981 = vrcp.f32 %v5411_v53  ;;  %v1489_v28 = vadd.f32 %v1425_v36, %v9023_v46 }
 0x6d4   : > { %v4956_v14 = vpop.f32.mrb[137].mxu0  ;;  %v5117_v41 = vpop.f32.mrb[137].mxu1  ;;  %v5508_v5 = vadd.f32 1.0, %v7964_v51  ;;  %v5204_v42 = vadd.f32 %v5115_v55, %v1482_v40  ;;  %v1491_v51 = vadd.f32 %v1427_v17, %v8677_v54  ;;  %v1429_v17 = vmul.f32 %v11113_v32, %v9017_v26 }
 0x6d5   : > { %v7966_v18 = vpop.eup %7965  ;;  %v5203_v27 = vadd.f32 %v4956_v14, %v1481_v48  ;;  %7983 = vrcp.f32 %v5300_v35  ;;  %v6143_v61 = vmul.f32 -1.442695, %v5202_v2  ;;  %v5205_v12 = vadd.f32 %v5117_v41, %v1483_v49 }
 0x6d6   : > { %v7968_v33 = vpop.eup %7967  ;;  %v5412_v31 = vadd.f32 1.0, %v7966_v18  ;;  %7985 = vrcp.f32 %v5508_v5  ;;  %v4960_v25 = vpop.f32.mrb[138].mxu0  ;;  %v1434_v35 = vmul.f32 %v11066_v7, %v8689_v57  ;;  %v1433_v18 = vmul.f32 %v11066_v7, %v9017_v26 }
 0x6d7   : > { %v7970_v52 = vpop.eup %7969  ;;  %v6175_v63 = vmul.f32 -1.442695, %v5203_v27  ;;  %v11125_v16 = vpop.f32.mrb[138].mxu1  ;;  %7987 = vtanh.f32 %v5200_v1  ;;  %v5206_v48 = vadd.f32 %v4960_v25, %v1484_v29  ;;  %v6159_v2 = vmul.f32 -1.442695, %v5205_v12 }
 0x6d8   : > { %v7972_v45 = vpop.eup %7971  ;;  %v5571_v58 = vmul.f32 %v7970_v52, %v7968_v33  ;;  %v4962_v23 = vpop.f32.mrb[139].mxu0  ;;  %7989 = vpow2.f32 %v6143_v61  ;;  %v1435_v5 = vmul.f32 %v11066_v7, %v8670_v30  ;;  %v11149_v52 = vmul.f32 %v11113_v32, %v8670_v30 }
 0x6d9   : > { %v5123_v53 = vpop.f32.mrb[139].mxu1  ;;  %v5555_v37 = vmul.f32 %v7972_v45, %v10635_v8  ;;  %v7974_v43 = vpop.eup %7973  ;;  %7991 = vrcp.f32 %v5412_v31  ;;  %v5207_v55 = vadd.f32 %v4962_v23, %v1485_v22  ;;  %v6144_v33 = vmul.f32 -1.442695, %v5206_v48 }
 0x6da   : > { %v5301_v49 = vadd.f32 1.0, %v7974_v43  ;;  %7993 = vpow2.f32 %v6175_v63  ;;  %v4966_v1 = vpop.f32.mrb[140].mxu0  ;;  %v11139_v8 = vpop.f32.mrb[140].mxu1  ;;  %v5209_v7 = vadd.f32 %v5123_v53, %v11116_v38  ;;  %v1492_v45 = vadd.f32 %v1428_v0, %v8672_v34 }
 0x6db   : > { %v5587_v40 = vadd.f32 %v5571_v58, %v5555_v37  ;;  %v7976_v29 = vpop.eup %7975  ;;  %7995 = vtanh.f32 %v5204_v42  ;;  %v4968_v14 = vpop.f32.mrb[141].mxu0  ;;  %v5210_v31 = vadd.f32 %v4966_v1, %v1488_v50  ;;  %v6176_v25 = vmul.f32 -1.442695, %v5207_v55 }
 0x6dc   : > { %v5129_v41 = vpop.f32.mrb[141].mxu1  ;;  %v7978_v27 = vpop.eup %7977  ;;  %v5509_v36 = vadd.f32 1.0, %v7976_v29  ;;  %v1496_v37 = vadd.f32 %v1432_v44, %v8672_v34  ;;  %v1498_v48 = vadd.f32 %v1434_v35, %v8694_v47  ;;  %v1497_v43 = vadd.f32 %v1433_v18, %v9023_v46 }
 0x6dd   : > { %7997 = vtanh.f32 %v5587_v40  ;;  %v7980_v22 = vpop.eup %7979  ;;  %v5413_v61 = vadd.f32 1.0, %v7978_v27  ;;  %v6145_v38 = vmul.f32 -1.442695, %v5210_v31  ;;  %v1499_v0 = vadd.f32 %v1435_v5, %v8677_v54 }
 0x6de   : > { %7999 = vrcp.f32 %v5301_v49  ;;  %v7982_v63 = vpop.eup %7981  ;;  %v4972_v58 = vpop.f32.mrb[142].mxu0  ;;  %v5211_v1 = vadd.f32 %v4968_v14, %v1489_v28  ;;  %v1493_v29 = vadd.f32 %v1429_v17, %v9023_v46  ;;  %v5208_v44 = vadd.f32 %v11125_v16, %v11110_v24 }
 0x6df   : > { %8001 = vrcp.f32 %v5509_v36  ;;  %v11153_v42 = vpop.f32.mrb[142].mxu1  ;;  %v7984_v50 = vpop.eup %7983  ;;  %v6160_v35 = vmul.f32 -1.442695, %v5209_v7  ;;  %v5213_v18 = vadd.f32 %v5129_v41, %v1491_v51  ;;  %v5214_v5 = vadd.f32 %v4972_v58, %v1492_v45 }
 0x6e0   : > { %8003 = vpow2.f32 %v6159_v2  ;;  %v4974_v12 = vpop.f32.mrb[143].mxu0  ;;  %v11155_v23 = vpop.f32.mrb[143].mxu1  ;;  %v5572_v49 = vmul.f32 %v7984_v50, %v7980_v22  ;;  %v6177_v41 = vmul.f32 -1.442695, %v5211_v1  ;;  %v1430_v7 = vmul.f32 %v11113_v32, %v8689_v57 }
 0x6e1   : > { %v7986_v40 = vpop.eup %7985  ;;  %8005 = vpow2.f32 %v6144_v33  ;;  %v5212_v45 = vadd.f32 %v11139_v8, %v11130_v62  ;;  %v5215_v58 = vadd.f32 %v4974_v12, %v1493_v29  ;;  %v6161_v1 = vmul.f32 -1.442695, %v5213_v18  ;;  %v1374_v8 = vpop.permute.xlu0 %1373 }
 0x6e2   : > { %v7988_v53 = vpop.eup %7987  ;;  %v5556_v55 = vmul.f32 %v7986_v40, %v11899_v15  ;;  %8007 = vrcp.f32 %v5413_v61  ;;  %v4978_v27 = vpop.f32.mrb[144].mxu0  ;;  %v1495_v32 = vadd.f32 %v11149_v52, %v8677_v54 }
 0x6e3   : > { %v7990_v2 = vpop.eup %7989  ;;  %8009 = vpow2.f32 %v6176_v25  ;;  %v5139_v36 = vpop.f32.mrb[144].mxu1  ;;  %v5218_v22 = vadd.f32 %v4978_v27, %v1496_v37 }
 0x6e4   : > { %v11165_v33 = vpop.eup %7991  ;;  %v5302_v31 = vadd.f32 1.0, %v7990_v2  ;;  %v11167_v50 = vadd.f32 %v5139_v36, %v1498_v48  ;;  %v4980_v15 = vpop.f32.mrb[145].mxu0  ;;  %8011 = vpow2.f32 %v6145_v38  ;;  %v11173_v24 = vadd.f32 %v5572_v49, %v5556_v55 }
 0x6e5   : > { %v5141_v28 = vpop.f32.mrb[145].mxu1  ;;  %v7994_v14 = vpop.eup %7993  ;;  %v11169_v61 = vadd.f32 %v4980_v15, %v1497_v43  ;;  %v6146_v43 = vmul.f32 -1.442695, %v5214_v5  ;;  %v5217_v15 = vadd.f32 %v11155_v23, %v1495_v32  ;;  %v1439_v32 = vmul.f32 %v1374_v8, %v8670_v30 }
 0x6e6   : > { %v11171_v17 = vadd.f32 %v5141_v28, %v1499_v0  ;;  %v7996_v16 = vpop.eup %7995  ;;  %8013 = vrcp.f32 %v5302_v31  ;;  %v5510_v51 = vadd.f32 1.0, %v7994_v14  ;;  %v4984_v37 = vpop.f32.mrb[146].mxu0 }
 0x6e7   : > { %v7998_v25 = vpop.eup %7997  ;;  %8015 = vpow2.f32 %v6160_v35  ;;  %v11179_v40 = vpop.f32.mrb[146].mxu1  ;;  %v1494_v35 = vadd.f32 %v1430_v7, %v8694_v47 }
 0x6e8   : > { %v8000_v48 = vpop.eup %7999  ;;  %8017 = vrcp.f32 %v5510_v51  ;;  %v11181_v49 = vpop.f32.mrb[147].mxu0  ;;  %v5619_v38 = vmul.f32 %v7998_v25, %v7982_v63  ;;  %v6178_v63 = vmul.f32 -1.442695, %v5215_v58 }
 0x6e9   : > { %v8002_v0 = vpop.eup %8001  ;;  %v5573_v55 = vmul.f32 %v8000_v48, %v7988_v53  ;;  %8019 = vtanh.f32 %v5208_v44  ;;  %v11185_v2 = vpop.f32.mrb[147].mxu1  ;;  %v1436_v53 = vmul.f32 %v1374_v8, %v8665_v19  ;;  %v6147_v48 = vmul.f32 -1.442695, %v5218_v22 }
 0x6ea   : > { %v8004_v62 = vpop.eup %8003  ;;  %v5557_v12 = vmul.f32 %v8002_v0, %v11903_v20  ;;  %8021 = vpow2.f32 %v6177_v41  ;;  %6259 = vmatmul.mubr.f32.vlgmr.msra.gmra.mrb[160].mxu0 %v5619_v38  ;;  %v11190_v44 = vpop.f32.mrb[148].mxu0  ;;  %v5216_v41 = vadd.f32 %v11153_v42, %v1494_v35  ;;  %v6162_v42 = vmul.f32 -1.442695, %v5217_v15 }
 0x6eb   : > { %v8006_v29 = vpop.eup %8005  ;;  %8023 = vtanh.f32 %v5212_v45  ;;  %v11192_v18 = vpop.f32.mrb[148].mxu1  ;;  %v5414_v5 = vadd.f32 1.0, %v8004_v62  ;;  %v1500_v25 = vadd.f32 %v1436_v53, %v8672_v34 }
 0x6ec   : > { %v11194_v52 = vpop.eup %8007  ;;  %v5303_v27 = vadd.f32 1.0, %v8006_v29  ;;  %8025 = vpow2.f32 %v6146_v43  ;;  %v11196_v36 = vpop.f32.mrb[149].mxu0  ;;  %v11201_v14 = vadd.f32 %v5573_v55, %v5557_v12  ;;  %v1437_v43 = vmul.f32 %v1374_v8, %v9017_v26 }
 0x6ed   : > { %11920 = vst [vmem:[#allocation18_spill] sm:$0xff] %v11194_v52  ;;  %v11198_v20 = vpop.f32.mrb[149].mxu1  ;;  %v8010_v31 = vpop.eup %8009  ;;  %8027 = vpow2.f32 %v6161_v1  ;;  %v6179_v29 = vmul.f32 -1.442695, %v11169_v61 }
 0x6ee   : > { %8029 = vrcp.f32 %v5303_v27  ;;  %v5511_v28 = vadd.f32 1.0, %v8010_v31  ;;  %v8012_v51 = vpop.eup %8011  ;;  %v11205_v7 = vpop.f32.mrb[150].mxu0 }
 0x6ef   : > { %8031 = vpow2.f32 %v6178_v63  ;;  %v5304_v58 = vadd.f32 1.0, %v8012_v51  ;;  %v11208_v38 = vpop.f32.mrb[150].mxu1  ;;  %v11210_v23 = vpop.f32.mrb[151].mxu0  ;;  %v5222_v63 = vadd.f32 %v4984_v37, %v1500_v25  ;;  %v1503_v37 = vadd.f32 %v1439_v32, %v8677_v54 }
 0x6f0   : > { %v8014_v45 = vpop.eup %8013  ;;  %8033 = vrcp.f32 %v5511_v28  ;;  %v1378_v55 = vpop.permute.xlu0 %1377  ;;  %v6163_v25 = vmul.f32 -1.442695, %v11171_v17 }
 0x6f1   : > { %v8016_v0 = vpop.eup %8015  ;;  %v5574_v1 = vmul.f32 %v8014_v45, %v7996_v16  ;;  %8035 = vrcp.f32 %v5414_v5  ;;  %v11213_v62 = vpop.f32.mrb[151].mxu1  ;;  %v1501_v5 = vadd.f32 %v1437_v43, %v9023_v46  ;;  %v1440_v15 = vmul.f32 %v1378_v55, %v8665_v19 }
 0x6f2   : > { %v8018_v12 = vpop.eup %8017  ;;  %8037 = vrcp.f32 %v5304_v58  ;;  %v11217_v53 = vpop.f32.mrb[152].mxu0  ;;  %v5415_v31 = vadd.f32 1.0, %v8016_v0  ;;  %v6148_v21 = vmul.f32 -1.442695, %v5222_v63  ;;  %v5225_v32 = vadd.f32 %v11185_v2, %v1503_v37 }
 0x6f3   : > { %v8020_v22 = vpop.eup %8019  ;;  %v5558_v35 = vmul.f32 %v8018_v12, %v10765_v13  ;;  %8039 = vtanh.f32 %v5216_v41  ;;  %v11219_v27 = vpop.f32.mrb[152].mxu1  ;;  %v1438_v13 = vmul.f32 %v1374_v8, %v8689_v57  ;;  %v5223_v58 = vadd.f32 %v11181_v49, %v1501_v5 }
 0x6f4   : > { %v8022_v16 = vpop.eup %8021  ;;  %8041 = vpow2.f32 %v6147_v48  ;;  %v11223_v28 = vpop.f32.mrb[153].mxu0  ;;  %v1442_v17 = vmul.f32 %v1378_v55, %v8689_v57  ;;  %v1443_v63 = vmul.f32 %v1378_v55, %v8670_v30 }
 0x6f5   : > { %v11225_v51 = vpop.f32.mrb[153].mxu1  ;;  %v8024_v61 = vpop.eup %8023  ;;  %v5512_v45 = vadd.f32 1.0, %v8022_v16  ;;  %8043 = vpow2.f32 %v6162_v42  ;;  %v11231_v48 = vadd.f32 %v5574_v1, %v5558_v35  ;;  %v1441_v16 = vmul.f32 %v1378_v55, %v9017_v26 }
 0x6f6   : > { %v8026_v41 = vpop.eup %8025  ;;  %8045 = vpow2.f32 %v6179_v29  ;;  %v1382_v0 = vpop.permute.xlu0 %1381  ;;  %v1504_v29 = vadd.f32 %v1440_v15, %v8672_v34  ;;  %v6180_v2 = vmul.f32 -1.442695, %v5223_v58  ;;  %v1506_v58 = vadd.f32 %v1442_v17, %v8694_v47 }
 0x6f7   : > { %11921 = vst [vmem:[#allocation19_spill] sm:$0xff] %v11231_v48  ;;  %v8028_v43 = vpop.eup %8027  ;;  %8047 = vrcp.f32 %v5512_v45  ;;  %v5305_v12 = vadd.f32 1.0, %v8026_v41  ;;  %v11234_v42 = vpop.f32.mrb[154].mxu0  ;;  %v1444_v45 = vmul.f32 %v1382_v0, %v8665_v19 }
 0x6f8   : > { %v8030_v8 = vpop.eup %8029  ;;  %8049 = vrcp.f32 %v5415_v31  ;;  %v11239_v49 = vpop.f32.mrb[154].mxu1  ;;  %v5226_v15 = vadd.f32 %v11190_v44, %v1504_v29  ;;  %v5416_v60 = vadd.f32 1.0, %v8028_v43 }
 0x6f9   : > { %v11241_v1 = vpop.f32.mrb[155].mxu0  ;;  %v8032_v35 = vpop.eup %8031  ;;  %v5575_v5 = vmul.f32 %v8030_v8, %v8020_v22  ;;  %8051 = vrcp.f32 %v5305_v12  ;;  %v1505_v22 = vadd.f32 %v1441_v16, %v9023_v46  ;;  %v1446_v16 = vmul.f32 %v1382_v0, %v8689_v57 }
 0x6fa   : > { %v11245_v41 = vpop.f32.mrb[155].mxu1  ;;  %v8034_v31 = vpop.eup %8033  ;;  %v5513_v10 = vadd.f32 1.0, %v8032_v35  ;;  %8053 = vpow2.f32 %v6163_v25  ;;  %v1502_v35 = vadd.f32 %v1438_v13, %v8694_v47  ;;  %v6164_v25 = vmul.f32 -1.442695, %v5225_v32 }
 0x6fb   : > { %v11248_v37 = vpop.eup %8035  ;;  %v5559_v52 = vmul.f32 %v8034_v31, %v11908_v4  ;;  %8055 = vpow2.f32 %v6148_v21  ;;  %v11252_v12 = vpop.f32.mrb[156].mxu0  ;;  %v5227_v21 = vadd.f32 %v11196_v36, %v1505_v22  ;;  %v1507_v13 = vadd.f32 %v1443_v63, %v8677_v54 }
 0x6fc   : > { %11922 = vst [vmem:[#allocation20_spill] sm:$0xff] %v11248_v37  ;;  %v11254_v55 = vpop.f32.mrb[156].mxu1  ;;  %v8038_v8 = vpop.eup %8037  ;;  %8057 = vrcp.f32 %v5513_v10  ;;  %v6149_v10 = vmul.f32 -1.442695, %v5226_v15  ;;  %v5224_v22 = vadd.f32 %v11179_v40, %v1502_v35 }
 0x6fd   : > { %v11258_v44 = vpop.f32.mrb[157].mxu0  ;;  %v11260_v29 = vpop.f32.mrb[157].mxu1  ;;  %v5576_v43 = vmul.f32 %v8038_v8, %v8024_v61  ;;  %8059 = vtanh.f32 %v11167_v50  ;;  %v11266_v32 = vadd.f32 %v5575_v5, %v5559_v52  ;;  %v1508_v61 = vadd.f32 %v1444_v45, %v8672_v34 }
 0x6fe   : > { %v8040_v4 = vpop.eup %8039  ;;  %8061 = vpow2.f32 %v6180_v2  ;;  %v11268_v37 = vpop.permute.xlu0 %1385  ;;  %v1445_v50 = vmul.f32 %v1382_v0, %v9017_v26  ;;  %v1447_v2 = vmul.f32 %v1382_v0, %v8670_v30  ;;  %v6181_v15 = vmul.f32 -1.442695, %v5227_v21 }
 0x6ff   : > { %v8042_v31 = vpop.eup %8041  ;;  %11923 = vst [vmem:[#allocation21_spill] sm:$0xff] %v11266_v32  ;;  %8063 = vrcp.f32 %v5416_v60  ;;  %v11272_v8 = vpop.f32.mrb[158].mxu0  ;;  %v1448_v52 = vmul.f32 %v11268_v37, %v8665_v19  ;;  %v5229_v35 = vadd.f32 %v11198_v20, %v1507_v13  ;;  %v1449_v13 = vmul.f32 %v11268_v37, %v9017_v26 }
 0x700   : > { %v8044_v17 = vpop.eup %8043  ;;  %v5306_v48 = vadd.f32 1.0, %v8042_v31  ;;  %8065 = vpow2.f32 %v6164_v25  ;;  %v11278_v5 = vpop.f32.mrb[158].mxu1  ;;  %v5230_v31 = vadd.f32 %v11205_v7, %v1508_v61  ;;  %v1509_v21 = vadd.f32 %v1445_v50, %v9023_v46 }
 0x701   : > { %v8046_v36 = vpop.eup %8045  ;;  %11924 = vst [vmem:[#allocation22_spill] sm:$0xff] %v11278_v5  ;;  %v11280_v63 = vpop.f32.mrb[159].mxu0  ;;  %v5417_v0 = vadd.f32 1.0, %v8044_v17  ;;  %v5228_v5 = vadd.f32 %v11192_v18, %v1506_v58  ;;  %v1511_v61 = vadd.f32 %v1447_v2, %v8677_v54  ;;  %v6165_v17 = vmul.f32 -1.442695, %v5229_v35 }
 0x702   : > { %v8048_v60 = vpop.eup %8047  ;;  %8067 = vrcp.f32 %v5306_v48  ;;  %v5514_v45 = vadd.f32 1.0, %v8046_v36  ;;  %v11283_v32 = vpop.f32.mrb[159].mxu1  ;;  %v1510_v48 = vadd.f32 %v1446_v16, %v8694_v47  ;;  %v5231_v20 = vadd.f32 %v11210_v23, %v1509_v21 }
 0x703   : > { %v11285_v39 = vpop.eup %8049  ;;  %v5560_v40 = vmul.f32 %v8048_v60, %v10823_v56  ;;  %8069 = vpow2.f32 %v6149_v10  ;;  %v6150_v10 = vmul.f32 -1.442695, %v5230_v31  ;;  %v11298_v58 = vpop.permute.xlu0 %1389  ;;  %v1513_v35 = vadd.f32 %v1449_v13, %v9023_v46 }
 0x704   : > { %11925 = vst [vmem:[#allocation23_spill] sm:$0xff] %v11285_v39  ;;  %v8052_v25 = vpop.eup %8051  ;;  %8071 = vrcp.f32 %v5514_v45  ;;  %v1452_v23 = vmul.f32 %v11298_v58, %v8665_v19  ;;  %v5233_v45 = vadd.f32 %v11213_v62, %v1511_v61 }
 0x705   : > { %v8054_v36 = vpop.eup %8053  ;;  %v5577_v7 = vmul.f32 %v8052_v25, %v8040_v4  ;;  %8073 = vtanh.f32 %v5224_v22  ;;  %v11293_v39 = vadd.f32 %v5576_v43, %v5560_v40  ;;  %v1512_v4 = vadd.f32 %v1448_v52, %v8672_v34 }
 0x706   : > { %v8056_v56 = vpop.eup %8055  ;;  %8075 = vpow2.f32 %v6181_v15  ;;  %v1451_v22 = vmul.f32 %v11268_v37, %v8670_v30  ;;  %v5418_v60 = vadd.f32 1.0, %v8054_v36  ;;  %v6182_v40 = vmul.f32 -1.442695, %v5231_v20 }
 0x707   : > { %v8058_v18 = vpop.eup %8057  ;;  %8077 = vrcp.f32 %v5417_v0  ;;  %v5307_v16 = vadd.f32 1.0, %v8056_v56  ;;  %v5234_v15 = vadd.f32 %v11217_v53, %v1512_v4  ;;  %v5232_v0 = vadd.f32 %v11208_v38, %v1510_v48 }
 0x708   : > { %v8060_v50 = vpop.eup %8059  ;;  %v5561_v43 = vmul.f32 %v8058_v18, %v10837_v6  ;;  %8079 = vtanh.f32 %v5228_v5  ;;  %v1515_v21 = vadd.f32 %v1451_v22, %v8677_v54  ;;  %v1516_v62 = vadd.f32 %v1452_v23, %v8672_v34  ;;  %v11327_v22 = vpop.permute.xlu0 %1393 }
 0x709   : > { %v8062_v2 = vpop.eup %8061  ;;  %8081 = vrcp.f32 %v5307_v16  ;;  %v1453_v53 = vmul.f32 %v11298_v58, %v9017_v26  ;;  %v5235_v56 = vadd.f32 %v11223_v28, %v1513_v35  ;;  %v6166_v38 = vmul.f32 -1.442695, %v5233_v45 }
 0x70a   : > { %v11308_v31 = vpop.eup %8063  ;;  %v5515_v52 = vadd.f32 1.0, %v8062_v2  ;;  %8083 = vpow2.f32 %v6150_v10  ;;  %v11310_v6 = vadd.f32 %v5577_v7, %v5561_v43  ;;  %v6151_v7 = vmul.f32 -1.442695, %v5234_v15 }
 0x70b   : > { %v8066_v5 = vpop.eup %8065  ;;  %8085 = vpow2.f32 %v6165_v17  ;;  %v5237_v48 = vadd.f32 %v11225_v51, %v1515_v21  ;;  %v1450_v16 = vmul.f32 %v11268_v37, %v8689_v57  ;;  %v1517_v28 = vadd.f32 %v1453_v53, %v9023_v46 }
 0x70c   : > { %v8068_v25 = vpop.eup %8067  ;;  %8087 = vrcp.f32 %v5515_v52  ;;  %v5419_v4 = vadd.f32 1.0, %v8066_v5  ;;  %v6183_v51 = vmul.f32 -1.442695, %v5235_v56  ;;  %v1456_v45 = vmul.f32 %v11327_v22, %v8665_v19 }
 0x70d   : > { %v8070_v36 = vpop.eup %8069  ;;  %v5578_v61 = vmul.f32 %v8068_v25, %v8060_v50  ;;  %8089 = vrcp.f32 %v5418_v60  ;;  %v5238_v50 = vadd.f32 %v11234_v42, %v1516_v62  ;;  %v6167_v60 = vmul.f32 -1.442695, %v5237_v48 }
 0x70e   : > { %v8072_v10 = vpop.eup %8071  ;;  %v5308_v20 = vadd.f32 1.0, %v8070_v36  ;;  %8091 = vpow2.f32 %v6182_v40  ;;  %v5239_v37 = vadd.f32 %v11241_v1, %v1517_v28  ;;  %v1514_v15 = vadd.f32 %v1450_v16, %v8694_v47 }
 0x70f   : > { %v8074_v13 = vpop.eup %8073  ;;  %v5562_v18 = vmul.f32 %v8072_v10, %v10860_v3  ;;  %8093 = vtanh.f32 %v5232_v0  ;;  %v6152_v5 = vmul.f32 -1.442695, %v5238_v50  ;;  %v1454_v0 = vmul.f32 %v11298_v58, %v8689_v57  ;;  %v11344_v10 = vpop.permute.xlu0 %1397 }
 0x710   : > { %v8076_v17 = vpop.eup %8075  ;;  %8095 = vrcp.f32 %v5308_v20  ;;  %v5236_v21 = vadd.f32 %v11219_v27, %v1514_v15  ;;  %v6184_v62 = vmul.f32 -1.442695, %v5239_v37  ;;  %v1455_v53 = vmul.f32 %v11298_v58, %v8670_v30 }
 0x711   : > { %v11325_v43 = vpop.eup %8077  ;;  %v5516_v23 = vadd.f32 1.0, %v8076_v17  ;;  %8097 = vpow2.f32 %v6151_v7  ;;  %v11329_v2 = vadd.f32 %v5578_v61, %v5562_v18  ;;  %v1520_v36 = vadd.f32 %v1456_v45, %v8672_v34 }
 0x712   : > { %v8080_v3 = vpop.eup %8079  ;;  %8099 = vpow2.f32 %v6166_v38  ;;  %v1518_v27 = vadd.f32 %v1454_v0, %v8694_v47  ;;  %v1457_v38 = vmul.f32 %v11327_v22, %v9017_v26 }
 0x713   : > { %v8082_v42 = vpop.eup %8081  ;;  %8101 = vrcp.f32 %v5516_v23  ;;  %v5242_v20 = vadd.f32 %v11252_v12, %v1520_v36 }
 0x714   : > { %v8084_v52 = vpop.eup %8083  ;;  %v5579_v40 = vmul.f32 %v8082_v42, %v8074_v13  ;;  %8103 = vrcp.f32 %v5419_v4  ;;  %v1460_v4 = vmul.f32 %v11344_v10, %v8665_v19  ;;  %v5240_v12 = vadd.f32 %v11239_v49, %v1518_v27 }
 0x715   : > { %v8086_v35 = vpop.eup %8085  ;;  %v5309_v25 = vadd.f32 1.0, %v8084_v52  ;;  %8105 = vpow2.f32 %v6183_v51  ;;  %v6153_v45 = vmul.f32 -1.442695, %v5242_v20  ;;  %v1459_v42 = vmul.f32 %v11327_v22, %v8670_v30 }
 0x716   : > { %v8088_v1 = vpop.eup %8087  ;;  %8107 = vpow2.f32 %v6167_v60  ;;  %v5420_v13 = vadd.f32 1.0, %v8086_v35  ;;  %v1521_v60 = vadd.f32 %v1457_v38, %v9023_v46  ;;  %v1461_v52 = vmul.f32 %v11344_v10, %v9017_v26 }
 0x717   : > { %v11341_v61 = vpop.eup %8089  ;;  %v5563_v7 = vmul.f32 %v8088_v1, %v10884_v11  ;;  %8109 = vrcp.f32 %v5309_v25  ;;  %v1519_v11 = vadd.f32 %v1455_v53, %v8677_v54 }
 0x718   : > { %v8092_v56 = vpop.eup %8091  ;;  %8111 = vpow2.f32 %v6152_v5 }
 0x719   : > { %v8094_v48 = vpop.eup %8093  ;;  %v5595_v58 = vadd.f32 %v5579_v40, %v5563_v7  ;;  %v5517_v18 = vadd.f32 1.0, %v8092_v56  ;;  %8113 = vtanh.f32 %v5236_v21  ;;  %v5241_v51 = vadd.f32 %v11245_v41, %v1519_v11 }
 0x71a   : > { %v8096_v16 = vpop.eup %8095  ;;  %8115 = vpow2.f32 %v6184_v62  ;;  %v1524_v41 = vadd.f32 %v1460_v4, %v8672_v34  ;;  %v1462_v56 = vmul.f32 %v11344_v10, %v8689_v57 }
 0x71b   : > { %v8098_v17 = vpop.eup %8097  ;;  %8117 = vtanh.f32 %v5595_v58  ;;  %v5580_v50 = vmul.f32 %v8096_v16, %v8080_v3  ;;  %v5243_v3 = vadd.f32 %v11258_v44, %v1521_v60  ;;  %v6168_v35 = vmul.f32 -1.442695, %v5241_v51 }
 0x71c   : > { %v8100_v28 = vpop.eup %8099  ;;  %8119 = vrcp.f32 %v5517_v18  ;;  %v5310_v23 = vadd.f32 1.0, %v8098_v17  ;;  %v1523_v44 = vadd.f32 %v1459_v42, %v8677_v54  ;;  %v5246_v34 = vadd.f32 %v11272_v8, %v1524_v41 }
 0x71d   : > { %v8102_v37 = vpop.eup %8101  ;;  %8121 = vrcp.f32 %v5420_v13  ;;  %v5421_v40 = vadd.f32 1.0, %v8100_v28  ;;  %v6185_v62 = vmul.f32 -1.442695, %v5243_v3 }
 0x71e   : > { %v8104_v15 = vpop.eup %8103  ;;  %v5564_v19 = vmul.f32 %v8102_v37, %v10908_v59  ;;  %8123 = vrcp.f32 %v5310_v23  ;;  %v1458_v59 = vmul.f32 %v11327_v22, %v8689_v57  ;;  %v5245_v22 = vadd.f32 %v11260_v29, %v1523_v44  ;;  %v11931_v44 = vld [vmem:[#allocation18_spill] sm:$0xff] }
 0x71f   : > { %v8106_v49 = vpop.eup %8105  ;;  %8125 = vtanh.f32 %v5240_v12  ;;  %v6154_v13 = vmul.f32 -1.442695, %v5246_v34  ;;  %v1463_v57 = vmul.f32 %v11344_v10, %v8670_v30 }
 0x720   : > { %v8108_v5 = vpop.eup %8107  ;;  %v5518_v0 = vadd.f32 1.0, %v8106_v49  ;;  %8127 = vtanh.f32 %v11173_v24  ;;  %v11364_v25 = vadd.f32 %v5580_v50, %v5564_v19  ;;  %v1525_v24 = vadd.f32 %v1461_v52, %v9023_v46  ;;  %v11928_v52 = vld [vmem:[#allocation19_spill] sm:$0xff] }
 0x721   : > { %v8110_v21 = vpop.eup %8109  ;;  %8129 = vpow2.f32 %v6153_v45  ;;  %v5422_v27 = vadd.f32 1.0, %v8108_v5  ;;  %v6169_v17 = vmul.f32 -1.442695, %v5245_v22  ;;  %v11927_v45 = vld [vmem:[#allocation14_spill] sm:$0xff]  ;;  %v11929_v5 = vld [vmem:[#allocation21_spill] sm:$0xff] }
 0x722   : > { %v8112_v1 = vpop.eup %8111  ;;  %v5581_v26 = vmul.f32 %v8110_v21, %v8094_v48  ;;  %8131 = vrcp.f32 %v5518_v0  ;;  %v1522_v48 = vadd.f32 %v1458_v59, %v8694_v47  ;;  %v5247_v8 = vadd.f32 %v11280_v63, %v1525_v24 }
 0x723   : > { %v8114_v53 = vpop.eup %8113  ;;  %8133 = vrcp.f32 %v5421_v40  ;;  %v5311_v36 = vadd.f32 1.0, %v8112_v1  ;;  %v1526_v63 = vadd.f32 %v1462_v56, %v8694_v47 }
 0x724   : > { %v8116_v7 = vpop.eup %8115  ;;  %8135 = vpow2.f32 %v6168_v35  ;;  %v5244_v29 = vadd.f32 %v11254_v55, %v1522_v48  ;;  %v6186_v12 = vmul.f32 -1.442695, %v5247_v8  ;;  %v1527_v55 = vadd.f32 %v1463_v57, %v8677_v54  ;;  %v11930_v35 = vld [vmem:[#allocation15_spill] sm:$0xff] }
 0x725   : > { %v8118_v20 = vpop.eup %8117  ;;  %8137 = vrcp.f32 %v5311_v36  ;;  %v5519_v38 = vadd.f32 1.0, %v8116_v7  ;;  %v11933_v8 = vld [vmem:[#allocation23_spill] sm:$0xff] }
 0x726   : > { %v8120_v58 = vpop.eup %8119  ;;  %8139 = vpow2.f32 %v6185_v62  ;;  %v11376_v18 = vmul.f32 %v8118_v20, %v8104_v15  ;;  %v11932_v20 = vld [vmem:[#allocation20_spill] sm:$0xff] }
 0x727   : > { %v11378_v46 = vpop.eup %8121  ;;  %v5565_v16 = vmul.f32 %v8120_v58, %v10924_v9  ;;  %8141 = vrcp.f32 %v5519_v38  ;;  %v11926_v9 = vld [vmem:[#allocation22_spill] sm:$0xff] }
 0x728   : > { %v8124_v11 = vpop.eup %8123  ;;  %8143 = vrcp.f32 %v5422_v27  ;;  %v5248_v10 = vadd.f32 %v11926_v9, %v1526_v63 }
 0x729   : > { %v8126_v4 = vpop.eup %8125  ;;  %v5582_v50 = vmul.f32 %v8124_v11, %v8114_v53  ;;  %8145 = vtanh.f32 %v11201_v14  ;;  %v5597_v28 = vadd.f32 %v5581_v26, %v5565_v16  ;;  %v5249_v14 = vadd.f32 %v11283_v32, %v1527_v55  ;;  %v11934_v16 = vld [vmem:[#allocation16_spill] sm:$0xff]  ;;  %v11935_v55 = vld [vmem:[#allocation17_spill] sm:$0xff] }
 0x72a   : > { %v8128_v23 = vpop.eup %8127  ;;  %8147 = vpow2.f32 %v6154_v13 }
 0x72b   : > { %v8130_v51 = vpop.eup %8129  ;;  %v5620_v30 = vmul.f32 %v8128_v23, %v11165_v33  ;;  %8149 = vtanh.f32 %v5244_v29  ;;  %v6170_v41 = vmul.f32 -1.442695, %v5249_v14 }
 0x72c   : > { %v8132_v60 = vpop.eup %8131  ;;  %v5312_v37 = vadd.f32 1.0, %v8130_v51  ;;  %8151 = vpow2.f32 %v6169_v17 }
 0x72d   : > { %v11389_v47 = vpop.eup %8133  ;;  %v5566_v42 = vmul.f32 %v8132_v60, %v11927_v45  ;;  %6261 = vmatprep.mubr.f32.mxu0 %v5620_v30  ;;  %8153 = vpow2.f32 %v6186_v12 }
 0x72e   : > { %v8136_v15 = vpop.eup %8135  ;;  %8155 = vrcp.f32 %v5312_v37 }
 0x72f   : > { %v8138_v19 = vpop.eup %8137  ;;  %8157 = vtanh.f32 %v5248_v10  ;;  %v5598_v33 = vadd.f32 %v5582_v50, %v5566_v42  ;;  %v5423_v7 = vadd.f32 1.0, %v8136_v15 }
 0x730   : > { %v8140_v3 = vpop.eup %8139  ;;  %v5583_v49 = vmul.f32 %v8138_v19, %v8126_v4  ;;  %8159 = vtanh.f32 %v11928_v52 }
 0x731   : > { %v8142_v54 = vpop.eup %8141  ;;  %v5520_v40 = vadd.f32 1.0, %v8140_v3  ;;  %8161 = vtanh.f32 %v11929_v5  ;;  %v6187_v3 = vld [vmem:[%s11495_s5] ss:$0 sm:$0xff] }
 0x732   : > { %v11395_v0 = vpop.eup %8143  ;;  %v5567_v21 = vmul.f32 %v8142_v54, %v11930_v35  ;;  %8163 = vtanh.f32 %v11293_v39 }
 0x733   : > { %v8146_v32 = vpop.eup %8145  ;;  %8165 = vrcp.f32 %v5520_v40 }
 0x734   : > { %v8148_v59 = vpop.eup %8147  ;;  %v5621_v1 = vmul.f32 %v8146_v32, %v11931_v44  ;;  %8167 = vtanh.f32 %v11310_v6  ;;  %v5599_v26 = vadd.f32 %v5583_v49, %v5567_v21 }
 0x735   : > { %v8150_v62 = vpop.eup %8149  ;;  %v5313_v34 = vadd.f32 1.0, %v8148_v59  ;;  %8169 = vpow2.f32 %v6170_v41 }
 0x736   : > { %v8152_v53 = vpop.eup %8151  ;;  %6262 = vmatmul.mubr.f32.gmra.mrb[162].mxu0 %v5621_v1  ;;  %8171 = vtanh.f32 %v11329_v2 }
 0x737   : > { %v8154_v36 = vpop.eup %8153  ;;  %8173 = vrcp.f32 %v5313_v34  ;;  %v5424_v13 = vadd.f32 1.0, %v8152_v53 }
 0x738   : > { %v8156_v24 = vpop.eup %8155  ;;  %v5521_v39 = vadd.f32 1.0, %v8154_v36  ;;  %8175 = vtanh.f32 %v11364_v25 }
 0x739   : > { %v8158_v56 = vpop.eup %8157  ;;  %v5584_v27 = vmul.f32 %v8156_v24, %v8150_v62  ;;  %8177 = vtanh.f32 %v5597_v28 }
 0x73a   : > { %v8160_v22 = vpop.eup %8159  ;;  %8179 = vrcp.f32 %v5521_v39 }
 0x73b   : > { %v8162_v6 = vpop.eup %8161  ;;  %v5622_v38 = vmul.f32 %v8160_v22, %v11932_v20  ;;  %8181 = vtanh.f32 %v5598_v33 }
 0x73c   : > { %v8164_v48 = vpop.eup %8163  ;;  %8183 = vrcp.f32 %v5423_v7  ;;  %v5623_v2 = vmul.f32 %v8162_v6, %v11933_v8 }
 0x73d   : > { %v8166_v58 = vpop.eup %8165  ;;  %6264 = vmatprep.mubr.f32.mxu0 %v5622_v38  ;;  %v5624_v57 = vmul.f32 %v8164_v48, %v11308_v31  ;;  %8185 = vtanh.f32 %v5599_v26 }
 0x73e   : > { %v8168_v25 = vpop.eup %8167  ;;  %v5568_v29 = vmul.f32 %v8166_v58, %v11934_v16  ;;  %6265 = vmatmul.mubr.f32.gmra.mrb[164].mxu0 %v5623_v2  ;;  %8187 = vrcp.f32 %v5424_v13 }
 0x73f   : > { %v8170_v11 = vpop.eup %8169  ;;  %6267 = vmatprep.mubr.f32.mxu0 %v5624_v57  ;;  %v5625_v17 = vmul.f32 %v8168_v25, %v11325_v43 }
 0x740   : > { %v8172_v63 = vpop.eup %8171  ;;  %v5600_v4 = vadd.f32 %v5584_v27, %v5568_v29  ;;  %v5425_v9 = vadd.f32 1.0, %v8170_v11 }
 0x741   : > { %v8174_v50 = vpop.eup %8173  ;;  %v5626_v12 = vmul.f32 %v8172_v63, %v11341_v61 }
 0x742   : > { %v8176_v28 = vpop.eup %8175  ;;  %v5585_v23 = vmul.f32 %v8174_v50, %v8158_v56  ;;  %6268 = vmatmul.mubr.f32.gmra.mrb[166].mxu0 %v5625_v17  ;;  %8189 = vtanh.f32 %v5600_v4 }
 0x743   : > { %v8178_v31 = vpop.eup %8177  ;;  %6270 = vmatprep.mubr.f32.mxu1 %v5626_v12  ;;  %v5628_v51 = vmul.f32 %v8176_v28, %v11378_v46  ;;  %8191 = vrcp.f32 %v5425_v9 }
 0x744   : > { %v8180_v30 = vpop.eup %8179  ;;  %6271 = vmatmul.mubr.f32.vlgmr.msra.gmra.mrb[160].mxu1 %v11376_v18  ;;  %v5629_v43 = vmul.f32 %v8178_v31, %v11389_v47 }
 0x745   : > { %v8182_v10 = vpop.eup %8181  ;;  %v5569_v60 = vmul.f32 %v8180_v30, %v11935_v55  ;;  %6273 = vmatprep.mubr.f32.mxu1 %v5628_v51 }
 0x746   : > { %v8184_v37 = vpop.eup %8183  ;;  %v5630_v61 = vmul.f32 %v8182_v10, %v11395_v0 }
 0x747   : > { %v8186_v45 = vpop.eup %8185  ;;  %v5601_v42 = vadd.f32 %v5585_v23, %v5569_v60 }
 0x748   : > { %6274 = vmatmul.mubr.f32.gmra.mrb[162].mxu1 %v5629_v43  ;;  %v5631_v46 = vmul.f32 %v8186_v45, %v8184_v37  ;;  %v8188_v14 = vpop.eup %8187 }
 0x749   : > { %6276 = vmatprep.mubr.f32.mxu1 %v5630_v61  ;;  %8193 = vtanh.f32 %v5601_v42 }
 0x74c   : > { %v8190_v18 = vpop.eup %8189  ;;  %6277 = vmatmul.mubr.f32.gmra.mrb[164].mxu1 %v5631_v46 }
 0x74d   : > { %v5632_v47 = vmul.f32 %v8190_v18, %v8188_v14  ;;  %v8192_v15 = vpop.eup %8191 }
 0x74f   : > { %6279 = vmatprep.mubr.f32.mxu1 %v5632_v47 }
 0x753   : > { %v8194_v19 = vpop.eup %8193 }
 0x754   : > { %v5633_v33 = vmul.f32 %v8194_v19, %v8192_v15 }
 0x756   : > { %6280 = vmatmul.mubr.f32.gmra.mrb[166].mxu1 %v5633_v33 }
 0x7bd   : > { %v6260_v49 = vpop.f32.mrb[160].mxu0 }
 0x7be   : > { %v5729_v52 = vadd.f32 %v6260_v49, %v6187_v3  ;;  %v5723_v54 = vpop.f32.mrb[161].mxu0 }
 0x7bf   : > { %v5724_v40 = vadd.f32 %v6187_v3, %v5723_v54 }
 0x7c0   : > { %5803 = vst [vmem:[%s11420_s11 + $0x8] sm:$0xff] %v5729_v52 }
 0x7c1   : > { %5802 = vst [vmem:[%s11420_s11] sm:$0xff] %v5724_v40 }
 0x809   : > { %v6263_v41 = vpop.f32.mrb[162].mxu0 }
 0x80a   : > { %v5739_v5 = vadd.f32 %v6263_v41, %v6187_v3  ;;  %v5733_v0 = vpop.f32.mrb[163].mxu0 }
 0x80b   : > { %v5734_v35 = vadd.f32 %v6187_v3, %v5733_v0 }
 0x80c   : > { %5805 = vst [vmem:[%s11420_s11 + $0x18] sm:$0xff] %v5739_v5 }
 0x80d   : > { %5804 = vst [vmem:[%s11420_s11 + $0x10] sm:$0xff] %v5734_v35 }
 0x811   : > { %v6266_v21 = vpop.f32.mrb[164].mxu0 }
 0x812   : > { %v5749_v32 = vadd.f32 %v6266_v21, %v6187_v3  ;;  %v5743_v59 = vpop.f32.mrb[165].mxu0 }
 0x813   : > { %v5744_v44 = vadd.f32 %v6187_v3, %v5743_v59 }
 0x814   : > { %5807 = vst [vmem:[%s11420_s11 + $0x28] sm:$0xff] %v5749_v32 }
 0x815   : > { %5806 = vst [vmem:[%s11420_s11 + $0x20] sm:$0xff] %v5744_v44  ;;  %v6269_v1 = vpop.f32.mrb[166].mxu0 }
 0x816   : > { %v5759_v26 = vadd.f32 %v6269_v1, %v6187_v3  ;;  %v5753_v62 = vpop.f32.mrb[167].mxu0 }
 0x817   : > { %v5754_v34 = vadd.f32 %v6187_v3, %v5753_v62  ;;  %v6272_v53 = vpop.f32.mrb[160].mxu1 }
 0x818   : > { %5809 = vst [vmem:[%s11420_s11 + $0x38] sm:$0xff] %v5759_v26  ;;  %v5769_v36 = vadd.f32 %v6272_v53, %v6187_v3  ;;  %v5763_v24 = vpop.f32.mrb[161].mxu1 }
 0x819   : > { %5808 = vst [vmem:[%s11420_s11 + $0x30] sm:$0xff] %v5754_v34  ;;  %v5764_v7 = vadd.f32 %v6187_v3, %v5763_v24 }
 0x81a   : > { %5811 = vst [vmem:[%s11420_s11 + $0x48] sm:$0xff] %v5769_v36 }
 0x81b   : > { %5810 = vst [vmem:[%s11420_s11 + $0x40] sm:$0xff] %v5764_v7  ;;  %v6275_v39 = vpop.f32.mrb[162].mxu1 }
 0x81c   : > { %v5779_v56 = vadd.f32 %v6275_v39, %v6187_v3  ;;  %v5773_v27 = vpop.f32.mrb[163].mxu1 }
 0x81d   : > { %v5774_v22 = vadd.f32 %v6187_v3, %v5773_v27 }
 0x81e   : > { %5813 = vst [vmem:[%s11420_s11 + $0x58] sm:$0xff] %v5779_v56 }
 0x81f   : > { %5812 = vst [vmem:[%s11420_s11 + $0x50] sm:$0xff] %v5774_v22  ;;  %v6278_v6 = vpop.f32.mrb[164].mxu1 }
 0x820   : > { %v5789_v20 = vadd.f32 %v6278_v6, %v6187_v3  ;;  %v5783_v38 = vpop.f32.mrb[165].mxu1 }
 0x821   : > { %v5784_v48 = vadd.f32 %v6187_v3, %v5783_v38 }
 0x822   : > { %5815 = vst [vmem:[%s11420_s11 + $0x68] sm:$0xff] %v5789_v20 }
 0x823   : > { %5814 = vst [vmem:[%s11420_s11 + $0x60] sm:$0xff] %v5784_v48 }
 0x829   : > { %v6281_v8 = vpop.f32.mrb[166].mxu1 }
 0x82a   : > { %v5799_v2 = vadd.f32 %v6281_v8, %v6187_v3  ;;  %v5793_v58 = vpop.f32.mrb[167].mxu1 }
 0x82b   : > { %v5794_v13 = vadd.f32 %v6187_v3, %v5793_v58 }
 0x82c   : > { %5817 = vst [vmem:[%s11420_s11 + $0x78] sm:$0xff] %v5799_v2 }
 0x82d   : > { %5816 = vst [vmem:[%s11420_s11 + $0x70] sm:$0xff] %v5794_v13 }
 0x82e   : > { %8302 = shalt.err (!%p8299_p7)
}
 0x82f   : > { %s8303_s10 = scalar_lea.hbm %s11441_s19, 2048  ;;  %s8307_s14 = scalar_lea.hbm %s11496_s6, 4096 }
 0x830   : > { %p8304_p8 = scmp.ne.s32.totalorder %s11441_s19, %s8303_s10  ;;  %p8308_p1 = scmp.lt.u32.totalorder %s11441_s19, %s11496_s6 }
 0x831   : > { %p8309_p0 = scmp.lt.u32.totalorder %s8307_s14, %s8303_s10  ;;  %p8311_p6 = scmp.lt.u32.totalorder %s8303_s10, %s11441_s19 }
 0x832   : > { %p8305_p11 = pnand %p8304_p8, %p11936_p9 }
 0x833   : > { %p8310_p5 = por %p8309_p0, %p8308_p1 }
 0x834   : > { %p8306_p13 = pneg %p8305_p11 }
 0x835   : > { %p8312_p10 = por %p8311_p6, %p8310_p5 }
 0x837   : > { %p8313_p12 = pnand %p8312_p10, %p8306_p13 }
 0x839   : > { %8316 = shalt.err (!%p8313_p12)
}
 0x83a   : > { %s8368_s9 = smov 128   ;;  %s8369_s17 = smov 8  }
 0x83b   : > { %6654 = dma.vmem_to_hbm [thread:$0]  (%p11936_p9), %s11443_s16, 2048, %s11441_s19, %s11449_s20, %s8368_s9, %s8368_s9, %s8369_s17  }
 0x83c PF: > { %p6666_p2 = scmp.ge.s32.totalorder %s8355_s24, 2  ;;  %s5847_s18 = sand.u32 1, %s8343_s21  }
 0x83d   : > { %p11937_p3 = scmp.ne.s32.totalorder %s11620_s8, 0  ;;  %s5848_s25 = scalar_lea.sflag [#allocation4], %s5847_s18 }
 0x83f   : > { %p6661_p4 = pnand %p6666_p2, %p11937_p3 }
 0x841   : > { %8338 = dma.done.wait (!%p6661_p4), %s5848_s25, 2048  }
 0x842   : > { %8340 = vsyncadd (!%p6661_p4), %s5848_s25, 4294965248  ;;  %p17_p7 = scmp.ge.s32.totalorder %s8430_s27, 4   ;;  %s11938_s21 = smov %s8347_s22 }
 0x843   : > { %s11939_s22 = smov %s8351_s23  ;;  %s11940_s23 = smov %s8441_s30 }
 0x844   : > { %s11941_s24 = smov %s8430_s27  ;;  %19 = sbr.rel (!%p17_p7) target bundleno = 4 (0x4), region = 84 }
 0x84b   :  { %5853 = vsyncpa [#allocation3], 1 }
 0x84c   :  { %5855 = vsyncpa [#allocation3 + $0x1], 1 }
 0x84d   :  { %5856 = vsyncpa [#allocation4], 1 }
 0x84e   :  { %5858 = vsyncpa [#allocation4 + $0x1], 1 }

</bundles_post_ra>
